<compile_context>
chip_gen: v7x
topology: tpu7x:2x2x1
jax: 0.10.0
libtpu: 0.0.40
codegen_flags: <defaults>
</compile_context>

<pallas_src>
import functools

import jax
import jax.numpy as jnp
from jax import lax
from jax.experimental import pallas as pl
from jax.experimental.pallas import tpu as pltpu


# ----------------------------------------------------------------------------
# Fused ConvBlock kernel
# ----------------------------------------------------------------------------
def _make_block_kernel(H, W, c_max, layer_dims, max_pool):
    """layer_dims: tuple of (cin, cout) per conv layer.
    Kernel refs: x, (w, shift) * L, out, buf_a, buf_b, im2col."""
    HW = H * W
    L = len(layer_dims)
    n_bufs_used = 1 if L == 1 else 2
    adt = jnp.bfloat16                     # activation / MXU-operand dtype

    def kernel(*refs):
        x_ref = refs[0]
        w_refs = [refs[1 + 2 * i] for i in range(L)]
        s_refs = [refs[2 + 2 * i] for i in range(L)]
        o_ref = refs[1 + 2 * L]
        buf_a, buf_b, col = refs[2 + 2 * L], refs[3 + 2 * L], refs[4 + 2 * L]
        bufs = (buf_a, buf_b)

        # Zero ONLY the halo ring (4 thin stores per buffer), every grid step
        # (scratch is reused across batch elements / cores).  The interior is
        # always overwritten; channels beyond cin are never read.
        zrow = jnp.zeros((1, W + 2, c_max), adt)
        zcol = jnp.zeros((H + 2, 1, c_max), adt)
        for b in range(n_bufs_used):
            bufs[b][0:1, :, :] = zrow
            bufs[b][H + 1:H + 2, :, :] = zrow
            bufs[b][:, 0:1, :] = zcol
            bufs[b][:, W + 1:W + 2, :] = zcol

        # Input (already bf16 NHWC) -> interior of the padded buffer
        # (padding=1 handled entirely in VMEM).
        c0 = layer_dims[0][0]
        buf_a[1:H + 1, 1:W + 1, 0:c0] = x_ref[0]

        y = None
        for i, (cin, cout) in enumerate(layer_dims):
            cur = bufs[i % 2]
            # im2col staging: tap k = dy*3 + dx occupies channel block
            # [k*cin, (k+1)*cin) of the staging buffer.  9 shifted VMEM
            # copies, then ONE K = 9*cin matmul on the MXU.
            for dy in range(3):                       # static unroll, 9 taps
                for dx in range(3):
                    k = dy * 3 + dx
                    col[:, :, k * cin:(k + 1) * cin] = \
                        cur[dy:dy + H, dx:dx + W, 0:cin]
            patches = col[:, :, 0:9 * cin].reshape(HW, 9 * cin)
            acc = jnp.dot(patches, w_refs[i][...],
                          preferred_element_type=jnp.float32)
            # BN(eval) scale folded into weights -> epilogue is shift + ReLU.
            y = jnp.maximum(acc + s_refs[i][...], 0.0)          # (HW, cout) f32
            if i + 1 < L:
                nxt = bufs[(i + 1) % 2]
                nxt[1:H + 1, 1:W + 1, 0:cout] = \
                    y.reshape(H, W, cout).astype(adt)

        c_last = layer_dims[-1][1]
        if max_pool:
            Ho, Wo = H // 2, W // 2
            # Fused 2x2 max-pool on the live value (no scratch spill):
            # rows of y are ordered r = h*W + w, so splitting W -> (Wo, 2)
            # pairs neighbours along W, then splitting H -> (Ho, 2) along H.
            y4 = y.reshape(H, Wo, 2, c_last)
            wmax = jnp.maximum(y4[:, :, 0, :], y4[:, :, 1, :])   # (H, Wo, C)
            y5 = wmax.reshape(Ho, 2, Wo, c_last)
            o_ref[0] = jnp.maximum(y5[:, 0, :, :], y5[:, 1, :, :])
        else:
            o_ref[0] = y.reshape(H, W, c_last)

    return kernel


# ----------------------------------------------------------------------------
# pallas_call wrapper
# ----------------------------------------------------------------------------
def _conv_block_call(params, x_nhwc_bf16, max_pool):
    N, H, W, c0 = x_nhwc_bf16.shape
    layer_dims = tuple((lyr["w"].shape[0] // 9, lyr["w"].shape[1])
                       for lyr in params)
    assert layer_dims[0][0] == c0
    if max_pool:
        assert H % 2 == 0 and W % 2 == 0
    c_last = layer_dims[-1][1]
    Ho, Wo = (H // 2, W // 2) if max_pool else (H, W)
    c_max = max(c0, *(c for _, c in layer_dims))

    inputs = [x_nhwc_bf16]
    in_specs = [pl.BlockSpec((1, H, W, c0), lambda b: (b, 0, 0, 0))]
    for lyr in params:
        inputs += [lyr["w"], lyr["shift"]]
        # Constant index maps -> weights/shifts stay VMEM-resident.
        in_specs += [pl.BlockSpec(lyr["w"].shape, lambda b: (0, 0)),
                     pl.BlockSpec(lyr["shift"].shape, lambda b: (0, 0))]

    scratch_shapes = [
        pltpu.VMEM((H + 2, W + 2, c_max), jnp.bfloat16),   # padded act (ping)
        pltpu.VMEM((H + 2, W + 2, c_max), jnp.bfloat16),   # padded act (pong)
        pltpu.VMEM((H, W, 9 * c_max), jnp.bfloat16),       # im2col staging
    ]

    kernel = _make_block_kernel(H, W, c_max, layer_dims, max_pool)

    return pl.pallas_call(
        kernel,
        out_shape=jax.ShapeDtypeStruct((N, Ho, Wo, c_last), jnp.float32),
        grid_spec=pltpu.PrefetchScalarGridSpec(
            num_scalar_prefetch=0,
            grid=(N,),
            in_specs=in_specs,
            out_specs=pl.BlockSpec((1, Ho, Wo, c_last), lambda b: (b, 0, 0, 0)),
            scratch_shapes=scratch_shapes,
        ),
        compiler_params=pltpu.CompilerParams(
            dimension_semantics=("parallel",),     # megacore / v7x 2-TC split
            # Actual footprint here is <1 MiB; keep the cap well below v7x's
            # 64 MiB physical VMEM so the auto-pipeline keeps its headroom.
            vmem_limit_bytes=32 * 1024 * 1024),
    )(*inputs)


@functools.partial(jax.jit, static_argnames=("max_pool",))
def conv_block_forward_nhwc(params, x_nhwc, max_pool=False):
    """Preferred entry when chaining blocks: NHWC end-to-end, no per-block
    layout transposes."""
    return _conv_block_call(params, x_nhwc.astype(jnp.bfloat16), max_pool)


@functools.partial(jax.jit, static_argnames=("max_pool",))
def conv_block_forward(params, x_nchw, max_pool=False):
    """NCHW wrapper matching the PyTorch module's layout (single boundary
    transpose each way; chained blocks should use conv_block_forward_nhwc)."""
    x = jnp.transpose(x_nchw, (0, 2, 3, 1)).astype(jnp.bfloat16)
    out = _conv_block_call(params, x, max_pool)
    return jnp.transpose(out, (0, 3, 1, 2))


# ----------------------------------------------------------------------------
# Parameters (deterministic, synthetic), BN(eval) scale folded into weights.
# w[k*cin + ci, co] = W_torch[co, ci, dy, dx] * gamma/sqrt(var+eps), k=dy*3+dx
# shift[co] = beta - mean*scale
# ----------------------------------------------------------------------------
def build_conv_block_params(key, num_layer, in_channels, out_channels, eps=1e-5):
    params = []
    for i in range(num_layer):
        cin = in_channels if i == 0 else out_channels
        cout = out_channels
        key, kw, kg, kb, km, kv = jax.random.split(key, 6)
        w = jax.random.normal(kw, (cout, cin, 3, 3), jnp.float32) * (cin * 9) ** -0.5
        gamma = jax.random.uniform(kg, (cout,), jnp.float32, 0.5, 1.5)
        beta = jax.random.normal(kb, (cout,), jnp.float32) * 0.1
        mean = jax.random.normal(km, (cout,), jnp.float32) * 0.1
        var = jax.random.uniform(kv, (cout,), jnp.float32, 0.5, 1.5)
        scale = gamma / jnp.sqrt(var + eps)
        shift = beta - mean * scale
        # (cout,cin,3,3) -> (ky,kx,cin,cout) -> (9*cin, cout), row = k*cin+ci
        wmat = jnp.transpose(w, (2, 3, 1, 0)).reshape(9 * cin, cout) * scale[None, :]
        params.append({"w": wmat.astype(jnp.bfloat16),           # MXU operands
                       "shift": shift.reshape(1, cout).astype(jnp.float32)})
    return params


# ----------------------------------------------------------------------------
# Pure-XLA reference of the folded math.
#   match_kernel_dtypes=True mirrors the kernel's quantization points exactly
#   (bf16 conv operands, f32 accumulate/epilogue, bf16 inter-layer handoff),
#   allowing a tight tolerance.  match_kernel_dtypes=False is the f32 check.
# ----------------------------------------------------------------------------
def conv_block_reference(params, x_nchw, max_pool=False, match_kernel_dtypes=False):
    x = jnp.transpose(x_nchw, (0, 2, 3, 1)).astype(jnp.float32)
    for lyr in params:
        w = lyr["w"].astype(jnp.float32)                 # stored bf16
        cin, cout = w.shape[0] // 9, w.shape[1]
        w_hwio = w.reshape(3, 3, cin, cout)
        xin = x.astype(jnp.bfloat16).astype(jnp.float32) if match_kernel_dtypes else x
        y = lax.conv_general_dilated(
            xin, w_hwio, window_strides=(1, 1), padding="SAME",
            dimension_numbers=("NHWC", "HWIO", "NHWC"),
            precision=lax.Precision.HIGHEST)
        x = jnp.maximum(y + lyr["shift"][0], 0.0)
    if max_pool:
        n, h, w_, c = x.shape
        x = jnp.max(x.reshape(n, h // 2, 2, w_ // 2, 2, c), axis=(2, 4))
    return jnp.transpose(x, (0, 3, 1, 2))


# ----------------------------------------------------------------------------
if __name__ == "__main__":
    N, Cin, H, W = 2, 4, 16, 16
    num_layer, Cout = 2, 32

    key = jax.random.PRNGKey(0)
    kp, kx = jax.random.split(key)
    params = build_conv_block_params(kp, num_layer, Cin, Cout)
    x = jax.random.normal(kx, (N, Cin, H, W), jnp.float32)

    for mp in (True, False):
        out = jax.block_until_ready(conv_block_forward(params, x, max_pool=mp))
        Ho = H // 2 if mp else H
        assert out.shape == (N, Cout, Ho, Ho), out.shape
        assert bool(jnp.all(jnp.isfinite(out)))
        # Tight check vs. a reference with the same bf16 quantization points.
        ref_q = conv_block_reference(params, x, max_pool=mp, match_kernel_dtypes=True)
        err_q = float(jnp.max(jnp.abs(out - ref_q)))
        assert err_q < 3e-3, ("quantization-matched check failed", mp, err_q)
        # Loose accuracy check vs. full-f32 math (bounds bf16 quantization loss).
        ref_f = conv_block_reference(params, x, max_pool=mp, match_kernel_dtypes=False)
        err_f = float(jnp.max(jnp.abs(out - ref_f)))
        assert err_f < 1e-1, ("f32-accuracy check failed", mp, err_f)

    print("KERNEL_OK")
</pallas_src>

<mosaic_0001>
module attributes {stable_mosaic.version = 11 : i64} {
  func.func @kernel(%arg0: i32, %arg1: memref<1x16x16x4xbf16, #tpu.memory_space<vmem>>, %arg2: memref<36x32xbf16, #tpu.memory_space<vmem>>, %arg3: memref<1x32xf32, #tpu.memory_space<vmem>>, %arg4: memref<288x32xbf16, #tpu.memory_space<vmem>>, %arg5: memref<1x32xf32, #tpu.memory_space<vmem>>, %arg6: memref<1x8x8x32xf32, #tpu.memory_space<vmem>>, %arg7: memref<18x18x32xbf16, #tpu.memory_space<vmem>>, %arg8: memref<18x18x32xbf16, #tpu.memory_space<vmem>>, %arg9: memref<16x16x288xbf16, #tpu.memory_space<vmem>>) attributes {dimension_semantics = [#tpu.dimension_semantics<parallel>], iteration_bounds = array<i64: 2>, scalar_prefetch = 0 : i64, scratch_operands = 3 : i64, tpu.core_type = #tpu.core_type<tc>, window_params = [{transform_indices = @transform_0, window_bounds = array<i64: 1, 16, 16, 4>}, {pipeline_mode = #tpu.pipeline_mode<synchronous>, transform_indices = @transform_1, window_bounds = array<i64: 36, 32>}, {pipeline_mode = #tpu.pipeline_mode<synchronous>, transform_indices = @transform_2, window_bounds = array<i64: 1, 32>}, {pipeline_mode = #tpu.pipeline_mode<synchronous>, transform_indices = @transform_3, window_bounds = array<i64: 288, 32>}, {pipeline_mode = #tpu.pipeline_mode<synchronous>, transform_indices = @transform_4, window_bounds = array<i64: 1, 32>}, {transform_indices = @transform_5, window_bounds = array<i64: 1, 8, 8, 32>}]} {
    %cst = arith.constant 0.000000e+00 : bf16
    %0 = vector.broadcast %cst : bf16 to vector<1x18x32xbf16>
    %cst_0 = arith.constant 0.000000e+00 : bf16
    %1 = vector.broadcast %cst_0 : bf16 to vector<18x1x32xbf16>
    %c0 = arith.constant 0 : index
    %c0_1 = arith.constant 0 : index
    %c0_2 = arith.constant 0 : index
    %2 = vector.load %arg7[%c0, %c0_1, %c0_2] : memref<18x18x32xbf16, #tpu.memory_space<vmem>>, vector<1x18x32xbf16>
    tpu.vector_store %arg7[%c0, %c0_1, %c0_2], %0 {strides = array<i32>} : memref<18x18x32xbf16, #tpu.memory_space<vmem>>, vector<1x18x32xbf16>,
    %c17 = arith.constant 17 : index
    %c0_3 = arith.constant 0 : index
    %c0_4 = arith.constant 0 : index
    %3 = vector.load %arg7[%c17, %c0_3, %c0_4] : memref<18x18x32xbf16, #tpu.memory_space<vmem>>, vector<1x18x32xbf16>
    tpu.vector_store %arg7[%c17, %c0_3, %c0_4], %0 {strides = array<i32>} : memref<18x18x32xbf16, #tpu.memory_space<vmem>>, vector<1x18x32xbf16>,
    %c0_5 = arith.constant 0 : index
    %c0_6 = arith.constant 0 : index
    %c0_7 = arith.constant 0 : index
    %4 = vector.load %arg7[%c0_5, %c0_6, %c0_7] : memref<18x18x32xbf16, #tpu.memory_space<vmem>>, vector<18x1x32xbf16>
    tpu.vector_store %arg7[%c0_5, %c0_6, %c0_7], %1 {strides = array<i32>} : memref<18x18x32xbf16, #tpu.memory_space<vmem>>, vector<18x1x32xbf16>,
    %c0_8 = arith.constant 0 : index
    %c17_9 = arith.constant 17 : index
    %c0_10 = arith.constant 0 : index
    %5 = vector.load %arg7[%c0_8, %c17_9, %c0_10] : memref<18x18x32xbf16, #tpu.memory_space<vmem>>, vector<18x1x32xbf16>
    tpu.vector_store %arg7[%c0_8, %c17_9, %c0_10], %1 {strides = array<i32>} : memref<18x18x32xbf16, #tpu.memory_space<vmem>>, vector<18x1x32xbf16>,
    %c0_11 = arith.constant 0 : index
    %c0_12 = arith.constant 0 : index
    %c0_13 = arith.constant 0 : index
    %6 = vector.load %arg8[%c0_11, %c0_12, %c0_13] : memref<18x18x32xbf16, #tpu.memory_space<vmem>>, vector<1x18x32xbf16>
    tpu.vector_store %arg8[%c0_11, %c0_12, %c0_13], %0 {strides = array<i32>} : memref<18x18x32xbf16, #tpu.memory_space<vmem>>, vector<1x18x32xbf16>,
    %c17_14 = arith.constant 17 : index
    %c0_15 = arith.constant 0 : index
    %c0_16 = arith.constant 0 : index
    %7 = vector.load %arg8[%c17_14, %c0_15, %c0_16] : memref<18x18x32xbf16, #tpu.memory_space<vmem>>, vector<1x18x32xbf16>
    tpu.vector_store %arg8[%c17_14, %c0_15, %c0_16], %0 {strides = array<i32>} : memref<18x18x32xbf16, #tpu.memory_space<vmem>>, vector<1x18x32xbf16>,
    %c0_17 = arith.constant 0 : index
    %c0_18 = arith.constant 0 : index
    %c0_19 = arith.constant 0 : index
    %8 = vector.load %arg8[%c0_17, %c0_18, %c0_19] : memref<18x18x32xbf16, #tpu.memory_space<vmem>>, vector<18x1x32xbf16>
    tpu.vector_store %arg8[%c0_17, %c0_18, %c0_19], %1 {strides = array<i32>} : memref<18x18x32xbf16, #tpu.memory_space<vmem>>, vector<18x1x32xbf16>,
    %c0_20 = arith.constant 0 : index
    %c17_21 = arith.constant 17 : index
    %c0_22 = arith.constant 0 : index
    %9 = vector.load %arg8[%c0_20, %c17_21, %c0_22] : memref<18x18x32xbf16, #tpu.memory_space<vmem>>, vector<18x1x32xbf16>
    tpu.vector_store %arg8[%c0_20, %c17_21, %c0_22], %1 {strides = array<i32>} : memref<18x18x32xbf16, #tpu.memory_space<vmem>>, vector<18x1x32xbf16>,
    %c0_23 = arith.constant 0 : index
    %c0_24 = arith.constant 0 : index
    %c0_25 = arith.constant 0 : index
    %c0_26 = arith.constant 0 : index
    %10 = vector.load %arg1[%c0_23, %c0_24, %c0_25, %c0_26] : memref<1x16x16x4xbf16, #tpu.memory_space<vmem>>, vector<1x16x16x4xbf16>
    %11 = vector.shape_cast %10 : vector<1x16x16x4xbf16> to vector<16x16x4xbf16>
    %c1 = arith.constant 1 : index
    %c1_27 = arith.constant 1 : index
    %c0_28 = arith.constant 0 : index
    %12 = vector.load %arg7[%c1, %c1_27, %c0_28] : memref<18x18x32xbf16, #tpu.memory_space<vmem>>, vector<16x16x4xbf16>
    tpu.vector_store %arg7[%c1, %c1_27, %c0_28], %11 {strides = array<i32>} : memref<18x18x32xbf16, #tpu.memory_space<vmem>>, vector<16x16x4xbf16>,
    %c0_29 = arith.constant 0 : index
    %c0_30 = arith.constant 0 : index
    %c0_31 = arith.constant 0 : index
    %13 = vector.load %arg7[%c0_29, %c0_30, %c0_31] : memref<18x18x32xbf16, #tpu.memory_space<vmem>>, vector<16x16x4xbf16>
    %c0_32 = arith.constant 0 : index
    %c0_33 = arith.constant 0 : index
    %c0_34 = arith.constant 0 : index
    %14 = vector.load %arg9[%c0_32, %c0_33, %c0_34] : memref<16x16x288xbf16, #tpu.memory_space<vmem>>, vector<16x16x4xbf16>
    tpu.vector_store %arg9[%c0_32, %c0_33, %c0_34], %13 {strides = array<i32>} : memref<16x16x288xbf16, #tpu.memory_space<vmem>>, vector<16x16x4xbf16>,
    %c0_35 = arith.constant 0 : index
    %c1_36 = arith.constant 1 : index
    %c0_37 = arith.constant 0 : index
    %15 = vector.load %arg7[%c0_35, %c1_36, %c0_37] : memref<18x18x32xbf16, #tpu.memory_space<vmem>>, vector<16x16x4xbf16>
    %c0_38 = arith.constant 0 : index
    %c0_39 = arith.constant 0 : index
    %c4 = arith.constant 4 : index
    %16 = vector.load %arg9[%c0_38, %c0_39, %c4] : memref<16x16x288xbf16, #tpu.memory_space<vmem>>, vector<16x16x4xbf16>
    tpu.vector_store %arg9[%c0_38, %c0_39, %c4], %15 {strides = array<i32>} : memref<16x16x288xbf16, #tpu.memory_space<vmem>>, vector<16x16x4xbf16>,
    %c0_40 = arith.constant 0 : index
    %c2 = arith.constant 2 : index
    %c0_41 = arith.constant 0 : index
    %17 = vector.load %arg7[%c0_40, %c2, %c0_41] : memref<18x18x32xbf16, #tpu.memory_space<vmem>>, vector<16x16x4xbf16>
    %c0_42 = arith.constant 0 : index
    %c0_43 = arith.constant 0 : index
    %c8 = arith.constant 8 : index
    %18 = vector.load %arg9[%c0_42, %c0_43, %c8] : memref<16x16x288xbf16, #tpu.memory_space<vmem>>, vector<16x16x4xbf16>
    tpu.vector_store %arg9[%c0_42, %c0_43, %c8], %17 {strides = array<i32>} : memref<16x16x288xbf16, #tpu.memory_space<vmem>>, vector<16x16x4xbf16>,
    %c1_44 = arith.constant 1 : index
    %c0_45 = arith.constant 0 : index
    %c0_46 = arith.constant 0 : index
    %19 = vector.load %arg7[%c1_44, %c0_45, %c0_46] : memref<18x18x32xbf16, #tpu.memory_space<vmem>>, vector<16x16x4xbf16>
    %c0_47 = arith.constant 0 : index
    %c0_48 = arith.constant 0 : index
    %c12 = arith.constant 12 : index
    %20 = vector.load %arg9[%c0_47, %c0_48, %c12] : memref<16x16x288xbf16, #tpu.memory_space<vmem>>, vector<16x16x4xbf16>
    tpu.vector_store %arg9[%c0_47, %c0_48, %c12], %19 {strides = array<i32>} : memref<16x16x288xbf16, #tpu.memory_space<vmem>>, vector<16x16x4xbf16>,
    %c1_49 = arith.constant 1 : index
    %c1_50 = arith.constant 1 : index
    %c0_51 = arith.constant 0 : index
    %21 = vector.load %arg7[%c1_49, %c1_50, %c0_51] : memref<18x18x32xbf16, #tpu.memory_space<vmem>>, vector<16x16x4xbf16>
    %c0_52 = arith.constant 0 : index
    %c0_53 = arith.constant 0 : index
    %c16 = arith.constant 16 : index
    %22 = vector.load %arg9[%c0_52, %c0_53, %c16] : memref<16x16x288xbf16, #tpu.memory_space<vmem>>, vector<16x16x4xbf16>
    tpu.vector_store %arg9[%c0_52, %c0_53, %c16], %21 {strides = array<i32>} : memref<16x16x288xbf16, #tpu.memory_space<vmem>>, vector<16x16x4xbf16>,
    %c1_54 = arith.constant 1 : index
    %c2_55 = arith.constant 2 : index
    %c0_56 = arith.constant 0 : index
    %23 = vector.load %arg7[%c1_54, %c2_55, %c0_56] : memref<18x18x32xbf16, #tpu.memory_space<vmem>>, vector<16x16x4xbf16>
    %c0_57 = arith.constant 0 : index
    %c0_58 = arith.constant 0 : index
    %c20 = arith.constant 20 : index
    %24 = vector.load %arg9[%c0_57, %c0_58, %c20] : memref<16x16x288xbf16, #tpu.memory_space<vmem>>, vector<16x16x4xbf16>
    tpu.vector_store %arg9[%c0_57, %c0_58, %c20], %23 {strides = array<i32>} : memref<16x16x288xbf16, #tpu.memory_space<vmem>>, vector<16x16x4xbf16>,
    %c2_59 = arith.constant 2 : index
    %c0_60 = arith.constant 0 : index
    %c0_61 = arith.constant 0 : index
    %25 = vector.load %arg7[%c2_59, %c0_60, %c0_61] : memref<18x18x32xbf16, #tpu.memory_space<vmem>>, vector<16x16x4xbf16>
    %c0_62 = arith.constant 0 : index
    %c0_63 = arith.constant 0 : index
    %c24 = arith.constant 24 : index
    %26 = vector.load %arg9[%c0_62, %c0_63, %c24] : memref<16x16x288xbf16, #tpu.memory_space<vmem>>, vector<16x16x4xbf16>
    tpu.vector_store %arg9[%c0_62, %c0_63, %c24], %25 {strides = array<i32>} : memref<16x16x288xbf16, #tpu.memory_space<vmem>>, vector<16x16x4xbf16>,
    %c2_64 = arith.constant 2 : index
    %c1_65 = arith.constant 1 : index
    %c0_66 = arith.constant 0 : index
    %27 = vector.load %arg7[%c2_64, %c1_65, %c0_66] : memref<18x18x32xbf16, #tpu.memory_space<vmem>>, vector<16x16x4xbf16>
    %c0_67 = arith.constant 0 : index
    %c0_68 = arith.constant 0 : index
    %c28 = arith.constant 28 : index
    %28 = vector.load %arg9[%c0_67, %c0_68, %c28] : memref<16x16x288xbf16, #tpu.memory_space<vmem>>, vector<16x16x4xbf16>
    tpu.vector_store %arg9[%c0_67, %c0_68, %c28], %27 {strides = array<i32>} : memref<16x16x288xbf16, #tpu.memory_space<vmem>>, vector<16x16x4xbf16>,
    %c2_69 = arith.constant 2 : index
    %c2_70 = arith.constant 2 : index
    %c0_71 = arith.constant 0 : index
    %29 = vector.load %arg7[%c2_69, %c2_70, %c0_71] : memref<18x18x32xbf16, #tpu.memory_space<vmem>>, vector<16x16x4xbf16>
    %c0_72 = arith.constant 0 : index
    %c0_73 = arith.constant 0 : index
    %c32 = arith.constant 32 : index
    %30 = vector.load %arg9[%c0_72, %c0_73, %c32] : memref<16x16x288xbf16, #tpu.memory_space<vmem>>, vector<16x16x4xbf16>
    tpu.vector_store %arg9[%c0_72, %c0_73, %c32], %29 {strides = array<i32>} : memref<16x16x288xbf16, #tpu.memory_space<vmem>>, vector<16x16x4xbf16>,
    %c0_74 = arith.constant 0 : index
    %c0_75 = arith.constant 0 : index
    %c0_76 = arith.constant 0 : index
    %31 = vector.load %arg9[%c0_74, %c0_75, %c0_76] : memref<16x16x288xbf16, #tpu.memory_space<vmem>>, vector<16x16x36xbf16>
    %32 = vector.shape_cast %31 : vector<16x16x36xbf16> to vector<256x36xbf16>
    %c0_77 = arith.constant 0 : index
    %c0_78 = arith.constant 0 : index
    %33 = vector.load %arg2[%c0_77, %c0_78] : memref<36x32xbf16, #tpu.memory_space<vmem>>, vector<36x32xbf16>
    %cst_79 = arith.constant dense<0.000000e+00> : vector<256x32xf32>
    %34 = tpu.matmul %32, %33, %cst_79 {dimension_numbers = #tpu.dot_dimension_numbers<[1], [0], [0], [1], [0, 0, 1, 1], [], []>} : vector<256x36xbf16>, vector<36x32xbf16>, vector<256x32xf32> -> vector<256x32xf32>
    %c0_80 = arith.constant 0 : index
    %c0_81 = arith.constant 0 : index
    %35 = vector.load %arg3[%c0_80, %c0_81] : memref<1x32xf32, #tpu.memory_space<vmem>>, vector<1x32xf32>
    %36 = vector.broadcast %35 : vector<1x32xf32> to vector<256x32xf32>
    %37 = arith.addf %34, %36 : vector<256x32xf32>
    %cst_82 = arith.constant 0.000000e+00 : f32
    %38 = vector.broadcast %cst_82 : f32 to vector<256x32xf32>
    %39 = arith.maximumf %37, %38 : vector<256x32xf32>
    %40 = vector.shape_cast %39 : vector<256x32xf32> to vector<16x16x32xf32>
    %41 = arith.truncf %40 : vector<16x16x32xf32> to vector<16x16x32xbf16>
    %c1_83 = arith.constant 1 : index
    %c1_84 = arith.constant 1 : index
    %c0_85 = arith.constant 0 : index
    %42 = vector.load %arg8[%c1_83, %c1_84, %c0_85] : memref<18x18x32xbf16, #tpu.memory_space<vmem>>, vector<16x16x32xbf16>
    tpu.vector_store %arg8[%c1_83, %c1_84, %c0_85], %41 {strides = array<i32>} : memref<18x18x32xbf16, #tpu.memory_space<vmem>>, vector<16x16x32xbf16>,
    %c0_86 = arith.constant 0 : index
    %c0_87 = arith.constant 0 : index
    %c0_88 = arith.constant 0 : index
    %43 = vector.load %arg8[%c0_86, %c0_87, %c0_88] : memref<18x18x32xbf16, #tpu.memory_space<vmem>>, vector<16x16x32xbf16>
    %c0_89 = arith.constant 0 : index
    %c0_90 = arith.constant 0 : index
    %c0_91 = arith.constant 0 : index
    %44 = vector.load %arg9[%c0_89, %c0_90, %c0_91] : memref<16x16x288xbf16, #tpu.memory_space<vmem>>, vector<16x16x32xbf16>
    tpu.vector_store %arg9[%c0_89, %c0_90, %c0_91], %43 {strides = array<i32>} : memref<16x16x288xbf16, #tpu.memory_space<vmem>>, vector<16x16x32xbf16>,
    %c0_92 = arith.constant 0 : index
    %c1_93 = arith.constant 1 : index
    %c0_94 = arith.constant 0 : index
    %45 = vector.load %arg8[%c0_92, %c1_93, %c0_94] : memref<18x18x32xbf16, #tpu.memory_space<vmem>>, vector<16x16x32xbf16>
    %c0_95 = arith.constant 0 : index
    %c0_96 = arith.constant 0 : index
    %c32_97 = arith.constant 32 : index
    %46 = vector.load %arg9[%c0_95, %c0_96, %c32_97] : memref<16x16x288xbf16, #tpu.memory_space<vmem>>, vector<16x16x32xbf16>
    tpu.vector_store %arg9[%c0_95, %c0_96, %c32_97], %45 {strides = array<i32>} : memref<16x16x288xbf16, #tpu.memory_space<vmem>>, vector<16x16x32xbf16>,
    %c0_98 = arith.constant 0 : index
    %c2_99 = arith.constant 2 : index
    %c0_100 = arith.constant 0 : index
    %47 = vector.load %arg8[%c0_98, %c2_99, %c0_100] : memref<18x18x32xbf16, #tpu.memory_space<vmem>>, vector<16x16x32xbf16>
    %c0_101 = arith.constant 0 : index
    %c0_102 = arith.constant 0 : index
    %c64 = arith.constant 64 : index
    %48 = vector.load %arg9[%c0_101, %c0_102, %c64] : memref<16x16x288xbf16, #tpu.memory_space<vmem>>, vector<16x16x32xbf16>
    tpu.vector_store %arg9[%c0_101, %c0_102, %c64], %47 {strides = array<i32>} : memref<16x16x288xbf16, #tpu.memory_space<vmem>>, vector<16x16x32xbf16>,
    %c1_103 = arith.constant 1 : index
    %c0_104 = arith.constant 0 : index
    %c0_105 = arith.constant 0 : index
    %49 = vector.load %arg8[%c1_103, %c0_104, %c0_105] : memref<18x18x32xbf16, #tpu.memory_space<vmem>>, vector<16x16x32xbf16>
    %c0_106 = arith.constant 0 : index
    %c0_107 = arith.constant 0 : index
    %c96 = arith.constant 96 : index
    %50 = vector.load %arg9[%c0_106, %c0_107, %c96] : memref<16x16x288xbf16, #tpu.memory_space<vmem>>, vector<16x16x32xbf16>
    tpu.vector_store %arg9[%c0_106, %c0_107, %c96], %49 {strides = array<i32>} : memref<16x16x288xbf16, #tpu.memory_space<vmem>>, vector<16x16x32xbf16>,
    %c1_108 = arith.constant 1 : index
    %c1_109 = arith.constant 1 : index
    %c0_110 = arith.constant 0 : index
    %51 = vector.load %arg8[%c1_108, %c1_109, %c0_110] : memref<18x18x32xbf16, #tpu.memory_space<vmem>>, vector<16x16x32xbf16>
    %c0_111 = arith.constant 0 : index
    %c0_112 = arith.constant 0 : index
    %c128 = arith.constant 128 : index
    %52 = vector.load %arg9[%c0_111, %c0_112, %c128] : memref<16x16x288xbf16, #tpu.memory_space<vmem>>, vector<16x16x32xbf16>
    tpu.vector_store %arg9[%c0_111, %c0_112, %c128], %51 {strides = array<i32>} : memref<16x16x288xbf16, #tpu.memory_space<vmem>>, vector<16x16x32xbf16>,
    %c1_113 = arith.constant 1 : index
    %c2_114 = arith.constant 2 : index
    %c0_115 = arith.constant 0 : index
    %53 = vector.load %arg8[%c1_113, %c2_114, %c0_115] : memref<18x18x32xbf16, #tpu.memory_space<vmem>>, vector<16x16x32xbf16>
    %c0_116 = arith.constant 0 : index
    %c0_117 = arith.constant 0 : index
    %c160 = arith.constant 160 : index
    %54 = vector.load %arg9[%c0_116, %c0_117, %c160] : memref<16x16x288xbf16, #tpu.memory_space<vmem>>, vector<16x16x32xbf16>
    tpu.vector_store %arg9[%c0_116, %c0_117, %c160], %53 {strides = array<i32>} : memref<16x16x288xbf16, #tpu.memory_space<vmem>>, vector<16x16x32xbf16>,
    %c2_118 = arith.constant 2 : index
    %c0_119 = arith.constant 0 : index
    %c0_120 = arith.constant 0 : index
    %55 = vector.load %arg8[%c2_118, %c0_119, %c0_120] : memref<18x18x32xbf16, #tpu.memory_space<vmem>>, vector<16x16x32xbf16>
    %c0_121 = arith.constant 0 : index
    %c0_122 = arith.constant 0 : index
    %c192 = arith.constant 192 : index
    %56 = vector.load %arg9[%c0_121, %c0_122, %c192] : memref<16x16x288xbf16, #tpu.memory_space<vmem>>, vector<16x16x32xbf16>
    tpu.vector_store %arg9[%c0_121, %c0_122, %c192], %55 {strides = array<i32>} : memref<16x16x288xbf16, #tpu.memory_space<vmem>>, vector<16x16x32xbf16>,
    %c2_123 = arith.constant 2 : index
    %c1_124 = arith.constant 1 : index
    %c0_125 = arith.constant 0 : index
    %57 = vector.load %arg8[%c2_123, %c1_124, %c0_125] : memref<18x18x32xbf16, #tpu.memory_space<vmem>>, vector<16x16x32xbf16>
    %c0_126 = arith.constant 0 : index
    %c0_127 = arith.constant 0 : index
    %c224 = arith.constant 224 : index
    %58 = vector.load %arg9[%c0_126, %c0_127, %c224] : memref<16x16x288xbf16, #tpu.memory_space<vmem>>, vector<16x16x32xbf16>
    tpu.vector_store %arg9[%c0_126, %c0_127, %c224], %57 {strides = array<i32>} : memref<16x16x288xbf16, #tpu.memory_space<vmem>>, vector<16x16x32xbf16>,
    %c2_128 = arith.constant 2 : index
    %c2_129 = arith.constant 2 : index
    %c0_130 = arith.constant 0 : index
    %59 = vector.load %arg8[%c2_128, %c2_129, %c0_130] : memref<18x18x32xbf16, #tpu.memory_space<vmem>>, vector<16x16x32xbf16>
    %c0_131 = arith.constant 0 : index
    %c0_132 = arith.constant 0 : index
    %c256 = arith.constant 256 : index
    %60 = vector.load %arg9[%c0_131, %c0_132, %c256] : memref<16x16x288xbf16, #tpu.memory_space<vmem>>, vector<16x16x32xbf16>
    tpu.vector_store %arg9[%c0_131, %c0_132, %c256], %59 {strides = array<i32>} : memref<16x16x288xbf16, #tpu.memory_space<vmem>>, vector<16x16x32xbf16>,
    %c0_133 = arith.constant 0 : index
    %c0_134 = arith.constant 0 : index
    %c0_135 = arith.constant 0 : index
    %61 = vector.load %arg9[%c0_133, %c0_134, %c0_135] : memref<16x16x288xbf16, #tpu.memory_space<vmem>>, vector<16x16x288xbf16>
    %62 = vector.shape_cast %61 : vector<16x16x288xbf16> to vector<256x288xbf16>
    %c0_136 = arith.constant 0 : index
    %c0_137 = arith.constant 0 : index
    %63 = vector.load %arg4[%c0_136, %c0_137] : memref<288x32xbf16, #tpu.memory_space<vmem>>, vector<288x32xbf16>
    %cst_138 = arith.constant dense<0.000000e+00> : vector<256x32xf32>
    %64 = tpu.matmul %62, %63, %cst_138 {dimension_numbers = #tpu.dot_dimension_numbers<[1], [0], [0], [1], [0, 0, 1, 1], [], []>} : vector<256x288xbf16>, vector<288x32xbf16>, vector<256x32xf32> -> vector<256x32xf32>
    %c0_139 = arith.constant 0 : index
    %c0_140 = arith.constant 0 : index
    %65 = vector.load %arg5[%c0_139, %c0_140] : memref<1x32xf32, #tpu.memory_space<vmem>>, vector<1x32xf32>
    %66 = vector.broadcast %65 : vector<1x32xf32> to vector<256x32xf32>
    %67 = arith.addf %64, %66 : vector<256x32xf32>
    %cst_141 = arith.constant 0.000000e+00 : f32
    %68 = vector.broadcast %cst_141 : f32 to vector<256x32xf32>
    %69 = arith.maximumf %67, %68 : vector<256x32xf32>
    %70 = vector.shape_cast %69 : vector<256x32xf32> to vector<16x8x2x32xf32>
    %71 = vector.extract_strided_slice %70 {offsets = [0, 0, 0, 0], sizes = [16, 8, 1, 32], strides = [1, 1, 1, 1]} : vector<16x8x2x32xf32> to vector<16x8x1x32xf32>
    %72 = vector.shape_cast %71 : vector<16x8x1x32xf32> to vector<16x8x32xf32>
    %73 = vector.extract_strided_slice %70 {offsets = [0, 0, 1, 0], sizes = [16, 8, 1, 32], strides = [1, 1, 1, 1]} : vector<16x8x2x32xf32> to vector<16x8x1x32xf32>
    %74 = vector.shape_cast %73 : vector<16x8x1x32xf32> to vector<16x8x32xf32>
    %75 = arith.maximumf %72, %74 : vector<16x8x32xf32>
    %76 = vector.shape_cast %75 : vector<16x8x32xf32> to vector<8x2x8x32xf32>
    %77 = vector.extract_strided_slice %76 {offsets = [0, 0, 0, 0], sizes = [8, 1, 8, 32], strides = [1, 1, 1, 1]} : vector<8x2x8x32xf32> to vector<8x1x8x32xf32>
    %78 = vector.shape_cast %77 : vector<8x1x8x32xf32> to vector<8x8x32xf32>
    %79 = vector.extract_strided_slice %76 {offsets = [0, 1, 0, 0], sizes = [8, 1, 8, 32], strides = [1, 1, 1, 1]} : vector<8x2x8x32xf32> to vector<8x1x8x32xf32>
    %80 = vector.shape_cast %79 : vector<8x1x8x32xf32> to vector<8x8x32xf32>
    %81 = arith.maximumf %78, %80 : vector<8x8x32xf32>
    %c0_142 = arith.constant 0 : index
    %c0_143 = arith.constant 0 : index
    %c0_144 = arith.constant 0 : index
    %c0_145 = arith.constant 0 : index
    %82 = vector.load %arg6[%c0_142, %c0_143, %c0_144, %c0_145] : memref<1x8x8x32xf32, #tpu.memory_space<vmem>>, vector<1x8x8x32xf32>
    %83 = vector.shape_cast %82 : vector<1x8x8x32xf32> to vector<8x8x32xf32>
    %84 = vector.shape_cast %81 : vector<8x8x32xf32> to vector<1x8x8x32xf32>
    tpu.vector_store %arg6[%c0_142, %c0_143, %c0_144, %c0_145], %84 {strides = array<i32>} : memref<1x8x8x32xf32, #tpu.memory_space<vmem>>, vector<1x8x8x32xf32>,
    return
  }
  func.func @transform_0(%arg0: i32) -> (i32, i32, i32, i32) {
    %c0_i32 = arith.constant 0 : i32
    %c0_i32_0 = arith.constant 0 : i32
    %c0_i32_1 = arith.constant 0 : i32
    %c0_i32_2 = arith.constant 0 : i32
    return %arg0, %c0_i32, %c0_i32_0, %c0_i32_1 : i32, i32, i32, i32
  }
  func.func @transform_1(%arg0: i32) -> (i32, i32) {
    %c0_i32 = arith.constant 0 : i32
    %c0_i32_0 = arith.constant 0 : i32
    %c0_i32_1 = arith.constant 0 : i32
    return %c0_i32, %c0_i32_0 : i32, i32
  }
  func.func @transform_2(%arg0: i32) -> (i32, i32) {
    %c0_i32 = arith.constant 0 : i32
    %c0_i32_0 = arith.constant 0 : i32
    %c0_i32_1 = arith.constant 0 : i32
    return %c0_i32, %c0_i32_0 : i32, i32
  }
  func.func @transform_3(%arg0: i32) -> (i32, i32) {
    %c0_i32 = arith.constant 0 : i32
    %c0_i32_0 = arith.constant 0 : i32
    %c0_i32_1 = arith.constant 0 : i32
    return %c0_i32, %c0_i32_0 : i32, i32
  }
  func.func @transform_4(%arg0: i32) -> (i32, i32) {
    %c0_i32 = arith.constant 0 : i32
    %c0_i32_0 = arith.constant 0 : i32
    %c0_i32_1 = arith.constant 0 : i32
    return %c0_i32, %c0_i32_0 : i32, i32
  }
  func.func @transform_5(%arg0: i32) -> (i32, i32, i32, i32) {
    %c0_i32 = arith.constant 0 : i32
    %c0_i32_0 = arith.constant 0 : i32
    %c0_i32_1 = arith.constant 0 : i32
    %c0_i32_2 = arith.constant 0 : i32
    return %arg0, %c0_i32, %c0_i32_0, %c0_i32_1 : i32, i32, i32, i32
  }
}

</mosaic_0001>

<bundles_post_ra>
// kernel: conv_block_forward.1
= control target key start
LH: loop header
LB: loop body
LE: loop exit
PB: predicated region body
PF: predicated region fallthrough
CT: control target
= control target key end

     0   :  { %10 = vsyncpa [#allocation6], 0  ;;  %s13026_s0 = inlined_call_operand.vmem [shape: bf16[2,16,16,4], index: 0, kind: input, shape index: {}]   ;;  %s13027_s1 = inlined_call_operand.vmem [shape: bf16[36,32], index: 1, kind: input, shape index: {}]   ;;  %s13028_s2 = inlined_call_operand.vmem [shape: f32[1,32], index: 2, kind: input, shape index: {}]   ;;  %s13029_s3 = inlined_call_operand.vmem [shape: bf16[288,32], index: 3, kind: input, shape index: {}]   ;;  %s13030_s4 = inlined_call_operand.vmem [shape: f32[1,32], index: 4, kind: input, shape index: {}]   ;;  %s13031_s5 = inlined_call_operand.hbm [shape: f32[2,8,8,32], index: 5, kind: output, shape index: {}]  }
   0x1   :  { %12 = vsyncpa [#allocation6 + $0x1], 0  ;;  %s11018_s18 = smov 0   ;;  %s11020_s19 = smov 0  }
   0x2   :  { %s11022_s20 = smov 0   ;;  %s11024_s21 = smov 0  }
   0x3 LB: > { %s11039_s22 = sadd.s32 4294967295, %s10972_s21   ;;  %s9374_s23 = sadd.s32 4294967294, %s10972_s21   ;;  %s10972_s21 = sphi %s11024_s21, %s13110_s21   ;;  %s10968_s20 = sphi %s11022_s20, %s13109_s20   ;;  %s10964_s19 = sphi %s11020_s19, %s13108_s19   ;;  %s10960_s18 = sphi %s11018_s18, %s13107_s18  }
   0x4   : > { %s11043_s24 = sadd.s32 1, %s10972_s21   ;;  %s135_s25 = sadd.s32 1, %s10968_s20 }
   0x5   : > { %s132_s26 = ssub.s32 %s10972_s21, %s11043_s24  ;;  %p145_p0 = scmp.ne.s32.totalorder %s10968_s20, %s10964_s19 }
   0x6   : > { %p133_p1 = scmp.eq.s32.totalorder %s132_s26, 0  ;;  %p146_p2 = scmp.eq.s32.totalorder %s11039_s22, 1 }
   0x7   : > { %p151_p3 = scmp.ne.s32.totalorder %s10964_s19, %s10960_s18  ;;  %p152_p4 = scmp.eq.s32.totalorder %s9374_s23, 1 }
   0x8   : > { %s11054_s27 = scalar_select %p133_p1, %s10968_s20, %s135_s25  }
   0x9   : > { %p11056_p5 = por %p146_p2, %p145_p0  ;;  %p11060_p6 = por %p152_p4, %p151_p3 }
   0xa   : > { %p9377_p7 = scmp.ge.s32.totalorder %s10972_s21, 1  ;;  %p190_p8 = scmp.lt.s32.totalorder %s10972_s21, 3 }
   0xc   : > { %p191_p9 = pnand %p9377_p7, %p190_p8 }
   0xd   : > { %p218_p10 = scmp.lt.s32.totalorder (!%p191_p9), %s11039_s22, 1  ;;  %vm227_vm0 = vcmask (!%p191_p9), 253952   ;;  %vm234_vm1 = vsmask.f32 (!%p191_p9), 256  ;;  %v239_v0 = vld [vmem:[#allocation2 + $0xc] sm:$0x1] (!%p191_p9) }
   0xe   : > { %194 = sbr.rel (%p191_p9) target bundleno = 1127 (0x467), region = 40  ;;  %vm11069_vm2 = vmand (!%p191_p9), %vm227_vm0, %vm234_vm1  ;;  %vm13032_vm3 = vcmask (!%p191_p9), 257024   ;;  %v10974_v3 = vmov (!%p191_p9), 0   ;;  %v242_v4 = vld [vmem:[#allocation2 + $0x18] sm:$0x1] (!%p191_p9)  ;;  %vm13034_vm6 = vcmask (!%p191_p9), 27648  }
   0xf   : > { %v240_v2 = vsel (!%p191_p9), %vm11069_vm2, 0, %v239_v0  ;;  %225 = vst.msk [vmem:[#allocation2] sm:$0xf] (!%p191_p9), %vm13032_vm3, %v10974_v3  ;;  %226 = vst.msk [vmem:[#allocation2 + $0x4] sm:$0xf] (!%p191_p9), %vm13032_vm3, %v10974_v3  ;;  %v243_v5 = vsel (!%p191_p9), %vm11069_vm2, 0, %v242_v4 }
  0x10   : > { %241 = vst [vmem:[#allocation2 + $0xc] sm:$0x1] (!%p191_p9), %v240_v2  ;;  %228 = vst.msk [vmem:[#allocation2 + $0x8] sm:$0x1] (!%p191_p9), %vm227_vm0, %v10974_v3  ;;  %vm13033_vm4 = vsmask.f32 (!%p191_p9), 7938 }
  0x11   : > { %230 = vst.msk [vmem:[#allocation2 + $0xcc] sm:$0xf] (!%p191_p9), %vm13032_vm3, %v10974_v3  ;;  %231 = vst.msk [vmem:[#allocation2 + $0xd0] sm:$0xf] (!%p191_p9), %vm13032_vm3, %v10974_v3  ;;  %v245_v6 = vld [vmem:[#allocation2 + $0x24] sm:$0x1] (!%p191_p9) }
  0x12   : > { %232 = vst.msk [vmem:[#allocation2 + $0xd4] sm:$0x1] (!%p191_p9), %vm227_vm0, %v10974_v3  ;;  %348 = vst.msk [vmem:[#allocation3 + $0x8] sm:$0x1] (!%p191_p9), %vm227_vm0, %v10974_v3  ;;  %vm493_vm5 = vsmask.f32 (!%p191_p9), 4368 }
  0x13   : > { %346 = vst.msk [vmem:[#allocation3] sm:$0xf] (!%p191_p9), %vm13032_vm3, %v10974_v3  ;;  %347 = vst.msk [vmem:[#allocation3 + $0x4] sm:$0xf] (!%p191_p9), %vm13032_vm3, %v10974_v3  ;;  %v246_v7 = vsel (!%p191_p9), %vm11069_vm2, 0, %v245_v6  ;;  %vm1688_vm10 = vcmask (!%p191_p9), 1046528  }
  0x14   : > { %350 = vst.msk [vmem:[#allocation3 + $0xcc] sm:$0xf] (!%p191_p9), %vm13032_vm3, %v10974_v3  ;;  %351 = vst.msk [vmem:[#allocation3 + $0xd0] sm:$0xf] (!%p191_p9), %vm13032_vm3, %v10974_v3  ;;  %v295_v34 = vld [vmem:[#allocation2 + $0x14] sm:$0x1] (!%p191_p9) }
  0x15   : > { %s219_s30 = scalar_select %p218_p10, %s11039_s22, 1  ;;  %352 = vst.msk [vmem:[#allocation3 + $0xd4] sm:$0x1] %vm227_vm0, %v10974_v3  ;;  %244 = vst [vmem:[#allocation2 + $0x18] sm:$0x1] %v243_v5  ;;  %vm823_vm11 = vcmask 24576  }
  0x16   : > { %247 = vst [vmem:[#allocation2 + $0x24] sm:$0x1] %v246_v7  ;;  %vm11102_vm7 = vmand %vm227_vm0, %vm13033_vm4  ;;  %v298_v40 = vld [vmem:[#allocation2 + $0x20] sm:$0x1]  ;;  %v10408_v45 = vld [vmem:[#allocation2] sm:$0xfe]  }
  0x17   : > { %s10081_s6 = sshll.u32 %s219_s30, 7  ;;  %vm11108_vm8 = vmor %vm234_vm1, %vm493_vm5  ;;  %v818_v28 = vld [vmem:[#allocation2 + $0xc] sm:$0xf]  ;;  %v292_v29 = vld [vmem:[#allocation2 + $0x8] sm:$0x1]  ;;  %v296_v58 = vsel %vm11102_vm7, 0, %v295_v34 }
  0x18   : > { %s11093_s9 = scalar_lea.vmem %s13026_s0, %s10081_s6  ;;  %vm11117_vm9 = vmand %vm13034_vm6, %vm13033_vm4  ;;  %v293_v35 = vsel %vm11102_vm7, 0, %v292_v29  ;;  %v236_v43 = vld [vmem:[#allocation2] sm:$0x1]  ;;  %v301_v54 = vld [vmem:[#allocation2 + $0x2c] sm:$0x1]  ;;  %v299_v63 = vsel %vm11102_vm7, 0, %v298_v40 }
  0x19   : > { %v461_v8 = vld [vmem:[%s11093_s9] sm:$0xf]  ;;  %v462_v9 = vld [vmem:[%s11093_s9 + $0x4] sm:$0xf]  ;;  %v463_v10 = vld [vmem:[%s11093_s9 + $0x8] sm:$0xf] }
  0x1a   : > { %v496_v12 = vshrl.u32 %v461_v8, 16  ;;  %v499_v13 = vshll.u32 %v461_v8, 16  ;;  %v504_v14 = vshrl.u32 %v462_v9, 16  ;;  %v507_v15 = vshll.u32 %v462_v9, 16  ;;  %v464_v16 = vld [vmem:[%s11093_s9 + $0xc] sm:$0xf]  ;;  %vm11171_vm13 = vmand %vm823_vm11, %vm234_vm1 }
  0x1b   : > { %v513_v18 = vshrl.u32 %v463_v10, 16  ;;  %v516_v19 = vshll.u32 %v463_v10, 16  ;;  %v521_v20 = vshrl.u32 %v464_v16, 16  ;;  %v465_v21 = vld [vmem:[%s11093_s9 + $0x10] sm:$0xf]  ;;  %v524_v25 = vshll.u32 %v464_v16, 16 }
  0x1c   : > { %v498_v22 = vrot.slane %v496_v12, 7  ;;  %v11113_v23 = vrot.slane %v504_v14, 7  ;;  %v466_v26 = vld [vmem:[%s11093_s9 + $0x14] sm:$0xf]  ;;  %v530_v27 = vshrl.u32 %v465_v21, 16  ;;  %v533_v33 = vshll.u32 %v465_v21, 16 }
  0x1d   : > { %v515_v36 = vrot.slane %v513_v18, 7  ;;  %v11125_v37 = vrot.slane %v521_v20, 7  ;;  %v828_v38 = vld [vmem:[#allocation2 + $0x18] sm:$0xf]  ;;  %294 = vst [vmem:[#allocation2 + $0x8] sm:$0x1] %v293_v35 }
  0x1e   : > { %v501_v30 = vor.u32 %v499_v13, %v498_v22  ;;  %v502_v31 = vrot.slane %v498_v22, 4  ;;  %v509_v32 = vor.u32 %v507_v15, %v11113_v23  ;;  %v532_v39 = vrot.slane %v530_v27, 7  ;;  %v835_v49 = vld [vmem:[#allocation2 + $0x24] sm:$0xf]  ;;  %v248_v59 = vld [vmem:[#allocation2 + $0x30] sm:$0x1] }
  0x1f   : > { %v538_v44 = vshrl.u32 %v466_v26, 16  ;;  %v518_v46 = vor.u32 %v516_v19, %v515_v36  ;;  %v519_v47 = vrot.slane %v515_v36, 4  ;;  %v526_v48 = vor.u32 %v524_v25, %v11125_v37  ;;  %v11144_v60 = vld [vmem:[%s11093_s9 + $0x18] sm:$0xf]  ;;  %297 = vst [vmem:[#allocation2 + $0x14] sm:$0x1] %v296_v58 }
  0x20   : > { %v510_v41 = vsel %vm11108_vm8, %v502_v31, %v509_v32  ;;  %v819_v42 = vsel %vm11117_vm9, %v501_v30, %v818_v28  ;;  %v237_v50 = vsel %vm11069_vm2, 0, %v236_v43  ;;  %v535_v51 = vor.u32 %v533_v33, %v532_v39  ;;  %v468_v2 = vld [vmem:[%s11093_s9 + $0x1c] sm:$0xf]  ;;  %300 = vst [vmem:[#allocation2 + $0x20] sm:$0x1] %v299_v63  ;;  %s10975_s10 = smov 12  }
  0x21   : > { %820 = vst [vmem:[#allocation2 + $0xc] sm:$0xf] %v819_v42  ;;  %822 = vst.msk [vmem:[#allocation2 + $0x10] sm:$0xf] %vm13034_vm6, %v510_v41  ;;  %v536_v52 = vrot.slane %v532_v39, 4  ;;  %v11135_v53 = vrot.slane %v538_v44, 7  ;;  %v527_v55 = vsel %vm11108_vm8, %v519_v47, %v526_v48  ;;  %v829_v56 = vsel %vm11117_vm9, %v518_v46, %v828_v38 }
  0x22   : > { %238 = vst [vmem:[#allocation2] sm:$0x1] %v237_v50  ;;  %v541_v57 = vshll.u32 %v466_v26, 16  ;;  %v511_v61 = vrot.slane %v11113_v23, 4  ;;  %830 = vst [vmem:[#allocation2 + $0x18] sm:$0xf] %v829_v56  ;;  %v836_v62 = vsel %vm11117_vm9, %v535_v51, %v835_v49 }
  0x23   : > { %831 = vst.msk [vmem:[#allocation2 + $0x1c] sm:$0xf] %vm13034_vm6, %v527_v55  ;;  %v302_v0 = vsel %vm11102_vm7, 0, %v301_v54  ;;  %v1689_v3 = vrot.slane %v10408_v45, 1  ;;  %837 = vst [vmem:[#allocation2 + $0x24] sm:$0xf] %v836_v62 }
  0x24   : > { %v543_v4 = vor.u32 %v541_v57, %v11135_v53  ;;  %303 = vst [vmem:[#allocation2 + $0x2c] sm:$0x1] %v302_v0  ;;  %v249_v5 = vsel %vm11069_vm2, 0, %v248_v59  ;;  %v547_v6 = vshrl.u32 %v11144_v60, 16  ;;  %v304_v7 = vld [vmem:[#allocation2 + $0x38] sm:$0x1] }
  0x25   : > { %v528_v8 = vrot.slane %v11125_v37, 4  ;;  %250 = vst [vmem:[#allocation2 + $0x30] sm:$0x1] %v249_v5  ;;  %v555_v9 = vshrl.u32 %v468_v2, 16  ;;  %v558_v10 = vshll.u32 %v468_v2, 16  ;;  %v305_v12 = vsel %vm11102_vm7, 0, %v304_v7 }
  0x26   : > { %v10409_v13 = vld [vmem:[#allocation2 + $0x8] ss:$0 sps:$4 sm:$0x11]   ;;  %v544_v14 = vsel %vm11108_vm8, %v536_v52, %v543_v4  ;;  %v11164_v15 = vrot.slane %v547_v6, 7  ;;  %306 = vst [vmem:[#allocation2 + $0x38] sm:$0x1] %v305_v12 }
  0x27   : > { %vm1254_vm12 = vsmask.f32 7424  ;;  %838 = vst.msk [vmem:[#allocation2 + $0x28] sm:$0xf] %vm13034_vm6, %v544_v14  ;;  %v11167_v18 = vrot.slane %v555_v9, 7  ;;  %v1690_v19 = vrot.slane %v10409_v13, 1 }
  0x28   : > { %v10407_v16 = vld [vmem:[#allocation2 + $0xc] sm:$0xff]   ;;  %v10413_v20 = vld [vmem:[#allocation2 + $0x8] ss:$0 sps:$4 sm:$0x11]   ;;  %v553_v23 = vrot.slane %v11164_v15, 4  ;;  %s10976_s11 = smov 8  }
  0x29   : > { %1914 = vrot.lane.b32.xlu0 %v10407_v16, %s10975_s10  ;;  %v10412_v22 = vld [vmem:[#allocation2] sm:$0xff]   ;;  %v560_v25 = vor.u32 %v558_v10, %v11167_v18  ;;  %v1691_v26 = vsel %vm1688_vm10, %v1689_v3, %v1690_v19  ;;  %v1263_v28 = vshll.u32 %v10413_v20, 16  ;;  %v825_v34 = vld [vmem:[#allocation2 + $0x14] sm:$0x1]  ;;  %s10977_s12 = smov 24   ;;  %v10423_v41 = vld [vmem:[#allocation2 + $0xc] sm:$0xff]  }
  0x2a   : > { %v10410_v27 = vld [vmem:[#allocation2 + $0x18] sm:$0xff]   ;;  %1737 = vrot.lane.b32.xlu1 %v1691_v26, %s10976_s11  ;;  %v1256_v30 = vshrl.u32 %v10412_v22, 16  ;;  %v1258_v32 = vshll.u32 %v10412_v22, 16  ;;  %v826_v35 = vsel %vm11171_vm13, %v511_v61, %v825_v34  ;;  %v10415_v36 = vld [vmem:[#allocation2 + $0xc] sm:$0xfe]   ;;  %v545_v45 = vrot.slane %v11135_v53, 4 }
  0x2b   : > { %v10411_v29 = vld [vmem:[#allocation2 + $0x18] sm:$0xff]   ;;  %v561_v31 = vsel %vm11108_vm8, %v553_v23, %v560_v25  ;;  %v1265_v33 = vrot.slane %v1263_v28, 1  ;;  %827 = vst [vmem:[#allocation2 + $0x14] sm:$0x1] %v826_v35  ;;  %v10417_v39 = vld [vmem:[#allocation2 + $0xc] sm:$0xfe]  }
  0x2c   : > { %845 = vst.msk [vmem:[#allocation2 + $0x34] sm:$0xf] %vm13034_vm6, %v561_v31  ;;  %v1260_v37 = vrot.slane %v1258_v32, 1  ;;  %v832_v40 = vld [vmem:[#allocation2 + $0x20] sm:$0x1]  ;;  %v2588_v46 = vrot.slane %v10415_v36, 1 }
  0x2d   : > { %2814 = vrot.lane.b32.xlu0 %v10410_v27, %s10977_s12  ;;  %v833_v43 = vsel %vm11171_vm13, %v528_v8, %v832_v40  ;;  %v10419_v44 = vld [vmem:[#allocation2 + $0x18] sm:$0xfe]   ;;  %v1692_v48 = vrot.slane %v10417_v39, 1  ;;  %v1270_v50 = vshll.u32 %v10423_v41, 16  ;;  %s10978_s13 = smov 4   ;;  %v1268_v54 = vshrl.u32 %v10423_v41, 16 }
  0x2e   : > { %v10414_v38 = vld [vmem:[#allocation2 + $0x24] sm:$0xff]   ;;  %1916 = vrot.lane.b32.xlu1 %v10411_v29, %s10975_s10  ;;  %v1261_v42 = vor.u32 %v1260_v37, %v1256_v30  ;;  %834 = vst [vmem:[#allocation2 + $0x20] sm:$0x1] %v833_v43  ;;  %v10421_v49 = vld [vmem:[#allocation2 + $0x18] sm:$0xfe]   ;;  %v3488_v51 = vrot.slane %v10419_v44, 1 }
  0x2f   : > { %v2591_v52 = vrot.slane %v10421_v49, 1  ;;  %v10425_v55 = vld [vmem:[#allocation2 + $0x18] sm:$0xff]   ;;  %v1272_v57 = vrot.slane %v1270_v50, 1  ;;  %v10427_v62 = vld [vmem:[#allocation2 + $0xc] sm:$0xff]   ;;  %v10429_v5 = vld [vmem:[#allocation2 + $0x24] sm:$0xff]   ;;  %s10979_s14 = smov 20  }
  0x30   : > { %v1266_v47 = vsel %vm1254_vm12, %v1261_v42, %v1265_v33  ;;  %v2168_v53 = vshrl.u32 %v10425_v55, 16  ;;  %v2170_v13 = vshll.u32 %v10425_v55, 16  ;;  %v2156_v14 = vshrl.u32 %v10427_v62, 16  ;;  %v839_v26 = vld [vmem:[#allocation2 + $0x2c] sm:$0x1]  ;;  %s10980_s15 = smov 32  }
  0x31   : > { %1447 = vrot.lane.b32.xlu0 %v1266_v47, %s10978_s13  ;;  %v1273_v8 = vor.u32 %v1272_v57, %v1268_v54  ;;  %v2158_v25 = vshll.u32 %v10427_v62, 16  ;;  %v840_v29 = vsel %vm11171_vm13, %v545_v45, %v839_v26  ;;  %v10431_v30 = vld [vmem:[#allocation2 + $0x18] sm:$0xff]   ;;  %v550_v31 = vshll.u32 %v11144_v60, 16  ;;  %s10981_s16 = smov 16   ;;  %v10437_v47 = vld [vmem:[#allocation2 + $0x24] sm:$0xff]   ;;  %s10982_s17 = smov 28  }
  0x32   : > { %2816 = vrot.lane.b32.xlu1 %v10414_v38, %s10977_s12  ;;  %v10416_v56 = vld [vmem:[#allocation2 + $0x14] ss:$0 sps:$4 sm:$0x11]   ;;  %v2172_v23 = vrot.slane %v2170_v13, 1  ;;  %841 = vst [vmem:[#allocation2 + $0x2c] sm:$0x1] %v840_v29 }
  0x33   : > { %v10418_v58 = vld [vmem:[#allocation2 + $0x14] ss:$0 sps:$4 sm:$0x11]   ;;  %v2589_v59 = vrot.slane %v10416_v56, 1  ;;  %v2160_v34 = vrot.slane %v2158_v25, 1  ;;  %v3070_v35 = vshll.u32 %v10429_v5, 16 }
  0x34   : > { %v10424_v61 = vld [vmem:[#allocation2 + $0x14] ss:$0 sps:$4 sm:$0x11]   ;;  %v1693_v63 = vrot.slane %v10418_v58, 1  ;;  %v2173_v33 = vor.u32 %v2172_v23, %v2168_v53  ;;  %v3068_v40 = vshrl.u32 %v10429_v5, 16  ;;  %v3056_v42 = vshrl.u32 %v10431_v30, 16 }
  0x35   : > { %v10420_v0 = vld [vmem:[#allocation2 + $0x20] ss:$0 sps:$4 sm:$0x11]   ;;  %v2590_v2 = vsel %vm1688_vm10, %v2588_v46, %v2589_v59  ;;  %v1275_v4 = vshll.u32 %v10424_v61, 16  ;;  %v2161_v39 = vor.u32 %v2160_v34, %v2156_v14  ;;  %v3072_v41 = vrot.slane %v3070_v35, 1  ;;  %v10433_v44 = vld [vmem:[#allocation2 + $0x18] sm:$0xff]  }
  0x36   : > { %v10422_v3 = vld [vmem:[#allocation2 + $0x20] ss:$0 sps:$4 sm:$0x11]   ;;  %2636 = vrot.lane.b32.xlu0 %v2590_v2, %s10979_s14  ;;  %v1694_v6 = vsel %vm1688_vm10, %v1692_v48, %v1693_v63  ;;  %v3489_v7 = vrot.slane %v10420_v0, 1  ;;  %v3058_v43 = vshll.u32 %v10431_v30, 16  ;;  %v1280_v50 = vshrl.u32 %v10433_v44, 16 }
  0x37   : > { %v10426_v9 = vld [vmem:[#allocation2 + $0x20] ss:$0 sps:$4 sm:$0x11]   ;;  %1739 = vrot.lane.b32.xlu1 %v1694_v6, %s10976_s11  ;;  %v2592_v10 = vrot.slane %v10422_v3, 1  ;;  %v1277_v12 = vrot.slane %v1275_v4, 1  ;;  %v1292_v55 = vshrl.u32 %v10437_v47, 16  ;;  %v3073_v61 = vor.u32 %v3072_v41, %v3068_v40 }
  0x38   : > { %v3490_v16 = vsel %vm1688_vm10, %v3488_v51, %v3489_v7  ;;  %v2175_v19 = vshll.u32 %v10426_v9, 16  ;;  %v10428_v20 = vld [vmem:[#allocation2 + $0x14] ss:$0 sps:$4 sm:$0x11]   ;;  %v3060_v48 = vrot.slane %v3058_v43, 1  ;;  %v1282_v51 = vshll.u32 %v10433_v44, 16 }
  0x39   : > { %v2593_v22 = vsel %vm1688_vm10, %v2591_v52, %v2592_v10  ;;  %v2163_v28 = vshll.u32 %v10428_v20, 16  ;;  %v1278_v32 = vsel %vm1254_vm12, %v1273_v8, %v1277_v12  ;;  %v10432_v37 = vld [vmem:[#allocation2 + $0x20] ss:$0 sps:$4 sm:$0x11]   ;;  %v10435_v54 = vld [vmem:[#allocation2 + $0x24] sm:$0xfe]  }
  0x3a   : > { %3536 = vrot.lane.b32.xlu0 %v3490_v16, %s10980_s15  ;;  %v2177_v27 = vrot.slane %v2175_v19, 1  ;;  %v3063_v60 = vshll.u32 %v10432_v37, 16  ;;  %v10434_v46 = vld [vmem:[#allocation2 + $0x20] ss:$0 sps:$4 sm:$0x11]   ;;  %v3061_v57 = vor.u32 %v3060_v48, %v3056_v42  ;;  %v1284_v58 = vrot.slane %v1282_v51, 1 }
  0x3b   : > { %2638 = vrot.lane.b32.xlu1 %v2593_v22, %s10979_s14  ;;  %v2165_v36 = vrot.slane %v2163_v28, 1  ;;  %v1287_v52 = vshll.u32 %v10434_v46, 16  ;;  %v10430_v56 = vld [vmem:[#allocation2 + $0x2c] ss:$0 sps:$4 sm:$0x11]   ;;  %v3491_v0 = vrot.slane %v10435_v54, 1  ;;  %v552_v19 = vor.u32 %v550_v31, %v11164_v15 }
  0x3c   : > { %v2178_v38 = vsel %vm1254_vm12, %v2173_v33, %v2177_v27  ;;  %v3065_v49 = vrot.slane %v3063_v60, 1  ;;  %v10436_v59 = vld [vmem:[#allocation2 + $0x2c] ss:$0 sps:$4 sm:$0x11]   ;;  %v3075_v62 = vshll.u32 %v10430_v56, 16  ;;  %v1294_v4 = vshll.u32 %v10437_v47, 16 }
  0x3d   : > { %v2166_v45 = vsel %vm1254_vm12, %v2161_v39, %v2165_v36  ;;  %v1289_v53 = vrot.slane %v1287_v52, 1  ;;  %v3492_v2 = vrot.slane %v10436_v59, 1  ;;  %v10438_v3 = vld [vmem:[#allocation2 + $0x2c] ss:$0 sps:$4 sm:$0x11]   ;;  %v562_v5 = vrot.slane %v11167_v18, 4 }
  0x3e   : > { %1449 = vrot.lane.b32.xlu0 %v1278_v32, %s10978_s13  ;;  %v3066_v63 = vsel %vm1254_vm12, %v3061_v57, %v3065_v49  ;;  %v3077_v6 = vrot.slane %v3075_v62, 1  ;;  %v1285_v7 = vor.u32 %v1284_v58, %v1280_v50  ;;  %v10445_v8 = vld [vmem:[#allocation2 + $0x24] sm:$0xff]   ;;  %v1296_v10 = vrot.slane %v1294_v4, 1  ;;  %v10439_v13 = vld [vmem:[#allocation2 + $0x18] sm:$0xfe]   ;;  %v10528_v48 = vld [vmem:[#allocation2 + $0xc] sm:$0xff]  }
  0x3f   : > { %2349 = vrot.lane.b32.xlu1 %v2178_v38, %s10981_s16  ;;  %v3493_v9 = vsel %vm1688_vm10, %v3491_v0, %v3492_v2  ;;  %v1299_v12 = vshll.u32 %v10438_v3, 16  ;;  %v10440_v16 = vld [vmem:[#allocation2 + $0x20] ss:$0 sps:$4 sm:$0x11]   ;;  %v2180_v20 = vshrl.u32 %v10445_v8, 16  ;;  %v1695_v23 = vrot.slane %v10439_v13, 1 }
  0x40   : > { %v3078_v14 = vsel %vm1254_vm12, %v3073_v61, %v3077_v6  ;;  %v251_v22 = vld [vmem:[#allocation2 + $0x3c] sm:$0x1]  ;;  %v1290_v25 = vsel %vm1254_vm12, %v1285_v7, %v1289_v53  ;;  %v1297_v26 = vor.u32 %v1296_v10, %v1292_v55  ;;  %v1696_v27 = vrot.slane %v10440_v16, 1  ;;  %v10441_v28 = vld [vmem:[#allocation2 + $0x24] sm:$0xfe]   ;;  %s10983_s8 = smov 64  }
  0x41   : > { %v1301_v18 = vrot.slane %v1299_v12, 1  ;;  %v10442_v29 = vld [vmem:[#allocation2 + $0x2c] ss:$0 sps:$4 sm:$0x11]   ;;  %v842_v30 = vld [vmem:[#allocation2 + $0x30] sm:$0xf] }
  0x42   : > { %2347 = vrot.lane.b32.xlu0 %v2166_v45, %s10981_s16  ;;  %v1697_v32 = vsel %vm1688_vm10, %v1695_v23, %v1696_v27  ;;  %v1698_v33 = vrot.slane %v10441_v28, 1  ;;  %v1699_v34 = vrot.slane %v10442_v29, 1  ;;  %v10443_v15 = vld [vmem:[#allocation2 + $0x24] sm:$0xff]   ;;  %v843_v31 = vsel %vm11117_vm9, %v552_v19, %v842_v30  ;;  %v10446_v38 = vld [vmem:[#allocation2 + $0x2c] ss:$0 sps:$4 sm:$0x11]  }
  0x43   : > { %3249 = vrot.lane.b32.xlu1 %v3078_v14, %s10982_s17  ;;  %844 = vst [vmem:[#allocation2 + $0x30] sm:$0xf] %v843_v31  ;;  %v2182_v35 = vshll.u32 %v10445_v8, 16  ;;  %v252_v36 = vsel %vm11069_vm2, 0, %v251_v22  ;;  %v1302_v37 = vsel %vm1254_vm12, %v1297_v26, %v1301_v18  ;;  %v846_v39 = vld [vmem:[#allocation2 + $0x38] sm:$0x1] }
  0x44   : > { %253 = vst [vmem:[#allocation2 + $0x3c] sm:$0x1] %v252_v36  ;;  %v10515_v40 = vld [vmem:[#allocation2] sm:$0xff]   ;;  %v847_v42 = vsel %vm11171_vm13, %v562_v5, %v846_v39  ;;  %vm1061_vm14 = vcmask 31744   ;;  %v2187_v43 = vshll.u32 %v10446_v38, 16  ;;  %v1700_v46 = vsel %vm1688_vm10, %v1698_v33, %v1699_v34  ;;  %s10114_s6 = sshll.u32 %s11039_s22, 10 }
  0x45   : > { %v2184_v41 = vrot.slane %v2182_v35, 1  ;;  %848 = vst [vmem:[#allocation2 + $0x38] sm:$0x1] %v847_v42  ;;  %1062 = vst.msk [vmem:[#allocation4] sm:$0xff] %vm1061_vm14, %v10515_v40  ;;  %v10449_v44 = vld [vmem:[#allocation2 + $0x24] sm:$0xfe]  }
  0x46   : > { %3247 = vrot.lane.b32.xlu0 %v3066_v63, %s10982_s17  ;;  %v10450_v45 = vld [vmem:[#allocation2 + $0x2c] ss:$0 sps:$4 sm:$0x11]   ;;  %v2189_v47 = vrot.slane %v2187_v43, 1  ;;  %v2594_v49 = vrot.slane %v10449_v44, 1  ;;  %1063 = vst.msk [vmem:[#allocation4 + $0x18] sm:$0xff] %vm1061_vm14, %v10528_v48 }
  0x47   : > { %1451 = vrot.lane.b32.xlu1 %v1290_v25, %s10978_s13  ;;  %v2185_v60 = vor.u32 %v2184_v41, %v2180_v20  ;;  %v2595_v50 = vrot.slane %v10450_v45, 1  ;;  %v469_v51 = vld [vmem:[%s11093_s9 + $0x20] sm:$0xf]  ;;  %v470_v52 = vld [vmem:[%s11093_s9 + $0x24] sm:$0xf]  ;;  %vm13036_vm15 = vcmask 64544  }
  0x48   : > { %v564_v56 = vshrl.u32 %v469_v51, 16  ;;  %v567_v53 = vshll.u32 %v469_v51, 16  ;;  %v572_v61 = vshrl.u32 %v470_v52, 16  ;;  %v575_v62 = vshll.u32 %v470_v52, 16  ;;  %v307_v26 = vld [vmem:[#allocation2 + $0x44] sm:$0x1] }
  0x49   : > { %v2190_v55 = vsel %vm1254_vm12, %v2185_v60, %v2189_v47  ;;  %v2596_v2 = vsel %vm1688_vm10, %v2594_v49, %v2595_v50  ;;  %vm13037_vm0 = vcmask 97344   ;;  %vm1962_vm1 = vcmask 130144  }
  0x4a   : > { %3538 = vrot.lane.b32.xlu0 %v3493_v9, %s10980_s15  ;;  %v10444_v54 = vld [vmem:[#allocation2 + $0x30] sm:$0xff]   ;;  %v566_v59 = vrot.slane %v564_v56, 7  ;;  %v574_v9 = vrot.slane %v572_v61, 7  ;;  %vm2395_vm5 = vcmask 162944   ;;  %vm2684_vm11 = vcmask 195744  }
  0x4b   : > { %1453 = vrot.lane.b32.xlu1 %v1302_v37, %s10978_s13  ;;  %v10447_v57 = vld [vmem:[#allocation2 + $0x30] sm:$0xff]   ;;  %v849_v10 = vld [vmem:[#allocation2 + $0x3c] sm:$0xf]  ;;  %vm13035_vm3 = vcmask 228544   ;;  %vm3295_vm4 = vcmask 261344  }
  0x4c   : > { %v10451_v58 = vld [vmem:[#allocation2 + $0x30] sm:$0xfe]   ;;  %v10448_v63 = vld [vmem:[#allocation2 + $0x38] ss:$0 sps:$4 sm:$0x11]   ;;  %v2192_v0 = vshrl.u32 %v10447_v57, 16  ;;  %v569_v5 = vor.u32 %v567_v53, %v566_v59  ;;  %v577_v20 = vor.u32 %v575_v62, %v574_v9 }
  0x4d   : > { %v2194_v3 = vshll.u32 %v10447_v57, 16  ;;  %v10452_v4 = vld [vmem:[#allocation2 + $0x38] ss:$0 sps:$4 sm:$0x11]   ;;  %v2199_v6 = vshll.u32 %v10448_v63, 16  ;;  %v10453_v7 = vld [vmem:[#allocation2 + $0x30] sm:$0xff]  }
  0x4e   : > { %1741 = vrot.lane.b32.xlu0 %v1697_v32, %s10976_s11  ;;  %v570_v8 = vrot.slane %v566_v59, 4  ;;  %v2597_v13 = vrot.slane %v10451_v58, 1  ;;  %v850_v14 = vsel %vm11117_vm9, %v569_v5, %v849_v10  ;;  %v2598_v19 = vrot.slane %v10452_v4, 1  ;;  %v10455_v18 = vld [vmem:[#allocation2 + $0x30] sm:$0xff]   ;;  %v471_v10 = vld [vmem:[%s11093_s9 + $0x28] sm:$0xf] }
  0x4f   : > { %1743 = vrot.lane.b32.xlu1 %v1700_v46, %s10976_s11  ;;  %v2196_v12 = vrot.slane %v2194_v3, 1  ;;  %v2201_v16 = vrot.slane %v2199_v6, 1  ;;  %v579_v22 = vrot.slane %v574_v9, 4  ;;  %851 = vst [vmem:[#allocation2 + $0x3c] sm:$0xf] %v850_v14  ;;  %v10463_v27 = vld [vmem:[#allocation2 + $0x30] sm:$0xff]  }
  0x50   : > { %v10456_v25 = vld [vmem:[#allocation2 + $0x38] ss:$0 sps:$4 sm:$0x11]   ;;  %v578_v28 = vsel %vm11108_vm8, %v570_v8, %v577_v20  ;;  %v3080_v29 = vshrl.u32 %v10455_v18, 16  ;;  %v3082_v30 = vshll.u32 %v10455_v18, 16  ;;  %v308_v32 = vsel %vm11102_vm7, 0, %v307_v26 }
  0x51   : > { %v2197_v23 = vor.u32 %v2196_v12, %v2192_v0  ;;  %852 = vst.msk [vmem:[#allocation2 + $0x40] sm:$0xf] %vm13034_vm6, %v578_v28  ;;  %v3087_v34 = vshll.u32 %v10456_v25, 16  ;;  %309 = vst [vmem:[#allocation2 + $0x44] sm:$0x1] %v308_v32  ;;  %v2599_v37 = vsel %vm1688_vm10, %v2597_v13, %v2598_v19  ;;  %v1306_v39 = vshll.u32 %v10463_v27, 16 }
  0x52   : > { %1918 = vrot.lane.b32.xlu0 %v10443_v15, %s10975_s10  ;;  %v1304_v15 = vshrl.u32 %v10463_v27, 16  ;;  %v3084_v31 = vrot.slane %v3082_v30, 1  ;;  %v10459_v35 = vld [vmem:[#allocation2 + $0x30] sm:$0xfe]   ;;  %v254_v9 = vld [vmem:[#allocation2 + $0x48] sm:$0x1] }
  0x53   : > { %1920 = vrot.lane.b32.xlu1 %v10444_v54, %s10975_s10  ;;  %v2202_v33 = vsel %vm1254_vm12, %v2197_v23, %v2201_v16  ;;  %v10460_v36 = vld [vmem:[#allocation2 + $0x38] ss:$0 sps:$4 sm:$0x11]   ;;  %v3089_v38 = vrot.slane %v3087_v34, 1  ;;  %v3494_v41 = vrot.slane %v10459_v35, 1  ;;  %v1308_v44 = vrot.slane %v1306_v39, 1 }
  0x54   : > { %v3085_v40 = vor.u32 %v3084_v31, %v3080_v29  ;;  %v3495_v42 = vrot.slane %v10460_v36, 1  ;;  %v10464_v60 = vld [vmem:[#allocation2 + $0x38] ss:$0 sps:$4 sm:$0x11]   ;;  %v10467_v45 = vld [vmem:[#allocation2 + $0x30] sm:$0xfe]  }
  0x55   : > { %v1309_v49 = vor.u32 %v1308_v44, %v1304_v15  ;;  %v1311_v50 = vshll.u32 %v10464_v60, 16  ;;  %v10468_v53 = vld [vmem:[#allocation2 + $0x38] ss:$0 sps:$4 sm:$0x11]   ;;  %v1701_v59 = vrot.slane %v10467_v45, 1  ;;  %v255_v14 = vsel %vm11069_vm2, 0, %v254_v9 }
  0x56   : > { %2351 = vrot.lane.b32.xlu0 %v2190_v55, %s10981_s16  ;;  %v3090_v43 = vsel %vm1254_vm12, %v3085_v40, %v3089_v38  ;;  %v3496_v48 = vsel %vm1688_vm10, %v3494_v41, %v3495_v42  ;;  %v1702_v4 = vrot.slane %v10468_v53, 1  ;;  %v472_v16 = vld [vmem:[%s11093_s9 + $0x2c] sm:$0xf]  ;;  %v581_v19 = vshrl.u32 %v471_v10, 16  ;;  %256 = vst [vmem:[#allocation2 + $0x48] sm:$0x1] %v255_v14 }
  0x57   : > { %2353 = vrot.lane.b32.xlu1 %v2202_v33, %s10981_s16  ;;  %v1313_v55 = vrot.slane %v1311_v50, 1  ;;  %v584_v20 = vshll.u32 %v471_v10, 16  ;;  %v589_v25 = vshrl.u32 %v472_v16, 16  ;;  %v592_v38 = vshll.u32 %v472_v16, 16  ;;  %v310_v45 = vld [vmem:[#allocation2 + $0x50] sm:$0x1] }
  0x58   : > { %v10454_v46 = vld [vmem:[#allocation2 + $0x3c] sm:$0xff]   ;;  %v853_v47 = vld [vmem:[#allocation2 + $0x44] sm:$0x1]  ;;  %v1703_v13 = vsel %vm1688_vm10, %v1701_v59, %v1702_v4  ;;  %v583_v27 = vrot.slane %v581_v19, 7  ;;  %v257_v53 = vld [vmem:[#allocation2 + $0x54] sm:$0x1] }
  0x59   : > { %v854_v51 = vsel %vm11171_vm13, %v579_v22, %v853_v47  ;;  %v10457_v52 = vld [vmem:[#allocation2 + $0x3c] sm:$0xff]   ;;  %v1314_v62 = vsel %vm1254_vm12, %v1309_v49, %v1313_v55  ;;  %v11277_v35 = vrot.slane %v589_v25, 7  ;;  %v473_v59 = vld [vmem:[%s11093_s9 + $0x30] sm:$0xf]  ;;  %v10541_v10 = vld [vmem:[%s13027_s1 + $0x8] sm:$0xff]  }
  0x5a   : > { %2640 = vrot.lane.b32.xlu0 %v2596_v2, %s10979_s14  ;;  %855 = vst [vmem:[#allocation2 + $0x44] sm:$0x1] %v854_v51  ;;  %v10461_v54 = vld [vmem:[#allocation2 + $0x3c] sm:$0xfe]   ;;  %v3092_v57 = vshrl.u32 %v10457_v52, 16  ;;  %v3094_v58 = vshll.u32 %v10457_v52, 16  ;;  %v586_v31 = vor.u32 %v584_v20, %v583_v27 }
  0x5b   : > { %2642 = vrot.lane.b32.xlu1 %v2599_v37, %s10979_s14  ;;  %v10465_v56 = vld [vmem:[#allocation2 + $0x3c] sm:$0xff]   ;;  %v3497_v61 = vrot.slane %v10461_v54, 1  ;;  %v587_v37 = vrot.slane %v583_v27, 4  ;;  %v594_v60 = vor.u32 %v592_v38, %v11277_v35  ;;  %v311_v52 = vsel %vm11102_vm7, 0, %v310_v45  ;;  %v11308_v16 = vld [vmem:[%s11093_s9 + $0x38] sm:$0xf] }
  0x5c   : > { %v1316_v63 = vshrl.u32 %v10465_v56, 16  ;;  %v1318_v0 = vshll.u32 %v10465_v56, 16  ;;  %v10473_v2 = vld [vmem:[#allocation2 + $0x3c] sm:$0xff]   ;;  %v3096_v3 = vrot.slane %v3094_v58, 1  ;;  %312 = vst [vmem:[#allocation2 + $0x50] sm:$0x1] %v311_v52 }
  0x5d   : > { %v11262_v5 = vld [vmem:[#allocation2 + $0x3c] sm:$0xfe]   ;;  %v2206_v12 = vshll.u32 %v10473_v2, 16  ;;  %v856_v44 = vld [vmem:[#allocation2 + $0x48] sm:$0xf]  ;;  %v595_v51 = vsel %vm11108_vm8, %v587_v37, %v594_v60  ;;  %v601_v4 = vshll.u32 %v473_v59, 16 }
  0x5e   : > { %2818 = vrot.lane.b32.xlu0 %v10453_v7, %s10977_s12  ;;  %v1320_v6 = vrot.slane %v1318_v0, 1  ;;  %v2204_v7 = vshrl.u32 %v10473_v2, 16  ;;  %v1704_v8 = vrot.slane %v11262_v5, 1  ;;  %v10535_v22 = vld [vmem:[%s13027_s1] sm:$0xff]   ;;  %v3097_v28 = vor.u32 %v3096_v3, %v3092_v57  ;;  %v10536_v50 = vld [vmem:[#allocation2 + $0x18] sm:$0xff]  }
  0x5f   : > { %2820 = vrot.lane.b32.xlu1 %v10454_v46, %s10977_s12  ;;  %v10471_v23 = vld [vmem:[#allocation2 + $0x3c] sm:$0xff]   ;;  %10264 = vmatprep.subr.bf16.mxu0 %v10535_v22  ;;  %v857_v47 = vsel %vm11117_vm9, %v586_v31, %v856_v44  ;;  %v596_v57 = vrot.slane %v11277_v35, 4  ;;  %859 = vst.msk [vmem:[#allocation2 + $0x4c] sm:$0xf] %vm13034_vm6, %v595_v51  ;;  %v474_v0 = vld [vmem:[%s11093_s9 + $0x34] sm:$0xf] }
  0x60   : > { %10265 = vmatpush3.bf16.msra.mxu0 %v10535_v22  ;;  %v1321_v36 = vor.u32 %v1320_v6, %v1316_v63  ;;  %858 = vst [vmem:[#allocation2 + $0x48] sm:$0xf] %v857_v47  ;;  %v10477_v54 = vld [vmem:[#allocation2 + $0x3c] sm:$0xfe]   ;;  %1064 = vst.msk [vmem:[#allocation4 + $0x30] sm:$0xff] %vm1061_vm14, %v10536_v50  ;;  %v258_v63 = vsel %vm11069_vm2, 0, %v257_v53 }
  0x61   : > { %v10458_v18 = vld [vmem:[#allocation2 + $0x44] ss:$0 sps:$4 sm:$0x11]   ;;  %v598_v2 = vshrl.u32 %v473_v59, 16  ;;  %259 = vst [vmem:[#allocation2 + $0x54] sm:$0x1] %v258_v63  ;;  %10266 = vmatprep.subr.bf16.mxu0 %v10541_v10 }
  0x62   : > { %3251 = vrot.lane.b32.xlu0 %v3090_v43, %s10982_s17  ;;  %v10462_v26 = vld [vmem:[#allocation2 + $0x44] ss:$0 sps:$4 sm:$0x11]   ;;  %v3099_v29 = vshll.u32 %v10458_v18, 16  ;;  %v2208_v43 = vrot.slane %v2206_v12, 1  ;;  %v606_v6 = vshrl.u32 %v474_v0, 16 }
  0x63   : > { %v10466_v30 = vld [vmem:[#allocation2 + $0x44] ss:$0 sps:$4 sm:$0x11]   ;;  %v3498_v32 = vrot.slane %v10462_v26, 1  ;;  %v313_v9 = vld [vmem:[#allocation2 + $0x5c] sm:$0x1] }
  0x64   : > { %v11275_v33 = vld [vmem:[#allocation2 + $0x44] ss:$0 sps:$4 sm:$0x11]   ;;  %v3101_v34 = vrot.slane %v3099_v29, 1  ;;  %v1323_v15 = vshll.u32 %v10466_v30, 16  ;;  %v600_v12 = vrot.slane %v598_v2, 7  ;;  %10267 = vmatpush3.bf16.msra.mxu0 %v10541_v10 }
  0x65   : > { %v1705_v41 = vrot.slane %v11275_v33, 1  ;;  %v10474_v42 = vld [vmem:[#allocation2 + $0x44] ss:$0 sps:$4 sm:$0x11]   ;;  %v3499_v46 = vsel %vm1688_vm10, %v3497_v61, %v3498_v32  ;;  %v2600_v61 = vrot.slane %v10477_v54, 1  ;;  %v608_v20 = vrot.slane %v606_v6, 7 }
  0x66   : > { %3540 = vrot.lane.b32.xlu0 %v3496_v48, %s10980_s15  ;;  %v3102_v39 = vsel %vm1254_vm12, %v3097_v28, %v3101_v34  ;;  %v1325_v40 = vrot.slane %v1323_v15, 1  ;;  %v2209_v48 = vor.u32 %v2208_v43, %v2204_v7  ;;  %v2211_v49 = vshll.u32 %v10474_v42, 16  ;;  %v10478_v55 = vld [vmem:[#allocation2 + $0x44] ss:$0 sps:$4 sm:$0x11]  }
  0x67   : > { %3253 = vrot.lane.b32.xlu1 %v3102_v39, %s10982_s17  ;;  %v609_v7 = vshll.u32 %v474_v0, 16  ;;  %v260_v14 = vld [vmem:[#allocation2 + $0x60] sm:$0x1]  ;;  %v615_v18 = vshrl.u32 %v11308_v16, 16  ;;  %v476_v25 = vld [vmem:[%s11093_s9 + $0x3c] sm:$0xf]  ;;  %v1706_v28 = vsel %vm1688_vm10, %v1704_v8, %v1705_v41  ;;  %v603_v33 = vor.u32 %v601_v4, %v600_v12 }
  0x68   : > { %v1326_v56 = vsel %vm1254_vm12, %v1321_v36, %v1325_v40  ;;  %v2213_v58 = vrot.slane %v2211_v49, 1  ;;  %v261_v22 = vsel %vm11069_vm2, 0, %v260_v14  ;;  %v618_v26 = vshll.u32 %v11308_v16, 16  ;;  %v10542_v27 = vld [vmem:[#allocation2 + $0x24] sm:$0xff]   ;;  %v860_v32 = vld [vmem:[#allocation2 + $0x50] sm:$0x1] }
  0x69   : > { %262 = vst [vmem:[#allocation2 + $0x60] sm:$0x1] %v261_v22  ;;  %v611_v29 = vor.u32 %v609_v7, %v608_v20  ;;  %v10472_v30 = vld [vmem:[#allocation2 + $0x48] sm:$0xff]   ;;  %v613_v34 = vrot.slane %v608_v20, 4  ;;  %1065 = vst.msk [vmem:[#allocation4 + $0x48] sm:$0xff] %vm1061_vm14, %v10542_v27  ;;  %v861_v15 = vsel %vm11171_vm13, %v596_v57, %v860_v32  ;;  %v11326_v36 = vrot.slane %v615_v18, 7 }
  0x6a   : > { %1455 = vrot.lane.b32.xlu0 %v1314_v62, %s10978_s13  ;;  %v2601_v62 = vrot.slane %v10478_v55, 1  ;;  %v2214_v3 = vsel %vm1254_vm12, %v2209_v48, %v2213_v58  ;;  %v10475_v31 = vld [vmem:[#allocation2 + $0x48] sm:$0xff]   ;;  %862 = vst [vmem:[#allocation2 + $0x50] sm:$0x1] %v861_v15  ;;  %v863_v38 = vld [vmem:[#allocation2 + $0x54] sm:$0xf] }
  0x6b   : > { %3542 = vrot.lane.b32.xlu1 %v3499_v46, %s10980_s15  ;;  %v10479_v5 = vld [vmem:[#allocation2 + $0x48] sm:$0xfe]   ;;  %v2218_v8 = vshll.u32 %v10475_v31, 16  ;;  %v623_v40 = vshrl.u32 %v476_v25, 16  ;;  %v864_v41 = vsel %vm11117_vm9, %v603_v33, %v863_v38  ;;  %v626_v43 = vshll.u32 %v476_v25, 16 }
  0x6c   : > { %v2602_v19 = vsel %vm1688_vm10, %v2600_v61, %v2601_v62  ;;  %v10481_v37 = vld [vmem:[#allocation2 + $0x48] sm:$0xff]   ;;  %v2216_v60 = vshrl.u32 %v10475_v31, 16  ;;  %v2603_v45 = vrot.slane %v10479_v5, 1  ;;  %865 = vst [vmem:[#allocation2 + $0x54] sm:$0xf] %v864_v41  ;;  %v621_v50 = vrot.slane %v11326_v36, 4 }
  0x6d   : > { %v10483_v39 = vld [vmem:[#allocation2 + $0x48] sm:$0xff]   ;;  %v2220_v44 = vrot.slane %v2218_v8, 1 }
  0x6e   : > { %1745 = vrot.lane.b32.xlu0 %v1703_v13, %s10976_s11  ;;  %v314_v13 = vsel %vm11102_vm7, 0, %v313_v9  ;;  %v10491_v42 = vld [vmem:[#allocation2 + $0x48] sm:$0xff]   ;;  %v3106_v46 = vshll.u32 %v10483_v39, 16  ;;  %v3104_v48 = vshrl.u32 %v10483_v39, 16 }
  0x6f   : > { %315 = vst [vmem:[#allocation2 + $0x5c] sm:$0x1] %v314_v13  ;;  %1457 = vrot.lane.b32.xlu1 %v1326_v56, %s10978_s13  ;;  %v10487_v51 = vld [vmem:[#allocation2 + $0x48] sm:$0xfe]   ;;  %v1330_v54 = vshll.u32 %v10491_v42, 16  ;;  %v11337_v56 = vrot.slane %v623_v40, 7  ;;  %v2221_v53 = vor.u32 %v2220_v44, %v2216_v60 }
  0x70   : > { %v3108_v52 = vrot.slane %v3106_v46, 1  ;;  %v1328_v58 = vshrl.u32 %v10491_v42, 16  ;;  %v3500_v61 = vrot.slane %v10487_v51, 1  ;;  %v316_v42 = vld [vmem:[#allocation2 + $0x68] sm:$0x1] }
  0x71   : > { %v10476_v55 = vld [vmem:[#allocation2 + $0x50] ss:$0 sps:$4 sm:$0x11]   ;;  %v628_v62 = vor.u32 %v626_v43, %v11337_v56  ;;  %v1332_v0 = vrot.slane %v1330_v54, 1  ;;  %v10495_v44 = vld [vmem:[#allocation2 + $0x48] sm:$0xfe]  }
  0x72   : > { %1922 = vrot.lane.b32.xlu0 %v10471_v23, %s10975_s10  ;;  %v604_v23 = vrot.slane %v600_v12, 4  ;;  %v10480_v57 = vld [vmem:[#allocation2 + $0x50] ss:$0 sps:$4 sm:$0x11]   ;;  %v2223_v59 = vshll.u32 %v10476_v55, 16  ;;  %v3109_v10 = vor.u32 %v3108_v52, %v3104_v48  ;;  %v1707_v52 = vrot.slane %v10495_v44, 1 }
  0x73   : > { %1747 = vrot.lane.b32.xlu1 %v1706_v28, %s10976_s11  ;;  %v2604_v63 = vrot.slane %v10480_v57, 1  ;;  %v629_v4 = vsel %vm11108_vm8, %v621_v50, %v628_v62  ;;  %v10488_v13 = vld [vmem:[#allocation2 + $0x50] ss:$0 sps:$4 sm:$0x11]   ;;  %v1333_v5 = vor.u32 %v1332_v0, %v1328_v58  ;;  %v317_v16 = vsel %vm11102_vm7, 0, %v316_v42 }
  0x74   : > { %v612_v35 = vsel %vm11108_vm8, %v604_v23, %v611_v29  ;;  %v2225_v2 = vrot.slane %v2223_v59, 1  ;;  %873 = vst.msk [vmem:[#allocation2 + $0x64] sm:$0xf] %vm13034_vm6, %v629_v4  ;;  %v3501_v25 = vrot.slane %v10488_v13, 1  ;;  %v630_v29 = vrot.slane %v11337_v56, 4 }
  0x75   : > { %866 = vst.msk [vmem:[#allocation2 + $0x58] sm:$0xf] %vm13034_vm6, %v612_v35  ;;  %v2605_v18 = vsel %vm1688_vm10, %v2603_v45, %v2604_v63  ;;  %v10492_v33 = vld [vmem:[#allocation2 + $0x50] ss:$0 sps:$4 sm:$0x11]  }
  0x76   : > { %2355 = vrot.lane.b32.xlu0 %v2214_v3, %s10981_s16  ;;  %v867_v47 = vld [vmem:[#allocation2 + $0x5c] sm:$0x1]  ;;  %v10484_v3 = vld [vmem:[#allocation2 + $0x50] ss:$0 sps:$4 sm:$0x11]   ;;  %v2226_v9 = vsel %vm1254_vm12, %v2221_v53, %v2225_v2  ;;  %v3502_v35 = vsel %vm1688_vm10, %v3500_v61, %v3501_v25 }
  0x77   : > { %1924 = vrot.lane.b32.xlu1 %v10472_v30, %s10975_s10  ;;  %v868_v49 = vsel %vm11171_vm13, %v613_v34, %v867_v47  ;;  %v3111_v12 = vshll.u32 %v10484_v3, 16  ;;  %v10496_v46 = vld [vmem:[#allocation2 + $0x50] ss:$0 sps:$4 sm:$0x11]   ;;  %v620_v47 = vor.u32 %v618_v26, %v11326_v36  ;;  %v870_v36 = vld [vmem:[#allocation2 + $0x60] sm:$0xf] }
  0x78   : > { %869 = vst [vmem:[#allocation2 + $0x5c] sm:$0x1] %v868_v49  ;;  %v1708_v55 = vrot.slane %v10496_v46, 1  ;;  %318 = vst [vmem:[#allocation2 + $0x68] sm:$0x1] %v317_v16 }
  0x79   : > { %v3113_v23 = vrot.slane %v3111_v12, 1  ;;  %v871_v4 = vsel %vm11117_vm9, %v620_v47, %v870_v36 }
  0x7a   : > { %2644 = vrot.lane.b32.xlu0 %v2602_v19, %s10979_s14  ;;  %v1709_v3 = vsel %vm1688_vm10, %v1707_v52, %v1708_v55  ;;  %872 = vst [vmem:[#allocation2 + $0x60] sm:$0xf] %v871_v4 }
  0x7b   : > { %2357 = vrot.lane.b32.xlu1 %v2226_v9, %s10981_s16  ;;  %v3114_v30 = vsel %vm1254_vm12, %v3109_v10, %v3113_v23 }
  0x7c   : > { %v10485_v6 = vld [vmem:[#allocation2 + $0x54] sm:$0xff]  }
  0x7d   : > { %v3116_v14 = vshrl.u32 %v10485_v6, 16  ;;  %v3118_v19 = vshll.u32 %v10485_v6, 16  ;;  %v10493_v22 = vld [vmem:[#allocation2 + $0x54] sm:$0xff]  }
  0x7e   : > { %2822 = vrot.lane.b32.xlu0 %v10481_v37, %s10977_s12  ;;  %v10489_v28 = vld [vmem:[#allocation2 + $0x54] sm:$0xfe]   ;;  %v1335_v37 = vshll.u32 %v10492_v33, 16  ;;  %v1340_v38 = vshrl.u32 %v10493_v22, 16  ;;  %v1342_v39 = vshll.u32 %v10493_v22, 16 }
  0x7f   : > { %v10486_v7 = vld [vmem:[#allocation2 + $0x5c] ss:$0 sps:$4 sm:$0x11]   ;;  %v3120_v27 = vrot.slane %v3118_v19, 1  ;;  %2646 = vrot.lane.b32.xlu1 %v2605_v18, %s10979_s14  ;;  %v10482_v34 = vld [vmem:[#allocation2 + $0x54] sm:$0xff]   ;;  %v3503_v8 = vrot.slane %v10489_v28, 1 }
  0x80   : > { %v3123_v20 = vshll.u32 %v10486_v7, 16  ;;  %v10490_v32 = vld [vmem:[#allocation2 + $0x5c] ss:$0 sps:$4 sm:$0x11]   ;;  %v10501_v41 = vld [vmem:[#allocation2 + $0x54] sm:$0xff]   ;;  %v1337_v60 = vrot.slane %v1335_v37, 1 }
  0x81   : > { %v3121_v15 = vor.u32 %v3120_v27, %v3116_v14  ;;  %v10494_v40 = vld [vmem:[#allocation2 + $0x5c] ss:$0 sps:$4 sm:$0x11]   ;;  %v3504_v43 = vrot.slane %v10490_v32, 1  ;;  %v1344_v51 = vrot.slane %v1342_v39, 1  ;;  %v2228_v58 = vshrl.u32 %v10501_v41, 16 }
  0x82   : > { %3255 = vrot.lane.b32.xlu0 %v3114_v30, %s10982_s17  ;;  %v3125_v31 = vrot.slane %v3123_v20, 1  ;;  %v1347_v45 = vshll.u32 %v10494_v40, 16  ;;  %v1338_v50 = vsel %vm1254_vm12, %v1333_v5, %v1337_v60  ;;  %v10497_v54 = vld [vmem:[#allocation2 + $0x54] sm:$0xfe]   ;;  %v2230_v53 = vshll.u32 %v10501_v41, 16  ;;  %v10503_v56 = vld [vmem:[#allocation2 + $0x60] sm:$0xff]  }
  0x83   : > { %2824 = vrot.lane.b32.xlu1 %v10482_v34, %s10977_s12  ;;  %v10498_v57 = vld [vmem:[#allocation2 + $0x5c] ss:$0 sps:$4 sm:$0x11]   ;;  %v1710_v26 = vrot.slane %v10497_v54, 1  ;;  %v3505_v0 = vsel %vm1688_vm10, %v3503_v8, %v3504_v43  ;;  %v1345_v2 = vor.u32 %v1344_v51, %v1340_v38  ;;  %v10499_v7 = vld [vmem:[#allocation2 + $0x54] sm:$0xff]   ;;  %v10511_v44 = vld [vmem:[#allocation2 + $0x60] sm:$0xff]  }
  0x84   : > { %v3126_v49 = vsel %vm1254_vm12, %v3121_v15, %v3125_v31  ;;  %v1349_v61 = vrot.slane %v1347_v45, 1  ;;  %v2232_v62 = vrot.slane %v2230_v53, 1  ;;  %v1711_v6 = vrot.slane %v10498_v57, 1  ;;  %v10502_v9 = vld [vmem:[#allocation2 + $0x5c] ss:$0 sps:$4 sm:$0x11]  }
  0x85   : > { %v2235_v12 = vshll.u32 %v10502_v9, 16  ;;  %v10505_v13 = vld [vmem:[#allocation2 + $0x54] sm:$0xfe]   ;;  %v10506_v14 = vld [vmem:[#allocation2 + $0x5c] ss:$0 sps:$4 sm:$0x11]  }
  0x86   : > { %3544 = vrot.lane.b32.xlu0 %v3502_v35, %s10980_s15  ;;  %v1350_v19 = vsel %vm1254_vm12, %v1345_v2, %v1349_v61  ;;  %v2233_v20 = vor.u32 %v2232_v62, %v2228_v58  ;;  %v263_v22 = vld [vmem:[#allocation2 + $0x6c] sm:$0x1]  ;;  %v2606_v23 = vrot.slane %v10505_v13, 1  ;;  %v2607_v25 = vrot.slane %v10506_v14, 1  ;;  %v477_v28 = vld [vmem:[%s11093_s9 + $0x40] sm:$0xf] }
  0x87   : > { %3257 = vrot.lane.b32.xlu1 %v3126_v49, %s10982_s17  ;;  %v2237_v18 = vrot.slane %v2235_v12, 1  ;;  %v264_v27 = vsel %vm11069_vm2, 0, %v263_v22  ;;  %v874_v32 = vld [vmem:[#allocation2 + $0x68] sm:$0x1]  ;;  %v478_v33 = vld [vmem:[%s11093_s9 + $0x44] sm:$0xf]  ;;  %v1712_v38 = vsel %vm1688_vm10, %v1710_v26, %v1711_v6 }
  0x88   : > { %265 = vst [vmem:[#allocation2 + $0x6c] sm:$0x1] %v264_v27  ;;  %v632_v34 = vshrl.u32 %v477_v28, 16  ;;  %v635_v15 = vshll.u32 %v477_v28, 16  ;;  %v875_v31 = vsel %vm11171_vm13, %v630_v29, %v874_v32  ;;  %v640_v35 = vshrl.u32 %v478_v33, 16  ;;  %v10572_v37 = vld [vmem:[#allocation2 + $0x30] sm:$0xff]  }
  0x89   : > { %v319_v5 = vld [vmem:[#allocation2 + $0x74] sm:$0x1]  ;;  %v2238_v39 = vsel %vm1254_vm12, %v2233_v20, %v2237_v18  ;;  %876 = vst [vmem:[#allocation2 + $0x68] sm:$0x1] %v875_v31  ;;  %v11393_v41 = vld [vmem:[#allocation2 + $0x60] sm:$0xfe]   ;;  %v2608_v47 = vsel %vm1688_vm10, %v2606_v23, %v2607_v25 }
  0x8a   : > { %1459 = vrot.lane.b32.xlu0 %v1338_v50, %s10978_s13  ;;  %v634_v40 = vrot.slane %v632_v34, 7  ;;  %v642_v29 = vrot.slane %v640_v35, 7  ;;  %1066 = vst.msk [vmem:[#allocation4 + $0x60] sm:$0xff] %vm1061_vm14, %v10572_v37  ;;  %v643_v60 = vshll.u32 %v478_v33, 16  ;;  %v10500_v45 = vld [vmem:[#allocation2 + $0x60] sm:$0xff]   ;;  %v2242_v46 = vshll.u32 %v10503_v56, 16 }
  0x8b   : > { %3546 = vrot.lane.b32.xlu1 %v3505_v0, %s10980_s15  ;;  %v2240_v49 = vshrl.u32 %v10503_v56, 16  ;;  %v3130_v50 = vshll.u32 %v10511_v44, 16  ;;  %v320_v51 = vsel %vm11102_vm7, 0, %v319_v5  ;;  %v2609_v55 = vrot.slane %v11393_v41, 1  ;;  %v10509_v57 = vld [vmem:[#allocation2 + $0x60] sm:$0xff]  }
  0x8c   : > { %v637_v42 = vor.u32 %v635_v15, %v634_v40  ;;  %v638_v43 = vrot.slane %v634_v40, 4  ;;  %v2244_v54 = vrot.slane %v2242_v46, 1  ;;  %321 = vst [vmem:[#allocation2 + $0x74] sm:$0x1] %v320_v51  ;;  %v3128_v16 = vshrl.u32 %v10511_v44, 16  ;;  %v10520_v26 = vld [vmem:[#allocation2 + $0x60] sm:$0xff]  }
  0x8d   : > { %v3132_v62 = vrot.slane %v3130_v50, 1  ;;  %v647_v2 = vrot.slane %v642_v29, 4  ;;  %v10516_v12 = vld [vmem:[#allocation2 + $0x60] sm:$0xfe]   ;;  %v1354_v13 = vshll.u32 %v10520_v26, 16  ;;  %v1352_v27 = vshrl.u32 %v10520_v26, 16 }
  0x8e   : > { %1749 = vrot.lane.b32.xlu0 %v1709_v3, %s10976_s11  ;;  %v2245_v4 = vor.u32 %v2244_v54, %v2240_v49  ;;  %v3506_v25 = vrot.slane %v10516_v12, 1  ;;  %v10524_v49 = vld [vmem:[#allocation2 + $0x60] sm:$0xfe]  }
  0x8f   : > { %1461 = vrot.lane.b32.xlu1 %v1350_v19, %s10978_s13  ;;  %v877_v58 = vld [vmem:[#allocation2 + $0x6c] sm:$0xf]  ;;  %v3133_v20 = vor.u32 %v3132_v62, %v3128_v16  ;;  %v1356_v15 = vrot.slane %v1354_v13, 1 }
  0x90   : > { %v878_v61 = vsel %vm11117_vm9, %v637_v42, %v877_v58  ;;  %v10504_v36 = vld [vmem:[#allocation2 + $0x68] ss:$0 sps:$4 sm:$0x11]  }
  0x91   : > { %879 = vst [vmem:[#allocation2 + $0x6c] sm:$0xf] %v878_v61  ;;  %v10508_v0 = vld [vmem:[#allocation2 + $0x68] ss:$0 sps:$4 sm:$0x11]   ;;  %v2247_v6 = vshll.u32 %v10504_v36, 16 }
  0x92   : > { %1926 = vrot.lane.b32.xlu0 %v10499_v7, %s10975_s10  ;;  %v10512_v7 = vld [vmem:[#allocation2 + $0x68] ss:$0 sps:$4 sm:$0x11]   ;;  %v2610_v19 = vrot.slane %v10508_v0, 1  ;;  %v1713_v61 = vrot.slane %v10524_v49, 1 }
  0x93   : > { %1751 = vrot.lane.b32.xlu1 %v1712_v38, %s10976_s11  ;;  %v2249_v14 = vrot.slane %v2247_v6, 1  ;;  %v3135_v22 = vshll.u32 %v10512_v7, 16  ;;  %v10517_v18 = vld [vmem:[#allocation2 + $0x68] ss:$0 sps:$4 sm:$0x11]  }
  0x94   : > { %v881_v23 = vld [vmem:[#allocation2 + $0x74] sm:$0x1]  ;;  %v3507_v34 = vrot.slane %v10517_v18, 1  ;;  %v2611_v31 = vsel %vm1688_vm10, %v2609_v55, %v2610_v19 }
  0x95   : > { %v3137_v32 = vrot.slane %v3135_v22, 1  ;;  %v882_v33 = vsel %vm11171_vm13, %v647_v2, %v881_v23  ;;  %v266_v23 = vld [vmem:[#allocation2 + $0x78] sm:$0x1] }
  0x96   : > { %2359 = vrot.lane.b32.xlu0 %v2238_v39, %s10981_s16  ;;  %883 = vst [vmem:[#allocation2 + $0x74] sm:$0x1] %v882_v33  ;;  %v3508_v41 = vsel %vm1688_vm10, %v3506_v25, %v3507_v34 }
  0x97   : > { %1928 = vrot.lane.b32.xlu1 %v10500_v45, %s10975_s10  ;;  %v3138_v35 = vsel %vm1254_vm12, %v3133_v20, %v3137_v32  ;;  %v480_v32 = vld [vmem:[%s11093_s9 + $0x4c] sm:$0xf] }
  0x9a   : > { %2648 = vrot.lane.b32.xlu0 %v2608_v47, %s10979_s14 }
  0x9b   : > { %v11356_v48 = vpop.permute.xlu0 %1914 }
  0x9c   : > { %v1738_v59 = vpop.permute.xlu1 %1737 }
  0x9d   : > { %v10514_v50 = vld [vmem:[#allocation2 + $0x74] ss:$0 sps:$4 sm:$0x11]  }
  0x9e   : > { %2826 = vrot.lane.b32.xlu0 %v10509_v57, %s10977_s12  ;;  %v3147_v55 = vshll.u32 %v10514_v50, 16 }
  0x9f   : > { %v11364_v63 = vpop.permute.xlu0 %2814 }
  0xa0   : > { %v11370_v10 = vpop.permute.xlu1 %1916  ;;  %v3149_v36 = vrot.slane %v3147_v55, 1 }
  0xa2   : > { %3259 = vrot.lane.b32.xlu0 %v3138_v35, %s10982_s17  ;;  %v10573_v35 = vld [vmem:[#allocation2 + $0x3c] sm:$0xff]  }
  0xa3   : > { %v1448_v30 = vpop.permute.xlu0 %1447  ;;  %1067 = vst.msk [vmem:[#allocation4 + $0x78] sm:$0xff] %vm1061_vm14, %v10573_v35 }
  0xa4   : > { %1496 = vst.msk [vmem:[#allocation4] sm:$0xff] %vm13036_vm15, %v1448_v30  ;;  %v11387_v8 = vpop.permute.xlu1 %2816  ;;  %v2250_v30 = vsel %vm1254_vm12, %v2245_v4, %v2249_v14  ;;  %v10527_v4 = vld [vmem:[#allocation2 + $0x74] ss:$0 sps:$4 sm:$0x11]  }
  0xa5   : > { %1786 = vst.msk [vmem:[#allocation4] sm:$0xff] %vm13037_vm0, %v1738_v59  ;;  %2361 = vrot.lane.b32.xlu1 %v2250_v30, %s10981_s16  ;;  %v479_v30 = vld [vmem:[%s11093_s9 + $0x48] sm:$0xf] }
  0xa6   : > { %1963 = vst.msk [vmem:[#allocation4] sm:$0xff] %vm1962_vm1, %v11356_v48  ;;  %v645_v48 = vor.u32 %v643_v60, %v642_v29  ;;  %v10521_v29 = vld [vmem:[#allocation2 + $0x68] ss:$0 sps:$4 sm:$0x11]   ;;  %v1357_v60 = vor.u32 %v1356_v15, %v1352_v27  ;;  %3548 = vrot.lane.b32.xlu0 %v3508_v41, %s10980_s15  ;;  %v1717_v27 = vrot.slane %v10527_v4, 1  ;;  %v649_v33 = vshrl.u32 %v479_v30, 16 }
  0xa7   : > { %v1359_v45 = vshll.u32 %v10521_v29, 16  ;;  %v652_v34 = vshll.u32 %v479_v30, 16  ;;  %v657_v15 = vshrl.u32 %v480_v32, 16  ;;  %v10532_v41 = vld [vmem:[#allocation2 + $0x74] ss:$0 sps:$4 sm:$0x11]  }
  0xa8   : > { %v11401_v52 = vpop.permute.xlu0 %2636  ;;  %v646_v59 = vsel %vm11108_vm8, %v638_v43, %v645_v48  ;;  %v10602_v29 = vld [vmem:[#allocation2 + $0x48] sm:$0xff]  }
  0xa9   : > { %v1740_v53 = vpop.permute.xlu1 %1739  ;;  %880 = vst.msk [vmem:[#allocation2 + $0x70] sm:$0xf] %vm13034_vm6, %v646_v59  ;;  %vm3584_vm6 = vcmask 294144   ;;  %2650 = vrot.lane.b32.xlu1 %v2611_v31, %s10979_s14  ;;  %v1361_v51 = vrot.slane %v1359_v45, 1 }
  0xaa   : > { %v10525_v59 = vld [vmem:[#allocation2 + $0x68] ss:$0 sps:$4 sm:$0x11]   ;;  %1068 = vst.msk [vmem:[#allocation4 + $0x90] sm:$0xff] %vm1061_vm14, %v10602_v29 }
  0xab   : > { %v1362_v57 = vsel %vm1254_vm12, %v1357_v60, %v1361_v51  ;;  %v1714_v0 = vrot.slane %v10525_v59, 1 }
  0xac   : > { %v11411_v3 = vpop.permute.xlu0 %3536  ;;  %1463 = vrot.lane.b32.xlu0 %v1362_v57, %s10978_s13 }
  0xad   : > { %v2639_v9 = vpop.permute.xlu1 %2638  ;;  %v1715_v13 = vsel %vm1688_vm10, %v1713_v61, %v1714_v0  ;;  %v269_v61 = vld [vmem:[#allocation2 + $0x84] sm:$0x1]  ;;  %v482_v0 = vld [vmem:[%s11093_s9 + $0x54] sm:$0xf] }
  0xb0   : > { %v1450_v28 = vpop.permute.xlu0 %1449  ;;  %v10513_v5 = vld [vmem:[#allocation2 + $0x6c] sm:$0xff]   ;;  %1753 = vrot.lane.b32.xlu0 %v1715_v13, %s10976_s11 }
  0xb1   : > { %1497 = vst.msk [vmem:[#allocation4 + $0x18] sm:$0xff] %vm13036_vm15, %v1450_v28  ;;  %v2350_v37 = vpop.permute.xlu1 %2349  ;;  %v10518_v38 = vld [vmem:[#allocation2 + $0x6c] sm:$0xfe]   ;;  %v3142_v56 = vshll.u32 %v10513_v5, 16  ;;  %v267_v28 = vsel %vm11069_vm2, 0, %v266_v23 }
  0xb2   : > { %1787 = vst.msk [vmem:[#allocation4 + $0x18] sm:$0xff] %vm13037_vm0, %v1740_v53  ;;  %v10510_v40 = vld [vmem:[#allocation2 + $0x6c] sm:$0xff]   ;;  %v3509_v43 = vrot.slane %v10518_v38, 1  ;;  %268 = vst [vmem:[#allocation2 + $0x78] sm:$0x1] %v267_v28 }
  0xb3   : > { %1964 = vst.msk [vmem:[#allocation4 + $0x18] sm:$0xff] %vm1962_vm1, %v11370_v10  ;;  %v10522_v42 = vld [vmem:[#allocation2 + $0x6c] sm:$0xff]   ;;  %v3140_v10 = vshrl.u32 %v10513_v5, 16  ;;  %v3144_v44 = vrot.slane %v3142_v56, 1  ;;  %2828 = vrot.lane.b32.xlu1 %v10510_v40, %s10977_s12  ;;  %v660_v5 = vshll.u32 %v480_v32, 16  ;;  %v651_v40 = vrot.slane %v649_v33, 7 }
  0xb4   : > { %2397 = vst.msk [vmem:[#allocation4 + $0x18] sm:$0xff] %vm2395_vm5, %v2350_v37  ;;  %v2348_v39 = vpop.permute.xlu0 %2347  ;;  %v1364_v46 = vshrl.u32 %v10522_v42, 16  ;;  %v1366_v47 = vshll.u32 %v10522_v42, 16  ;;  %v10531_v16 = vld [vmem:[#allocation2 + $0x6c] sm:$0xff]   ;;  %v659_v56 = vrot.slane %v657_v15, 7 }
  0xb5   : > { %2686 = vst.msk [vmem:[#allocation4 + $0x18] sm:$0xff] %vm2684_vm11, %v2639_v9  ;;  %v3250_v58 = vpop.permute.xlu1 %3249  ;;  %v10526_v2 = vld [vmem:[#allocation2 + $0x6c] sm:$0xfe]   ;;  %v2252_v7 = vshrl.u32 %v10531_v16, 16  ;;  %v2254_v14 = vshll.u32 %v10531_v16, 16 }
  0xb6   : > { %2396 = vst.msk [vmem:[#allocation4] sm:$0xff] %vm2395_vm5, %v2348_v39  ;;  %v1368_v54 = vrot.slane %v1366_v47, 1  ;;  %v10529_v6 = vld [vmem:[#allocation2 + $0x6c] sm:$0xff]   ;;  %v1716_v18 = vrot.slane %v10526_v2, 1  ;;  %v322_v42 = vld [vmem:[#allocation2 + $0x80] sm:$0x1]  ;;  %v662_v60 = vor.u32 %v660_v5, %v659_v56 }
  0xb7   : > { %2685 = vst.msk [vmem:[#allocation4] sm:$0xff] %vm2684_vm11, %v11401_v52  ;;  %v10519_v52 = vld [vmem:[#allocation2 + $0x74] ss:$0 sps:$4 sm:$0x11]   ;;  %v2256_v37 = vrot.slane %v2254_v14, 1  ;;  %1930 = vrot.lane.b32.xlu0 %v10529_v6, %s10975_s10  ;;  %v323_v47 = vsel %vm11102_vm7, 0, %v322_v42 }
  0xb8   : > { %2864 = vst.msk [vmem:[#allocation4 + $0x18] sm:$0xff] %vm13035_vm3, %v11387_v8  ;;  %2863 = vst.msk [vmem:[#allocation4] sm:$0xff] %vm13035_vm3, %v11364_v63  ;;  %v3248_v48 = vpop.permute.xlu0 %3247  ;;  %v3145_v8 = vor.u32 %v3144_v44, %v3140_v10  ;;  %v10523_v63 = vld [vmem:[#allocation2 + $0x74] ss:$0 sps:$4 sm:$0x11]   ;;  %v3510_v53 = vrot.slane %v10519_v52, 1  ;;  %v1369_v22 = vor.u32 %v1368_v54, %v1364_v46  ;;  %v654_v10 = vor.u32 %v652_v34, %v651_v40 }
  0xb9   : > { %3296 = vst.msk [vmem:[#allocation4] sm:$0xff] %vm3295_vm4, %v3248_v48  ;;  %3297 = vst.msk [vmem:[#allocation4 + $0x18] sm:$0xff] %vm3295_vm4, %v3250_v58  ;;  %v1371_v62 = vshll.u32 %v10523_v63, 16  ;;  %vm3644_vm3 = vcmask 293888   ;;  %v1452_v9 = vpop.permute.xlu1 %1451  ;;  %v2257_v45 = vor.u32 %v2256_v37, %v2252_v7  ;;  %v2259_v46 = vshll.u32 %v10532_v41, 16  ;;  %v10603_v58 = vld [vmem:[#allocation2 + $0x54] sm:$0xff]  }
  0xba   : > { %3585 = vst.msk [vmem:[#allocation4] sm:$0xff] %vm3584_vm6, %v11411_v3  ;;  %v3150_v3 = vsel %vm1254_vm12, %v3145_v8, %v3149_v36  ;;  %v3511_v20 = vsel %vm1688_vm10, %v3509_v43, %v3510_v53  ;;  %v655_v43 = vrot.slane %v651_v40, 4  ;;  %v1718_v48 = vsel %vm1688_vm10, %v1716_v18, %v1717_v27  ;;  %324 = vst [vmem:[#allocation2 + $0x80] sm:$0x1] %v323_v47  ;;  %v10537_v51 = vld [vmem:[#allocation2 + $0x6c] sm:$0xfe]  }
  0xbb   : > { %3261 = vrot.lane.b32.xlu1 %v3150_v3, %s10982_s17  ;;  %v1373_v12 = vrot.slane %v1371_v62, 1  ;;  %1498 = vst.msk [vmem:[#allocation4 + $0x30] sm:$0xff] %vm13036_vm15, %v1452_v9  ;;  %v884_v52 = vld [vmem:[#allocation2 + $0x78] sm:$0xf]  ;;  %v2261_v54 = vrot.slane %v2259_v46, 1  ;;  %v2612_v57 = vrot.slane %v10537_v51, 1 }
  0xbc   : > { %v3539_v26 = vpop.permute.xlu0 %3538  ;;  %v663_v50 = vsel %vm11108_vm8, %v655_v43, %v662_v60  ;;  %v10538_v8 = vld [vmem:[#allocation2 + $0x74] ss:$0 sps:$4 sm:$0x11]   ;;  %v885_v55 = vsel %vm11117_vm9, %v654_v10, %v884_v52  ;;  %v270_v36 = vsel %vm11069_vm2, 0, %v269_v61  ;;  %v481_v62 = vld [vmem:[%s11093_s9 + $0x50] sm:$0xf] }
  0xbd   : > { %3586 = vst.msk [vmem:[#allocation4 + $0x18] sm:$0xff] %vm3584_vm6, %v3539_v26  ;;  %v1454_v31 = vpop.permute.xlu1 %1453  ;;  %v1374_v39 = vsel %vm1254_vm12, %v1369_v22, %v1373_v12  ;;  %886 = vst [vmem:[#allocation2 + $0x78] sm:$0xf] %v885_v55  ;;  %v2262_v53 = vsel %vm1254_vm12, %v2257_v45, %v2261_v54  ;;  %v2613_v59 = vrot.slane %v10538_v8, 1  ;;  %v664_v26 = vrot.slane %v659_v56, 4 }
  0xbe   : > { %1499 = vst.msk [vmem:[#allocation4 + $0x48] sm:$0xff] %vm13036_vm15, %v1454_v31  ;;  %vm13050_vm15 = vcmask 27648   ;;  %2363 = vrot.lane.b32.xlu0 %v2262_v53, %s10981_s16  ;;  %271 = vst [vmem:[#allocation2 + $0x84] sm:$0x1] %v270_v36  ;;  %v666_v3 = vshrl.u32 %v481_v62, 16  ;;  %v669_v4 = vshll.u32 %v481_v62, 16 }
  0xbf   : > { %3550 = vrot.lane.b32.xlu1 %v3511_v20, %s10980_s15  ;;  %887 = vst.msk [vmem:[#allocation2 + $0x7c] sm:$0xf] %vm13050_vm15, %v663_v50  ;;  %v2614_v2 = vsel %vm1688_vm10, %v2612_v57, %v2613_v59  ;;  %v674_v6 = vshrl.u32 %v482_v0, 16  ;;  %v677_v7 = vshll.u32 %v482_v0, 16  ;;  %v325_v12 = vld [vmem:[#allocation2 + $0x8c] sm:$0x1] }
  0xc0   : > { %v1742_v19 = vpop.permute.xlu0 %1741  ;;  %1069 = vst.msk [vmem:[#allocation4 + $0xa8] sm:$0xff] %vm1061_vm14, %v10603_v58  ;;  %v10545_v9 = vld [vmem:[%s13027_s1 + $0x10] ss:$0 sps:$4 sm:$0x33]   ;;  %v668_v14 = vrot.slane %v666_v3, 7  ;;  %v326_v20 = vsel %vm11102_vm7, 0, %v325_v12 }
  0xc1   : > { %1788 = vst.msk [vmem:[#allocation4 + $0x30] sm:$0xff] %vm13037_vm0, %v1742_v19  ;;  %v3601_v25 = vld [vmem:[#allocation4] sm:$0xff]  ;;  %v1744_v44 = vpop.permute.xlu1 %1743  ;;  %v888_v13 = vld [vmem:[#allocation2 + $0x80] sm:$0x1]  ;;  %v676_v19 = vrot.slane %v674_v6, 7  ;;  %vm13051_vm15 = vcmask 228544  }
  0xc2   : > { %10270 = vmatprep.mubr.msk.bf16.mxu0 %vm3644_vm3, %v3601_v25  ;;  %1789 = vst.msk [vmem:[#allocation4 + $0x48] sm:$0xff] %vm13037_vm0, %v1744_v44  ;;  %vm3693_vm0 = vcmask 1041408   ;;  %v889_v18 = vsel %vm11171_vm13, %v664_v26, %v888_v13  ;;  %2652 = vrot.lane.b32.xlu0 %v2614_v2, %s10979_s14  ;;  %327 = vst [vmem:[#allocation2 + $0x8c] sm:$0x1] %v326_v20  ;;  %v671_v25 = vor.u32 %v669_v4, %v668_v14  ;;  %v672_v27 = vrot.slane %v668_v14, 4 }
  0xc3   : > { %1465 = vrot.lane.b32.xlu1 %v1374_v39, %s10978_s13  ;;  %10354 = vmatprep.subr.msk.bf16.mxu0 %vm3693_vm0, %v10545_v9  ;;  %890 = vst [vmem:[#allocation2 + $0x80] sm:$0x1] %v889_v18  ;;  %v679_v28 = vor.u32 %v677_v7, %v676_v19  ;;  %v3695_v32 = vsel %vm3693_vm0, %v10545_v9, 0  ;;  %v681_v35 = vrot.slane %v676_v19, 4  ;;  %vm13053_vm0 = vcmask 228544  }
  0xc4   : > { %v1919_v38 = vpop.permute.xlu0 %1918  ;;  %10269 = vmatpush3.bf16.msra.mxu0 %v3695_v32  ;;  %v3602_v15 = vld [vmem:[#allocation4 + $0x18] sm:$0xff] }
  0xc5   : > { %1965 = vst.msk [vmem:[#allocation4 + $0x30] sm:$0xff] %vm1962_vm1, %v1919_v38  ;;  %v1921_v63 = vpop.permute.xlu1 %1920  ;;  %v680_v34 = vsel %vm11108_vm8, %v672_v27, %v679_v28  ;;  %v891_v5 = vld [vmem:[#allocation2 + $0x84] sm:$0xf] }
  0xc6   : > { %1966 = vst.msk [vmem:[#allocation4 + $0x48] sm:$0xff] %vm1962_vm1, %v1921_v63  ;;  %v10530_v30 = vld [vmem:[#allocation2 + $0x78] sm:$0xff]   ;;  %v892_v40 = vsel %vm11117_vm9, %v671_v25, %v891_v5 }
  0xc7   : > { %1755 = vrot.lane.b32.xlu1 %v1718_v48, %s10976_s11  ;;  %v10533_v33 = vld [vmem:[#allocation2 + $0x78] sm:$0xff]   ;;  %893 = vst [vmem:[#allocation2 + $0x84] sm:$0xf] %v892_v40  ;;  %10271 = vmatmul.mubr.msk.bf16.vlgmr.msra.gmra.mrb[0].mxu0 %vm3644_vm3, %v3602_v15 }
  0xc8   : > { %v2352_v49 = vpop.permute.xlu0 %2351  ;;  %v10543_v31 = vld [vmem:[#allocation2 + $0x78] sm:$0xff]   ;;  %v2266_v38 = vshll.u32 %v10533_v33, 16  ;;  %v2264_v29 = vshrl.u32 %v10533_v33, 16 }
  0xc9   : > { %2398 = vst.msk [vmem:[#allocation4 + $0x30] sm:$0xff] %vm2395_vm5, %v2352_v49  ;;  %v2354_v23 = vpop.permute.xlu1 %2353  ;;  %v10539_v39 = vld [vmem:[#allocation2 + $0x78] sm:$0xfe]   ;;  %2830 = vrot.lane.b32.xlu0 %v10543_v31, %s10977_s12  ;;  %v895_v60 = vld [vmem:[#allocation2 + $0x8c] sm:$0x1] }
  0xca   : > { %2399 = vst.msk [vmem:[#allocation4 + $0x48] sm:$0xff] %vm2395_vm5, %v2354_v23  ;;  %v10546_v56 = vld [vmem:[#allocation2 + $0x78] sm:$0xff]   ;;  %v2268_v42 = vrot.slane %v2266_v38, 1  ;;  %v10534_v45 = vld [vmem:[#allocation2 + $0x80] ss:$0 sps:$4 sm:$0x11]   ;;  %v896_v46 = vsel %vm11171_vm13, %v681_v35, %v895_v60 }
  0xcb   : > { %1932 = vrot.lane.b32.xlu1 %v10530_v30, %s10975_s10  ;;  %v3152_v10 = vshrl.u32 %v10546_v56, 16  ;;  %v3154_v43 = vshll.u32 %v10546_v56, 16  ;;  %v10550_v44 = vld [vmem:[#allocation2 + $0x78] sm:$0xfe]   ;;  %897 = vst [vmem:[#allocation2 + $0x8c] sm:$0x1] %v896_v46 }
  0xcc   : > { %v2641_v16 = vpop.permute.xlu0 %2640  ;;  %v10554_v47 = vld [vmem:[#allocation2 + $0x78] sm:$0xff]   ;;  %v10540_v48 = vld [vmem:[#allocation2 + $0x80] ss:$0 sps:$4 sm:$0x11]   ;;  %v2269_v52 = vor.u32 %v2268_v42, %v2264_v29  ;;  %v2271_v54 = vshll.u32 %v10534_v45, 16  ;;  %v2615_v55 = vrot.slane %v10539_v39, 1 }
  0xcd   : > { %2687 = vst.msk [vmem:[#allocation4 + $0x30] sm:$0xff] %vm2684_vm11, %v2641_v16  ;;  %v2643_v37 = vpop.permute.xlu1 %2642  ;;  %v3156_v50 = vrot.slane %v3154_v43, 1  ;;  %v10547_v8 = vld [vmem:[#allocation2 + $0x80] ss:$0 sps:$4 sm:$0x11]   ;;  %v2616_v57 = vrot.slane %v10540_v48, 1 }
  0xce   : > { %2688 = vst.msk [vmem:[#allocation4 + $0x48] sm:$0xff] %vm2684_vm11, %v2643_v37  ;;  %v2273_v63 = vrot.slane %v2271_v54, 1  ;;  %v3159_v53 = vshll.u32 %v10547_v8, 16  ;;  %v3512_v59 = vrot.slane %v10550_v44, 1  ;;  %v1378_v61 = vshll.u32 %v10554_v47, 16 }
  0xcf   : > { %v3157_v58 = vor.u32 %v3156_v50, %v3152_v10  ;;  %v10551_v0 = vld [vmem:[#allocation2 + $0x80] ss:$0 sps:$4 sm:$0x11]   ;;  %v1376_v2 = vshrl.u32 %v10554_v47, 16  ;;  %v2617_v4 = vsel %vm1688_vm10, %v2615_v55, %v2616_v57  ;;  %v272_v55 = vld [vmem:[#allocation2 + $0x90] sm:$0x1] }
  0xd0   : > { %v2819_v22 = vpop.permute.xlu0 %2818  ;;  %v2274_v26 = vsel %vm1254_vm12, %v2269_v52, %v2273_v63  ;;  %v3161_v36 = vrot.slane %v3159_v53, 1  ;;  %v3513_v19 = vrot.slane %v10551_v0, 1  ;;  %v10555_v30 = vld [vmem:[#allocation2 + $0x80] ss:$0 sps:$4 sm:$0x11]  }
  0xd1   : > { %2865 = vst.msk [vmem:[#allocation4 + $0x30] sm:$0xff] %vm13051_vm15, %v2819_v22  ;;  %vm13052_vm15 = vcmask 27648   ;;  %v2821_v49 = vpop.permute.xlu1 %2820  ;;  %2365 = vrot.lane.b32.xlu1 %v2274_v26, %s10981_s16  ;;  %v1380_v22 = vrot.slane %v1378_v61, 1  ;;  %v1383_v31 = vshll.u32 %v10555_v30, 16  ;;  %v483_v57 = vld [vmem:[%s11093_s9 + $0x58] sm:$0xf] }
  0xd2   : > { %894 = vst.msk [vmem:[#allocation2 + $0x88] sm:$0xf] %vm13052_vm15, %v680_v34  ;;  %vm13054_vm15 = vcmask 64544   ;;  %v3162_v6 = vsel %vm1254_vm12, %v3157_v58, %v3161_v36  ;;  %v10549_v7 = vld [vmem:[#allocation2 + $0x8c] ss:$0 sps:$4 sm:$0x11]   ;;  %v3514_v28 = vsel %vm1688_vm10, %v3512_v59, %v3513_v19 }
  0xd3   : > { %2866 = vst.msk [vmem:[#allocation4 + $0x48] sm:$0xff] %vm13053_vm0, %v2821_v49  ;;  %3263 = vrot.lane.b32.xlu0 %v3162_v6, %s10982_s17  ;;  %v3171_v23 = vshll.u32 %v10549_v7, 16  ;;  %v10553_v25 = vld [vmem:[#allocation2 + $0x8c] ss:$0 sps:$4 sm:$0x11]   ;;  %vm13055_vm0 = vcmask 97344   ;;  %v1381_v15 = vor.u32 %v1380_v22, %v1376_v2 }
  0xd4   : > { %v3252_v41 = vpop.permute.xlu0 %3251  ;;  %v3516_v33 = vrot.slane %v10553_v25, 1  ;;  %v10557_v35 = vld [vmem:[#allocation2 + $0x8c] ss:$0 sps:$4 sm:$0x11]   ;;  %v1385_v40 = vrot.slane %v1383_v31, 1  ;;  %v273_v58 = vsel %vm11069_vm2, 0, %v272_v55 }
  0xd5   : > { %3298 = vst.msk [vmem:[#allocation4 + $0x30] sm:$0xff] %vm3295_vm4, %v3252_v41  ;;  %2654 = vrot.lane.b32.xlu1 %v2617_v4, %s10979_s14  ;;  %v3173_v32 = vrot.slane %v3171_v23, 1  ;;  %v1395_v56 = vshll.u32 %v10557_v35, 16  ;;  %v10558_v41 = vld [vmem:[#allocation2 + $0x78] sm:$0xfe]   ;;  %v683_v59 = vshrl.u32 %v483_v57, 16 }
  0xd6   : > { %v10559_v10 = vld [vmem:[#allocation2 + $0x80] ss:$0 sps:$4 sm:$0x11]   ;;  %v1386_v43 = vsel %vm1254_vm12, %v1381_v15, %v1385_v40  ;;  %v1719_v60 = vrot.slane %v10558_v41, 1  ;;  %v484_v53 = vld [vmem:[%s11093_s9 + $0x5c] sm:$0xf] }
  0xd7   : > { %3552 = vrot.lane.b32.xlu0 %v3514_v28, %s10980_s15  ;;  %v1720_v44 = vrot.slane %v10559_v10, 1  ;;  %v10561_v46 = vld [vmem:[#allocation2 + $0x8c] ss:$0 sps:$4 sm:$0x11]   ;;  %v1397_v48 = vrot.slane %v1395_v56, 1  ;;  %v686_v61 = vshll.u32 %v483_v57, 16 }
  0xd8   : > { %v3541_v51 = vpop.permute.xlu0 %3540  ;;  %v1723_v54 = vrot.slane %v10561_v46, 1  ;;  %274 = vst [vmem:[#allocation2 + $0x90] sm:$0x1] %v273_v58  ;;  %v691_v26 = vshrl.u32 %v484_v53, 16  ;;  %v694_v36 = vshll.u32 %v484_v53, 16  ;;  %v685_v0 = vrot.slane %v683_v59, 7 }
  0xd9   : > { %3587 = vst.msk [vmem:[#allocation4 + $0x30] sm:$0xff] %vm3584_vm6, %v3541_v51  ;;  %v10548_v62 = vld [vmem:[#allocation2 + $0x84] sm:$0xff]   ;;  %v3254_v39 = vpop.permute.xlu1 %3253  ;;  %v1721_v51 = vsel %vm1688_vm10, %v1719_v60, %v1720_v44  ;;  %v10565_v2 = vld [vmem:[#allocation2 + $0x8c] ss:$0 sps:$4 sm:$0x11]   ;;  %v10644_v59 = vld [vmem:[#allocation2 + $0x78] sm:$0xff]  }
  0xda   : > { %v10552_v3 = vld [vmem:[#allocation2 + $0x84] sm:$0xfe]   ;;  %v3164_v9 = vshrl.u32 %v10548_v62, 16  ;;  %v3166_v14 = vshll.u32 %v10548_v62, 16  ;;  %3299 = vst.msk [vmem:[#allocation4 + $0x48] sm:$0xff] %vm3295_vm4, %v3254_v39  ;;  %v11541_v4 = vrot.slane %v691_v26, 7 }
  0xdb   : > { %v10556_v12 = vld [vmem:[#allocation2 + $0x84] sm:$0xff]   ;;  %v3515_v20 = vrot.slane %v10552_v3, 1  ;;  %1467 = vrot.lane.b32.xlu0 %v1386_v43, %s10978_s13  ;;  %v2283_v19 = vshll.u32 %v10565_v2, 16  ;;  %v275_v56 = vld [vmem:[#allocation2 + $0x9c] sm:$0x1]  ;;  %1072 = vst.msk [vmem:[#allocation4 + $0xf0] sm:$0xff] %vm1061_vm14, %v10644_v59 }
  0xdc   : > { %v1456_v16 = vpop.permute.xlu0 %1455  ;;  %v10544_v13 = vld [vmem:[#allocation2 + $0x84] sm:$0xff]   ;;  %v3168_v27 = vrot.slane %v3166_v14, 1  ;;  %v1388_v37 = vshrl.u32 %v10556_v12, 16  ;;  %v1390_v38 = vshll.u32 %v10556_v12, 16  ;;  %v689_v14 = vrot.slane %v685_v0, 4 }
  0xdd   : > { %1500 = vst.msk [vmem:[#allocation4 + $0x60] sm:$0xff] %vm13054_vm15, %v1456_v16  ;;  %2832 = vrot.lane.b32.xlu1 %v10544_v13, %s10977_s12  ;;  %v10560_v45 = vld [vmem:[#allocation2 + $0x84] sm:$0xfe]   ;;  %v3543_v47 = vpop.permute.xlu1 %3542  ;;  %v3517_v49 = vsel %vm1688_vm10, %v3515_v20, %v3516_v33  ;;  %v696_v23 = vor.u32 %v694_v36, %v11541_v4  ;;  %v698_v25 = vrot.slane %v11541_v4, 4  ;;  %v2285_v30 = vrot.slane %v2283_v19, 1 }
  0xde   : > { %v3169_v34 = vor.u32 %v3168_v27, %v3164_v9  ;;  %v1392_v42 = vrot.slane %v1390_v38, 1  ;;  %3588 = vst.msk [vmem:[#allocation4 + $0x48] sm:$0xff] %vm3584_vm6, %v3543_v47  ;;  %v1722_v52 = vrot.slane %v10560_v45, 1  ;;  %v10562_v8 = vld [vmem:[#allocation2 + $0x84] sm:$0xff]   ;;  %v328_v9 = vld [vmem:[#allocation2 + $0x98] sm:$0x1] }
  0xdf   : > { %v10564_v16 = vld [vmem:[#allocation2 + $0x84] sm:$0xff]   ;;  %1757 = vrot.lane.b32.xlu0 %v1721_v51, %s10976_s11  ;;  %v329_v20 = vsel %vm11102_vm7, 0, %v328_v9  ;;  %v10569_v33 = vld [vmem:[#allocation2 + $0x8c] ss:$0 sps:$4 sm:$0x11]   ;;  %v697_v15 = vsel %vm11108_vm8, %v689_v14, %v696_v23  ;;  %v276_v10 = vsel %vm11069_vm2, 0, %v275_v56 }
  0xe0   : > { %v1746_v18 = vpop.permute.xlu0 %1745  ;;  %v3174_v29 = vsel %vm1254_vm12, %v3169_v34, %v3173_v32  ;;  %v1393_v50 = vor.u32 %v1392_v42, %v1388_v37  ;;  %v2276_v6 = vshrl.u32 %v10564_v16, 16  ;;  %v2278_v7 = vshll.u32 %v10564_v16, 16  ;;  %v3603_v12 = vld [vmem:[#allocation4 + $0x30] sm:$0xff]  ;;  %330 = vst [vmem:[#allocation2 + $0x98] sm:$0x1] %v329_v20  ;;  %v10633_v51 = vld [vmem:[#allocation2 + $0x6c] sm:$0xff]  }
  0xe1   : > { %1790 = vst.msk [vmem:[#allocation4 + $0x60] sm:$0xff] %vm13055_vm0, %v1746_v18  ;;  %3265 = vrot.lane.b32.xlu1 %v3174_v29, %s10982_s17  ;;  %v1458_v62 = vpop.permute.xlu1 %1457  ;;  %10274 = vmatprep.mubr.msk.bf16.mxu0 %vm3644_vm3, %v3603_v12  ;;  %v10632_v22 = vld [vmem:[#allocation2 + $0x60] sm:$0xff]   ;;  %v688_v18 = vor.u32 %v686_v61, %v685_v0  ;;  %v1724_v34 = vsel %vm1688_vm10, %v1722_v52, %v1723_v54  ;;  %v898_v35 = vld [vmem:[#allocation2 + $0x90] sm:$0xf]  ;;  %v2619_v37 = vrot.slane %v10569_v33, 1 }
  0xe2   : > { %1501 = vst.msk [vmem:[#allocation4 + $0x78] sm:$0xff] %vm13054_vm15, %v1458_v62  ;;  %v1398_v3 = vsel %vm1254_vm12, %v1393_v50, %v1397_v48  ;;  %v2280_v27 = vrot.slane %v2278_v7, 1  ;;  %v10568_v32 = vld [vmem:[#allocation2 + $0x84] sm:$0xfe]   ;;  %vm13056_vm15 = vcmask 27648  }
  0xe3   : > { %1934 = vrot.lane.b32.xlu0 %v10562_v8, %s10975_s10  ;;  %1070 = vst.msk [vmem:[#allocation4 + $0xc0] sm:$0xff] %vm1061_vm14, %v10632_v22  ;;  %v899_v39 = vsel %vm11117_vm9, %v688_v18, %v898_v35  ;;  %v485_v41 = vld [vmem:[%s11093_s9 + $0x60] sm:$0xf]  ;;  %v486_v29 = vld [vmem:[%s11093_s9 + $0x64] sm:$0xf]  ;;  %1071 = vst.msk [vmem:[#allocation4 + $0xd8] sm:$0xff] %vm1061_vm14, %v10633_v51 }
  0xe4   : > { %v1923_v5 = vpop.permute.xlu0 %1922  ;;  %v2281_v31 = vor.u32 %v2280_v27, %v2276_v6  ;;  %901 = vst.msk [vmem:[#allocation2 + $0x94] sm:$0xf] %vm13056_vm15, %v697_v15  ;;  %900 = vst [vmem:[#allocation2 + $0x90] sm:$0xf] %v899_v39  ;;  %v700_v43 = vshrl.u32 %v485_v41, 16  ;;  %v703_v60 = vshll.u32 %v485_v41, 16 }
  0xe5   : > { %1967 = vst.msk [vmem:[#allocation4 + $0x60] sm:$0xff] %vm1962_vm1, %v1923_v5  ;;  %3554 = vrot.lane.b32.xlu1 %v3517_v49, %s10980_s15  ;;  %v1748_v28 = vpop.permute.xlu1 %1747  ;;  %v2618_v5 = vrot.slane %v10568_v32, 1  ;;  %v3604_v44 = vld [vmem:[#allocation4 + $0x48] sm:$0xff]  ;;  %v331_v45 = vld [vmem:[#allocation2 + $0xa4] sm:$0x1]  ;;  %v708_v47 = vshrl.u32 %v486_v29, 16 }
  0xe6   : > { %1791 = vst.msk [vmem:[#allocation4 + $0x78] sm:$0xff] %vm13055_vm0, %v1748_v28  ;;  %v2286_v40 = vsel %vm1254_vm12, %v2281_v31, %v2285_v30  ;;  %vm13057_vm0 = vcmask 228544   ;;  %277 = vst [vmem:[#allocation2 + $0x9c] sm:$0x1] %v276_v10  ;;  %v711_v49 = vshll.u32 %v486_v29, 16  ;;  %10275 = vmatmul.mubr.msk.bf16.gmra.mrb[4].mxu0 %vm3644_vm3, %v3604_v44  ;;  %v332_v48 = vsel %vm11102_vm7, 0, %v331_v45 }
  0xe7   : > { %2367 = vrot.lane.b32.xlu0 %v2286_v40, %s10981_s16  ;;  %v2620_v46 = vsel %vm1688_vm10, %v2618_v5, %v2619_v37  ;;  %v278_v50 = vld [vmem:[#allocation2 + $0xa8] sm:$0x1]  ;;  %v902_v52 = vld [vmem:[#allocation2 + $0x98] sm:$0x1]  ;;  %v702_v54 = vrot.slane %v700_v43, 7 }
  0xe8   : > { %v2356_v63 = vpop.permute.xlu0 %2355  ;;  %333 = vst [vmem:[#allocation2 + $0xa4] sm:$0x1] %v332_v48  ;;  %v279_v8 = vsel %vm11069_vm2, 0, %v278_v50  ;;  %v11575_v55 = vld [vmem:[%s11093_s9 + $0x68] sm:$0xf]  ;;  %v903_v57 = vsel %vm11171_vm13, %v698_v25, %v902_v52 }
  0xe9   : > { %2400 = vst.msk [vmem:[#allocation4 + $0x60] sm:$0xff] %vm2395_vm5, %v2356_v63  ;;  %1469 = vrot.lane.b32.xlu1 %v1398_v3, %s10978_s13  ;;  %v1925_v42 = vpop.permute.xlu1 %1924  ;;  %v710_v63 = vrot.slane %v708_v47, 7  ;;  %280 = vst [vmem:[#allocation2 + $0xa8] sm:$0x1] %v279_v8  ;;  %v488_v58 = vld [vmem:[%s11093_s9 + $0x6c] sm:$0xf]  ;;  %v705_v2 = vor.u32 %v703_v60, %v702_v54 }
  0xea   : > { %1968 = vst.msk [vmem:[#allocation4 + $0x78] sm:$0xff] %vm1962_vm1, %v1925_v42  ;;  %v717_v53 = vshrl.u32 %v11575_v55, 16  ;;  %904 = vst [vmem:[#allocation2 + $0x98] sm:$0x1] %v903_v57  ;;  %v706_v61 = vrot.slane %v702_v54, 4  ;;  %v725_v16 = vshrl.u32 %v488_v58, 16 }
  0xeb   : > { %2656 = vrot.lane.b32.xlu0 %v2620_v46, %s10979_s14  ;;  %v728_v26 = vshll.u32 %v488_v58, 16  ;;  %v334_v36 = vld [vmem:[#allocation2 + $0xb0] sm:$0x1]  ;;  %v10645_v62 = vld [vmem:[#allocation2 + $0x84] sm:$0xff]   ;;  %v713_v0 = vor.u32 %v711_v49, %v710_v63  ;;  %v715_v3 = vrot.slane %v710_v63, 4  ;;  %v720_v54 = vshll.u32 %v11575_v55, 16 }
  0xec   : > { %v2645_v13 = vpop.permute.xlu0 %2644  ;;  %v11584_v4 = vrot.slane %v717_v53, 7  ;;  %1073 = vst.msk [vmem:[#allocation4 + $0x108] sm:$0xff] %vm1061_vm14, %v10645_v62  ;;  %v10563_v6 = vld [vmem:[#allocation2 + $0x90] sm:$0xff]   ;;  %v11589_v9 = vrot.slane %v725_v16, 7  ;;  %v335_v23 = vsel %vm11102_vm7, 0, %v334_v36 }
  0xed   : > { %2689 = vst.msk [vmem:[#allocation4 + $0x60] sm:$0xff] %vm2684_vm11, %v2645_v13  ;;  %1759 = vrot.lane.b32.xlu1 %v1724_v34, %s10976_s11  ;;  %v714_v7 = vsel %vm11108_vm8, %v706_v61, %v713_v0  ;;  %v10566_v12 = vld [vmem:[#allocation2 + $0x90] sm:$0xff]   ;;  %v905_v20 = vld [vmem:[#allocation2 + $0x9c] sm:$0xf]  ;;  %v2358_v22 = vpop.permute.xlu1 %2357  ;;  %336 = vst [vmem:[#allocation2 + $0xb0] sm:$0x1] %v335_v23 }
  0xee   : > { %v10570_v13 = vld [vmem:[#allocation2 + $0x90] sm:$0xfe]   ;;  %908 = vst.msk [vmem:[#allocation2 + $0xa0] sm:$0xf] %vm13056_vm15, %v714_v7  ;;  %v723_v14 = vrot.slane %v11584_v4, 4  ;;  %v730_v18 = vor.u32 %v728_v26, %v11589_v9  ;;  %v2288_v25 = vshrl.u32 %v10566_v12, 16  ;;  %v906_v30 = vsel %vm11117_vm9, %v705_v2, %v905_v20 }
  0xef   : > { %v10574_v19 = vld [vmem:[#allocation2 + $0x90] sm:$0xff]   ;;  %v2290_v27 = vshll.u32 %v10566_v12, 16  ;;  %v2621_v28 = vrot.slane %v10570_v13, 1  ;;  %2401 = vst.msk [vmem:[#allocation4 + $0x78] sm:$0xff] %vm2395_vm5, %v2358_v22  ;;  %907 = vst [vmem:[#allocation2 + $0x9c] sm:$0xf] %v906_v30 }
  0xf0   : > { %v2823_v38 = vpop.permute.xlu0 %2822  ;;  %v10576_v32 = vld [vmem:[#allocation2 + $0x90] sm:$0xff]   ;;  %2834 = vrot.lane.b32.xlu0 %v10574_v19, %s10977_s12  ;;  %v731_v15 = vsel %vm11108_vm8, %v723_v14, %v730_v18  ;;  %v909_v42 = vld [vmem:[#allocation2 + $0xa4] sm:$0x1]  ;;  %v732_v53 = vrot.slane %v11589_v9, 4 }
  0xf1   : > { %2867 = vst.msk [vmem:[#allocation4 + $0x60] sm:$0xff] %vm13057_vm0, %v2823_v38  ;;  %1936 = vrot.lane.b32.xlu1 %v10563_v6, %s10975_s10  ;;  %v10567_v33 = vld [vmem:[#allocation2 + $0x98] ss:$0 sps:$4 sm:$0x11]   ;;  %v11601_v34 = vld [vmem:[#allocation2 + $0x90] sm:$0xff]   ;;  %v2292_v31 = vrot.slane %v2290_v27, 1  ;;  %vm13058_vm0 = vmmov %vm13056_vm15  ;;  %v2647_v38 = vpop.permute.xlu1 %2646  ;;  %v910_v60 = vsel %vm11171_vm13, %v715_v3, %v909_v42  ;;  %v722_v42 = vor.u32 %v720_v54, %v11584_v4 }
  0xf2   : > { %v10571_v35 = vld [vmem:[#allocation2 + $0x98] ss:$0 sps:$4 sm:$0x11]   ;;  %915 = vst.msk [vmem:[#allocation2 + $0xac] sm:$0xf] %vm13058_vm0, %v731_v15  ;;  %v2295_v5 = vshll.u32 %v10567_v33, 16 }
  0xf3   : > { %v10577_v37 = vld [vmem:[#allocation2 + $0x98] ss:$0 sps:$4 sm:$0x11]   ;;  %v2293_v40 = vor.u32 %v2292_v31, %v2288_v25  ;;  %v2622_v56 = vrot.slane %v10571_v35, 1  ;;  %v3176_v41 = vshrl.u32 %v10576_v32, 16  ;;  %v3178_v29 = vshll.u32 %v10576_v32, 16 }
  0xf4   : > { %v3256_v39 = vpop.permute.xlu0 %3255  ;;  %2690 = vst.msk [vmem:[#allocation4 + $0x78] sm:$0xff] %vm2684_vm11, %v2647_v38  ;;  %v2297_v10 = vrot.slane %v2295_v5, 1  ;;  %v3183_v43 = vshll.u32 %v10577_v37, 16  ;;  %911 = vst [vmem:[#allocation2 + $0xa4] sm:$0x1] %v910_v60  ;;  %v1402_v49 = vshll.u32 %v11601_v34, 16 }
  0xf5   : > { %3300 = vst.msk [vmem:[#allocation4 + $0x60] sm:$0xff] %vm3295_vm4, %v3256_v39  ;;  %v3180_v44 = vrot.slane %v3178_v29, 1  ;;  %v10580_v47 = vld [vmem:[#allocation2 + $0x90] sm:$0xfe]   ;;  %v2825_v48 = vpop.permute.xlu1 %2824  ;;  %v1400_v52 = vshrl.u32 %v11601_v34, 16  ;;  %vm13059_vm15 = vcmask 228544   ;;  %v2623_v8 = vsel %vm1688_vm10, %v2621_v28, %v2622_v56 }
  0xf6   : > { %v2298_v45 = vsel %vm1254_vm12, %v2293_v40, %v2297_v10  ;;  %v3185_v46 = vrot.slane %v3183_v43, 1  ;;  %2868 = vst.msk [vmem:[#allocation4 + $0x78] sm:$0xff] %vm13059_vm15, %v2825_v48  ;;  %v10578_v57 = vld [vmem:[#allocation2 + $0x9c] sm:$0xff]   ;;  %v10581_v63 = vld [vmem:[#allocation2 + $0x98] ss:$0 sps:$4 sm:$0x11]  }
  0xf7   : > { %2369 = vrot.lane.b32.xlu1 %v2298_v45, %s10981_s16  ;;  %v3181_v51 = vor.u32 %v3180_v44, %v3176_v41  ;;  %v3518_v58 = vrot.slane %v10580_v47, 1  ;;  %v10575_v59 = vld [vmem:[#allocation2 + $0x9c] sm:$0xff]   ;;  %v3188_v26 = vshrl.u32 %v10578_v57, 16  ;;  %v3190_v36 = vshll.u32 %v10578_v57, 16  ;;  %v10588_v39 = vld [vmem:[#allocation2 + $0x90] sm:$0xfe]  }
  0xf8   : > { %v3545_v50 = vpop.permute.xlu0 %3544  ;;  %v10582_v16 = vld [vmem:[#allocation2 + $0x9c] sm:$0xfe]   ;;  %v3519_v62 = vrot.slane %v10581_v63, 1  ;;  %v1404_v0 = vrot.slane %v1402_v49, 1  ;;  %vm13060_vm0 = vcmask 64544   ;;  %vm13061_vm15 = vcmask 97344  }
  0xf9   : > { %3589 = vst.msk [vmem:[#allocation4 + $0x60] sm:$0xff] %vm3584_vm6, %v3545_v50  ;;  %v3186_v61 = vsel %vm1254_vm12, %v3181_v51, %v3185_v46  ;;  %v3258_v55 = vpop.permute.xlu1 %3257  ;;  %v3521_v3 = vrot.slane %v10582_v16, 1  ;;  %v10586_v6 = vld [vmem:[#allocation2 + $0x9c] sm:$0xff]   ;;  %v3192_v12 = vrot.slane %v3190_v36, 1  ;;  %v1725_v45 = vrot.slane %v10588_v39, 1 }
  0xfa   : > { %3267 = vrot.lane.b32.xlu0 %v3186_v61, %s10982_s17  ;;  %3301 = vst.msk [vmem:[#allocation4 + $0x78] sm:$0xff] %vm3295_vm4, %v3258_v55  ;;  %v3520_v13 = vsel %vm1688_vm10, %v3518_v58, %v3519_v62  ;;  %v1412_v19 = vshrl.u32 %v10586_v6, 16  ;;  %v10585_v18 = vld [vmem:[#allocation2 + $0x98] ss:$0 sps:$4 sm:$0x11]   ;;  %v1414_v28 = vshll.u32 %v10586_v6, 16  ;;  %v1405_v32 = vor.u32 %v1404_v0, %v1400_v52 }
  0xfb   : > { %2658 = vrot.lane.b32.xlu1 %v2623_v8, %s10979_s14  ;;  %v10579_v7 = vld [vmem:[#allocation2 + $0xa4] ss:$0 sps:$4 sm:$0x11]   ;;  %v3193_v20 = vor.u32 %v3192_v12, %v3188_v26  ;;  %v1407_v33 = vshll.u32 %v10585_v18, 16  ;;  %v10594_v15 = vld [vmem:[#allocation2 + $0x9c] sm:$0xff]   ;;  %v10646_v26 = vld [vmem:[#allocation2 + $0x90] sm:$0xff]  }
  0xfc   : > { %v1460_v2 = vpop.permute.xlu0 %1459  ;;  %v10583_v14 = vld [vmem:[#allocation2 + $0xa4] ss:$0 sps:$4 sm:$0x11]   ;;  %v3195_v22 = vshll.u32 %v10579_v7, 16  ;;  %v1416_v31 = vrot.slane %v1414_v28, 1  ;;  %v2300_v10 = vshrl.u32 %v10594_v15, 16 }
  0xfd   : > { %1502 = vst.msk [vmem:[#allocation4 + $0x90] sm:$0xff] %vm13060_vm0, %v1460_v2  ;;  %v3547_v23 = vpop.permute.xlu1 %3546  ;;  %v3522_v27 = vrot.slane %v10583_v14, 1  ;;  %v10587_v34 = vld [vmem:[#allocation2 + $0xa4] ss:$0 sps:$4 sm:$0x11]   ;;  %v1409_v37 = vrot.slane %v1407_v33, 1 }
  0xfe   : > { %3556 = vrot.lane.b32.xlu0 %v3520_v13, %s10980_s15  ;;  %3590 = vst.msk [vmem:[#allocation4 + $0x78] sm:$0xff] %vm3584_vm6, %v3547_v23  ;;  %v3197_v30 = vrot.slane %v3195_v22, 1  ;;  %v1419_v38 = vshll.u32 %v10587_v34, 16  ;;  %v10589_v29 = vld [vmem:[#allocation2 + $0x98] ss:$0 sps:$4 sm:$0x11]   ;;  %v1417_v60 = vor.u32 %v1416_v31, %v1412_v19 }
  0xff   : > { %2836 = vrot.lane.b32.xlu1 %v10575_v59, %s10977_s12  ;;  %v3523_v41 = vsel %vm1688_vm10, %v3521_v3, %v3522_v27  ;;  %v1410_v43 = vsel %vm1254_vm12, %v1405_v32, %v1409_v37  ;;  %v1726_v46 = vrot.slane %v10589_v29, 1  ;;  %v10590_v47 = vld [vmem:[#allocation2 + $0x9c] sm:$0xfe]   ;;  %v10591_v49 = vld [vmem:[#allocation2 + $0xa4] ss:$0 sps:$4 sm:$0x11]  }
 0x100   : > { %v1750_v25 = vpop.permute.xlu0 %1749  ;;  %v3605_v35 = vld [vmem:[#allocation4 + $0x60] sm:$0xff]  ;;  %v3198_v5 = vsel %vm1254_vm12, %v3193_v20, %v3197_v30  ;;  %v1421_v44 = vrot.slane %v1419_v38, 1  ;;  %v912_v48 = vld [vmem:[#allocation2 + $0xa8] sm:$0xf]  ;;  %v1728_v52 = vrot.slane %v10590_v47, 1  ;;  %v1729_v54 = vrot.slane %v10591_v49, 1 }
 0x101   : > { %1792 = vst.msk [vmem:[#allocation4 + $0x90] sm:$0xff] %vm13061_vm15, %v1750_v25  ;;  %v1462_v40 = vpop.permute.xlu1 %1461  ;;  %10278 = vmatprep.mubr.msk.bf16.mxu0 %vm3644_vm3, %v3605_v35  ;;  %v1727_v4 = vsel %vm1688_vm10, %v1725_v45, %v1726_v46  ;;  %v10592_v8 = vld [vmem:[#allocation2 + $0x9c] sm:$0xff]   ;;  %v913_v57 = vsel %vm11117_vm9, %v722_v42, %v912_v48  ;;  %v2302_v58 = vshll.u32 %v10594_v15, 16  ;;  %v10595_v61 = vld [vmem:[#allocation2 + $0xa4] ss:$0 sps:$4 sm:$0x11]  }
 0x102   : > { %1503 = vst.msk [vmem:[#allocation4 + $0xa8] sm:$0xff] %vm13060_vm0, %v1462_v40  ;;  %1471 = vrot.lane.b32.xlu0 %v1410_v43, %s10978_s13  ;;  %v1422_v63 = vsel %vm1254_vm12, %v1417_v60, %v1421_v44  ;;  %914 = vst [vmem:[#allocation2 + $0xa8] sm:$0xf] %v913_v57  ;;  %v916_v16 = vld [vmem:[#allocation2 + $0xb0] sm:$0x1]  ;;  %v10647_v2 = vld [vmem:[#allocation2 + $0x9c] sm:$0xff]   ;;  %v1730_v6 = vsel %vm1688_vm10, %v1728_v52, %v1729_v54 }
 0x103   : > { %3269 = vrot.lane.b32.xlu1 %v3198_v5, %s10982_s17  ;;  %v2304_v36 = vrot.slane %v2302_v58, 1  ;;  %v917_v62 = vsel %vm11171_vm13, %v732_v53, %v916_v16  ;;  %v2307_v3 = vshll.u32 %v10595_v61, 16  ;;  %1074 = vst.msk [vmem:[#allocation4 + $0x120] sm:$0xff] %vm1061_vm14, %v10646_v26  ;;  %v10598_v9 = vld [vmem:[#allocation2 + $0x9c] sm:$0xfe]   ;;  %1075 = vst.msk [vmem:[#allocation4 + $0x138] sm:$0xff] %vm1061_vm14, %v10647_v2 }
 0x104   : > { %v1927_v56 = vpop.permute.xlu0 %1926  ;;  %918 = vst [vmem:[#allocation2 + $0xb0] sm:$0x1] %v917_v62  ;;  %v10599_v12 = vld [vmem:[#allocation2 + $0xa4] ss:$0 sps:$4 sm:$0x11]   ;;  %v2624_v13 = vrot.slane %v10598_v9, 1 }
 0x105   : > { %1969 = vst.msk [vmem:[#allocation4 + $0x90] sm:$0xff] %vm1962_vm1, %v1927_v56  ;;  %v1752_v50 = vpop.permute.xlu1 %1751  ;;  %v3606_v59 = vld [vmem:[#allocation4 + $0x78] sm:$0xff]  ;;  %v2305_v7 = vor.u32 %v2304_v36, %v2300_v10  ;;  %v2309_v53 = vrot.slane %v2307_v3, 1  ;;  %v2625_v14 = vrot.slane %v10599_v12, 1  ;;  %vm13062_vm0 = vcmask 228544  }
 0x106   : > { %1793 = vst.msk [vmem:[#allocation4 + $0xa8] sm:$0xff] %vm13061_vm15, %v1752_v50  ;;  %1761 = vrot.lane.b32.xlu0 %v1727_v4, %s10976_s11  ;;  %10279 = vmatmul.mubr.msk.bf16.gmra.mrb[8].mxu0 %vm3644_vm3, %v3606_v59  ;;  %v281_v35 = vld [vmem:[#allocation2 + $0xb4] sm:$0x1]  ;;  %v489_v56 = vld [vmem:[%s11093_s9 + $0x70] sm:$0xf]  ;;  %vm13063_vm15 = vmmov %vm13062_vm0 }
 0x107   : > { %3558 = vrot.lane.b32.xlu1 %v3523_v41, %s10980_s15  ;;  %v2310_v22 = vsel %vm1254_vm12, %v2305_v7, %v2309_v53  ;;  %v2626_v30 = vsel %vm1688_vm10, %v2624_v13, %v2625_v14  ;;  %v282_v40 = vsel %vm11069_vm2, 0, %v281_v35  ;;  %v490_v42 = vld [vmem:[%s11093_s9 + $0x74] sm:$0xf]  ;;  %v734_v10 = vshrl.u32 %v489_v56, 16  ;;  %v337_v52 = vld [vmem:[#allocation2 + $0xbc] sm:$0x1] }
 0x108   : > { %v2360_v51 = vpop.permute.xlu0 %2359  ;;  %283 = vst [vmem:[#allocation2 + $0xb4] sm:$0x1] %v282_v40  ;;  %v737_v43 = vshll.u32 %v489_v56, 16  ;;  %v742_v45 = vshrl.u32 %v490_v42, 16  ;;  %v745_v46 = vshll.u32 %v490_v42, 16  ;;  %v338_v58 = vsel %vm11102_vm7, 0, %v337_v52 }
 0x109   : > { %2402 = vst.msk [vmem:[#allocation4 + $0x90] sm:$0xff] %vm2395_vm5, %v2360_v51  ;;  %v1929_v0 = vpop.permute.xlu1 %1928  ;;  %v10593_v20 = vld [vmem:[#allocation2 + $0xa8] sm:$0xff]   ;;  %v736_v49 = vrot.slane %v734_v10, 7  ;;  %339 = vst [vmem:[#allocation2 + $0xbc] sm:$0x1] %v338_v58 }
 0x10a   : > { %1970 = vst.msk [vmem:[#allocation4 + $0xa8] sm:$0xff] %vm1962_vm1, %v1929_v0  ;;  %1938 = vrot.lane.b32.xlu0 %v10592_v8, %s10975_s10  ;;  %v10596_v18 = vld [vmem:[#allocation2 + $0xa8] sm:$0xff]   ;;  %v744_v51 = vrot.slane %v742_v45, 7  ;;  %v492_v40 = vld [vmem:[%s11093_s9 + $0x7c] sm:$0xf] }
 0x10b   : > { %1473 = vrot.lane.b32.xlu1 %v1422_v63, %s10978_s13  ;;  %v10600_v23 = vld [vmem:[#allocation2 + $0xa8] sm:$0xfe]   ;;  %v10597_v27 = vld [vmem:[#allocation2 + $0xb0] ss:$0 sps:$4 sm:$0x11]   ;;  %v2312_v28 = vshrl.u32 %v10596_v18, 16  ;;  %v739_v8 = vor.u32 %v737_v43, %v736_v49 }
 0x10c   : > { %v2649_v55 = vpop.permute.xlu0 %2648  ;;  %v2314_v32 = vshll.u32 %v10596_v18, 16  ;;  %v10601_v33 = vld [vmem:[#allocation2 + $0xb0] ss:$0 sps:$4 sm:$0x11]   ;;  %v2319_v15 = vshll.u32 %v10597_v27, 16  ;;  %v2627_v31 = vrot.slane %v10600_v23, 1  ;;  %v747_v16 = vor.u32 %v745_v46, %v744_v51 }
 0x10d   : > { %2691 = vst.msk [vmem:[#allocation4 + $0x90] sm:$0xff] %vm2684_vm11, %v2649_v55  ;;  %v10606_v5 = vld [vmem:[#allocation2 + $0xa8] sm:$0xff]   ;;  %v2628_v38 = vrot.slane %v10601_v33, 1  ;;  %v10607_v48 = vld [vmem:[#allocation2 + $0xb0] ss:$0 sps:$4 sm:$0x11]  }
 0x10e   : > { %2371 = vrot.lane.b32.xlu0 %v2310_v22, %s10981_s16  ;;  %v2316_v37 = vrot.slane %v2314_v32, 1  ;;  %v10604_v39 = vld [vmem:[#allocation2 + $0xa8] sm:$0xff]   ;;  %v2321_v29 = vrot.slane %v2319_v15, 1  ;;  %v3200_v60 = vshrl.u32 %v10606_v5, 16  ;;  %v3202_v4 = vshll.u32 %v10606_v5, 16 }
 0x10f   : > { %1763 = vrot.lane.b32.xlu1 %v1730_v6, %s10976_s11  ;;  %v740_v57 = vrot.slane %v736_v49, 4  ;;  %v3207_v63 = vshll.u32 %v10607_v48, 16  ;;  %v10614_v59 = vld [vmem:[#allocation2 + $0xa8] sm:$0xff]   ;;  %v2629_v61 = vsel %vm1688_vm10, %v2627_v31, %v2628_v38  ;;  %v749_v36 = vrot.slane %v744_v51, 4  ;;  %v919_v6 = vld [vmem:[#allocation2 + $0xb4] sm:$0xf] }
 0x110   : > { %v2827_v19 = vpop.permute.xlu0 %2826  ;;  %v2317_v44 = vor.u32 %v2316_v37, %v2312_v28  ;;  %v3204_v26 = vrot.slane %v3202_v4, 1  ;;  %v10610_v62 = vld [vmem:[#allocation2 + $0xa8] sm:$0xfe]   ;;  %v10611_v2 = vld [vmem:[#allocation2 + $0xb0] ss:$0 sps:$4 sm:$0x11]   ;;  %v920_v53 = vsel %vm11117_vm9, %v739_v8, %v919_v6 }
 0x111   : > { %2869 = vst.msk [vmem:[#allocation4 + $0x90] sm:$0xff] %vm13062_vm0, %v2827_v19  ;;  %v3209_v55 = vrot.slane %v3207_v63, 1  ;;  %vm13064_vm0 = vcmask 64544   ;;  %v748_v3 = vsel %vm11108_vm8, %v740_v57, %v747_v16  ;;  %v3524_v9 = vrot.slane %v10610_v62, 1  ;;  %921 = vst [vmem:[#allocation2 + $0xb4] sm:$0xf] %v920_v53 }
 0x112   : > { %2660 = vrot.lane.b32.xlu0 %v2626_v30, %s10979_s14  ;;  %v2322_v50 = vsel %vm1254_vm12, %v2317_v44, %v2321_v29  ;;  %v3205_v7 = vor.u32 %v3204_v26, %v3200_v60  ;;  %v1424_v12 = vshrl.u32 %v10614_v59, 16  ;;  %v3525_v13 = vrot.slane %v10611_v2, 1  ;;  %v10615_v14 = vld [vmem:[#allocation2 + $0xb0] ss:$0 sps:$4 sm:$0x11]  }
 0x113   : > { %1940 = vrot.lane.b32.xlu1 %v10593_v20, %s10975_s10  ;;  %v1426_v20 = vshll.u32 %v10614_v59, 16  ;;  %v1431_v23 = vshll.u32 %v10615_v14, 16  ;;  %v10619_v32 = vld [vmem:[#allocation2 + $0xb0] ss:$0 sps:$4 sm:$0x11]   ;;  %v759_v42 = vshrl.u32 %v492_v40, 16 }
 0x114   : > { %v3260_v34 = vpop.permute.xlu0 %3259  ;;  %v3210_v19 = vsel %vm1254_vm12, %v3205_v7, %v3209_v55  ;;  %v3526_v28 = vsel %vm1688_vm10, %v3524_v9, %v3525_v13  ;;  %v284_v33 = vld [vmem:[#allocation2 + $0xc0] sm:$0x1]  ;;  %v1732_v38 = vrot.slane %v10619_v32, 1  ;;  %v762_v10 = vshll.u32 %v492_v40, 16  ;;  %v340_v62 = vld [vmem:[#allocation2 + $0xc8] sm:$0x1] }
 0x115   : > { %3302 = vst.msk [vmem:[#allocation4 + $0x90] sm:$0xff] %vm3295_vm4, %v3260_v34  ;;  %v1428_v30 = vrot.slane %v1426_v20, 1  ;;  %v923_v34 = vld [vmem:[#allocation2 + $0xbc] sm:$0x1]  ;;  %v1433_v15 = vrot.slane %v1431_v23, 1  ;;  %v285_v31 = vsel %vm11069_vm2, 0, %v284_v33 }
 0x116   : > { %2838 = vrot.lane.b32.xlu0 %v10604_v39, %s10977_s12  ;;  %v924_v35 = vsel %vm11171_vm13, %v749_v36, %v923_v34  ;;  %286 = vst [vmem:[#allocation2 + $0xc0] sm:$0x1] %v285_v31  ;;  %v491_v39 = vld [vmem:[%s11093_s9 + $0x78] sm:$0xf]  ;;  %v11703_v49 = vrot.slane %v759_v42, 7 }
 0x117   : > { %v2362_v25 = vpop.permute.xlu1 %2361  ;;  %2373 = vrot.lane.b32.xlu1 %v2322_v50, %s10981_s16  ;;  %v1429_v5 = vor.u32 %v1428_v30, %v1424_v12  ;;  %925 = vst [vmem:[#allocation2 + $0xbc] sm:$0x1] %v924_v35  ;;  %v754_v29 = vshll.u32 %v491_v39, 16 }
 0x118   : > { %2403 = vst.msk [vmem:[#allocation4 + $0xa8] sm:$0xff] %vm2395_vm5, %v2362_v25  ;;  %v3549_v47 = vpop.permute.xlu0 %3548  ;;  %v10618_v25 = vld [vmem:[#allocation2 + $0xa8] sm:$0xfe]   ;;  %v764_v57 = vor.u32 %v762_v10, %v11703_v49 }
 0x119   : > { %3591 = vst.msk [vmem:[#allocation4 + $0x90] sm:$0xff] %vm3584_vm6, %v3549_v47  ;;  %v1731_v37 = vrot.slane %v10618_v25, 1  ;;  %v1434_v60 = vsel %vm1254_vm12, %v1429_v5, %v1433_v15  ;;  %v341_v25 = vsel %vm11102_vm7, 0, %v340_v62  ;;  %v766_v5 = vrot.slane %v11703_v49, 4 }
 0x11a   : > { %3271 = vrot.lane.b32.xlu0 %v3210_v19, %s10982_s17  ;;  %342 = vst [vmem:[#allocation2 + $0xc8] sm:$0x1] %v341_v25 }
 0x11b   : > { %v2651_v41 = vpop.permute.xlu1 %2650  ;;  %2662 = vrot.lane.b32.xlu1 %v2629_v61, %s10979_s14  ;;  %v1733_v51 = vsel %vm1688_vm10, %v1731_v37, %v1732_v38 }
 0x11c   : > { %2692 = vst.msk [vmem:[#allocation4 + $0xa8] sm:$0xff] %vm2684_vm11, %v2651_v41  ;;  %v751_v41 = vshrl.u32 %v491_v39, 16 }
 0x11d   : > { %v926_v23 = vld [vmem:[#allocation2 + $0xc0] sm:$0xf] }
 0x11e   : > { %v1464_v0 = vpop.permute.xlu0 %1463  ;;  %3560 = vrot.lane.b32.xlu0 %v3526_v28, %s10980_s15  ;;  %v753_v45 = vrot.slane %v751_v41, 7  ;;  %v10609_v16 = vld [vmem:[#allocation2 + $0xbc] ss:$0 sps:$4 sm:$0x11]  }
 0x11f   : > { %1504 = vst.msk [vmem:[#allocation4 + $0xc0] sm:$0xff] %vm13064_vm0, %v1464_v0  ;;  %vm13066_vm0 = vcmask 97344   ;;  %v10613_v55 = vld [vmem:[#allocation2 + $0xbc] ss:$0 sps:$4 sm:$0x11]   ;;  %v3219_v7 = vshll.u32 %v10609_v16, 16 }
 0x120   : > { %v3607_v18 = vld [vmem:[#allocation4 + $0x90] sm:$0xff]  ;;  %v757_v4 = vrot.slane %v753_v45, 4  ;;  %v10617_v9 = vld [vmem:[#allocation2 + $0xbc] ss:$0 sps:$4 sm:$0x11]   ;;  %v756_v12 = vor.u32 %v754_v29, %v753_v45  ;;  %v3528_v53 = vrot.slane %v10613_v55, 1 }
 0x121   : > { %10282 = vmatprep.mubr.msk.bf16.mxu0 %vm3644_vm3, %v3607_v18  ;;  %v10621_v13 = vld [vmem:[#allocation2 + $0xbc] ss:$0 sps:$4 sm:$0x11]   ;;  %v3221_v14 = vrot.slane %v3219_v7, 1  ;;  %v1443_v19 = vshll.u32 %v10617_v9, 16 }
 0x122   : > { %v1754_v27 = vpop.permute.xlu0 %1753  ;;  %1475 = vrot.lane.b32.xlu0 %v1434_v60, %s10978_s13  ;;  %v765_v36 = vsel %vm11108_vm8, %v757_v4, %v764_v57  ;;  %v1735_v18 = vrot.slane %v10621_v13, 1  ;;  %v927_v32 = vsel %vm11117_vm9, %v756_v12, %v926_v23  ;;  %v10625_v34 = vld [vmem:[#allocation2 + $0xbc] ss:$0 sps:$4 sm:$0x11]   ;;  %vm13070_vm9 = vcmask 228544   ;;  %v10648_v60 = vld [vmem:[#allocation2 + $0xa8] sm:$0xff]  }
 0x123   : > { %1794 = vst.msk [vmem:[#allocation4 + $0xc0] sm:$0xff] %vm13066_vm0, %v1754_v27  ;;  %vm13068_vm0 = vcmask 27648   ;;  %v1445_v30 = vrot.slane %v1443_v19, 1  ;;  %928 = vst [vmem:[#allocation2 + $0xc0] sm:$0xf] %v927_v32  ;;  %v2331_v39 = vshll.u32 %v10625_v34, 16 }
 0x124   : > { %929 = vst.msk [vmem:[#allocation2 + $0xc4] sm:$0xf] %vm13068_vm0, %v765_v36  ;;  %v10629_v29 = vld [vmem:[#allocation2 + $0xbc] ss:$0 sps:$4 sm:$0x11]  }
 0x125   : > { %v2829_v54 = vpop.permute.xlu1 %2828  ;;  %v2333_v41 = vrot.slane %v2331_v39, 1  ;;  %v930_v45 = vld [vmem:[#allocation2 + $0xc8] sm:$0x1]  ;;  %1076 = vst.msk [vmem:[#allocation4 + $0x150] sm:$0xff] %vm1061_vm14, %v10648_v60  ;;  %v343_v16 = vld [vmem:[#allocation2 + $0xd4] sm:$0x1] }
 0x126   : > { %2870 = vst.msk [vmem:[#allocation4 + $0xa8] sm:$0xff] %vm13063_vm15, %v2829_v54  ;;  %vm13065_vm15 = vcmask 27648   ;;  %1765 = vrot.lane.b32.xlu0 %v1733_v51, %s10976_s11  ;;  %v931_v49 = vsel %vm11171_vm13, %v766_v5, %v930_v45  ;;  %v344_v62 = vsel %vm11102_vm7, 0, %v343_v16  ;;  %vm13071_vm13 = vmmov %vm13070_vm9  ;;  %v359_v45 = vld [vmem:[#allocation3 + $0x18] sm:$0x1] }
 0x127   : > { %922 = vst.msk [vmem:[#allocation2 + $0xb8] sm:$0xf] %vm13065_vm15, %v748_v3  ;;  %vm13067_vm15 = vcmask 64544   ;;  %932 = vst [vmem:[#allocation2 + $0xc8] sm:$0x1] %v931_v49 }
 0x128   : > { %345 = vst [vmem:[#allocation2 + $0xd4] sm:$0x1] %v344_v62  ;;  %v356_v49 = vld [vmem:[#allocation3 + $0xc] sm:$0x1]  ;;  %v419_v62 = vld [vmem:[#allocation3 + $0x38] sm:$0x1] }
 0x129   : > { %v1931_v43 = vpop.permute.xlu0 %1930 }
 0x12a   : > { %1971 = vst.msk [vmem:[#allocation4 + $0xc0] sm:$0xff] %vm1962_vm1, %v1931_v43 }
 0x12b   : > { %v10623_v57 = vld [vmem:[#allocation2 + $0xc0] sm:$0xff]  }
 0x12d   : > { %v3262_v22 = vpop.permute.xlu1 %3261 }
 0x12e   : > { %3303 = vst.msk [vmem:[#allocation4 + $0xa8] sm:$0xff] %vm3295_vm4, %v3262_v22  ;;  %v10605_v44 = vld [vmem:[#allocation2 + $0xb4] sm:$0xff]   ;;  %v10627_v55 = vld [vmem:[#allocation2 + $0xc8] ss:$0 sps:$4 sm:$0x11]  }
 0x12f   : > { %v10608_v46 = vld [vmem:[#allocation2 + $0xb4] sm:$0xff]   ;;  %2840 = vrot.lane.b32.xlu1 %v10605_v44, %s10977_s12  ;;  %v2343_v9 = vshll.u32 %v10627_v55, 16  ;;  %v10637_v12 = vld [vmem:[#allocation2 + $0xc8] ss:$0 sps:$4 sm:$0x11]  }
 0x130   : > { %v10612_v47 = vld [vmem:[#allocation2 + $0xb4] sm:$0xfe]   ;;  %v3212_v52 = vshrl.u32 %v10608_v46, 16  ;;  %v3214_v54 = vshll.u32 %v10608_v46, 16  ;;  %v2364_v3 = vpop.permute.xlu0 %2363  ;;  %v2631_v46 = vrot.slane %v10629_v29, 1 }
 0x131   : > { %v3551_v56 = vpop.permute.xlu1 %3550  ;;  %v10616_v50 = vld [vmem:[#allocation2 + $0xb4] sm:$0xff]   ;;  %v3527_v8 = vrot.slane %v10612_v47, 1  ;;  %2404 = vst.msk [vmem:[#allocation4 + $0xc0] sm:$0xff] %vm2395_vm5, %v2364_v3  ;;  %v2345_v19 = vrot.slane %v2343_v9, 1  ;;  %v10642_v29 = vld [vmem:[#allocation2 + $0xcc] sm:$0xfe]  }
 0x132   : > { %3592 = vst.msk [vmem:[#allocation4 + $0xa8] sm:$0xff] %vm3584_vm6, %v3551_v56  ;;  %v1436_v63 = vshrl.u32 %v10616_v50, 16  ;;  %v1438_v58 = vshll.u32 %v10616_v50, 16  ;;  %v11710_v59 = vld [vmem:[#allocation2 + $0xb4] sm:$0xfe]   ;;  %v3216_v26 = vrot.slane %v3214_v54, 1 }
 0x133   : > { %v10622_v61 = vld [vmem:[#allocation2 + $0xb4] sm:$0xff]   ;;  %v1734_v20 = vrot.slane %v11710_v59, 1  ;;  %v3529_v31 = vsel %vm1688_vm10, %v3527_v8, %v3528_v53  ;;  %v10636_v54 = vld [vmem:[#allocation2 + $0xc0] sm:$0xff]  }
 0x134   : > { %v1440_v2 = vrot.slane %v1438_v58, 1  ;;  %v3217_v6 = vor.u32 %v3216_v26, %v3212_v52  ;;  %v10624_v22 = vld [vmem:[#allocation2 + $0xb4] sm:$0xff]   ;;  %1942 = vrot.lane.b32.xlu0 %v10622_v61, %s10975_s10  ;;  %v2653_v27 = vpop.permute.xlu0 %2652  ;;  %v287_v52 = vld [vmem:[#allocation2 + $0xcc] sm:$0x1]  ;;  %v10634_v8 = vld [vmem:[#allocation2 + $0xc0] sm:$0xff]   ;;  %v3226_v61 = vshll.u32 %v10636_v54, 16 }
 0x135   : > { %v1466_v48 = vpop.permute.xlu1 %1465  ;;  %v2324_v33 = vshrl.u32 %v10624_v22, 16  ;;  %2693 = vst.msk [vmem:[#allocation4 + $0xc0] sm:$0xff] %vm2684_vm11, %v2653_v27  ;;  %v2326_v15 = vshll.u32 %v10624_v22, 16  ;;  %v10628_v40 = vld [vmem:[#allocation2 + $0xb4] sm:$0xfe]   ;;  %v1736_v51 = vsel %vm1688_vm10, %v1734_v20, %v1735_v18  ;;  %v288_v21 = vsel %vm11069_vm2, 0, %v287_v52 }
 0x136   : > { %1505 = vst.msk [vmem:[#allocation4 + $0xd8] sm:$0xff] %vm13067_vm15, %v1466_v48  ;;  %vm13069_vm15 = vcmask 97344   ;;  %v3222_v28 = vsel %vm1254_vm12, %v3217_v6, %v3221_v14  ;;  %v1441_v35 = vor.u32 %v1440_v2, %v1436_v63  ;;  %v2630_v43 = vrot.slane %v10628_v40, 1  ;;  %v10649_v47 = vld [vmem:[#allocation2 + $0xb4] sm:$0xff]   ;;  %v10626_v48 = vld [vmem:[#allocation2 + $0xc0] sm:$0xff]  }
 0x137   : > { %3273 = vrot.lane.b32.xlu1 %v3222_v28, %s10982_s17  ;;  %v2328_v38 = vrot.slane %v2326_v15, 1  ;;  %1077 = vst.msk [vmem:[#allocation4 + $0x168] sm:$0xff] %vm1061_vm14, %v10649_v47  ;;  %v2338_v4 = vshll.u32 %v10626_v48, 16  ;;  %v2336_v63 = vshrl.u32 %v10626_v48, 16  ;;  %v10630_v59 = vld [vmem:[#allocation2 + $0xc0] sm:$0xfe]   ;;  %vm13073_vm0 = vmmov %vm13069_vm15 }
 0x138   : > { %v1446_v10 = vsel %vm1254_vm12, %v1441_v35, %v1445_v30  ;;  %v2632_v50 = vsel %vm1688_vm10, %v2630_v43, %v2631_v46  ;;  %289 = vst [vmem:[#allocation2 + $0xcc] sm:$0x1] %v288_v21  ;;  %v3224_v36 = vshrl.u32 %v10636_v54, 16  ;;  %v3228_v2 = vrot.slane %v3226_v61, 1  ;;  %v410_v52 = vld [vmem:[#allocation3 + $0x14] sm:$0x1] }
 0x139   : > { %v1756_v0 = vpop.permute.xlu1 %1755  ;;  %v3608_v37 = vld [vmem:[#allocation4 + $0xa8] sm:$0xff]  ;;  %v2329_v56 = vor.u32 %v2328_v38, %v2324_v33  ;;  %v2340_v58 = vrot.slane %v2338_v4, 1  ;;  %v10631_v6 = vld [vmem:[#allocation2 + $0xc8] ss:$0 sps:$4 sm:$0x11]   ;;  %v2633_v13 = vrot.slane %v10630_v59, 1 }
 0x13a   : > { %1795 = vst.msk [vmem:[#allocation4 + $0xd8] sm:$0xff] %vm13069_vm15, %v1756_v0  ;;  %10283 = vmatmul.mubr.msk.bf16.gmra.mrb[12].mxu0 %vm3644_vm3, %v3608_v37  ;;  %v10640_v0 = vld [vmem:[#allocation2 + $0xc0] sm:$0xfe]   ;;  %v10641_v14 = vld [vmem:[#allocation2 + $0xc8] ss:$0 sps:$4 sm:$0x11]   ;;  %v3229_v22 = vor.u32 %v3228_v2, %v3224_v36 }
 0x13b   : > { %3562 = vrot.lane.b32.xlu1 %v3529_v31, %s10980_s15  ;;  %v2831_v42 = vpop.permute.xlu0 %2830  ;;  %v2334_v44 = vsel %vm1254_vm12, %v2329_v56, %v2333_v41  ;;  %v2341_v7 = vor.u32 %v2340_v58, %v2336_v63  ;;  %v2634_v20 = vrot.slane %v10631_v6, 1  ;;  %v3231_v18 = vshll.u32 %v10637_v12, 16  ;;  %v10639_v15 = vld [vmem:[#allocation2 + $0xd4] ss:$0 sps:$4 sm:$0x11]  }
 0x13c   : > { %2871 = vst.msk [vmem:[#allocation4 + $0xc0] sm:$0xff] %vm13070_vm9, %v2831_v42  ;;  %2375 = vrot.lane.b32.xlu0 %v2334_v44, %s10981_s16  ;;  %v3530_v27 = vrot.slane %v10640_v0, 1  ;;  %v3531_v33 = vrot.slane %v10641_v14, 1  ;;  %v3243_v38 = vshll.u32 %v10639_v15, 16  ;;  %vm13072_vm14 = vcmask 64544   ;;  %vm13075_vm9 = vmmov %vm13073_vm0 }
 0x13d   : > { %v1933_v24 = vpop.permute.xlu1 %1932  ;;  %v2346_v28 = vsel %vm1254_vm12, %v2341_v7, %v2345_v19  ;;  %v3233_v30 = vrot.slane %v3231_v18, 1  ;;  %v2635_v31 = vsel %vm1688_vm10, %v2633_v13, %v2634_v20  ;;  %v10643_v56 = vld [vmem:[#allocation2 + $0xd4] ss:$0 sps:$4 sm:$0x11]   ;;  %v3533_v46 = vrot.slane %v10642_v29, 1  ;;  %vm13074_vm15 = vmmov %vm13072_vm14 }
 0x13e   : > { %1972 = vst.msk [vmem:[#allocation4 + $0xd8] sm:$0xff] %vm1962_vm1, %v1933_v24  ;;  %v3532_v40 = vsel %vm1688_vm10, %v3530_v27, %v3531_v33  ;;  %v360_v47 = vsel %vm11069_vm2, 0, %v359_v45  ;;  %v413_v4 = vld [vmem:[#allocation3 + $0x20] sm:$0x1]  ;;  %v411_v21 = vsel %vm11102_vm7, 0, %v410_v52  ;;  %v420_v2 = vsel %vm11102_vm7, 0, %v419_v62 }
 0x13f   : > { %1477 = vrot.lane.b32.xlu1 %v1446_v10, %s10978_s13  ;;  %v10638_v23 = vld [vmem:[#allocation2 + $0xcc] sm:$0xff]   ;;  %v3234_v35 = vsel %vm1254_vm12, %v3229_v22, %v3233_v30  ;;  %v3245_v10 = vrot.slane %v3243_v38, 1  ;;  %361 = vst [vmem:[#allocation3 + $0x18] sm:$0x1] %v360_v47  ;;  %v407_v63 = vld [vmem:[#allocation3 + $0x8] sm:$0x1]  ;;  %s12974_s13 = scalar_lea.hbm %s13031_s5, %s10114_s6 }
 0x140   : > { %2664 = vrot.lane.b32.xlu0 %v2632_v50, %s10979_s14  ;;  %v3238_v32 = vshll.u32 %v10638_v23, 16  ;;  %v3236_v5 = vshrl.u32 %v10638_v23, 16  ;;  %v10635_v24 = vld [vmem:[#allocation2 + $0xcc] sm:$0xff]   ;;  %v3534_v50 = vrot.slane %v10643_v56, 1  ;;  %412 = vst [vmem:[#allocation3 + $0x14] sm:$0x1] %v411_v21 }
 0x141   : > { %v408_v61 = vsel %vm11102_vm7, 0, %v407_v63  ;;  %v362_v36 = vld [vmem:[#allocation3 + $0x24] sm:$0x1]  ;;  %421 = vst [vmem:[#allocation3 + $0x38] sm:$0x1] %v420_v2 }
 0x142   : > { %v3240_v37 = vrot.slane %v3238_v32, 1  ;;  %409 = vst [vmem:[#allocation3 + $0x8] sm:$0x1] %v408_v61  ;;  %v3535_v16 = vsel %vm1688_vm10, %v3533_v46, %v3534_v50  ;;  %v363_v55 = vsel %vm11069_vm2, 0, %v362_v36  ;;  %v10652_v20 = vld [vmem:[#allocation3] sm:$0xfe]  }
 0x143   : > { %1767 = vrot.lane.b32.xlu1 %v1736_v51, %s10976_s11  ;;  %v2366_v26 = vpop.permute.xlu1 %2365  ;;  %v357_v51 = vsel %vm11069_vm2, 0, %v356_v49  ;;  %364 = vst [vmem:[#allocation3 + $0x24] sm:$0x1] %v363_v55  ;;  %v368_v38 = vld [vmem:[#allocation3 + $0x3c] sm:$0x1] }
 0x144   : > { %2405 = vst.msk [vmem:[#allocation4 + $0xd8] sm:$0xff] %vm2395_vm5, %v2366_v26  ;;  %2842 = vrot.lane.b32.xlu0 %v10634_v8, %s10977_s12  ;;  %v3241_v42 = vor.u32 %v3240_v37, %v3236_v5  ;;  %358 = vst [vmem:[#allocation3 + $0xc] sm:$0x1] %v357_v51  ;;  %v414_v8 = vsel %vm11102_vm7, 0, %v413_v4  ;;  %v365_v26 = vld [vmem:[#allocation3 + $0x30] sm:$0x1] }
 0x145   : > { %v3264_v3 = vpop.permute.xlu0 %3263  ;;  %415 = vst [vmem:[#allocation3 + $0x20] sm:$0x1] %v414_v8  ;;  %v366_v0 = vsel %vm11069_vm2, 0, %v365_v26  ;;  %v377_v49 = vld [vmem:[#allocation3 + $0x60] sm:$0x1] }
 0x146   : > { %3304 = vst.msk [vmem:[#allocation4 + $0xc0] sm:$0xff] %vm3295_vm4, %v3264_v3  ;;  %v3246_v48 = vsel %vm1254_vm12, %v3241_v42, %v3245_v10  ;;  %v416_v3 = vld [vmem:[#allocation3 + $0x2c] sm:$0x1]  ;;  %367 = vst [vmem:[#allocation3 + $0x30] sm:$0x1] %v366_v0 }
 0x147   : > { %1944 = vrot.lane.b32.xlu1 %v10623_v57, %s10975_s10  ;;  %v2655_v53 = vpop.permute.xlu1 %2654  ;;  %v353_v57 = vld [vmem:[#allocation3] sm:$0x1]  ;;  %v417_v12 = vsel %vm11102_vm7, 0, %v416_v3  ;;  %v11840_v61 = vld [vmem:[%s13028_s2] ss:$0 sm:$0xff] }
 0x148   : > { %2694 = vst.msk [vmem:[#allocation4 + $0xd8] sm:$0xff] %vm2684_vm11, %v2655_v53  ;;  %3275 = vrot.lane.b32.xlu0 %v3234_v35, %s10982_s17  ;;  %v354_v59 = vsel %vm11069_vm2, 0, %v353_v57  ;;  %v371_v53 = vld [vmem:[#allocation3 + $0x48] sm:$0x1]  ;;  %418 = vst [vmem:[#allocation3 + $0x2c] sm:$0x1] %v417_v12 }
 0x149   : > { %v3553_v25 = vpop.permute.xlu0 %3552  ;;  %355 = vst [vmem:[#allocation3] sm:$0x1] %v354_v59  ;;  %v372_v13 = vsel %vm11069_vm2, 0, %v371_v53  ;;  %v10651_v22 = vld [vmem:[#allocation3 + $0x8] ss:$0 sps:$4 sm:$0x11]  }
 0x14a   : > { %3593 = vst.msk [vmem:[#allocation4 + $0xc0] sm:$0xff] %vm3584_vm6, %v3553_v25  ;;  %373 = vst [vmem:[#allocation3 + $0x48] sm:$0x1] %v372_v13  ;;  %v10653_v25 = vld [vmem:[#allocation3 + $0x8] ss:$0 sps:$4 sm:$0x11]  }
 0x14b   : > { %2377 = vrot.lane.b32.xlu1 %v2346_v28, %s10981_s16  ;;  %v4750_v27 = vshll.u32 %v10651_v22, 16  ;;  %v5176_v15 = vrot.slane %v10653_v25, 1  ;;  %v431_v62 = vld [vmem:[#allocation3 + $0x68] sm:$0x1]  ;;  %v428_v2 = vld [vmem:[#allocation3 + $0x5c] sm:$0x1] }
 0x14c   : > { %3564 = vrot.lane.b32.xlu0 %v3532_v40, %s10980_s15  ;;  %v432_v55 = vsel %vm11102_vm7, 0, %v431_v62  ;;  %s10986_s16 = smov [#allocation5]  }
 0x14d   : > { %v1468_v39 = vpop.permute.xlu0 %1467  ;;  %v4752_v32 = vrot.slane %v4750_v27, 1  ;;  %433 = vst [vmem:[#allocation3 + $0x68] sm:$0x1] %v432_v55 }
 0x14e   : > { %1506 = vst.msk [vmem:[#allocation4 + $0xf0] sm:$0xff] %vm13072_vm14, %v1468_v39  ;;  %v369_v39 = vsel %vm11069_vm2, 0, %v368_v38  ;;  %vm13076_vm14 = vmmov %vm13071_vm13 }
 0x14f   : > { %v2833_v34 = vpop.permute.xlu1 %2832  ;;  %2666 = vrot.lane.b32.xlu1 %v2635_v31, %s10979_s14  ;;  %370 = vst [vmem:[#allocation3 + $0x3c] sm:$0x1] %v369_v39  ;;  %v4316_v39 = vld [vmem:[#allocation3 + $0x18] sm:$0xf] }
 0x150   : > { %2872 = vst.msk [vmem:[#allocation4 + $0xd8] sm:$0xff] %vm13071_vm13, %v2833_v34  ;;  %v10650_v19 = vld [vmem:[#allocation3] sm:$0xff]   ;;  %v5175_v34 = vrot.slane %v10652_v20, 1 }
 0x151   : > { %v3609_v43 = vld [vmem:[#allocation4 + $0xc0] sm:$0xff]  ;;  %v1758_v60 = vpop.permute.xlu0 %1757  ;;  %v4743_v18 = vshrl.u32 %v10650_v19, 16  ;;  %v4745_v23 = vshll.u32 %v10650_v19, 16 }
 0x152   : > { %10286 = vmatprep.mubr.msk.bf16.mxu0 %vm3644_vm3, %v3609_v43  ;;  %1796 = vst.msk [vmem:[#allocation4 + $0xf0] sm:$0xff] %vm13073_vm0, %v1758_v60  ;;  %v5177_v5 = vsel %vm1688_vm10, %v5175_v34, %v5176_v15  ;;  %vm13077_vm0 = vmmov %vm13074_vm15 }
 0x153   : > { %v3266_v41 = vpop.permute.xlu1 %3265  ;;  %2844 = vrot.lane.b32.xlu1 %v10635_v24, %s10977_s12  ;;  %v4747_v28 = vrot.slane %v4745_v23, 1  ;;  %v425_v24 = vld [vmem:[#allocation3 + $0x50] sm:$0x1]  ;;  %s10984_s12 = smov 96  }
 0x154   : > { %3305 = vst.msk [vmem:[#allocation4 + $0xd8] sm:$0xff] %vm3295_vm4, %v3266_v41  ;;  %v426_v56 = vsel %vm11102_vm7, 0, %v425_v24  ;;  %v422_v41 = vld [vmem:[#allocation3 + $0x44] sm:$0x1] }
 0x155   : > { %v1935_v54 = vpop.permute.xlu0 %1934  ;;  %v4748_v33 = vor.u32 %v4747_v28, %v4743_v18  ;;  %427 = vst [vmem:[#allocation3 + $0x50] sm:$0x1] %v426_v56  ;;  %v423_v42 = vsel %vm11102_vm7, 0, %v422_v41 }
 0x156   : > { %1973 = vst.msk [vmem:[#allocation4 + $0xf0] sm:$0xff] %vm1962_vm1, %v1935_v54  ;;  %424 = vst [vmem:[#allocation3 + $0x44] sm:$0x1] %v423_v42 }
 0x157   : > { %v3555_v44 = vpop.permute.xlu1 %3554  ;;  %3277 = vrot.lane.b32.xlu1 %v3246_v48, %s10982_s17  ;;  %v4753_v35 = vsel %vm1254_vm12, %v4748_v33, %v4752_v32  ;;  %v378_v48 = vsel %vm11069_vm2, 0, %v377_v49  ;;  %s10914_s17 = sshll.u32 %s10986_s16, 4  ;;  %s10915_s17 = int_to_ptr.vmem [resolvable:$false] %s10914_s17 }
 0x158   : > { %3594 = vst.msk [vmem:[#allocation4 + $0xd8] sm:$0xff] %vm3584_vm6, %v3555_v44  ;;  %379 = vst [vmem:[#allocation3 + $0x60] sm:$0x1] %v378_v48 }
 0x159   : > { %v2368_v9 = vpop.permute.xlu0 %2367 }
 0x15a   : > { %2406 = vst.msk [vmem:[#allocation4 + $0xf0] sm:$0xff] %vm2395_vm5, %v2368_v9 }
 0x15b   : > { %v1470_v58 = vpop.permute.xlu1 %1469  ;;  %3566 = vrot.lane.b32.xlu1 %v3535_v16, %s10980_s15  ;;  %v374_v16 = vld [vmem:[#allocation3 + $0x54] sm:$0x1] }
 0x15c   : > { %1507 = vst.msk [vmem:[#allocation4 + $0x108] sm:$0xff] %vm13074_vm15, %v1470_v58  ;;  %vm13078_vm15 = vmmov %vm13075_vm9  ;;  %v375_v36 = vsel %vm11069_vm2, 0, %v374_v16 }
 0x15d   : > { %v2657_v14 = vpop.permute.xlu0 %2656  ;;  %376 = vst [vmem:[#allocation3 + $0x54] sm:$0x1] %v375_v36 }
 0x15e   : > { %2695 = vst.msk [vmem:[#allocation4 + $0xf0] sm:$0xff] %vm2684_vm11, %v2657_v14 }
 0x15f   : > { %v1760_v6 = vpop.permute.xlu1 %1759  ;;  %v3610_v7 = vld [vmem:[#allocation4 + $0xd8] sm:$0xff]  ;;  %4934 = vrot.lane.b32.xlu1 %v4753_v35, %s10980_s15 }
 0x160   : > { %1797 = vst.msk [vmem:[#allocation4 + $0x108] sm:$0xff] %vm13075_vm9, %v1760_v6  ;;  %10287 = vmatmul.mubr.msk.bf16.gmra.mrb[16].mxu0 %vm3644_vm3, %v3610_v7  ;;  %vm13079_vm9 = vmmov %vm13077_vm0  ;;  %v429_v7 = vsel %vm11102_vm7, 0, %v428_v2 }
 0x161   : > { %430 = vst [vmem:[#allocation3 + $0x5c] sm:$0x1] %v429_v7 }
 0x162   : > { %v2835_v31 = vpop.permute.xlu0 %2834 }
 0x163   : > { %v1937_v30 = vpop.permute.xlu1 %1936  ;;  %2873 = vst.msk [vmem:[#allocation4 + $0xf0] sm:$0xff] %vm13071_vm13, %v2835_v31  ;;  %5223 = vrot.lane.b32.xlu1 %v5177_v5, %s10983_s8  ;;  %vm13080_vm13 = vmmov %vm13078_vm15 }
 0x164   : > { %1974 = vst.msk [vmem:[#allocation4 + $0x108] sm:$0xff] %vm1962_vm1, %v1937_v30 }
 0x169   : > { %v2370_v37 = vpop.permute.xlu1 %2369 }
 0x16a   : > { %2407 = vst.msk [vmem:[#allocation4 + $0x108] sm:$0xff] %vm2395_vm5, %v2370_v37 }
 0x16c   : > { %v3268_v40 = vpop.permute.xlu0 %3267 }
 0x16d   : > { %v2659_v29 = vpop.permute.xlu1 %2658  ;;  %3306 = vst.msk [vmem:[#allocation4 + $0xf0] sm:$0xff] %vm3295_vm4, %v3268_v40 }
 0x16e   : > { %2696 = vst.msk [vmem:[#allocation4 + $0x108] sm:$0xff] %vm2684_vm11, %v2659_v29  ;;  %v4309_v29 = vld [vmem:[#allocation3 + $0xc] sm:$0xf] }
 0x170   : > { %v3557_v10 = vpop.permute.xlu0 %3556 }
 0x171   : > { %v2837_v43 = vpop.permute.xlu1 %2836  ;;  %3595 = vst.msk [vmem:[#allocation4 + $0xf0] sm:$0xff] %vm3584_vm6, %v3557_v10 }
 0x172   : > { %2874 = vst.msk [vmem:[#allocation4 + $0x108] sm:$0xff] %vm13076_vm14, %v2837_v43 }
 0x174   : > { %v1472_v44 = vpop.permute.xlu0 %1471 }
 0x175   : > { %v3270_v60 = vpop.permute.xlu1 %3269  ;;  %1508 = vst.msk [vmem:[#allocation4 + $0x120] sm:$0xff] %vm13077_vm0, %v1472_v44  ;;  %vm13081_vm0 = vmmov %vm13076_vm14 }
 0x176   : > { %3307 = vst.msk [vmem:[#allocation4 + $0x108] sm:$0xff] %vm3295_vm4, %v3270_v60 }
 0x178   : > { %v3611_v45 = vld [vmem:[#allocation4 + $0xf0] sm:$0xff]  ;;  %v1762_v47 = vpop.permute.xlu0 %1761 }
 0x179   : > { %v3559_v46 = vpop.permute.xlu1 %3558  ;;  %10290 = vmatprep.mubr.msk.bf16.mxu0 %vm3644_vm3, %v3611_v45  ;;  %1798 = vst.msk [vmem:[#allocation4 + $0x120] sm:$0xff] %vm13078_vm15, %v1762_v47  ;;  %vm13082_vm15 = vmmov %vm13079_vm9  ;;  %v4320_v45 = vld [vmem:[#allocation3 + $0x20] sm:$0x1] }
 0x17a   : > { %3596 = vst.msk [vmem:[#allocation4 + $0x108] sm:$0xff] %vm3584_vm6, %v3559_v46 }
 0x17c   : > { %v1939_v51 = vpop.permute.xlu0 %1938 }
 0x17d   : > { %v1474_v50 = vpop.permute.xlu1 %1473  ;;  %1975 = vst.msk [vmem:[#allocation4 + $0x120] sm:$0xff] %vm1962_vm1, %v1939_v51 }
 0x17e   : > { %1509 = vst.msk [vmem:[#allocation4 + $0x138] sm:$0xff] %vm13079_vm9, %v1474_v50  ;;  %vm13083_vm9 = vmmov %vm13080_vm13 }
 0x180   : > { %v2372_v54 = vpop.permute.xlu0 %2371 }
 0x181   : > { %v1764_v4 = vpop.permute.xlu1 %1763  ;;  %v3612_v52 = vld [vmem:[#allocation4 + $0x108] sm:$0xff]  ;;  %2408 = vst.msk [vmem:[#allocation4 + $0x120] sm:$0xff] %vm2395_vm5, %v2372_v54  ;;  %v4313_v54 = vld [vmem:[#allocation3 + $0x14] sm:$0x1] }
 0x182   : > { %1799 = vst.msk [vmem:[#allocation4 + $0x138] sm:$0xff] %vm13080_vm13, %v1764_v4  ;;  %10291 = vmatmul.mubr.msk.bf16.gmra.mrb[20].mxu0 %vm3644_vm3, %v3612_v52  ;;  %vm13084_vm13 = vsmask.f32 7938 }
 0x184   : > { %v2661_v21 = vpop.permute.xlu0 %2660 }
 0x185   : > { %v1941_v8 = vpop.permute.xlu1 %1940  ;;  %2697 = vst.msk [vmem:[#allocation4 + $0x120] sm:$0xff] %vm2684_vm11, %v2661_v21 }
 0x186   : > { %1976 = vst.msk [vmem:[#allocation4 + $0x138] sm:$0xff] %vm1962_vm1, %v1941_v8  ;;  %v383_v8 = vld [vmem:[#allocation3 + $0x78] sm:$0x1] }
 0x188   : > { %v2839_v57 = vpop.permute.xlu0 %2838 }
 0x189   : > { %v2374_v63 = vpop.permute.xlu1 %2373  ;;  %2875 = vst.msk [vmem:[#allocation4 + $0x120] sm:$0xff] %vm13076_vm14, %v2839_v57  ;;  %vm13085_vm14 = vcmask 257024  }
 0x18a   : > { %2409 = vst.msk [vmem:[#allocation4 + $0x138] sm:$0xff] %vm2395_vm5, %v2374_v63 }
 0x18c   : > { %v3272_v59 = vpop.permute.xlu0 %3271 }
 0x18d   : > { %v2663_v58 = vpop.permute.xlu1 %2662  ;;  %3308 = vst.msk [vmem:[#allocation4 + $0x120] sm:$0xff] %vm3295_vm4, %v3272_v59  ;;  %v384_v59 = vsel %vm11069_vm2, 0, %v383_v8 }
 0x18e   : > { %2698 = vst.msk [vmem:[#allocation4 + $0x138] sm:$0xff] %vm2684_vm11, %v2663_v58  ;;  %385 = vst [vmem:[#allocation3 + $0x78] sm:$0x1] %v384_v59 }
 0x190   : > { %v3561_v26 = vpop.permute.xlu0 %3560 }
 0x191   : > { %3597 = vst.msk [vmem:[#allocation4 + $0x120] sm:$0xff] %vm3584_vm6, %v3561_v26 }
 0x194   : > { %v1476_v13 = vpop.permute.xlu0 %1475 }
 0x195   : > { %1510 = vst.msk [vmem:[#allocation4 + $0x150] sm:$0xff] %vm13082_vm15, %v1476_v13  ;;  %vm13088_vm15 = vmmov %vm13085_vm14 }
 0x198   : > { %v1766_v28 = vpop.permute.xlu0 %1765  ;;  %v3613_v30 = vld [vmem:[#allocation4 + $0x120] sm:$0xff] }
 0x199   : > { %1800 = vst.msk [vmem:[#allocation4 + $0x150] sm:$0xff] %vm13083_vm9, %v1766_v28  ;;  %10294 = vmatprep.mubr.msk.bf16.mxu0 %vm3644_vm3, %v3613_v30  ;;  %vm13089_vm9 = vmmov %vm13085_vm14 }
 0x19a   : > { %v10272_v0 = vpop.f32.mrb[0].mxu0 }
 0x19b   : > { %v3740_v3 = vadd.f32 %v10272_v0, %v11840_v61  ;;  %v3731_v6 = vpop.f32.mrb[1].mxu0 }
 0x19c   : > { %v3732_v9 = vadd.f32 %v11840_v61, %v3731_v6  ;;  %v10273_v12 = vpop.f32.mrb[2].mxu0 }
 0x19d   : > { %v3860_v14 = vmax.f32 %v3740_v3, 0.0  ;;  %v3743_v19 = vadd.f32 %v10273_v12, %v11840_v61  ;;  %v3734_v22 = vpop.f32.mrb[3].mxu0 }
 0x19e   : > { %v3858_v20 = vmax.f32 %v3732_v9, 0.0  ;;  %v3735_v25 = vadd.f32 %v11840_v61, %v3734_v22 }
 0x19f   : > { %v10084_v18 = vpack.c.bf16 %v3860_v14, %v3860_v14  ;;  %v3861_v23 = vmax.f32 %v3743_v19, 0.0 }
 0x1a0   : > { %v10082_v27 = vpack.c.bf16 %v3858_v20, %v3858_v20  ;;  %v3859_v34 = vmax.f32 %v3735_v25, 0.0 }
 0x1a1   : > { %v2841_v53 = vpop.permute.xlu1 %2840  ;;  %v4004_v32 = vshrl.u32 %v10084_v18, 16  ;;  %v10085_v33 = vpack.c.bf16 %v3861_v23, %v3861_v23  ;;  %v4007_v35 = vshll.u32 %v10084_v18, 16 }
 0x1a2   : > { %2876 = vst.msk [vmem:[#allocation4 + $0x138] sm:$0xff] %vm13081_vm0, %v2841_v53  ;;  %v3987_v15 = vshrl.u32 %v10082_v27, 16  ;;  %v10083_v37 = vpack.c.bf16 %v3859_v34, %v3859_v34  ;;  %vm11859_vm0 = vmand %vm13085_vm14, %vm13084_vm13  ;;  %v3990_v40 = vshll.u32 %v10082_v27, 16  ;;  %vm13090_vm13 = vcmask 64544  }
 0x1a3   : > { %v4006_v31 = vrot.slane %v4004_v32, 7  ;;  %v4012_v5 = vshrl.u32 %v10085_v33, 16  ;;  %v4015_v10 = vshll.u32 %v10085_v33, 16  ;;  %vm13091_vm14 = vcmask 97344  }
 0x1a4   : > { %v3989_v24 = vrot.slane %v3987_v15, 7  ;;  %v3995_v43 = vshrl.u32 %v10083_v37, 16  ;;  %v3998_v46 = vshll.u32 %v10083_v37, 16 }
 0x1a5   : > { %v4009_v41 = vor.u32 %v4007_v35, %v4006_v31  ;;  %v4014_v42 = vrot.slane %v4012_v5, 7  ;;  %v4010_v60 = vrot.slane %v4006_v31, 4 }
 0x1a6   : > { %v1943_v56 = vpop.permute.xlu0 %1942  ;;  %v3992_v44 = vor.u32 %v3990_v40, %v3989_v24  ;;  %v3997_v51 = vrot.slane %v3995_v43, 7  ;;  %v3993_v4 = vrot.slane %v3989_v24, 4 }
 0x1a7   : > { %1977 = vst.msk [vmem:[#allocation4 + $0x150] sm:$0xff] %vm1962_vm1, %v1943_v56  ;;  %v4317_v49 = vsel %vm11859_vm0, %v4009_v41, %v4316_v39  ;;  %v4017_v48 = vor.u32 %v4015_v10, %v4014_v42  ;;  %v4019_v50 = vrot.slane %v4014_v42, 4 }
 0x1a8   : > { %4318 = vst [vmem:[#allocation3 + $0x18] sm:$0xf] %v4317_v49  ;;  %v4310_v52 = vsel %vm11859_vm0, %v3992_v44, %v4309_v29  ;;  %v4000_v63 = vor.u32 %v3998_v46, %v3997_v51  ;;  %v4002_v58 = vrot.slane %v3997_v51, 4 }
 0x1a9   : > { %v3274_v47 = vpop.permute.xlu1 %3273  ;;  %4311 = vst [vmem:[#allocation3 + $0xc] sm:$0xf] %v4310_v52  ;;  %v4018_v21 = vsel %vm11108_vm8, %v4010_v60, %v4017_v48  ;;  %v4321_v57 = vsel %vm11069_vm2, %v4019_v50, %v4320_v45 }
 0x1aa   : > { %3309 = vst.msk [vmem:[#allocation4 + $0x138] sm:$0xff] %vm3295_vm4, %v3274_v47  ;;  %4322 = vst [vmem:[#allocation3 + $0x20] sm:$0x1] %v4321_v57  ;;  %v4001_v26 = vsel %vm11108_vm8, %v3993_v4, %v4000_v63  ;;  %v4314_v36 = vsel %vm11069_vm2, %v4002_v58, %v4313_v54 }
 0x1ab   : > { %4319 = vst.msk [vmem:[#allocation3 + $0x1c] sm:$0xf] %vm13088_vm15, %v4018_v21  ;;  %4315 = vst [vmem:[#allocation3 + $0x14] sm:$0x1] %v4314_v36  ;;  %vm13092_vm15 = vcmask 228544  }
 0x1ac   : > { %4312 = vst.msk [vmem:[#allocation3 + $0x10] sm:$0xf] %vm13089_vm9, %v4001_v26 }
 0x1ad   : > { %v3563_v16 = vpop.permute.xlu1 %3562 }
 0x1ae   : > { %3598 = vst.msk [vmem:[#allocation4 + $0x138] sm:$0xff] %vm3584_vm6, %v3563_v16  ;;  %v2376_v62 = vpop.permute.xlu0 %2375 }
 0x1af   : > { %2410 = vst.msk [vmem:[#allocation4 + $0x150] sm:$0xff] %vm2395_vm5, %v2376_v62 }
 0x1b1   : > { %v1478_v0 = vpop.permute.xlu1 %1477  ;;  %v10657_v12 = vld [vmem:[#allocation3 + $0x20] ss:$0 sps:$4 sm:$0x11]  }
 0x1b2   : > { %1511 = vst.msk [vmem:[#allocation4 + $0x168] sm:$0xff] %vm13090_vm13, %v1478_v0  ;;  %v10654_v55 = vld [vmem:[#allocation3 + $0x18] sm:$0xff]   ;;  %v2665_v2 = vpop.permute.xlu0 %2664  ;;  %v6045_v14 = vrot.slane %v10657_v12, 1  ;;  %v10660_v22 = vld [vmem:[#allocation3 + $0x14] ss:$0 sps:$4 sm:$0x11]  }
 0x1b3   : > { %v10655_v3 = vld [vmem:[#allocation3 + $0x18] sm:$0xff]   ;;  %2699 = vst.msk [vmem:[#allocation4 + $0x150] sm:$0xff] %vm2684_vm11, %v2665_v2  ;;  %6266 = vrot.lane.b32.xlu0 %v10654_v55, %s10983_s8  ;;  %v10658_v53 = vld [vmem:[#allocation3 + $0xc] sm:$0xff]   ;;  %v6042_v32 = vrot.slane %v10660_v22, 1 }
 0x1b4   : > { %v10656_v9 = vld [vmem:[#allocation3 + $0x18] sm:$0xfe]   ;;  %5402 = vrot.lane.b32.xlu1 %v10655_v3, %s10984_s12  ;;  %v10659_v19 = vld [vmem:[#allocation3 + $0xc] sm:$0xfe]  }
 0x1b5   : > { %v1768_v6 = vpop.permute.xlu1 %1767  ;;  %v3614_v7 = vld [vmem:[#allocation4 + $0x138] sm:$0xff]  ;;  %v6044_v13 = vrot.slane %v10656_v9, 1  ;;  %v10663_v18 = vld [vmem:[#allocation3 + $0x18] sm:$0xff]   ;;  %v6041_v27 = vrot.slane %v10659_v19, 1  ;;  %v10719_v55 = vld [vmem:[%s13029_s3 + $0x40] sm:$0xff]  }
 0x1b6   : > { %1801 = vst.msk [vmem:[#allocation4 + $0x168] sm:$0xff] %vm13091_vm14, %v1768_v6  ;;  %10295 = vmatmul.mubr.msk.bf16.gmra.mrb[24].mxu0 %vm3644_vm3, %v3614_v7  ;;  %v2843_v20 = vpop.permute.xlu0 %2842  ;;  %v10661_v28 = vld [vmem:[#allocation3 + $0x18] sm:$0xfe]   ;;  %v10662_v33 = vld [vmem:[#allocation3 + $0x20] ss:$0 sps:$4 sm:$0x11]   ;;  %10134 = vmatprep.subr.bf16.mxu0 %v10719_v55 }
 0x1b7   : > { %2877 = vst.msk [vmem:[#allocation4 + $0x150] sm:$0xff] %vm13092_vm15, %v2843_v20  ;;  %v6046_v25 = vsel %vm1688_vm10, %v6044_v13, %v6045_v14  ;;  %v10667_v30 = vld [vmem:[#allocation3 + $0x18] sm:$0xff]   ;;  %v5181_v34 = vrot.slane %v10661_v28, 1  ;;  %v6507_v15 = vshrl.u32 %v10663_v18, 16  ;;  %v5182_v31 = vrot.slane %v10662_v33, 1  ;;  %v11901_v50 = vld [vmem:[#allocation3 + $0xc] sm:$0xff]   ;;  %10338 = vmatprep.subr.bf16.mxu1 %v10719_v55 }
 0x1b8   : > { %6091 = vrot.lane.b32.xlu0 %v6046_v25, %s10980_s15  ;;  %5400 = vrot.lane.b32.xlu1 %v10658_v53, %s10984_s12  ;;  %v10664_v35 = vld [vmem:[#allocation3 + $0x20] ss:$0 sps:$4 sm:$0x11]   ;;  %v6509_v5 = vshll.u32 %v10663_v18, 16  ;;  %v4767_v37 = vshrl.u32 %v10667_v30, 16  ;;  %v6043_v39 = vsel %vm1688_vm10, %v6041_v27, %v6042_v32  ;;  %v4769_v42 = vshll.u32 %v10667_v30, 16 }
 0x1b9   : > { %v1945_v23 = vpop.permute.xlu1 %1944  ;;  %v10276_v24 = vpop.f32.mrb[4].mxu0  ;;  %v5183_v40 = vsel %vm1688_vm10, %v5181_v34, %v5182_v31  ;;  %v6514_v41 = vshll.u32 %v10664_v35, 16  ;;  %v10665_v29 = vld [vmem:[#allocation3 + $0xc] sm:$0xfe]   ;;  %v4755_v9 = vshrl.u32 %v11901_v50, 16  ;;  %v4757_v19 = vshll.u32 %v11901_v50, 16 }
 0x1ba   : > { %1978 = vst.msk [vmem:[#allocation4 + $0x168] sm:$0xff] %vm1962_vm1, %v1945_v23  ;;  %v6511_v56 = vrot.slane %v6509_v5, 1  ;;  %v3756_v43 = vadd.f32 %v10276_v24, %v11840_v61  ;;  %v3747_v60 = vpop.f32.mrb[5].mxu0  ;;  %v10666_v44 = vld [vmem:[#allocation3 + $0x14] ss:$0 sps:$4 sm:$0x11]   ;;  %v3276_v51 = vpop.permute.xlu0 %3275 }
 0x1bb   : > { %vm4549_vm1 = vcmask 261120   ;;  %v3748_v45 = vadd.f32 %v11840_v61, %v3747_v60  ;;  %v10277_v46 = vpop.f32.mrb[6].mxu0  ;;  %v6516_v49 = vrot.slane %v6514_v41, 1  ;;  %v5178_v48 = vrot.slane %v10665_v29, 1  ;;  %3310 = vst.msk [vmem:[#allocation4 + $0x150] sm:$0xff] %vm3295_vm4, %v3276_v51  ;;  %v10720_v20 = vld [vmem:[%s13029_s3] sm:$0xff]  }
 0x1bc   : > { %6089 = vrot.lane.b32.xlu0 %v6043_v39, %s10980_s15  ;;  %5227 = vrot.lane.b32.xlu1 %v5183_v40, %s10983_s8  ;;  %v6512_v47 = vor.u32 %v6511_v56, %v6507_v15  ;;  %v3864_v4 = vmax.f32 %v3756_v43, 0.0  ;;  %v3759_v52 = vadd.f32 %v10277_v46, %v11840_v61  ;;  %v3750_v54 = vpop.f32.mrb[7].mxu0  ;;  %v5179_v8 = vrot.slane %v10666_v44, 1  ;;  %v10668_v59 = vld [vmem:[#allocation3 + $0x20] ss:$0 sps:$4 sm:$0x11]  }
 0x1bd   : > { %v2378_v10 = vpop.permute.xlu1 %2377  ;;  %v4771_v21 = vrot.slane %v4769_v42, 1  ;;  %v3862_v57 = vmax.f32 %v3748_v45, 0.0  ;;  %v3751_v63 = vadd.f32 %v11840_v61, %v3750_v54  ;;  %v4774_v6 = vshll.u32 %v10668_v59, 16  ;;  %v11914_v7 = vld [vmem:[#allocation3 + $0x14] ss:$0 sps:$4 sm:$0x11]   ;;  %10135 = vmatpush3.bf16.msra.mxu0 %v10720_v20  ;;  %10346 = vmatpush3.bf16.msra.mxu1 %v10720_v20 }
 0x1be   : > { %2411 = vst.msk [vmem:[#allocation4 + $0x168] sm:$0xff] %vm2395_vm5, %v2378_v10  ;;  %v6517_v58 = vsel %vm1254_vm12, %v6512_v47, %v6516_v49  ;;  %v10088_v26 = vpack.c.bf16 %v3864_v4, %v3864_v4  ;;  %v3865_v36 = vmax.f32 %v3759_v52, 0.0  ;;  %v5180_v62 = vsel %vm1688_vm10, %v5178_v48, %v5179_v8  ;;  %v3565_v12 = vpop.permute.xlu0 %3564  ;;  %v4330_v22 = vld [vmem:[#allocation3 + $0x30] sm:$0xf]  ;;  %v10725_v28 = vld [vmem:[#allocation3] sm:$0xff]   ;;  %vm13093_vm5 = vmmov %vm13092_vm15 }
 0x1bf   : > { %v4772_v0 = vor.u32 %v4771_v21, %v4767_v37  ;;  %v10086_v2 = vpack.c.bf16 %v3862_v57, %v3862_v57  ;;  %v3863_v3 = vmax.f32 %v3751_v63, 0.0  ;;  %3599 = vst.msk [vmem:[#allocation4 + $0x150] sm:$0xff] %vm3584_vm6, %v3565_v12  ;;  %v4776_v27 = vrot.slane %v4774_v6, 1  ;;  %v4323_v33 = vld [vmem:[#allocation3 + $0x24] sm:$0xf]  ;;  %v10726_v41 = vld [vmem:[%s13029_s3 + $0x48] sm:$0xff]  }
 0x1c0   : > { %6698 = vrot.lane.b32.xlu0 %v6517_v58, %s10984_s12  ;;  %5225 = vrot.lane.b32.xlu1 %v5180_v62, %s10983_s8  ;;  %v4038_v53 = vshrl.u32 %v10088_v26, 16  ;;  %v4041_v13 = vshll.u32 %v10088_v26, 16  ;;  %v10089_v14 = vpack.c.bf16 %v3865_v36, %v3865_v36  ;;  %v4759_v31 = vrot.slane %v4757_v19, 1  ;;  %v380_v35 = vld [vmem:[#allocation3 + $0x6c] sm:$0x1]  ;;  %4550 = vst.msk [vmem:[#allocation4] sm:$0xff] %vm4549_vm1, %v10725_v28 }
 0x1c1   : > { %v2667_v16 = vpop.permute.xlu1 %2666  ;;  %v4021_v18 = vshrl.u32 %v10086_v2, 16  ;;  %v4024_v23 = vshll.u32 %v10086_v2, 16  ;;  %v10087_v25 = vpack.c.bf16 %v3863_v3, %v3863_v3  ;;  %v4334_v37 = vld [vmem:[#allocation3 + $0x38] sm:$0x1]  ;;  %v4777_v40 = vsel %vm1254_vm12, %v4772_v0, %v4776_v27  ;;  %v437_v56 = vld [vmem:[#allocation3 + $0x80] sm:$0x1]  ;;  %10136 = vmatprep.subr.bf16.mxu0 %v10726_v41  ;;  %10339 = vmatprep.subr.bf16.mxu1 %v10726_v41 }
 0x1c2   : > { %2700 = vst.msk [vmem:[#allocation4 + $0x168] sm:$0xff] %vm2684_vm11, %v2667_v16  ;;  %v4040_v32 = vrot.slane %v4038_v53, 7  ;;  %v4046_v34 = vshrl.u32 %v10089_v14, 16  ;;  %v4049_v15 = vshll.u32 %v10089_v14, 16  ;;  %v4327_v43 = vld [vmem:[#allocation3 + $0x2c] sm:$0x1]  ;;  %v4760_v60 = vor.u32 %v4759_v31, %v4755_v9 }
 0x1c3   : > { %v4023_v5 = vrot.slane %v4021_v18, 7  ;;  %v4029_v39 = vshrl.u32 %v10087_v25, 16  ;;  %v4032_v24 = vshll.u32 %v10087_v25, 16  ;;  %v434_v44 = vld [vmem:[#allocation3 + $0x74] sm:$0x1]  ;;  %v10732_v46 = vld [vmem:[%s13029_s3 + $0x50] sm:$0xff]  }
 0x1c4   : > { %v4043_v29 = vor.u32 %v4041_v13, %v4040_v32  ;;  %v4044_v42 = vrot.slane %v4040_v32, 4  ;;  %v4048_v10 = vrot.slane %v4046_v34, 7  ;;  %4938 = vrot.lane.b32.xlu1 %v4777_v40, %s10980_s15  ;;  %v10727_v45 = vld [vmem:[%s13029_s3 + $0x8] sm:$0xff]   ;;  %v4762_v50 = vshll.u32 %v11914_v7, 16  ;;  %v10733_v51 = vld [vmem:[%s13029_s3 + $0x10] sm:$0xff]   ;;  %v10738_v26 = vld [vmem:[%s13029_s3 + $0x58] sm:$0xff]  }
 0x1c5   : > { %v2845_v30 = vpop.permute.xlu1 %2844  ;;  %v4026_v47 = vor.u32 %v4024_v23, %v4023_v5  ;;  %v4027_v49 = vrot.slane %v4023_v5, 4  ;;  %v4031_v48 = vrot.slane %v4029_v39, 7  ;;  %v10741_v4 = vld [vmem:[#allocation3 + $0x18] sm:$0xff]   ;;  %v381_v57 = vsel %vm11069_vm2, 0, %v380_v35  ;;  %10137 = vmatpush3.bf16.msra.mxu0 %v10727_v45  ;;  %10347 = vmatpush3.bf16.msra.mxu1 %v10727_v45  ;;  %v10745_v12 = vld [vmem:[#allocation3 + $0xc] sm:$0xff]   ;;  %v10739_v13 = vld [vmem:[%s13029_s3 + $0x18] sm:$0xff]  }
 0x1c6   : > { %2878 = vst.msk [vmem:[#allocation4 + $0x168] sm:$0xff] %vm13093_vm5, %v2845_v30  ;;  %v4331_v54 = vsel %vm11859_vm0, %v4043_v29, %v4330_v22  ;;  %v4051_v8 = vor.u32 %v4049_v15, %v4048_v10  ;;  %v4053_v21 = vrot.slane %v4048_v10, 4  ;;  %v4764_v16 = vrot.slane %v4762_v50, 1  ;;  %382 = vst [vmem:[#allocation3 + $0x6c] sm:$0x1] %v381_v57  ;;  %10138 = vmatprep.subr.bf16.mxu0 %v10732_v46  ;;  %v3615_v62 = vld [vmem:[#allocation4 + $0x150] sm:$0xff] }
 0x1c7   : > { %4332 = vst [vmem:[#allocation3 + $0x30] sm:$0xf] %v4331_v54  ;;  %v4324_v63 = vsel %vm11859_vm0, %v4026_v47, %v4323_v33  ;;  %v4034_v58 = vor.u32 %v4032_v24, %v4031_v48  ;;  %v4036_v59 = vrot.slane %v4031_v48, 4  ;;  %v10740_v36 = vld [vmem:[#allocation3 + $0x20] ss:$0 sps:$4 sm:$0x11]   ;;  %10340 = vmatprep.subr.bf16.mxu1 %v10732_v46  ;;  %10298 = vmatprep.mubr.msk.bf16.mxu0 %vm3644_vm3, %v3615_v62 }
 0x1c8   : > { %4325 = vst [vmem:[#allocation3 + $0x24] sm:$0xf] %v4324_v63  ;;  %v4052_v0 = vsel %vm11108_vm8, %v4044_v42, %v4051_v8  ;;  %v4335_v55 = vsel %vm11069_vm2, %v4053_v21, %v4334_v37  ;;  %v438_v2 = vsel %vm11102_vm7, 0, %v437_v56  ;;  %v435_v3 = vsel %vm11102_vm7, 0, %v434_v44  ;;  %v10742_v20 = vld [vmem:[%s13029_s3 + $0x60] sm:$0xff]   ;;  %v10754_v34 = vld [vmem:[#allocation3 + $0x18] sm:$0xff]  }
 0x1c9   : > { %v3278_v52 = vpop.permute.xlu1 %3277  ;;  %4336 = vst [vmem:[#allocation3 + $0x38] sm:$0x1] %v4335_v55  ;;  %v4035_v6 = vsel %vm11108_vm8, %v4027_v49, %v4034_v58  ;;  %v4328_v7 = vsel %vm11069_vm2, %v4036_v59, %v4327_v43  ;;  %v4765_v9 = vsel %vm1254_vm12, %v4760_v60, %v4764_v16  ;;  %439 = vst [vmem:[#allocation3 + $0x80] sm:$0x1] %v438_v2  ;;  %10139 = vmatpush3.bf16.msra.mxu0 %v10733_v51  ;;  %v10743_v27 = vld [vmem:[%s13029_s3 + $0x20] sm:$0xff]   ;;  %v10746_v31 = vld [vmem:[%s13029_s3 + $0x68] sm:$0xff]  }
 0x1ca   : > { %3311 = vst.msk [vmem:[#allocation4 + $0x168] sm:$0xff] %vm3295_vm4, %v3278_v52  ;;  %vm13094_vm4 = vmmov %vm13089_vm9  ;;  %4936 = vrot.lane.b32.xlu1 %v4765_v9, %s10980_s15  ;;  %v5661_v14 = vshll.u32 %v10740_v36, 16  ;;  %v5656_v19 = vshll.u32 %v10741_v4, 16  ;;  %10140 = vmatprep.subr.bf16.mxu0 %v10738_v26  ;;  %v10744_v22 = vld [vmem:[#allocation3 + $0x14] ss:$0 sps:$4 sm:$0x11]  }
 0x1cb   : > { %4333 = vst.msk [vmem:[#allocation3 + $0x34] sm:$0xf] %vm13094_vm4, %v4052_v0  ;;  %436 = vst [vmem:[#allocation3 + $0x74] sm:$0x1] %v435_v3  ;;  %v5644_v18 = vshll.u32 %v10745_v12, 16  ;;  %10348 = vmatpush3.bf16.msra.mxu1 %v10733_v51  ;;  %v5654_v23 = vshrl.u32 %v10741_v4, 16 }
 0x1cc   : > { %vm13095_vm11 = vmmov %vm13094_vm4  ;;  %4329 = vst [vmem:[#allocation3 + $0x2c] sm:$0x1] %v4328_v7  ;;  %v5658_v25 = vrot.slane %v5656_v19, 1  ;;  %v5642_v28 = vshrl.u32 %v10745_v12, 16  ;;  %10341 = vmatprep.subr.bf16.mxu1 %v10738_v26  ;;  %v5663_v30 = vrot.slane %v5661_v14, 1  ;;  %v5649_v32 = vshll.u32 %v10744_v22, 16 }
 0x1cd   : > { %v3567_v53 = vpop.permute.xlu1 %3566  ;;  %4326 = vst.msk [vmem:[#allocation3 + $0x28] sm:$0xf] %vm13095_vm11, %v4035_v6  ;;  %v5646_v33 = vrot.slane %v5644_v18, 1  ;;  %10141 = vmatpush3.bf16.msra.mxu0 %v10739_v13  ;;  %v10747_v24 = vld [vmem:[%s13029_s3 + $0x28] sm:$0xff]   ;;  %v10750_v56 = vld [vmem:[%s13029_s3 + $0x70] sm:$0xff]   ;;  %vm5271_vm9 = vcmask 785920  }
 0x1ce   : > { %3600 = vst.msk [vmem:[#allocation4 + $0x168] sm:$0xff] %vm3584_vm6, %v3567_v53  ;;  %v5659_v15 = vor.u32 %v5658_v25, %v5654_v23  ;;  %10142 = vmatprep.subr.bf16.mxu0 %v10742_v20  ;;  %v5651_v39 = vrot.slane %v5649_v32, 1  ;;  %vm4982_vm6 = vcmask 523520   ;;  %v10751_v45 = vld [vmem:[%s13029_s3 + $0x30] sm:$0xff]   ;;  %vm5448_vm5 = vcmask 1048320  }
 0x1cf   : > { %v5647_v35 = vor.u32 %v5646_v33, %v5642_v28  ;;  %4552 = vst.msk [vmem:[#allocation4 + $0x30] sm:$0xff] %vm4549_vm1, %v10754_v34  ;;  %10349 = vmatpush3.bf16.msra.mxu1 %v10739_v13 }
 0x1d0   : > { %v5664_v37 = vsel %vm1254_vm12, %v5659_v15, %v5663_v30  ;;  %10342 = vmatprep.subr.bf16.mxu1 %v10742_v20  ;;  %v10676_v60 = vld [vmem:[#allocation3 + $0x38] ss:$0 sps:$4 sm:$0x11]  }
 0x1d1   : > { %5850 = vst.msk [vmem:[#allocation4 + $0x20] sm:$0xff] %vm4549_vm1, %v5664_v37  ;;  %10143 = vmatpush3.bf16.msra.mxu0 %v10743_v27  ;;  %v5652_v42 = vsel %vm1254_vm12, %v5647_v35, %v5651_v39  ;;  %v6051_v49 = vrot.slane %v10676_v60, 1  ;;  %v10678_v48 = vld [vmem:[#allocation3 + $0x38] ss:$0 sps:$4 sm:$0x11]   ;;  %v4935_v51 = vpop.permute.xlu1 %4934 }
 0x1d2   : > { %v10671_v5 = vld [vmem:[#allocation3 + $0x30] sm:$0xff]   ;;  %5849 = vst.msk [vmem:[#allocation4 + $0x8] sm:$0xff] %vm4549_vm1, %v5652_v42  ;;  %10144 = vmatprep.subr.bf16.mxu0 %v10746_v31  ;;  %v5188_v54 = vrot.slane %v10678_v48, 1  ;;  %v10684_v20 = vld [vmem:[#allocation3 + $0x38] ss:$0 sps:$4 sm:$0x11]  }
 0x1d3   : > { %v10672_v40 = vld [vmem:[#allocation3 + $0x30] sm:$0xff]   ;;  %6270 = vrot.lane.b32.xlu0 %v10671_v5, %s10983_s8  ;;  %10350 = vmatpush3.bf16.msra.mxu1 %v10743_v27  ;;  %4983 = vst.msk [vmem:[#allocation4] sm:$0xff] %vm4982_vm6, %v4935_v51  ;;  %v10680_v63 = vld [vmem:[#allocation3 + $0x2c] ss:$0 sps:$4 sm:$0x11]   ;;  %v6538_v32 = vshll.u32 %v10684_v20, 16 }
 0x1d4   : > { %v10673_v29 = vld [vmem:[#allocation3 + $0x24] sm:$0xff]   ;;  %5406 = vrot.lane.b32.xlu1 %v10672_v40, %s10984_s12  ;;  %v10675_v43 = vld [vmem:[#allocation3 + $0x30] sm:$0xfe]   ;;  %10343 = vmatprep.subr.bf16.mxu1 %v10746_v31  ;;  %v6048_v62 = vrot.slane %v10680_v63, 1  ;;  %v389_v20 = vld [vmem:[#allocation3 + $0x90] sm:$0x1] }
 0x1d5   : > { %v3616_v41 = vld [vmem:[#allocation4 + $0x168] sm:$0xff]  ;;  %v10683_v44 = vld [vmem:[#allocation3 + $0x30] sm:$0xff]   ;;  %v6050_v47 = vrot.slane %v10675_v43, 1  ;;  %10145 = vmatpush3.bf16.msra.mxu0 %v10747_v24  ;;  %v5224_v36 = vpop.permute.xlu1 %5223  ;;  %v10682_v55 = vld [vmem:[#allocation3 + $0x2c] ss:$0 sps:$4 sm:$0x11]  }
 0x1d6   : > { %10299 = vmatmul.mubr.msk.bf16.gmra.mrb[28].mxu0 %vm3644_vm3, %v3616_v41  ;;  %v10674_v10 = vld [vmem:[#allocation3 + $0x24] sm:$0xff]   ;;  %v10677_v46 = vld [vmem:[#allocation3 + $0x30] sm:$0xfe]   ;;  %v6531_v50 = vshrl.u32 %v10683_v44, 16  ;;  %v6533_v52 = vshll.u32 %v10683_v44, 16  ;;  %10146 = vmatprep.subr.bf16.mxu0 %v10750_v56  ;;  %5272 = vst.msk [vmem:[#allocation4] sm:$0xff] %vm5271_vm9, %v5224_v36  ;;  %vm13096_vm3 = vmmov %vm13094_vm4 }
 0x1d7   : > { %6268 = vrot.lane.b32.xlu0 %v10673_v29, %s10983_s8  ;;  %v5187_v4 = vrot.slane %v10677_v46, 1  ;;  %v10679_v8 = vld [vmem:[#allocation3 + $0x24] sm:$0xfe]   ;;  %v10685_v21 = vld [vmem:[#allocation3 + $0x30] sm:$0xff]   ;;  %10351 = vmatpush3.bf16.msra.mxu1 %v10747_v24  ;;  %v6052_v57 = vsel %vm1688_vm10, %v6050_v47, %v6051_v49  ;;  %v5185_v53 = vrot.slane %v10682_v55, 1  ;;  %v6540_v39 = vrot.slane %v6538_v32, 1  ;;  %vm13097_vm13 = vmmov %vm13096_vm3 }
 0x1d8   : > { %5404 = vrot.lane.b32.xlu1 %v10674_v10, %s10984_s12  ;;  %v6535_v58 = vrot.slane %v6533_v52, 1  ;;  %10344 = vmatprep.subr.bf16.mxu1 %v10750_v56  ;;  %v6047_v16 = vrot.slane %v10679_v8, 1  ;;  %v4791_v26 = vshrl.u32 %v10685_v21, 16  ;;  %v10681_v0 = vld [vmem:[#allocation3 + $0x24] sm:$0xfe]   ;;  %v4793_v3 = vshll.u32 %v10685_v21, 16  ;;  %vm13098_vm14 = vmmov %vm13096_vm3 }
 0x1d9   : > { %v5189_v59 = vsel %vm1688_vm10, %v5187_v4, %v5188_v54  ;;  %10147 = vmatpush3.bf16.msra.mxu0 %v10751_v45  ;;  %v10280_v2 = vpop.f32.mrb[8].mxu0  ;;  %v5184_v12 = vrot.slane %v10681_v0, 1  ;;  %v12006_v13 = vld [vmem:[#allocation3 + $0x24] sm:$0xff]   ;;  %v10686_v33 = vld [vmem:[#allocation3 + $0x38] ss:$0 sps:$4 sm:$0x11]   ;;  %vm13099_vm15 = vmmov %vm13096_vm3 }
 0x1da   : > { %v3772_v6 = vadd.f32 %v10280_v2, %v11840_v61  ;;  %v3763_v7 = vpop.f32.mrb[9].mxu0  ;;  %v6049_v9 = vsel %vm1688_vm10, %v6047_v16, %v6048_v62  ;;  %v6536_v27 = vor.u32 %v6535_v58, %v6531_v50  ;;  %v4795_v34 = vrot.slane %v4793_v3, 1  ;;  %v10688_v42 = vld [vmem:[#allocation3 + $0x2c] ss:$0 sps:$4 sm:$0x11]   ;;  %v10755_v50 = vld [vmem:[%s13029_s3 + $0x78] sm:$0xff]   ;;  %vm13100_vm4 = vmmov %vm13096_vm3 }
 0x1db   : > { %6095 = vrot.lane.b32.xlu0 %v6052_v57, %s10980_s15  ;;  %10352 = vmatpush3.bf16.msra.mxu1 %v10751_v45  ;;  %v3764_v14 = vadd.f32 %v11840_v61, %v3763_v7  ;;  %v10281_v19 = vpop.f32.mrb[10].mxu0  ;;  %v5186_v25 = vsel %vm1688_vm10, %v5184_v12, %v5185_v53  ;;  %v6519_v35 = vshrl.u32 %v12006_v13, 16  ;;  %v4798_v29 = vshll.u32 %v10686_v33, 16  ;;  %v4344_v10 = vld [vmem:[#allocation3 + $0x48] sm:$0xf]  ;;  %v10756_v16 = vld [vmem:[%s13029_s3 + $0x38] sm:$0xff]   ;;  %vm13101_vm11 = vmmov %vm13096_vm3 }
 0x1dc   : > { %5231 = vrot.lane.b32.xlu1 %v5189_v59, %s10983_s8  ;;  %v3868_v22 = vmax.f32 %v3772_v6, 0.0  ;;  %v3775_v18 = vadd.f32 %v10281_v19, %v11840_v61  ;;  %v3766_v23 = vpop.f32.mrb[11].mxu0  ;;  %v4796_v24 = vor.u32 %v4795_v34, %v4791_v26  ;;  %v6541_v44 = vsel %vm1254_vm12, %v6536_v27, %v6540_v39  ;;  %v4337_v46 = vld [vmem:[#allocation3 + $0x3c] sm:$0xf]  ;;  %v4348_v4 = vld [vmem:[#allocation3 + $0x50] sm:$0x1]  ;;  %10148 = vmatprep.subr.bf16.mxu0 %v10755_v50 }
 0x1dd   : > { %v3866_v28 = vmax.f32 %v3764_v14, 0.0  ;;  %v3767_v30 = vadd.f32 %v11840_v61, %v3766_v23  ;;  %v4800_v48 = vrot.slane %v4798_v29, 1  ;;  %v6521_v8 = vshll.u32 %v12006_v13, 16  ;;  %v10690_v59 = vld [vmem:[#allocation3 + $0x2c] ss:$0 sps:$4 sm:$0x11]   ;;  %10345 = vmatprep.subr.bf16.mxu1 %v10755_v50  ;;  %10149 = vmatpush3.bf16.msra.mxu0 %v10756_v16 }
 0x1de   : > { %v10092_v15 = vpack.c.bf16 %v3868_v22, %v3868_v22  ;;  %v3869_v31 = vmax.f32 %v3775_v18, 0.0  ;;  %v10689_v55 = vld [vmem:[#allocation3 + $0x24] sm:$0xff]   ;;  %v10761_v2 = vld [vmem:[#allocation3 + $0xc] sm:$0xff]   ;;  %v6526_v12 = vshll.u32 %v10688_v42, 16 }
 0x1df   : > { %6093 = vrot.lane.b32.xlu0 %v6049_v9, %s10980_s15  ;;  %v10090_v5 = vpack.c.bf16 %v3866_v28, %v3866_v28  ;;  %v3867_v37 = vmax.f32 %v3767_v30, 0.0  ;;  %v4801_v58 = vsel %vm1254_vm12, %v4796_v24, %v4800_v48  ;;  %v6523_v0 = vrot.slane %v6521_v8, 1  ;;  %v4341_v9 = vld [vmem:[#allocation3 + $0x44] sm:$0x1]  ;;  %10353 = vmatpush3.bf16.msra.mxu1 %v10756_v16  ;;  %4551 = vst.msk [vmem:[#allocation4 + $0x18] sm:$0xff] %vm4549_vm1, %v10761_v2  ;;  %v12034_v18 = vld [vmem:[%s13029_s3 + $0x80] sm:$0xff]  }
 0x1e0   : > { %5229 = vrot.lane.b32.xlu1 %v5186_v25, %s10983_s8  ;;  %v4072_v40 = vshrl.u32 %v10092_v15, 16  ;;  %v4075_v56 = vshll.u32 %v10092_v15, 16  ;;  %v10093_v41 = vpack.c.bf16 %v3869_v31, %v3869_v31  ;;  %v386_v22 = vld [vmem:[#allocation3 + $0x84] sm:$0x1]  ;;  %v6528_v27 = vrot.slane %v6526_v12, 1  ;;  %10302 = vmatprep.subr.bf16.mxu0 %v12034_v18 }
 0x1e1   : > { %v4055_v61 = vshrl.u32 %v10090_v5, 16  ;;  %v4058_v43 = vshll.u32 %v10090_v5, 16  ;;  %v10091_v60 = vpack.c.bf16 %v3867_v37, %v3867_v37  ;;  %v6524_v19 = vor.u32 %v6523_v0, %v6519_v35  ;;  %v443_v28 = vld [vmem:[#allocation3 + $0x98] sm:$0x1]  ;;  %v440_v30 = vld [vmem:[#allocation3 + $0x8c] sm:$0x1] }
 0x1e2   : > { %v4074_v45 = vrot.slane %v4072_v40, 7  ;;  %v4080_v47 = vshrl.u32 %v10093_v41, 16  ;;  %v4083_v49 = vshll.u32 %v10093_v41, 16  ;;  %v4781_v34 = vshll.u32 %v10689_v55, 16  ;;  %v6766_v12 = vld [vmem:[#allocation3 + $0x28] sm:$0xf] }
 0x1e3   : > { %6702 = vrot.lane.b32.xlu0 %v6541_v44, %s10984_s12  ;;  %v4057_v51 = vrot.slane %v4055_v61, 7  ;;  %v4063_v52 = vshrl.u32 %v10091_v60, 16  ;;  %v4066_v54 = vshll.u32 %v10091_v60, 16  ;;  %v4786_v15 = vshll.u32 %v10690_v59, 16 }
 0x1e4   : > { %v4077_v21 = vor.u32 %v4075_v56, %v4074_v45  ;;  %v4078_v57 = vrot.slane %v4074_v45, 4  ;;  %v4082_v63 = vrot.slane %v4080_v47, 7  ;;  %4942 = vrot.lane.b32.xlu1 %v4801_v58, %s10980_s15  ;;  %v6529_v31 = vsel %vm1254_vm12, %v6524_v19, %v6528_v27  ;;  %v10765_v56 = vld [vmem:[#allocation3 + $0x18] sm:$0xfe]  }
 0x1e5   : > { %v4060_v26 = vor.u32 %v4058_v43, %v4057_v51  ;;  %v4061_v36 = vrot.slane %v4057_v51, 4  ;;  %v4065_v62 = vrot.slane %v4063_v52, 7  ;;  %v390_v35 = vsel %vm11069_vm2, 0, %v389_v20  ;;  %v10766_v42 = vld [vmem:[#allocation3 + $0x20] ss:$0 sps:$4 sm:$0x11]  }
 0x1e6   : > { %v4345_v3 = vsel %vm11859_vm0, %v4077_v21, %v4344_v10  ;;  %v4085_v6 = vor.u32 %v4083_v49, %v4082_v63  ;;  %v4087_v7 = vrot.slane %v4082_v63, 4  ;;  %v387_v5 = vsel %vm11069_vm2, 0, %v386_v22  ;;  %391 = vst [vmem:[#allocation3 + $0x90] sm:$0x1] %v390_v35  ;;  %v12071_v22 = vld [vmem:[#allocation3 + $0x30] sm:$0xff]  }
 0x1e7   : > { %4346 = vst [vmem:[#allocation3 + $0x48] sm:$0xf] %v4345_v3  ;;  %v4338_v53 = vsel %vm11859_vm0, %v4060_v26, %v4337_v46  ;;  %v4068_v13 = vor.u32 %v4066_v54, %v4065_v62  ;;  %v4070_v14 = vrot.slane %v4065_v62, 4  ;;  %v444_v37 = vsel %vm11102_vm7, 0, %v443_v28  ;;  %6700 = vrot.lane.b32.xlu0 %v6529_v31, %s10984_s12  ;;  %388 = vst [vmem:[#allocation3 + $0x84] sm:$0x1] %v387_v5 }
 0x1e8   : > { %4339 = vst [vmem:[#allocation3 + $0x3c] sm:$0xf] %v4338_v53  ;;  %v4086_v23 = vsel %vm11108_vm8, %v4078_v57, %v4085_v6  ;;  %v4349_v25 = vsel %vm11069_vm2, %v4087_v7, %v4348_v4  ;;  %v4779_v39 = vshrl.u32 %v10689_v55, 16  ;;  %v4783_v24 = vrot.slane %v4781_v34, 1  ;;  %445 = vst [vmem:[#allocation3 + $0x98] sm:$0x1] %v444_v37 }
 0x1e9   : > { %4347 = vst.msk [vmem:[#allocation3 + $0x4c] sm:$0xf] %vm13096_vm3, %v4086_v23  ;;  %4350 = vst [vmem:[#allocation3 + $0x50] sm:$0x1] %v4349_v25  ;;  %v4069_v32 = vsel %vm11108_vm8, %v4061_v36, %v4068_v13  ;;  %v4342_v33 = vsel %vm11069_vm2, %v4070_v14, %v4341_v9  ;;  %v441_v40 = vsel %vm11102_vm7, 0, %v440_v30  ;;  %v4788_v29 = vrot.slane %v4786_v15, 1 }
 0x1ea   : > { %4340 = vst.msk [vmem:[#allocation3 + $0x40] sm:$0xf] %vm13097_vm13, %v4069_v32  ;;  %4343 = vst [vmem:[#allocation3 + $0x44] sm:$0x1] %v4342_v33  ;;  %v4784_v41 = vor.u32 %v4783_v24, %v4779_v39  ;;  %v6938_v43 = vrot.slane %v10765_v56, 1  ;;  %v6939_v44 = vrot.slane %v10766_v42, 1 }
 0x1eb   : > { %442 = vst [vmem:[#allocation3 + $0x8c] sm:$0x1] %v441_v40  ;;  %v6765_v28 = vld [vmem:[#allocation3 + $0x24] sm:$0xe]  ;;  %vm13102_vm13 = vmmov %vm13096_vm3 }
 0x1ec   : > { %v4789_v10 = vsel %vm1254_vm12, %v4784_v41, %v4788_v29  ;;  %v6940_v47 = vsel %vm1688_vm10, %v6938_v43, %v6939_v44  ;;  %v9883_v39 = vcombine.low %v6765_v28, %v6766_v12  ;;  %v5678_v43 = vshrl.u32 %v12071_v22, 16  ;;  %v10782_v28 = vld [vmem:[#allocation3 + $0x38] ss:$0 sps:$4 sm:$0x11]  }
 0x1ed   : > { %4940 = vrot.lane.b32.xlu1 %v4789_v10, %s10980_s15  ;;  %7002 = vst.msk [vmem:[#allocation4 + $0x10] sm:$0xff] %vm4549_vm1, %v6940_v47 }
 0x1f0   : > { %v10691_v61 = vld [vmem:[#allocation3 + $0x48] sm:$0xff]   ;;  %v10696_v48 = vld [vmem:[#allocation3 + $0x50] ss:$0 sps:$4 sm:$0x11]  }
 0x1f1   : > { %v10692_v60 = vld [vmem:[#allocation3 + $0x48] sm:$0xff]   ;;  %6274 = vrot.lane.b32.xlu0 %v10691_v61, %s10983_s8  ;;  %v10693_v45 = vld [vmem:[#allocation3 + $0x3c] sm:$0xff]   ;;  %v10698_v52 = vld [vmem:[#allocation3 + $0x50] ss:$0 sps:$4 sm:$0x11]   ;;  %v6057_v54 = vrot.slane %v10696_v48, 1 }
 0x1f2   : > { %v10695_v46 = vld [vmem:[#allocation3 + $0x48] sm:$0xfe]   ;;  %5410 = vrot.lane.b32.xlu1 %v10692_v60, %s10984_s12  ;;  %v10694_v49 = vld [vmem:[#allocation3 + $0x3c] sm:$0xff]   ;;  %v5194_v57 = vrot.slane %v10698_v52, 1  ;;  %v12081_v60 = vld [vmem:[%s13028_s2] ss:$0 sm:$0xff] }
 0x1f3   : > { %v10703_v50 = vld [vmem:[#allocation3 + $0x48] sm:$0xff]   ;;  %v6056_v51 = vrot.slane %v10695_v46, 1  ;;  %v10699_v63 = vld [vmem:[#allocation3 + $0x3c] sm:$0xfe]   ;;  %v5680_v52 = vshll.u32 %v12071_v22, 16 }
 0x1f4   : > { %v10697_v4 = vld [vmem:[#allocation3 + $0x48] sm:$0xfe]   ;;  %v6555_v8 = vshrl.u32 %v10703_v50, 16  ;;  %v10700_v58 = vld [vmem:[#allocation3 + $0x44] ss:$0 sps:$4 sm:$0x11]  }
 0x1f5   : > { %6272 = vrot.lane.b32.xlu0 %v10693_v45, %s10983_s8  ;;  %v5193_v21 = vrot.slane %v10697_v4, 1  ;;  %v6557_v59 = vshll.u32 %v10703_v50, 16  ;;  %v6058_v16 = vsel %vm1688_vm10, %v6056_v51, %v6057_v54  ;;  %v6053_v26 = vrot.slane %v10699_v63, 1  ;;  %v10705_v36 = vld [vmem:[#allocation3 + $0x48] sm:$0xff]   ;;  %v10701_v0 = vld [vmem:[#allocation3 + $0x3c] sm:$0xfe]  }
 0x1f6   : > { %5408 = vrot.lane.b32.xlu1 %v10694_v49, %s10984_s12  ;;  %v6054_v62 = vrot.slane %v10700_v58, 1  ;;  %v10702_v55 = vld [vmem:[#allocation3 + $0x44] ss:$0 sps:$4 sm:$0x11]   ;;  %v5190_v3 = vrot.slane %v10701_v0, 1  ;;  %v10707_v20 = vld [vmem:[#allocation3 + $0x3c] sm:$0xff]  }
 0x1f7   : > { %v5195_v2 = vsel %vm1688_vm10, %v5193_v21, %v5194_v57  ;;  %v5191_v6 = vrot.slane %v10702_v55, 1  ;;  %v10704_v7 = vld [vmem:[#allocation3 + $0x50] ss:$0 sps:$4 sm:$0x11]   ;;  %v6559_v9 = vrot.slane %v6557_v59, 1  ;;  %v4817_v25 = vshll.u32 %v10705_v36, 16 }
 0x1f8   : > { %v6055_v53 = vsel %vm1688_vm10, %v6053_v26, %v6054_v62  ;;  %v6562_v14 = vshll.u32 %v10704_v7, 16  ;;  %v10706_v19 = vld [vmem:[#allocation3 + $0x50] ss:$0 sps:$4 sm:$0x11]   ;;  %v10709_v27 = vld [vmem:[#allocation3 + $0x3c] sm:$0xff]   ;;  %v4815_v32 = vshrl.u32 %v10705_v36, 16 }
 0x1f9   : > { %6099 = vrot.lane.b32.xlu0 %v6058_v16, %s10980_s15  ;;  %v6560_v13 = vor.u32 %v6559_v9, %v6555_v8  ;;  %v5192_v23 = vsel %vm1688_vm10, %v5190_v3, %v5191_v6  ;;  %v4822_v33 = vshll.u32 %v10706_v19, 16  ;;  %v6545_v34 = vshll.u32 %v10707_v20, 16  ;;  %v10708_v31 = vld [vmem:[#allocation3 + $0x44] ss:$0 sps:$4 sm:$0x11]   ;;  %v10791_v59 = vld [vmem:[#allocation3 + $0x30] sm:$0xff]  }
 0x1fa   : > { %5235 = vrot.lane.b32.xlu1 %v5195_v2, %s10983_s8  ;;  %v6564_v30 = vrot.slane %v6562_v14, 1  ;;  %v4819_v15 = vrot.slane %v4817_v25, 1  ;;  %v6543_v5 = vshrl.u32 %v10707_v20, 16  ;;  %v6550_v56 = vshll.u32 %v10708_v31, 16  ;;  %v10777_v2 = vld [vmem:[#allocation3 + $0x30] sm:$0xfe]  }
 0x1fb   : > { %v6547_v37 = vrot.slane %v6545_v34, 1  ;;  %v4824_v40 = vrot.slane %v4822_v33, 1  ;;  %v10710_v41 = vld [vmem:[#allocation3 + $0x44] ss:$0 sps:$4 sm:$0x11]   ;;  %v4805_v29 = vshll.u32 %v10709_v27, 16 }
 0x1fc   : > { %v6565_v35 = vsel %vm1254_vm12, %v6560_v13, %v6564_v30  ;;  %v4820_v24 = vor.u32 %v4819_v15, %v4815_v32  ;;  %v4803_v61 = vshrl.u32 %v10709_v27, 16  ;;  %v6552_v47 = vrot.slane %v6550_v56, 1  ;;  %v10774_v58 = vld [vmem:[#allocation3 + $0x2c] ss:$0 sps:$4 sm:$0x11]   ;;  %4554 = vst.msk [vmem:[#allocation4 + $0x60] sm:$0xff] %vm4549_vm1, %v10791_v59 }
 0x1fd   : > { %6097 = vrot.lane.b32.xlu0 %v6055_v53, %s10980_s15  ;;  %v6548_v10 = vor.u32 %v6547_v37, %v6543_v5  ;;  %v4807_v49 = vrot.slane %v4805_v29, 1  ;;  %v4810_v51 = vshll.u32 %v10710_v41, 16  ;;  %v6941_v4 = vrot.slane %v9883_v39, 1  ;;  %v10778_v9 = vld [vmem:[#allocation3 + $0x38] ss:$0 sps:$4 sm:$0x11]  }
 0x1fe   : > { %5233 = vrot.lane.b32.xlu1 %v5192_v23, %s10983_s8  ;;  %v4825_v46 = vsel %vm1254_vm12, %v4820_v24, %v4824_v40  ;;  %v6942_v55 = vrot.slane %v10774_v58, 1  ;;  %v4358_v19 = vld [vmem:[#allocation3 + $0x60] sm:$0xf]  ;;  %v6944_v27 = vrot.slane %v10777_v2, 1  ;;  %v4351_v32 = vld [vmem:[#allocation3 + $0x54] sm:$0xf] }
 0x1ff   : > { %v6553_v57 = vsel %vm1254_vm12, %v6548_v10, %v6552_v47  ;;  %v4808_v63 = vor.u32 %v4807_v49, %v4803_v61  ;;  %v4812_v36 = vrot.slane %v4810_v51, 1  ;;  %v6945_v15 = vrot.slane %v10778_v9, 1  ;;  %v10787_v24 = vld [vmem:[#allocation3 + $0x24] sm:$0xff]   ;;  %v4355_v29 = vld [vmem:[#allocation3 + $0x5c] sm:$0x1] }
 0x200   : > { %v6943_v14 = vsel %vm1688_vm10, %v6941_v4, %v6942_v55  ;;  %v5682_v39 = vrot.slane %v5680_v52, 1  ;;  %v10783_v10 = vld [vmem:[#allocation3 + $0x3c] sm:$0xfe]   ;;  %v10784_v47 = vld [vmem:[#allocation3 + $0x44] ss:$0 sps:$4 sm:$0x11]  }
 0x201   : > { %6706 = vrot.lane.b32.xlu0 %v6565_v35, %s10984_s12  ;;  %v4813_v7 = vsel %vm1254_vm12, %v4808_v63, %v4812_v36  ;;  %7003 = vst.msk [vmem:[#allocation4 + $0x28] sm:$0xff] %vm4549_vm1, %v6943_v14  ;;  %v4362_v35 = vld [vmem:[#allocation3 + $0x68] sm:$0x1]  ;;  %v5685_v4 = vshll.u32 %v10782_v28, 16  ;;  %v6948_v58 = vrot.slane %v10784_v47, 1 }
 0x202   : > { %4946 = vrot.lane.b32.xlu1 %v4825_v46, %s10980_s15  ;;  %v5683_v46 = vor.u32 %v5682_v39, %v5678_v43  ;;  %v10798_v49 = vld [vmem:[#allocation3 + $0x24] sm:$0xff]   ;;  %v10786_v59 = vld [vmem:[#allocation3 + $0x50] ss:$0 sps:$4 sm:$0x11]   ;;  %v392_v14 = vld [vmem:[#allocation3 + $0x9c] sm:$0x1] }
 0x203   : > { %4553 = vst.msk [vmem:[#allocation4 + $0x48] sm:$0xff] %vm4549_vm1, %v10798_v49  ;;  %v5687_v63 = vrot.slane %v5685_v4, 1  ;;  %v6951_v2 = vrot.slane %v10786_v59, 1  ;;  %v393_v28 = vsel %vm11069_vm2, 0, %v392_v14 }
 0x204   : > { %394 = vst [vmem:[#allocation3 + $0x9c] sm:$0x1] %v393_v28 }
 0x205   : > { %6704 = vrot.lane.b32.xlu0 %v6553_v57, %s10984_s12  ;;  %v10785_v57 = vld [vmem:[#allocation3 + $0x48] sm:$0xfe]  }
 0x206   : > { %4944 = vrot.lane.b32.xlu1 %v4813_v7, %s10980_s15  ;;  %v6950_v36 = vrot.slane %v10785_v57, 1  ;;  %v395_v7 = vld [vmem:[#allocation3 + $0xa8] sm:$0x1] }
 0x208   : > { %v6952_v9 = vsel %vm1688_vm10, %v6950_v36, %v6951_v2 }
 0x209   : > { %7006 = vst.msk [vmem:[#allocation4 + $0x70] sm:$0xff] %vm4549_vm1, %v6952_v9 }
 0x20d   : > { %v10284_v42 = vpop.f32.mrb[12].mxu0 }
 0x20e   : > { %v3788_v44 = vadd.f32 %v12081_v60, %v10284_v42  ;;  %v3779_v45 = vpop.f32.mrb[13].mxu0  ;;  %v6946_v42 = vsel %vm1688_vm10, %v6944_v27, %v6945_v15 }
 0x20f   : > { %v3780_v48 = vadd.f32 %v12081_v60, %v3779_v45  ;;  %v10285_v50 = vpop.f32.mrb[14].mxu0  ;;  %7004 = vst.msk [vmem:[#allocation4 + $0x40] sm:$0xff] %vm4549_vm1, %v6946_v42 }
 0x210   : > { %v3872_v54 = vmax.f32 %v3788_v44, 0.0  ;;  %v3791_v8 = vadd.f32 %v12081_v60, %v10285_v50  ;;  %v3782_v21 = vpop.f32.mrb[15].mxu0 }
 0x211   : > { %v3870_v16 = vmax.f32 %v3780_v48, 0.0  ;;  %v3783_v26 = vadd.f32 %v12081_v60, %v3782_v21  ;;  %v6947_v21 = vrot.slane %v10783_v10, 1 }
 0x212   : > { %v10096_v62 = vpack.c.bf16 %v3872_v54, %v3872_v54  ;;  %v3873_v0 = vmax.f32 %v3791_v8, 0.0 }
 0x213   : > { %v10094_v3 = vpack.c.bf16 %v3870_v16, %v3870_v16  ;;  %v3871_v6 = vmax.f32 %v3783_v26, 0.0  ;;  %v6949_v55 = vsel %vm1688_vm10, %v6947_v21, %v6948_v58 }
 0x214   : > { %v4106_v12 = vshrl.u32 %v10096_v62, 16  ;;  %v4109_v53 = vshll.u32 %v10096_v62, 16  ;;  %v10097_v13 = vpack.c.bf16 %v3873_v0, %v3873_v0  ;;  %v5666_v62 = vshrl.u32 %v10787_v24, 16  ;;  %7005 = vst.msk [vmem:[#allocation4 + $0x58] sm:$0xff] %vm4549_vm1, %v6949_v55 }
 0x215   : > { %v4089_v20 = vshrl.u32 %v10094_v3, 16  ;;  %v4092_v23 = vshll.u32 %v10094_v3, 16  ;;  %v10095_v25 = vpack.c.bf16 %v3871_v6, %v3871_v6  ;;  %v5688_v0 = vsel %vm1254_vm12, %v5683_v46, %v5687_v63  ;;  %v10788_v3 = vld [vmem:[#allocation3 + $0x2c] ss:$0 sps:$4 sm:$0x11]  }
 0x216   : > { %v4108_v30 = vrot.slane %v4106_v12, 7  ;;  %v4114_v33 = vshrl.u32 %v10097_v13, 16  ;;  %v4117_v34 = vshll.u32 %v10097_v13, 16  ;;  %v5668_v6 = vshll.u32 %v10787_v24, 16  ;;  %5852 = vst.msk [vmem:[#allocation4 + $0x50] sm:$0xff] %vm4549_vm1, %v5688_v0 }
 0x217   : > { %v4091_v31 = vrot.slane %v4089_v20, 7  ;;  %v4097_v5 = vshrl.u32 %v10095_v25, 16  ;;  %v4100_v37 = vshll.u32 %v10095_v25, 16  ;;  %v396_v13 = vsel %vm11069_vm2, 0, %v395_v7 }
 0x218   : > { %v4111_v40 = vor.u32 %v4109_v53, %v4108_v30  ;;  %v4112_v56 = vrot.slane %v4108_v30, 4  ;;  %v4116_v41 = vrot.slane %v4114_v33, 7  ;;  %v5670_v12 = vrot.slane %v5668_v6, 1  ;;  %397 = vst [vmem:[#allocation3 + $0xa8] sm:$0x1] %v396_v13 }
 0x219   : > { %v4094_v61 = vor.u32 %v4092_v23, %v4091_v31  ;;  %v4095_v44 = vrot.slane %v4091_v31, 4  ;;  %v4099_v45 = vrot.slane %v4097_v5, 7  ;;  %v5673_v53 = vshll.u32 %v10788_v3, 16 }
 0x21a   : > { %v4359_v48 = vsel %vm11859_vm0, %v4111_v40, %v4358_v19  ;;  %v4119_v50 = vor.u32 %v4117_v34, %v4116_v41  ;;  %v4121_v51 = vrot.slane %v4116_v41, 4  ;;  %v449_v19 = vld [vmem:[#allocation3 + $0xb0] sm:$0x1]  ;;  %v5671_v20 = vor.u32 %v5670_v12, %v5666_v62 }
 0x21b   : > { %4360 = vst [vmem:[#allocation3 + $0x60] sm:$0xf] %v4359_v48  ;;  %v4352_v52 = vsel %vm11859_vm0, %v4094_v61, %v4351_v32  ;;  %v4102_v54 = vor.u32 %v4100_v37, %v4099_v45  ;;  %v4104_v8 = vrot.slane %v4099_v45, 4  ;;  %v5675_v25 = vrot.slane %v5673_v53, 1 }
 0x21c   : > { %4353 = vst [vmem:[#allocation3 + $0x54] sm:$0xf] %v4352_v52  ;;  %v4120_v22 = vsel %vm11108_vm8, %v4112_v56, %v4119_v50  ;;  %v4363_v43 = vsel %vm11069_vm2, %v4121_v51, %v4362_v35  ;;  %v450_v30 = vsel %vm11102_vm7, 0, %v449_v19 }
 0x21d   : > { %4361 = vst.msk [vmem:[#allocation3 + $0x64] sm:$0xf] %vm13098_vm14, %v4120_v22  ;;  %4364 = vst [vmem:[#allocation3 + $0x68] sm:$0x1] %v4363_v43  ;;  %v4103_v16 = vsel %vm11108_vm8, %v4095_v44, %v4102_v54  ;;  %v4356_v26 = vsel %vm11069_vm2, %v4104_v8, %v4355_v29  ;;  %v5676_v33 = vsel %vm1254_vm12, %v5671_v20, %v5675_v25 }
 0x21e   : > { %4354 = vst.msk [vmem:[#allocation3 + $0x58] sm:$0xf] %vm13099_vm15, %v4103_v16  ;;  %4357 = vst [vmem:[#allocation3 + $0x5c] sm:$0x1] %v4356_v26 }
 0x21f   : > { %451 = vst [vmem:[#allocation3 + $0xb0] sm:$0x1] %v450_v30  ;;  %5851 = vst.msk [vmem:[#allocation4 + $0x38] sm:$0xff] %vm4549_vm1, %v5676_v33 }
 0x220   : > { %vm13103_vm14 = vmmov %vm13096_vm3 }
 0x221   : > { %vm13104_vm15 = vmmov %vm13096_vm3 }
 0x224   : > { %v10711_v23 = vld [vmem:[#allocation3 + $0x60] sm:$0xff]   ;;  %v10716_v31 = vld [vmem:[#allocation3 + $0x68] ss:$0 sps:$4 sm:$0x11]  }
 0x225   : > { %v10712_v27 = vld [vmem:[#allocation3 + $0x60] sm:$0xff]   ;;  %6278 = vrot.lane.b32.xlu0 %v10711_v23, %s10983_s8  ;;  %v10713_v32 = vld [vmem:[#allocation3 + $0x54] sm:$0xff]   ;;  %v6267_v5 = vpop.permute.xlu0 %6266  ;;  %v10718_v24 = vld [vmem:[#allocation3 + $0x68] ss:$0 sps:$4 sm:$0x11]   ;;  %v6063_v56 = vrot.slane %v10716_v31, 1 }
 0x226   : > { %5414 = vrot.lane.b32.xlu1 %v10712_v27, %s10984_s12  ;;  %v10714_v34 = vld [vmem:[#allocation3 + $0x54] sm:$0xff]   ;;  %v10715_v15 = vld [vmem:[#allocation3 + $0x60] sm:$0xfe]   ;;  %v12132_v40 = vpop.permute.xlu1 %5402  ;;  %v5200_v42 = vrot.slane %v10718_v24, 1 }
 0x227   : > { %v10728_v35 = vld [vmem:[#allocation3 + $0x60] sm:$0xff]   ;;  %v6062_v37 = vrot.slane %v10715_v15, 1  ;;  %v10721_v10 = vld [vmem:[#allocation3 + $0x54] sm:$0xfe]  }
 0x228   : > { %v10717_v39 = vld [vmem:[#allocation3 + $0x60] sm:$0xfe]   ;;  %v6579_v41 = vshrl.u32 %v10728_v35, 16  ;;  %v10722_v61 = vld [vmem:[#allocation3 + $0x5c] ss:$0 sps:$4 sm:$0x11]  }
 0x229   : > { %6276 = vrot.lane.b32.xlu0 %v10713_v32, %s10983_s8  ;;  %v5199_v29 = vrot.slane %v10717_v39, 1  ;;  %v6581_v44 = vshll.u32 %v10728_v35, 16  ;;  %v6064_v45 = vsel %vm1688_vm10, %v6062_v37, %v6063_v56  ;;  %v6059_v46 = vrot.slane %v10721_v10, 1  ;;  %v10730_v47 = vld [vmem:[#allocation3 + $0x60] sm:$0xff]   ;;  %v10723_v4 = vld [vmem:[#allocation3 + $0x54] sm:$0xfe]  }
 0x22a   : > { %5412 = vrot.lane.b32.xlu1 %v10714_v34, %s10984_s12  ;;  %v6092_v49 = vpop.permute.xlu0 %6091  ;;  %v5401_v48 = vpop.permute.xlu1 %5400  ;;  %v6060_v51 = vrot.slane %v10722_v61, 1  ;;  %v10724_v52 = vld [vmem:[#allocation3 + $0x5c] ss:$0 sps:$4 sm:$0x11]   ;;  %v5196_v54 = vrot.slane %v10723_v4, 1  ;;  %v4839_v3 = vshrl.u32 %v10730_v47, 16 }
 0x22b   : > { %v5201_v50 = vsel %vm1688_vm10, %v5199_v29, %v5200_v42  ;;  %6138 = vst.msk [vmem:[#allocation4 + $0x20] sm:$0xff] %vm4982_vm6, %v6092_v49  ;;  %v5197_v8 = vrot.slane %v10724_v52, 1  ;;  %v10729_v21 = vld [vmem:[#allocation3 + $0x68] ss:$0 sps:$4 sm:$0x11]   ;;  %v6583_v57 = vrot.slane %v6581_v44, 1 }
 0x22c   : > { %5449 = vst.msk [vmem:[#allocation4] sm:$0xff] %vm5448_vm5, %v5401_v48  ;;  %v6061_v43 = vsel %vm1688_vm10, %v6059_v46, %v6060_v51  ;;  %v6586_v36 = vshll.u32 %v10729_v21, 16  ;;  %v10731_v2 = vld [vmem:[#allocation3 + $0x68] ss:$0 sps:$4 sm:$0x11]   ;;  %v4841_v6 = vshll.u32 %v10730_v47, 16 }
 0x22d   : > { %6103 = vrot.lane.b32.xlu0 %v6064_v45, %s10980_s15  ;;  %v5198_v16 = vsel %vm1688_vm10, %v5196_v54, %v5197_v8  ;;  %v6584_v26 = vor.u32 %v6583_v57, %v6579_v41  ;;  %v10734_v13 = vld [vmem:[#allocation3 + $0x54] sm:$0xff]   ;;  %v4846_v23 = vshll.u32 %v10731_v2, 16  ;;  %v10735_v30 = vld [vmem:[#allocation3 + $0x5c] ss:$0 sps:$4 sm:$0x11]  }
 0x22e   : > { %5239 = vrot.lane.b32.xlu1 %v5201_v50, %s10983_s8  ;;  %v6090_v63 = vpop.permute.xlu0 %6089  ;;  %v12147_v62 = vpop.permute.xlu1 %5227  ;;  %v6588_v53 = vrot.slane %v6586_v36, 1  ;;  %v4843_v20 = vrot.slane %v4841_v6, 1  ;;  %v6567_v39 = vshrl.u32 %v10734_v13, 16  ;;  %v6569_v24 = vshll.u32 %v10734_v13, 16  ;;  %v4372_v41 = vld [vmem:[#allocation3 + $0x78] sm:$0xf] }
 0x22f   : > { %6137 = vst.msk [vmem:[#allocation4 + $0x8] sm:$0xff] %vm4982_vm6, %v6090_v63  ;;  %v4848_v31 = vrot.slane %v4846_v23, 1  ;;  %v4365_v45 = vld [vmem:[#allocation3 + $0x6c] sm:$0xf]  ;;  %v12161_v49 = vld [vmem:[#allocation3 + $0x54] sm:$0xff]   ;;  %v6574_v54 = vshll.u32 %v10735_v30, 16 }
 0x230   : > { %6314 = vst.msk [vmem:[#allocation4 + $0x8] sm:$0xff] %vm5271_vm9, %v6267_v5  ;;  %v6589_v28 = vsel %vm1254_vm12, %v6584_v26, %v6588_v53  ;;  %v4844_v15 = vor.u32 %v4843_v20, %v4839_v3  ;;  %v6571_v47 = vrot.slane %v6569_v24, 1  ;;  %v12163_v48 = vld [vmem:[#allocation3 + $0x5c] ss:$0 sps:$4 sm:$0x11]   ;;  %v10829_v13 = vld [vmem:[#allocation3 + $0x48] sm:$0xff]  }
 0x231   : > { %6101 = vrot.lane.b32.xlu0 %v6061_v43, %s10980_s15  ;;  %v4376_v4 = vld [vmem:[#allocation3 + $0x80] sm:$0x1]  ;;  %v10793_v3 = vld [vmem:[#allocation3 + $0x5c] ss:$0 sps:$4 sm:$0x11]   ;;  %v4834_v30 = vshll.u32 %v12163_v48, 16 }
 0x232   : > { %5237 = vrot.lane.b32.xlu1 %v5198_v16, %s10983_s8  ;;  %v6699_v32 = vpop.permute.xlu0 %6698  ;;  %v12157_v35 = vpop.permute.xlu1 %5225  ;;  %v4849_v10 = vsel %vm1254_vm12, %v4844_v15, %v4848_v31  ;;  %v6572_v43 = vor.u32 %v6571_v47, %v6567_v39  ;;  %v12170_v16 = vld [vmem:[#allocation3 + $0x48] sm:$0xff]   ;;  %4556 = vst.msk [vmem:[#allocation4 + $0x90] sm:$0xff] %vm4549_vm1, %v10829_v13  ;;  %v4827_v39 = vshrl.u32 %v12161_v49, 16 }
 0x233   : > { %v10288_v22 = vpop.f32.mrb[16].mxu0  ;;  %6746 = vst.msk [vmem:[#allocation4 + $0x8] sm:$0xff] %vm5448_vm5, %v6699_v32  ;;  %v7018_v2 = vld [vmem:[#allocation4] sm:$0xff]  ;;  %v7020_v32 = vld [vmem:[#allocation4 + $0x10] sm:$0xff] }
 0x234   : > { %v3804_v58 = vadd.f32 %v12081_v60, %v10288_v22  ;;  %v3795_v59 = vpop.f32.mrb[17].mxu0  ;;  %v4369_v22 = vld [vmem:[#allocation3 + $0x74] sm:$0x1] }
 0x235   : > { %v3796_v0 = vadd.f32 %v12081_v60, %v3795_v59  ;;  %v10289_v55 = vpop.f32.mrb[18].mxu0  ;;  %6710 = vrot.lane.b32.xlu0 %v6589_v28, %s10984_s12  ;;  %v10792_v59 = vld [vmem:[#allocation3 + $0x54] sm:$0xfe]  }
 0x236   : > { %v3876_v7 = vmax.f32 %v3804_v58, 0.0  ;;  %v3807_v9 = vadd.f32 %v12081_v60, %v10289_v55  ;;  %v3798_v12 = vpop.f32.mrb[19].mxu0  ;;  %4950 = vrot.lane.b32.xlu1 %v4849_v10, %s10980_s15  ;;  %v4939_v63 = vpop.permute.xlu1 %4938  ;;  %v12168_v58 = vld [vmem:[%s13029_s3 + $0x88] sm:$0xff]   ;;  %v6576_v55 = vrot.slane %v6574_v54, 1  ;;  %v6953_v31 = vrot.slane %v10792_v59, 1 }
 0x237   : > { %v3874_v14 = vmax.f32 %v3796_v0, 0.0  ;;  %v3799_v19 = vadd.f32 %v12081_v60, %v3798_v12  ;;  %4985 = vst.msk [vmem:[#allocation4 + $0x30] sm:$0xff] %vm4982_vm6, %v4939_v63 }
 0x238   : > { %v10100_v25 = vpack.c.bf16 %v3876_v7, %v3876_v7  ;;  %v3877_v27 = vmax.f32 %v3807_v9, 0.0  ;;  %5274 = vst.msk [vmem:[#allocation4 + $0x30] sm:$0xff] %vm5271_vm9, %v12147_v62  ;;  %v6577_v23 = vsel %vm1254_vm12, %v6572_v43, %v6576_v55  ;;  %v4829_v62 = vshll.u32 %v12161_v49, 16  ;;  %v7023_v49 = vld [vmem:[#allocation4 + $0x28] sm:$0xff] }
 0x239   : > { %v10098_v33 = vpack.c.bf16 %v3874_v14, %v3874_v14  ;;  %v3875_v34 = vmax.f32 %v3799_v19, 0.0  ;;  %6708 = vrot.lane.b32.xlu0 %v6577_v23, %s10984_s12 }
 0x23a   : > { %v4140_v5 = vshrl.u32 %v10100_v25, 16  ;;  %v10101_v37 = vpack.c.bf16 %v3877_v27, %v3877_v27  ;;  %v4143_v56 = vshll.u32 %v10100_v25, 16  ;;  %v7019_v53 = vld [vmem:[#allocation4 + $0x8] sm:$0xff]  ;;  %v4831_v24 = vrot.slane %v4829_v62, 1 }
 0x23b   : > { %v4123_v29 = vshrl.u32 %v10098_v33, 16  ;;  %v10099_v42 = vpack.c.bf16 %v3875_v34, %v3875_v34  ;;  %v4126_v44 = vshll.u32 %v10098_v33, 16  ;;  %7297 = vmatprep.mubr.bf16.mxu0 %v7019_v53  ;;  %v10832_v25 = vld [vmem:[#allocation3 + $0x3c] sm:$0xff]   ;;  %v7032_v53 = vld [vmem:[#allocation4 + $0x70] sm:$0xff] }
 0x23c   : > { %v4142_v61 = vrot.slane %v4140_v5, 7  ;;  %v4148_v46 = vshrl.u32 %v10101_v37, 16  ;;  %v4151_v51 = vshll.u32 %v10101_v37, 16  ;;  %7298 = vmatmul.mubr.bf16.vlgmr.msra.gmra.mrb[32].mxu0 %v7018_v2  ;;  %v10795_v33 = vld [vmem:[#allocation3 + $0x60] sm:$0xfe]   ;;  %v6954_v5 = vrot.slane %v10793_v3, 1 }
 0x23d   : > { %v4125_v50 = vrot.slane %v4123_v29, 7  ;;  %v4131_v52 = vshrl.u32 %v10099_v42, 16  ;;  %v4134_v57 = vshll.u32 %v10099_v42, 16  ;;  %10303 = vmatpush3.bf16.msra.mxu0 %v12034_v18  ;;  %10306 = vmatprep.mubr.msk.bf16.mxu0 %vm4549_vm1, %v7020_v32  ;;  %v10796_v37 = vld [vmem:[#allocation3 + $0x68] ss:$0 sps:$4 sm:$0x11]  }
 0x23e   : > { %v4145_v8 = vor.u32 %v4143_v56, %v4142_v61  ;;  %v4150_v21 = vrot.slane %v4148_v46, 7  ;;  %v4146_v26 = vrot.slane %v4142_v61, 4  ;;  %4555 = vst.msk [vmem:[#allocation4 + $0x78] sm:$0xff] %vm4549_vm1, %v10832_v25  ;;  %v4937_v56 = vpop.permute.xlu1 %4936  ;;  %10304 = vmatprep.subr.bf16.mxu0 %v12168_v58  ;;  %v5704_v29 = vshll.u32 %v12170_v16, 16  ;;  %v446_v61 = vld [vmem:[#allocation3 + $0xa4] sm:$0x1] }
 0x23f   : > { %v4128_v36 = vor.u32 %v4126_v44, %v4125_v50  ;;  %v4133_v0 = vrot.slane %v4131_v52, 7  ;;  %v4129_v7 = vrot.slane %v4125_v50, 4  ;;  %v4836_v18 = vrot.slane %v4834_v30, 1  ;;  %4984 = vst.msk [vmem:[#allocation4 + $0x18] sm:$0xff] %vm4982_vm6, %v4937_v56 }
 0x240   : > { %v4373_v6 = vsel %vm11859_vm0, %v4145_v8, %v4372_v41  ;;  %v4153_v9 = vor.u32 %v4151_v51, %v4150_v21  ;;  %v4155_v12 = vrot.slane %v4150_v21, 4  ;;  %v6956_v41 = vrot.slane %v10795_v33, 1  ;;  %5273 = vst.msk [vmem:[#allocation4 + $0x18] sm:$0xff] %vm5271_vm9, %v12157_v35  ;;  %v10824_v50 = vld [vmem:[#allocation3 + $0x50] ss:$0 sps:$4 sm:$0x11]  }
 0x241   : > { %4374 = vst [vmem:[#allocation3 + $0x78] sm:$0xf] %v4373_v6  ;;  %v4366_v14 = vsel %vm11859_vm0, %v4128_v36, %v4365_v45  ;;  %v4136_v19 = vor.u32 %v4134_v57, %v4133_v0  ;;  %v4138_v20 = vrot.slane %v4133_v0, 4  ;;  %v6955_v42 = vsel %vm1688_vm10, %v6953_v31, %v6954_v5  ;;  %5450 = vst.msk [vmem:[#allocation4 + $0x18] sm:$0xff] %vm5448_vm5, %v12132_v40  ;;  %v12212_v51 = vld [vmem:[#allocation3 + $0x3c] sm:$0xff]   ;;  %v7029_v6 = vld [vmem:[#allocation4 + $0x58] sm:$0xff] }
 0x242   : > { %4367 = vst [vmem:[#allocation3 + $0x6c] sm:$0xf] %v4366_v14  ;;  %v4154_v27 = vsel %vm11108_vm8, %v4146_v26, %v4153_v9  ;;  %v4377_v28 = vsel %vm11069_vm2, %v4155_v12, %v4376_v4  ;;  %v6957_v10 = vrot.slane %v10796_v37, 1  ;;  %v5702_v44 = vshrl.u32 %v12170_v16, 16  ;;  %7007 = vst.msk [vmem:[#allocation4 + $0x88] sm:$0xff] %vm4549_vm1, %v6955_v42  ;;  %10305 = vmatpush3.bf16.msra.mxu0 %v12168_v58  ;;  %v7026_v4 = vld [vmem:[#allocation4 + $0x40] sm:$0xff] }
 0x243   : > { %4375 = vst.msk [vmem:[#allocation3 + $0x7c] sm:$0xf] %vm13100_vm4, %v4154_v27  ;;  %4378 = vst [vmem:[#allocation3 + $0x80] sm:$0x1] %v4377_v28  ;;  %v4137_v34 = vsel %vm11108_vm8, %v4129_v7, %v4136_v19  ;;  %v4370_v15 = vsel %vm11069_vm2, %v4138_v20, %v4369_v22  ;;  %v4832_v45 = vor.u32 %v4831_v24, %v4827_v39  ;;  %v447_v46 = vsel %vm11102_vm7, 0, %v446_v61 }
 0x244   : > { %4368 = vst.msk [vmem:[#allocation3 + $0x70] sm:$0xf] %vm13101_vm11, %v4137_v34  ;;  %4371 = vst [vmem:[#allocation3 + $0x74] sm:$0x1] %v4370_v15  ;;  %v5706_v47 = vrot.slane %v5704_v29, 1  ;;  %v6958_v48 = vsel %vm1688_vm10, %v6956_v41, %v6957_v10  ;;  %v5709_v54 = vshll.u32 %v10824_v50, 16 }
 0x245   : > { %448 = vst [vmem:[#allocation3 + $0xa4] sm:$0x1] %v447_v46  ;;  %v4837_v35 = vsel %vm1254_vm12, %v4832_v45, %v4836_v18  ;;  %7008 = vst.msk [vmem:[#allocation4 + $0xa0] sm:$0xff] %vm4549_vm1, %v6958_v48  ;;  %10307 = vmatmul.mubr.msk.bf16.vlgmr.msra.gmra.mrb[36].mxu0 %vm4549_vm1, %v7023_v49  ;;  %v5690_v21 = vshrl.u32 %v12212_v51, 16  ;;  %v5692_v57 = vshll.u32 %v12212_v51, 16  ;;  %v12222_v43 = vpop.permute.xlu0 %6270  ;;  %v12247_v45 = vld [vmem:[#allocation3 + $0x60] sm:$0xff]  }
 0x246   : > { %4948 = vrot.lane.b32.xlu1 %v4837_v35, %s10980_s15  ;;  %v5707_v40 = vor.u32 %v5706_v47, %v5702_v44  ;;  %10310 = vmatprep.mubr.msk.bf16.mxu0 %vm4549_vm1, %v7026_v4  ;;  %v5711_v63 = vrot.slane %v5709_v54, 1  ;;  %v12225_v16 = vpop.permute.xlu1 %5406  ;;  %vm9231_vm4 = vcmask 1047559  }
 0x247   : > { %v12245_v44 = vrot.slane %v5692_v57, 1 }
 0x248   : > { %v5712_v0 = vsel %vm1254_vm12, %v5707_v40, %v5711_v63 }
 0x249   : > { %5854 = vst.msk [vmem:[#allocation4 + $0x80] sm:$0xff] %vm4549_vm1, %v5712_v0  ;;  %v6269_v12 = vpop.permute.xlu0 %6268 }
 0x24a   : > { %v10748_v52 = vld [vmem:[#allocation3 + $0x78] sm:$0xff]   ;;  %v10758_v26 = vld [vmem:[#allocation3 + $0x80] ss:$0 sps:$4 sm:$0x11]   ;;  %6315 = vst.msk [vmem:[#allocation4 + $0x20] sm:$0xff] %vm5271_vm9, %v6269_v12  ;;  %v5405_v20 = vpop.permute.xlu1 %5404 }
 0x24b   : > { %v10749_v8 = vld [vmem:[#allocation3 + $0x78] sm:$0xff]   ;;  %6282 = vrot.lane.b32.xlu0 %v10748_v52, %s10983_s8  ;;  %v10752_v22 = vld [vmem:[#allocation3 + $0x6c] sm:$0xff]   ;;  %v10760_v3 = vld [vmem:[#allocation3 + $0x80] ss:$0 sps:$4 sm:$0x11]   ;;  %v6069_v7 = vrot.slane %v10758_v26, 1 }
 0x24c   : > { %5418 = vrot.lane.b32.xlu1 %v10749_v8, %s10984_s12  ;;  %v10753_v58 = vld [vmem:[#allocation3 + $0x6c] sm:$0xff]   ;;  %v10757_v59 = vld [vmem:[#allocation3 + $0x78] sm:$0xfe]   ;;  %v5206_v14 = vrot.slane %v10760_v3, 1  ;;  %5451 = vst.msk [vmem:[#allocation4 + $0x30] sm:$0xff] %vm5448_vm5, %v5405_v20  ;;  %v5726_v3 = vshrl.u32 %v12247_v45, 16 }
 0x24d   : > { %v10770_v36 = vld [vmem:[#allocation3 + $0x78] sm:$0xff]   ;;  %v6068_v55 = vrot.slane %v10757_v59, 1  ;;  %v10763_v19 = vld [vmem:[#allocation3 + $0x6c] sm:$0xfe]   ;;  %10311 = vmatmul.mubr.msk.bf16.gmra.mrb[40].mxu0 %vm4549_vm1, %v7029_v6  ;;  %v6096_v15 = vpop.permute.xlu0 %6095 }
 0x24e   : > { %v10759_v2 = vld [vmem:[#allocation3 + $0x78] sm:$0xfe]   ;;  %v6603_v9 = vshrl.u32 %v10770_v36, 16  ;;  %v10764_v23 = vld [vmem:[#allocation3 + $0x74] ss:$0 sps:$4 sm:$0x11]   ;;  %10314 = vmatprep.mubr.msk.bf16.mxu0 %vm4549_vm1, %v7032_v53  ;;  %v12240_v24 = vpop.permute.xlu1 %5231 }
 0x24f   : > { %6280 = vrot.lane.b32.xlu0 %v10752_v22, %s10983_s8  ;;  %v5205_v13 = vrot.slane %v10759_v2, 1  ;;  %v6605_v25 = vshll.u32 %v10770_v36, 16  ;;  %v6070_v27 = vsel %vm1688_vm10, %v6068_v55, %v6069_v7  ;;  %v6065_v28 = vrot.slane %v10763_v19, 1  ;;  %v10772_v62 = vld [vmem:[#allocation3 + $0x78] sm:$0xff]   ;;  %v10767_v33 = vld [vmem:[#allocation3 + $0x6c] sm:$0xfe]  }
 0x250   : > { %5416 = vrot.lane.b32.xlu1 %v10753_v58, %s10984_s12  ;;  %v6066_v32 = vrot.slane %v10764_v23, 1  ;;  %v10768_v34 = vld [vmem:[#allocation3 + $0x74] ss:$0 sps:$4 sm:$0x11]   ;;  %6140 = vst.msk [vmem:[#allocation4 + $0x50] sm:$0xff] %vm4982_vm6, %v6096_v15  ;;  %v5202_v31 = vrot.slane %v10767_v33, 1 }
 0x251   : > { %v5207_v30 = vsel %vm1688_vm10, %v5205_v13, %v5206_v14  ;;  %v5203_v5 = vrot.slane %v10768_v34, 1  ;;  %v10771_v37 = vld [vmem:[#allocation3 + $0x80] ss:$0 sps:$4 sm:$0x11]   ;;  %v6607_v39 = vrot.slane %v6605_v25, 1  ;;  %v10775_v10 = vld [vmem:[#allocation3 + $0x6c] sm:$0xff]   ;;  %v6094_v61 = vpop.permute.xlu0 %6093 }
 0x252   : > { %v6067_v56 = vsel %vm1688_vm10, %v6065_v28, %v6066_v32  ;;  %v6610_v18 = vshll.u32 %v10771_v37, 16  ;;  %v10773_v42 = vld [vmem:[#allocation3 + $0x80] ss:$0 sps:$4 sm:$0x11]   ;;  %v4863_v46 = vshrl.u32 %v10772_v62, 16  ;;  %v4865_v47 = vshll.u32 %v10772_v62, 16  ;;  %v12254_v57 = vpop.permute.xlu1 %5229 }
 0x253   : > { %6107 = vrot.lane.b32.xlu0 %v6070_v27, %s10980_s15  ;;  %v5204_v41 = vsel %vm1688_vm10, %v5202_v31, %v5203_v5  ;;  %v6608_v29 = vor.u32 %v6607_v39, %v6603_v9  ;;  %6139 = vst.msk [vmem:[#allocation4 + $0x38] sm:$0xff] %vm4982_vm6, %v6094_v61  ;;  %v4870_v48 = vshll.u32 %v10773_v42, 16  ;;  %v6593_v50 = vshll.u32 %v10775_v10, 16  ;;  %v10779_v35 = vld [vmem:[#allocation3 + $0x6c] sm:$0xff]   ;;  %v7035_v2 = vld [vmem:[#allocation4 + $0x88] sm:$0xff]  ;;  %v7038_v14 = vld [vmem:[#allocation4 + $0xa0] sm:$0xff] }
 0x254   : > { %5243 = vrot.lane.b32.xlu1 %v5207_v30, %s10983_s8  ;;  %v6612_v49 = vrot.slane %v6610_v18, 1  ;;  %6316 = vst.msk [vmem:[#allocation4 + $0x38] sm:$0xff] %vm5271_vm9, %v12222_v43  ;;  %v4867_v4 = vrot.slane %v4865_v47, 1  ;;  %v10776_v52 = vld [vmem:[#allocation3 + $0x74] ss:$0 sps:$4 sm:$0x11]  }
 0x255   : > { %v6591_v54 = vshrl.u32 %v10775_v10, 16  ;;  %v6595_v8 = vrot.slane %v6593_v50, 1  ;;  %v10292_v22 = vpop.f32.mrb[20].mxu0  ;;  %v4872_v58 = vrot.slane %v4870_v48, 1  ;;  %v6598_v59 = vshll.u32 %v10776_v52, 16  ;;  %v6703_v13 = vpop.permute.xlu0 %6702  ;;  %10315 = vmatmul.mubr.msk.bf16.gmra.mrb[44].mxu0 %vm4549_vm1, %v7035_v2 }
 0x256   : > { %v6613_v40 = vsel %vm1254_vm12, %v6608_v29, %v6612_v49  ;;  %v4868_v63 = vor.u32 %v4867_v4, %v4863_v46  ;;  %v10780_v26 = vld [vmem:[#allocation3 + $0x74] ss:$0 sps:$4 sm:$0x11]   ;;  %v3820_v36 = vadd.f32 %v12081_v60, %v10292_v22  ;;  %v3811_v0 = vpop.f32.mrb[21].mxu0  ;;  %v4853_v43 = vshll.u32 %v10779_v35, 16  ;;  %6748 = vst.msk [vmem:[#allocation4 + $0x38] sm:$0xff] %vm5448_vm5, %v6703_v13  ;;  %10318 = vmatprep.mubr.msk.bf16.mxu0 %vm4549_vm1, %v7038_v14  ;;  %v4943_v5 = vpop.permute.xlu1 %4942 }
 0x257   : > { %6105 = vrot.lane.b32.xlu0 %v6067_v56, %s10980_s15  ;;  %v6596_v55 = vor.u32 %v6595_v8, %v6591_v54  ;;  %v3812_v6 = vadd.f32 %v12081_v60, %v3811_v0  ;;  %v10293_v7 = vpop.f32.mrb[22].mxu0  ;;  %v6600_v12 = vrot.slane %v6598_v59, 1  ;;  %v4858_v53 = vshll.u32 %v10780_v26, 16  ;;  %v10803_v33 = vld [vmem:[#allocation3 + $0x6c] sm:$0xfe]   ;;  %4987 = vst.msk [vmem:[#allocation4 + $0x60] sm:$0xff] %vm4982_vm6, %v4943_v5 }
 0x258   : > { %5241 = vrot.lane.b32.xlu1 %v5204_v41, %s10983_s8  ;;  %v4873_v9 = vsel %vm1254_vm12, %v4868_v63, %v4872_v58  ;;  %v3880_v19 = vmax.f32 %v3820_v36, 0.0  ;;  %v3823_v20 = vadd.f32 %v12081_v60, %v10293_v7  ;;  %v3814_v23 = vpop.f32.mrb[23].mxu0  ;;  %v4851_v25 = vshrl.u32 %v10779_v35, 16  ;;  %v10804_v37 = vld [vmem:[#allocation3 + $0x74] ss:$0 sps:$4 sm:$0x11]  }
 0x259   : > { %v4855_v27 = vrot.slane %v4853_v43, 1  ;;  %v3878_v28 = vmax.f32 %v3812_v6, 0.0  ;;  %v3815_v62 = vadd.f32 %v12081_v60, %v3814_v23  ;;  %v6601_v30 = vsel %vm1254_vm12, %v6596_v55, %v6600_v12  ;;  %5276 = vst.msk [vmem:[#allocation4 + $0x60] sm:$0xff] %vm5271_vm9, %v12240_v24  ;;  %v10807_v10 = vld [vmem:[#allocation3 + $0x78] sm:$0xfe]   ;;  %v6701_v55 = vpop.permute.xlu0 %6700 }
 0x25a   : > { %v4860_v32 = vrot.slane %v4858_v53, 1  ;;  %v10104_v34 = vpack.c.bf16 %v3880_v19, %v3880_v19  ;;  %v3881_v15 = vmax.f32 %v3823_v20, 0.0  ;;  %v6959_v41 = vrot.slane %v10803_v33, 1  ;;  %v4386_v61 = vld [vmem:[#allocation3 + $0x90] sm:$0xf]  ;;  %6747 = vst.msk [vmem:[#allocation4 + $0x20] sm:$0xff] %vm5448_vm5, %v6701_v55 }
 0x25b   : > { %6714 = vrot.lane.b32.xlu0 %v6613_v40, %s10984_s12  ;;  %v4856_v31 = vor.u32 %v4855_v27, %v4851_v25  ;;  %v10102_v39 = vpack.c.bf16 %v3878_v28, %v3878_v28  ;;  %v3879_v56 = vmax.f32 %v3815_v62, 0.0  ;;  %v6960_v48 = vrot.slane %v10804_v37, 1  ;;  %v10808_v50 = vld [vmem:[#allocation3 + $0x80] ss:$0 sps:$4 sm:$0x11]   ;;  %v12283_v23 = vld [vmem:[#allocation3 + $0x54] sm:$0xff]  }
 0x25c   : > { %4954 = vrot.lane.b32.xlu1 %v4873_v9, %s10980_s15  ;;  %v4174_v29 = vshrl.u32 %v10104_v34, 16  ;;  %v4177_v18 = vshll.u32 %v10104_v34, 16  ;;  %v10105_v42 = vpack.c.bf16 %v3881_v15, %v3881_v15  ;;  %v4379_v4 = vld [vmem:[#allocation3 + $0x84] sm:$0xf]  ;;  %v6962_v54 = vrot.slane %v10807_v10, 1 }
 0x25d   : > { %v4861_v60 = vsel %vm1254_vm12, %v4856_v31, %v4860_v32  ;;  %v4157_v46 = vshrl.u32 %v10102_v39, 16  ;;  %v4160_v47 = vshll.u32 %v10102_v39, 16  ;;  %v10103_v49 = vpack.c.bf16 %v3879_v56, %v3879_v56  ;;  %v4390_v22 = vld [vmem:[#allocation3 + $0x98] sm:$0x1]  ;;  %v4383_v0 = vld [vmem:[#allocation3 + $0x8c] sm:$0x1] }
 0x25e   : > { %v4176_v35 = vrot.slane %v4174_v29, 7  ;;  %v4182_v52 = vshrl.u32 %v10105_v42, 16  ;;  %v4185_v40 = vshll.u32 %v10105_v42, 16  ;;  %v6961_v24 = vsel %vm1688_vm10, %v6959_v41, %v6960_v48  ;;  %v10826_v2 = vld [vmem:[#allocation3 + $0x44] ss:$0 sps:$4 sm:$0x11]  }
 0x25f   : > { %6712 = vrot.lane.b32.xlu0 %v6601_v30, %s10984_s12  ;;  %v4159_v8 = vrot.slane %v4157_v46, 7  ;;  %v4165_v63 = vshrl.u32 %v10103_v49, 16  ;;  %v4168_v58 = vshll.u32 %v10103_v49, 16  ;;  %7009 = vst.msk [vmem:[#allocation4 + $0xb8] sm:$0xff] %vm4549_vm1, %v6961_v24  ;;  %v6963_v43 = vrot.slane %v10808_v50, 1  ;;  %v4941_v5 = vpop.permute.xlu1 %4940  ;;  %v7025_v46 = vld [vmem:[#allocation4 + $0x38] sm:$0xff] }
 0x260   : > { %4952 = vrot.lane.b32.xlu1 %v4861_v60, %s10980_s15  ;;  %v4179_v59 = vor.u32 %v4177_v18, %v4176_v35  ;;  %v4180_v26 = vrot.slane %v4176_v35, 4  ;;  %v4184_v36 = vrot.slane %v4182_v52, 7  ;;  %v5695_v12 = vor.u32 %v12245_v44, %v5690_v21  ;;  %v401_v20 = vld [vmem:[#allocation3 + $0xc0] sm:$0x1]  ;;  %v398_v21 = vld [vmem:[#allocation3 + $0xb4] sm:$0x1] }
 0x261   : > { %v4162_v6 = vor.u32 %v4160_v47, %v4159_v8  ;;  %v4163_v7 = vrot.slane %v4159_v8, 4  ;;  %v4167_v9 = vrot.slane %v4165_v63, 7  ;;  %v6964_v19 = vsel %vm1688_vm10, %v6962_v54, %v6963_v43  ;;  %v455_v33 = vld [vmem:[#allocation3 + $0xc8] sm:$0x1]  ;;  %v452_v34 = vld [vmem:[#allocation3 + $0xbc] sm:$0x1] }
 0x262   : > { %v4387_v53 = vsel %vm11859_vm0, %v4179_v59, %v4386_v61  ;;  %v4187_v13 = vor.u32 %v4185_v40, %v4184_v36  ;;  %v4189_v14 = vrot.slane %v4184_v36, 4  ;;  %7010 = vst.msk [vmem:[#allocation4 + $0xd0] sm:$0xff] %vm4549_vm1, %v6964_v19  ;;  %v5697_v51 = vshll.u32 %v10826_v2, 16  ;;  %v10854_v41 = vld [vmem:[#allocation3 + $0x68] ss:$0 sps:$4 sm:$0x11]  }
 0x263   : > { %4388 = vst [vmem:[#allocation3 + $0x90] sm:$0xf] %v4387_v53  ;;  %v4380_v25 = vsel %vm11859_vm0, %v4162_v6, %v4379_v4  ;;  %v4170_v27 = vor.u32 %v4168_v58, %v4167_v9  ;;  %v4172_v28 = vrot.slane %v4167_v9, 4  ;;  %v402_v30 = vsel %vm11069_vm2, 0, %v401_v20  ;;  %4986 = vst.msk [vmem:[#allocation4 + $0x48] sm:$0xff] %vm4982_vm6, %v4941_v5  ;;  %v7021_v18 = vld [vmem:[#allocation4 + $0x18] sm:$0xff]  ;;  %v6275_v42 = vpop.permute.xlu0 %6274 }
 0x264   : > { %4381 = vst [vmem:[#allocation3 + $0x84] sm:$0xf] %v4380_v25  ;;  %v4188_v44 = vsel %vm11108_vm8, %v4180_v26, %v4187_v13  ;;  %v4391_v62 = vsel %vm11069_vm2, %v4189_v14, %v4390_v22  ;;  %v399_v32 = vsel %vm11069_vm2, 0, %v398_v21  ;;  %v5699_v37 = vrot.slane %v5697_v51, 1  ;;  %403 = vst [vmem:[#allocation3 + $0xc0] sm:$0x1] %v402_v30  ;;  %v12316_v49 = vpop.permute.xlu1 %5410 }
 0x265   : > { %4389 = vst.msk [vmem:[#allocation3 + $0x94] sm:$0xf] %vm13096_vm3, %v4188_v44  ;;  %4392 = vst [vmem:[#allocation3 + $0x98] sm:$0x1] %v4391_v62  ;;  %v4171_v15 = vsel %vm11108_vm8, %v4163_v7, %v4170_v27  ;;  %v4384_v31 = vsel %vm11069_vm2, %v4172_v28, %v4383_v0  ;;  %v456_v39 = vsel %vm11102_vm7, 0, %v455_v33  ;;  %v453_v56 = vsel %vm11102_vm7, 0, %v452_v34 }
 0x266   : > { %400 = vst [vmem:[#allocation3 + $0xb4] sm:$0x1] %v399_v32  ;;  %4382 = vst.msk [vmem:[#allocation3 + $0x88] sm:$0xf] %vm13102_vm13, %v4171_v15  ;;  %v7041_v29 = vld [vmem:[#allocation4 + $0xb8] sm:$0xff]  ;;  %v5700_v60 = vsel %vm1254_vm12, %v5695_v12, %v5699_v37  ;;  %v5728_v10 = vshll.u32 %v12247_v45, 16 }
 0x267   : > { %4385 = vst [vmem:[#allocation3 + $0x8c] sm:$0x1] %v4384_v31  ;;  %457 = vst [vmem:[#allocation3 + $0xc8] sm:$0x1] %v456_v39  ;;  %10319 = vmatmul.mubr.msk.bf16.gmra.mrb[48].mxu0 %vm4549_vm1, %v7041_v29  ;;  %v7022_v61 = vld [vmem:[#allocation4 + $0x20] sm:$0xff]  ;;  %v5733_v47 = vshll.u32 %v10854_v41, 16  ;;  %v6273_v35 = vpop.permute.xlu0 %6272 }
 0x268   : > { %5275 = vst.msk [vmem:[#allocation4 + $0x48] sm:$0xff] %vm5271_vm9, %v12254_v57  ;;  %454 = vst [vmem:[#allocation3 + $0xbc] sm:$0x1] %v453_v56  ;;  %v5716_v57 = vshll.u32 %v12283_v23, 16  ;;  %7305 = vmatprep.mubr.bf16.mxu1 %v7022_v61  ;;  %v5730_v48 = vrot.slane %v5728_v10, 1  ;;  %v5409_v54 = vpop.permute.xlu1 %5408  ;;  %v5714_v8 = vshrl.u32 %v12283_v23, 16 }
 0x269   : > { %5452 = vst.msk [vmem:[#allocation4 + $0x48] sm:$0xff] %vm5448_vm5, %v12225_v16  ;;  %v12318_v50 = vld [vmem:[#allocation3 + $0x5c] ss:$0 sps:$4 sm:$0x11]   ;;  %7306 = vmatmul.mubr.bf16.vlgmr.msra.gmra.mrb[0].mxu1 %v7021_v18  ;;  %v5735_v52 = vrot.slane %v5733_v47, 1  ;;  %5453 = vst.msk [vmem:[#allocation4 + $0x60] sm:$0xff] %vm5448_vm5, %v5409_v54 }
 0x26a   : > { %5853 = vst.msk [vmem:[#allocation4 + $0x68] sm:$0xff] %vm4549_vm1, %v5700_v60  ;;  %7313 = vmatprep.mubr.bf16.mxu1 %v7025_v46  ;;  %v5731_v16 = vor.u32 %v5730_v48, %v5726_v3  ;;  %v12327_v58 = vrot.slane %v5716_v57, 1  ;;  %v5721_v45 = vshll.u32 %v12318_v50, 16  ;;  %v7024_v59 = vld [vmem:[#allocation4 + $0x30] sm:$0xff] }
 0x26b   : > { %6317 = vst.msk [vmem:[#allocation4 + $0x50] sm:$0xff] %vm5271_vm9, %v6273_v35  ;;  %v6100_v26 = vpop.permute.xlu0 %6099  ;;  %v7044_v0 = vld [vmem:[#allocation4 + $0xd0] sm:$0xff] }
 0x26c   : > { %v10789_v4 = vld [vmem:[#allocation3 + $0x90] sm:$0xff]   ;;  %v5736_v63 = vsel %vm1254_vm12, %v5731_v16, %v5735_v52  ;;  %v10800_v36 = vld [vmem:[#allocation3 + $0x98] ss:$0 sps:$4 sm:$0x11]   ;;  %6142 = vst.msk [vmem:[#allocation4 + $0x80] sm:$0xff] %vm4982_vm6, %v6100_v26  ;;  %10322 = vmatprep.mubr.msk.bf16.mxu0 %vm4549_vm1, %v7044_v0  ;;  %v5236_v6 = vpop.permute.xlu1 %5235 }
 0x26d   : > { %v10790_v40 = vld [vmem:[#allocation3 + $0x90] sm:$0xff]   ;;  %6286 = vrot.lane.b32.xlu0 %v10789_v4, %s10983_s8  ;;  %v10794_v22 = vld [vmem:[#allocation3 + $0x84] sm:$0xff]   ;;  %5856 = vst.msk [vmem:[#allocation4 + $0xb0] sm:$0xff] %vm4549_vm1, %v5736_v63  ;;  %v10802_v2 = vld [vmem:[#allocation3 + $0x98] ss:$0 sps:$4 sm:$0x11]  }
 0x26e   : > { %5422 = vrot.lane.b32.xlu1 %v10790_v40, %s10984_s12  ;;  %v10797_v3 = vld [vmem:[#allocation3 + $0x84] sm:$0xff]   ;;  %v10799_v24 = vld [vmem:[#allocation3 + $0x90] sm:$0xfe]   ;;  %v6075_v7 = vrot.slane %v10800_v36, 1  ;;  %v5212_v53 = vrot.slane %v10802_v2, 1 }
 0x26f   : > { %v6074_v55 = vrot.slane %v10799_v24, 1  ;;  %v10801_v43 = vld [vmem:[#allocation3 + $0x90] sm:$0xfe]   ;;  %v10805_v13 = vld [vmem:[#allocation3 + $0x84] sm:$0xfe]   ;;  %v6098_v14 = vpop.permute.xlu0 %6097 }
 0x270   : > { %v10811_v9 = vld [vmem:[#allocation3 + $0x90] sm:$0xff]   ;;  %v5211_v12 = vrot.slane %v10801_v43, 1  ;;  %v10806_v19 = vld [vmem:[#allocation3 + $0x8c] ss:$0 sps:$4 sm:$0x11]   ;;  %6141 = vst.msk [vmem:[#allocation4 + $0x68] sm:$0xff] %vm4982_vm6, %v6098_v14  ;;  %v5234_v51 = vpop.permute.xlu1 %5233 }
 0x271   : > { %6284 = vrot.lane.b32.xlu0 %v10794_v22, %s10983_s8  ;;  %7314 = vmatmul.mubr.bf16.gmra.mrb[4].mxu1 %v7024_v59  ;;  %v6627_v20 = vshrl.u32 %v10811_v9, 16  ;;  %v6076_v25 = vsel %vm1688_vm10, %v6074_v55, %v6075_v7  ;;  %v6071_v27 = vrot.slane %v10805_v13, 1  ;;  %v6629_v28 = vshll.u32 %v10811_v9, 16  ;;  %6318 = vst.msk [vmem:[#allocation4 + $0x68] sm:$0xff] %vm5271_vm9, %v6275_v42  ;;  %v10809_v62 = vld [vmem:[#allocation3 + $0x84] sm:$0xfe]  }
 0x272   : > { %5420 = vrot.lane.b32.xlu1 %v10797_v3, %s10984_s12  ;;  %v5213_v21 = vsel %vm1688_vm10, %v5211_v12, %v5212_v53  ;;  %v6072_v44 = vrot.slane %v10806_v19, 1  ;;  %v10810_v30 = vld [vmem:[#allocation3 + $0x8c] ss:$0 sps:$4 sm:$0x11]   ;;  %v5208_v32 = vrot.slane %v10809_v62, 1  ;;  %v10813_v41 = vld [vmem:[#allocation3 + $0x90] sm:$0xff]  }
 0x273   : > { %v5209_v33 = vrot.slane %v10810_v30, 1  ;;  %v10812_v34 = vld [vmem:[#allocation3 + $0x98] ss:$0 sps:$4 sm:$0x11]   ;;  %v6631_v15 = vrot.slane %v6629_v28, 1  ;;  %v6707_v31 = vpop.permute.xlu0 %6706  ;;  %v10817_v18 = vld [vmem:[#allocation3 + $0x84] sm:$0xff]  }
 0x274   : > { %v6073_v5 = vsel %vm1688_vm10, %v6071_v27, %v6072_v44  ;;  %6750 = vst.msk [vmem:[#allocation4 + $0x68] sm:$0xff] %vm5448_vm5, %v6707_v31  ;;  %v6634_v56 = vshll.u32 %v10812_v34, 16  ;;  %v10814_v29 = vld [vmem:[#allocation3 + $0x98] ss:$0 sps:$4 sm:$0x11]   ;;  %v4947_v42 = vpop.permute.xlu1 %4946  ;;  %v4887_v10 = vshrl.u32 %v10813_v41, 16 }
 0x275   : > { %6111 = vrot.lane.b32.xlu0 %v6076_v25, %s10980_s15  ;;  %v5210_v37 = vsel %vm1688_vm10, %v5208_v32, %v5209_v33  ;;  %v6632_v39 = vor.u32 %v6631_v15, %v6627_v20  ;;  %v4889_v61 = vshll.u32 %v10813_v41, 16  ;;  %v4894_v46 = vshll.u32 %v10814_v29, 16  ;;  %v10815_v47 = vld [vmem:[#allocation3 + $0x84] sm:$0xfe]   ;;  %4989 = vst.msk [vmem:[#allocation4 + $0x90] sm:$0xff] %vm4982_vm6, %v4947_v42 }
 0x276   : > { %5247 = vrot.lane.b32.xlu1 %v5213_v21, %s10983_s8  ;;  %v6636_v60 = vrot.slane %v6634_v56, 1  ;;  %v10816_v57 = vld [vmem:[#allocation3 + $0x8c] ss:$0 sps:$4 sm:$0x11]   ;;  %v6615_v48 = vshrl.u32 %v10817_v18, 16  ;;  %5278 = vst.msk [vmem:[#allocation4 + $0x90] sm:$0xff] %vm5271_vm9, %v5236_v6  ;;  %v5719_v21 = vor.u32 %v12327_v58, %v5714_v8 }
 0x277   : > { %v6705_v35 = vpop.permute.xlu0 %6704  ;;  %v4891_v4 = vrot.slane %v4889_v61, 1  ;;  %v4896_v52 = vrot.slane %v4894_v46, 1  ;;  %v6965_v40 = vrot.slane %v10815_v47, 1  ;;  %v10821_v54 = vld [vmem:[#allocation3 + $0x84] sm:$0xff]   ;;  %v6966_v22 = vrot.slane %v10816_v57, 1 }
 0x278   : > { %v6637_v16 = vsel %vm1254_vm12, %v6632_v39, %v6636_v60  ;;  %6749 = vst.msk [vmem:[#allocation4 + $0x50] sm:$0xff] %vm5448_vm5, %v6705_v35  ;;  %v10818_v63 = vld [vmem:[#allocation3 + $0x8c] ss:$0 sps:$4 sm:$0x11]   ;;  %v6617_v24 = vshll.u32 %v10817_v18, 16  ;;  %v4875_v59 = vshrl.u32 %v10821_v54, 16  ;;  %v4945_v26 = vpop.permute.xlu1 %4944 }
 0x279   : > { %6109 = vrot.lane.b32.xlu0 %v6073_v5, %s10980_s15  ;;  %v4892_v3 = vor.u32 %v4891_v4, %v4887_v10  ;;  %v6967_v36 = vsel %vm1688_vm10, %v6965_v40, %v6966_v22  ;;  %v6622_v0 = vshll.u32 %v10818_v63, 16  ;;  %v10819_v55 = vld [vmem:[#allocation3 + $0x90] sm:$0xfe]   ;;  %v4877_v43 = vshll.u32 %v10821_v54, 16  ;;  %4988 = vst.msk [vmem:[#allocation4 + $0x78] sm:$0xff] %vm4982_vm6, %v4945_v26  ;;  %v7027_v33 = vld [vmem:[#allocation4 + $0x48] sm:$0xff] }
 0x27a   : > { %5245 = vrot.lane.b32.xlu1 %v5210_v37, %s10983_s8  ;;  %7011 = vst.msk [vmem:[#allocation4 + $0xe8] sm:$0xff] %vm4549_vm1, %v6967_v36  ;;  %v6619_v6 = vrot.slane %v6617_v24, 1  ;;  %v10820_v7 = vld [vmem:[#allocation3 + $0x98] ss:$0 sps:$4 sm:$0x11]   ;;  %v6968_v12 = vrot.slane %v10819_v55, 1 }
 0x27b   : > { %v4897_v2 = vsel %vm1254_vm12, %v4892_v3, %v4896_v52  ;;  %5277 = vst.msk [vmem:[#allocation4 + $0x78] sm:$0xff] %vm5271_vm9, %v5234_v51  ;;  %v6624_v9 = vrot.slane %v6622_v0, 1  ;;  %v6969_v14 = vrot.slane %v10820_v7, 1  ;;  %v10822_v19 = vld [vmem:[#allocation3 + $0x8c] ss:$0 sps:$4 sm:$0x11]  }
 0x27c   : > { %5454 = vst.msk [vmem:[#allocation4 + $0x78] sm:$0xff] %vm5448_vm5, %v12316_v49  ;;  %v6620_v13 = vor.u32 %v6619_v6, %v6615_v48  ;;  %v4879_v20 = vrot.slane %v4877_v43, 1  ;;  %v12363_v25 = vld [vmem:[%s13028_s2] ss:$0 sm:$0xff]  ;;  %v4882_v23 = vshll.u32 %v10822_v19, 16  ;;  %v7031_v8 = vld [vmem:[#allocation4 + $0x68] sm:$0xff] }
 0x27d   : > { %6718 = vrot.lane.b32.xlu0 %v6637_v16, %s10984_s12  ;;  %v6970_v30 = vsel %vm1688_vm10, %v6968_v12, %v6969_v14  ;;  %v5723_v58 = vrot.slane %v5721_v45, 1  ;;  %v10859_v39 = vld [vmem:[#allocation3 + $0x60] sm:$0xff]   ;;  %v10863_v60 = vld [vmem:[#allocation3 + $0x54] sm:$0xff]   ;;  %v404_v50 = vld [vmem:[#allocation3 + $0xcc] sm:$0x1] }
 0x27e   : > { %4958 = vrot.lane.b32.xlu1 %v4897_v2, %s10980_s15  ;;  %v6625_v62 = vsel %vm1254_vm12, %v6620_v13, %v6624_v9  ;;  %v4880_v32 = vor.u32 %v4879_v20, %v4875_v59  ;;  %7012 = vst.msk [vmem:[#allocation4 + $0x100] sm:$0xff] %vm4549_vm1, %v6970_v30  ;;  %v4884_v18 = vrot.slane %v4882_v23, 1  ;;  %4558 = vst.msk [vmem:[#allocation4 + $0xc0] sm:$0xff] %vm4549_vm1, %v10859_v39  ;;  %v4400_v48 = vld [vmem:[#allocation3 + $0xa8] sm:$0xf]  ;;  %v405_v52 = vsel %vm11069_vm2, 0, %v404_v50 }
 0x27f   : > { %v7028_v51 = vld [vmem:[#allocation4 + $0x50] sm:$0xff]  ;;  %v5724_v42 = vsel %vm1254_vm12, %v5719_v21, %v5723_v58  ;;  %4557 = vst.msk [vmem:[#allocation4 + $0xa8] sm:$0xff] %vm4549_vm1, %v10863_v60  ;;  %v10880_v40 = vld [vmem:[#allocation3 + $0x78] sm:$0xff]   ;;  %406 = vst [vmem:[#allocation3 + $0xcc] sm:$0x1] %v405_v52 }
 0x280   : > { %7321 = vmatprep.mubr.bf16.mxu1 %v7028_v51  ;;  %5855 = vst.msk [vmem:[#allocation4 + $0x98] sm:$0xff] %vm4549_vm1, %v5724_v42  ;;  %v4885_v57 = vsel %vm1254_vm12, %v4880_v32, %v4884_v18  ;;  %v4393_v22 = vld [vmem:[#allocation3 + $0x9c] sm:$0xf]  ;;  %v10881_v24 = vld [vmem:[#allocation3 + $0x80] ss:$0 sps:$4 sm:$0x11]  }
 0x281   : > { %6716 = vrot.lane.b32.xlu0 %v6625_v62, %s10984_s12  ;;  %7322 = vmatmul.mubr.bf16.gmra.mrb[8].mxu1 %v7027_v33  ;;  %v7047_v29 = vld [vmem:[#allocation4 + $0xe8] sm:$0xff]  ;;  %v4404_v26 = vld [vmem:[#allocation3 + $0xb0] sm:$0x1]  ;;  %v7030_v43 = vld [vmem:[#allocation4 + $0x60] sm:$0xff]  ;;  %v5750_v2 = vshrl.u32 %v10880_v40, 16  ;;  %v5752_v13 = vshll.u32 %v10880_v40, 16 }
 0x282   : > { %7329 = vmatprep.mubr.bf16.mxu1 %v7031_v8  ;;  %10323 = vmatmul.mubr.msk.bf16.gmra.mrb[52].mxu0 %vm4549_vm1, %v7047_v29  ;;  %v458_v6 = vld [vmem:[#allocation3 + $0xd4] sm:$0x1]  ;;  %v10884_v14 = vld [vmem:[#allocation3 + $0x6c] sm:$0xff]   ;;  %v10886_v19 = vld [vmem:[#allocation3 + $0x78] sm:$0xff]   ;;  %v5757_v51 = vshll.u32 %v10881_v24, 16 }
 0x283   : > { %4956 = vrot.lane.b32.xlu1 %v4885_v57, %s10980_s15  ;;  %v10887_v21 = vld [vmem:[#allocation3 + $0x6c] sm:$0xff]   ;;  %v5754_v30 = vrot.slane %v5752_v13, 1  ;;  %4560 = vst.msk [vmem:[#allocation4 + $0xf0] sm:$0xff] %vm4549_vm1, %v10886_v19  ;;  %v10885_v23 = vld [vmem:[#allocation3 + $0x74] ss:$0 sps:$4 sm:$0x11]  }
 0x284   : > { %4559 = vst.msk [vmem:[#allocation4 + $0xd8] sm:$0xff] %vm4549_vm1, %v10887_v21  ;;  %v459_v39 = vsel %vm11102_vm7, 0, %v458_v6  ;;  %v5740_v18 = vshll.u32 %v10884_v14, 16  ;;  %v5745_v42 = vshll.u32 %v10885_v23, 16  ;;  %vm13105_vm7 = vmmov %vm13096_vm3 }
 0x285   : > { %v7050_v55 = vld [vmem:[#allocation4 + $0x100] sm:$0xff]  ;;  %460 = vst [vmem:[#allocation3 + $0xd4] sm:$0x1] %v459_v39 }
 0x286   : > { %10326 = vmatprep.mubr.msk.bf16.mxu0 %vm4549_vm1, %v7050_v55  ;;  %v12412_v50 = vld [vmem:[#allocation3 + $0xcc] sm:$0xff]  }
 0x287   : > { %v6687_v52 = vshrl.u32 %v12412_v50, 16 }
 0x289   : > { %v10296_v53 = vpop.f32.mrb[24].mxu0  ;;  %7330 = vmatmul.mubr.bf16.gmra.mrb[12].mxu1 %v7030_v43 }
 0x28a   : > { %v3836_v27 = vadd.f32 %v12363_v25, %v10296_v53  ;;  %v3827_v28 = vpop.f32.mrb[25].mxu0  ;;  %v4397_v53 = vld [vmem:[#allocation3 + $0xa4] sm:$0x1] }
 0x28b   : > { %v3828_v49 = vadd.f32 %v12363_v25, %v3827_v28  ;;  %v10297_v44 = vpop.f32.mrb[26].mxu0 }
 0x28c   : > { %v3884_v34 = vmax.f32 %v3836_v27, 0.0  ;;  %v3839_v15 = vadd.f32 %v12363_v25, %v10297_v44  ;;  %v3830_v31 = vpop.f32.mrb[27].mxu0 }
 0x28d   : > { %v3882_v5 = vmax.f32 %v3828_v49, 0.0  ;;  %v3831_v37 = vadd.f32 %v12363_v25, %v3830_v31  ;;  %v5759_v31 = vrot.slane %v5757_v51, 1 }
 0x28e   : > { %v10108_v56 = vpack.c.bf16 %v3884_v34, %v3884_v34  ;;  %v3885_v41 = vmax.f32 %v3839_v15, 0.0 }
 0x28f   : > { %v10106_v10 = vpack.c.bf16 %v3882_v5, %v3882_v5  ;;  %v3883_v61 = vmax.f32 %v3831_v37, 0.0  ;;  %v5755_v37 = vor.u32 %v5754_v30, %v5750_v2 }
 0x290   : > { %v4208_v45 = vshrl.u32 %v10108_v56, 16  ;;  %v4211_v46 = vshll.u32 %v10108_v56, 16  ;;  %v10109_v47 = vpack.c.bf16 %v3885_v41, %v3885_v41 }
 0x291   : > { %v4191_v35 = vshrl.u32 %v10106_v10, 16  ;;  %v4194_v16 = vshll.u32 %v10106_v10, 16  ;;  %v10107_v4 = vpack.c.bf16 %v3883_v61, %v3883_v61  ;;  %v5760_v29 = vsel %vm1254_vm12, %v5755_v37, %v5759_v31 }
 0x292   : > { %v4210_v54 = vrot.slane %v4208_v45, 7  ;;  %v4216_v63 = vshrl.u32 %v10109_v47, 16  ;;  %v4219_v3 = vshll.u32 %v10109_v47, 16  ;;  %5858 = vst.msk [vmem:[#allocation4 + $0xe0] sm:$0xff] %vm4549_vm1, %v5760_v29  ;;  %v5738_v10 = vshrl.u32 %v10884_v14, 16 }
 0x293   : > { %v4193_v59 = vrot.slane %v4191_v35, 7  ;;  %v4199_v36 = vshrl.u32 %v10107_v4, 16  ;;  %v4202_v0 = vshll.u32 %v10107_v4, 16  ;;  %v5742_v61 = vrot.slane %v5740_v18, 1 }
 0x294   : > { %v4213_v7 = vor.u32 %v4211_v46, %v4210_v54  ;;  %v4214_v9 = vrot.slane %v4210_v54, 4  ;;  %v4218_v12 = vrot.slane %v4216_v63, 7  ;;  %v5747_v45 = vrot.slane %v5745_v42, 1  ;;  %v12414_v46 = vld [vmem:[#allocation3 + $0x90] sm:$0xff]  }
 0x295   : > { %v4196_v20 = vor.u32 %v4194_v16, %v4193_v59  ;;  %v4197_v27 = vrot.slane %v4193_v59, 4  ;;  %v4201_v28 = vrot.slane %v4199_v36, 7  ;;  %v5743_v47 = vor.u32 %v5742_v61, %v5738_v10  ;;  %v12424_v59 = vld [vmem:[#allocation3 + $0x98] ss:$0 sps:$4 sm:$0x11]  }
 0x296   : > { %v4401_v49 = vsel %vm11859_vm0, %v4213_v7, %v4400_v48  ;;  %v4221_v44 = vor.u32 %v4219_v3, %v4218_v12  ;;  %v4223_v62 = vrot.slane %v4218_v12, 4  ;;  %v5774_v40 = vshrl.u32 %v12414_v46, 16 }
 0x297   : > { %4402 = vst [vmem:[#allocation3 + $0xa8] sm:$0xf] %v4401_v49  ;;  %v4394_v32 = vsel %vm11859_vm0, %v4196_v20, %v4393_v22  ;;  %v4204_v33 = vor.u32 %v4202_v0, %v4201_v28  ;;  %v4206_v34 = vrot.slane %v4201_v28, 4  ;;  %v6279_v15 = vpop.permute.xlu0 %6278  ;;  %v5748_v16 = vsel %vm1254_vm12, %v5743_v47, %v5747_v45 }
 0x298   : > { %4395 = vst [vmem:[#allocation3 + $0x9c] sm:$0xf] %v4394_v32  ;;  %v4222_v8 = vsel %vm11108_vm8, %v4214_v9, %v4221_v44  ;;  %v4405_v58 = vsel %vm11069_vm2, %v4223_v62, %v4404_v26  ;;  %v12398_v5 = vpop.permute.xlu1 %5414  ;;  %5857 = vst.msk [vmem:[#allocation4 + $0xc8] sm:$0xff] %vm4549_vm1, %v5748_v16  ;;  %v5776_v22 = vshll.u32 %v12414_v46, 16  ;;  %v5781_v28 = vshll.u32 %v12424_v59, 16 }
 0x299   : > { %4403 = vst.msk [vmem:[#allocation3 + $0xac] sm:$0xf] %vm13103_vm14, %v4222_v8  ;;  %4406 = vst [vmem:[#allocation3 + $0xb0] sm:$0x1] %v4405_v58  ;;  %v4205_v56 = vsel %vm11108_vm8, %v4197_v27, %v4204_v33  ;;  %v4398_v41 = vsel %vm11069_vm2, %v4206_v34, %v4397_v53 }
 0x29a   : > { %4396 = vst.msk [vmem:[#allocation3 + $0xa0] sm:$0xf] %vm13104_vm15, %v4205_v56  ;;  %4399 = vst [vmem:[#allocation3 + $0xa4] sm:$0x1] %v4398_v41  ;;  %v12431_v7 = vrot.slane %v5776_v22, 1 }
 0x29b   : > { %v6277_v60 = vpop.permute.xlu0 %6276 }
 0x29c   : > { %6319 = vst.msk [vmem:[#allocation4 + $0x80] sm:$0xff] %vm5271_vm9, %v6277_v60  ;;  %v5413_v11 = vpop.permute.xlu1 %5412 }
 0x29d   : > { %5455 = vst.msk [vmem:[#allocation4 + $0x90] sm:$0xff] %vm5448_vm5, %v5413_v11 }
 0x29f   : > { %v6104_v57 = vpop.permute.xlu0 %6103 }
 0x2a0   : > { %v10827_v48 = vld [vmem:[#allocation3 + $0xa8] sm:$0xff]   ;;  %6144 = vst.msk [vmem:[#allocation4 + $0xb0] sm:$0xff] %vm4982_vm6, %v6104_v57  ;;  %v5240_v35 = vpop.permute.xlu1 %5239  ;;  %v10834_v26 = vld [vmem:[#allocation3 + $0xb0] ss:$0 sps:$4 sm:$0x11]  }
 0x2a1   : > { %v10828_v4 = vld [vmem:[#allocation3 + $0xa8] sm:$0xff]   ;;  %6290 = vrot.lane.b32.xlu0 %v10827_v48, %s10983_s8  ;;  %v10830_v54 = vld [vmem:[#allocation3 + $0x9c] sm:$0xff]   ;;  %v10836_v43 = vld [vmem:[#allocation3 + $0xa4] ss:$0 sps:$4 sm:$0x11]   ;;  %v6081_v6 = vrot.slane %v10834_v26, 1 }
 0x2a2   : > { %5426 = vrot.lane.b32.xlu1 %v10828_v4, %s10984_s12  ;;  %v10831_v63 = vld [vmem:[#allocation3 + $0x9c] sm:$0xff]   ;;  %v10833_v3 = vld [vmem:[#allocation3 + $0xa8] sm:$0xfe]   ;;  %v5215_v12 = vrot.slane %v10836_v43, 1 }
 0x2a3   : > { %v6102_v24 = vpop.permute.xlu0 %6101  ;;  %v10841_v36 = vld [vmem:[#allocation3 + $0xa8] sm:$0xff]   ;;  %v6080_v0 = vrot.slane %v10833_v3, 1  ;;  %v10835_v55 = vld [vmem:[#allocation3 + $0x9c] sm:$0xfe]  }
 0x2a4   : > { %6143 = vst.msk [vmem:[#allocation4 + $0x98] sm:$0xff] %vm4982_vm6, %v6102_v24  ;;  %v12428_v2 = vpop.permute.xlu1 %5237  ;;  %v5214_v9 = vrot.slane %v10835_v55, 1  ;;  %v10837_v53 = vld [vmem:[#allocation3 + $0x9c] sm:$0xfe]   ;;  %v4913_v14 = vshll.u32 %v10841_v36, 16  ;;  %v4911_v23 = vshrl.u32 %v10841_v36, 16 }
 0x2a5   : > { %6320 = vst.msk [vmem:[#allocation4 + $0x98] sm:$0xff] %vm5271_vm9, %v6279_v15  ;;  %6288 = vrot.lane.b32.xlu0 %v10830_v54, %s10983_s8  ;;  %v10838_v13 = vld [vmem:[#allocation3 + $0xa4] ss:$0 sps:$4 sm:$0x11]   ;;  %v6082_v20 = vsel %vm1688_vm10, %v6080_v0, %v6081_v6  ;;  %v6077_v27 = vrot.slane %v10837_v53, 1  ;;  %v10845_v24 = vld [vmem:[#allocation3 + $0xa8] sm:$0xff]  }
 0x2a6   : > { %5424 = vrot.lane.b32.xlu1 %v10831_v63, %s10984_s12  ;;  %v5216_v51 = vsel %vm1688_vm10, %v5214_v9, %v5215_v12  ;;  %v6078_v21 = vrot.slane %v10838_v13, 1  ;;  %v10839_v49 = vld [vmem:[#allocation3 + $0x9c] sm:$0xfe]   ;;  %v10840_v44 = vld [vmem:[#allocation3 + $0xa4] ss:$0 sps:$4 sm:$0x11]  }
 0x2a7   : > { %v6711_v19 = vpop.permute.xlu0 %6710  ;;  %v4915_v30 = vrot.slane %v4913_v14, 1  ;;  %v6971_v15 = vrot.slane %v10839_v49, 1  ;;  %v6972_v31 = vrot.slane %v10840_v44, 1  ;;  %v10842_v39 = vld [vmem:[#allocation3 + $0xb0] ss:$0 sps:$4 sm:$0x11]  }
 0x2a8   : > { %6752 = vst.msk [vmem:[#allocation4 + $0x98] sm:$0xff] %vm5448_vm5, %v6711_v19  ;;  %v4951_v32 = vpop.permute.xlu1 %4950  ;;  %v6079_v37 = vsel %vm1688_vm10, %v6077_v27, %v6078_v21  ;;  %v4918_v10 = vshll.u32 %v10842_v39, 16  ;;  %v10843_v61 = vld [vmem:[#allocation3 + $0xa8] sm:$0xfe]   ;;  %v4414_v36 = vld [vmem:[#allocation3 + $0xc0] sm:$0xf] }
 0x2a9   : > { %6115 = vrot.lane.b32.xlu0 %v6082_v20, %s10980_s15  ;;  %v10300_v62 = vpop.f32.mrb[28].mxu0  ;;  %4991 = vst.msk [vmem:[#allocation4 + $0xc0] sm:$0xff] %vm4982_vm6, %v4951_v32  ;;  %v6973_v18 = vsel %vm1688_vm10, %v6971_v15, %v6972_v31  ;;  %v4916_v11 = vor.u32 %v4915_v30, %v4911_v23  ;;  %v10844_v57 = vld [vmem:[#allocation3 + $0xb0] ss:$0 sps:$4 sm:$0x11]   ;;  %v6974_v4 = vrot.slane %v10843_v61, 1 }
 0x2aa   : > { %5249 = vrot.lane.b32.xlu1 %v5216_v51, %s10983_s8  ;;  %v3852_v33 = vadd.f32 %v12363_v25, %v10300_v62  ;;  %v3843_v34 = vpop.f32.mrb[29].mxu0  ;;  %5280 = vst.msk [vmem:[#allocation4 + $0xc0] sm:$0xff] %vm5271_vm9, %v5240_v35  ;;  %v4920_v16 = vrot.slane %v4918_v10, 1  ;;  %v6975_v3 = vrot.slane %v10844_v57, 1  ;;  %v4407_v12 = vld [vmem:[#allocation3 + $0xb4] sm:$0xf] }
 0x2ab   : > { %v3844_v8 = vadd.f32 %v12363_v25, %v3843_v34  ;;  %v10301_v58 = vpop.f32.mrb[30].mxu0  ;;  %7013 = vst.msk [vmem:[#allocation4 + $0x118] sm:$0xff] %vm4549_vm1, %v6973_v18  ;;  %v6709_v54 = vpop.permute.xlu0 %6708  ;;  %v10846_v26 = vld [vmem:[#allocation3 + $0xb0] ss:$0 sps:$4 sm:$0x11]   ;;  %v12455_v21 = vld [vmem:[#allocation3 + $0x9c] sm:$0xff]  }
 0x2ac   : > { %v3888_v56 = vmax.f32 %v3852_v33, 0.0  ;;  %v3855_v41 = vadd.f32 %v12363_v25, %v10301_v58  ;;  %v3846_v29 = vpop.f32.mrb[31].mxu0  ;;  %6751 = vst.msk [vmem:[#allocation4 + $0x80] sm:$0xff] %vm5448_vm5, %v6709_v54  ;;  %v4921_v43 = vsel %vm1254_vm12, %v4916_v11, %v4920_v16  ;;  %v6976_v13 = vsel %vm1688_vm10, %v6974_v4, %v6975_v3  ;;  %v4418_v20 = vld [vmem:[#allocation3 + $0xc8] sm:$0x1]  ;;  %v12457_v34 = vld [vmem:[#allocation3 + $0x9c] sm:$0xff]  }
 0x2ad   : > { %6113 = vrot.lane.b32.xlu0 %v6079_v37, %s10980_s15  ;;  %v3886_v42 = vmax.f32 %v3844_v8, 0.0  ;;  %v3847_v60 = vadd.f32 %v12363_v25, %v3846_v29  ;;  %7014 = vst.msk [vmem:[#allocation4 + $0x130] sm:$0xff] %vm4549_vm1, %v6976_v13  ;;  %v4411_v62 = vld [vmem:[#allocation3 + $0xbc] sm:$0x1]  ;;  %v6651_v32 = vshrl.u32 %v10845_v24, 16  ;;  %v6653_v33 = vshll.u32 %v10845_v24, 16 }
 0x2ae   : > { %v10112_v45 = vpack.c.bf16 %v3888_v56, %v3888_v56  ;;  %v3889_v47 = vmax.f32 %v3855_v41, 0.0  ;;  %4962 = vrot.lane.b32.xlu1 %v4921_v43, %s10980_s15  ;;  %v6658_v8 = vshll.u32 %v10846_v26, 16  ;;  %v10848_v58 = vld [vmem:[#allocation3 + $0xa4] ss:$0 sps:$4 sm:$0x11]   ;;  %v7033_v18 = vld [vmem:[#allocation4 + $0x78] sm:$0xff] }
 0x2af   : > { %v10110_v48 = vpack.c.bf16 %v3886_v42, %v3886_v42  ;;  %v3887_v35 = vmax.f32 %v3847_v60, 0.0  ;;  %v6655_v41 = vrot.slane %v6653_v33, 1  ;;  %v10850_v61 = vld [vmem:[#allocation3 + $0xa4] ss:$0 sps:$4 sm:$0x11]   ;;  %v7037_v38 = vld [vmem:[#allocation4 + $0x98] sm:$0xff] }
 0x2b0   : > { %v4242_v22 = vshrl.u32 %v10112_v45, 16  ;;  %v10113_v63 = vpack.c.bf16 %v3889_v47, %v3889_v47  ;;  %v4245_v25 = vshll.u32 %v10112_v45, 16  ;;  %v4901_v54 = vshll.u32 %v12455_v21, 16 }
 0x2b1   : > { %v4225_v0 = vshrl.u32 %v10110_v48, 16  ;;  %v10111_v55 = vpack.c.bf16 %v3887_v35, %v3887_v35  ;;  %v4228_v9 = vshll.u32 %v10110_v48, 16  ;;  %v6656_v48 = vor.u32 %v6655_v41, %v6651_v32 }
 0x2b2   : > { %v4244_v6 = vrot.slane %v4242_v22, 7  ;;  %v4250_v53 = vshrl.u32 %v10113_v63, 16  ;;  %v4253_v19 = vshll.u32 %v10113_v63, 16  ;;  %v7053_v30 = vld [vmem:[#allocation4 + $0x118] sm:$0xff]  ;;  %v6660_v35 = vrot.slane %v6658_v8, 1 }
 0x2b3   : > { %v4227_v14 = vrot.slane %v4225_v0, 7  ;;  %v4233_v27 = vshrl.u32 %v10111_v55, 16  ;;  %v4236_v51 = vshll.u32 %v10111_v55, 16  ;;  %10327 = vmatmul.mubr.msk.bf16.gmra.mrb[56].mxu0 %vm4549_vm1, %v7053_v30  ;;  %v7034_v45 = vld [vmem:[#allocation4 + $0x80] sm:$0xff]  ;;  %v4906_v22 = vshll.u32 %v10848_v58, 16 }
 0x2b4   : > { %v4247_v49 = vor.u32 %v4245_v25, %v4244_v6  ;;  %v4252_v44 = vrot.slane %v4250_v53, 7  ;;  %v4248_v15 = vrot.slane %v4244_v6, 4  ;;  %7337 = vmatprep.mubr.bf16.mxu1 %v7034_v45  ;;  %v10851_v63 = vld [vmem:[#allocation3 + $0xa8] sm:$0xfe]   ;;  %v6661_v17 = vsel %vm1254_vm12, %v6656_v48, %v6660_v35 }
 0x2b5   : > { %v4230_v31 = vor.u32 %v4228_v9, %v4227_v14  ;;  %v4235_v23 = vrot.slane %v4233_v27, 7  ;;  %v4231_v42 = vrot.slane %v4227_v14, 4  ;;  %7338 = vmatmul.mubr.bf16.gmra.mrb[16].mxu1 %v7033_v18  ;;  %v7056_v3 = vld [vmem:[#allocation4 + $0x130] sm:$0xff]  ;;  %v6641_v24 = vshll.u32 %v12457_v34, 16  ;;  %6722 = vrot.lane.b32.xlu0 %v6661_v17, %s10984_s12 }
 0x2b6   : > { %v4415_v37 = vsel %vm11859_vm0, %v4247_v49, %v4414_v36  ;;  %v4255_v39 = vor.u32 %v4253_v19, %v4252_v44  ;;  %v4257_v56 = vrot.slane %v4252_v44, 4  ;;  %v6646_v1 = vshll.u32 %v10850_v61, 16  ;;  %7345 = vmatprep.mubr.bf16.mxu1 %v7037_v38  ;;  %10330 = vmatprep.mubr.msk.bf16.mxu0 %vm4549_vm1, %v7056_v3  ;;  %v10852_v55 = vld [vmem:[#allocation3 + $0xb0] ss:$0 sps:$4 sm:$0x11]   ;;  %v12495_v53 = vld [vmem:[#allocation3 + $0x84] sm:$0xff]  }
 0x2b7   : > { %4416 = vst [vmem:[#allocation3 + $0xc0] sm:$0xf] %v4415_v37  ;;  %v4408_v60 = vsel %vm11859_vm0, %v4230_v31, %v4407_v12  ;;  %v4238_v11 = vor.u32 %v4236_v51, %v4235_v23  ;;  %v4240_v10 = vrot.slane %v4235_v23, 4  ;;  %vm13106_vm0 = vmmov %vm13096_vm3  ;;  %v5779_v25 = vor.u32 %v12431_v7, %v5774_v40  ;;  %v12497_v14 = vld [vmem:[#allocation3 + $0xd4] ss:$0 sps:$4 sm:$0x11]  }
 0x2b8   : > { %v4949_v29 = vpop.permute.xlu1 %4948  ;;  %4409 = vst [vmem:[#allocation3 + $0xb4] sm:$0xf] %v4408_v60  ;;  %v4256_v47 = vsel %vm11108_vm8, %v4248_v15, %v4255_v39  ;;  %v4419_v57 = vsel %vm11069_vm2, %v4257_v56, %v4418_v20  ;;  %v4903_v36 = vrot.slane %v4901_v54, 1  ;;  %v6639_v0 = vshrl.u32 %v12457_v34, 16  ;;  %v10892_v19 = vld [vmem:[#allocation3 + $0x90] sm:$0xff]  }
 0x2b9   : > { %4990 = vst.msk [vmem:[#allocation4 + $0xa8] sm:$0xff] %vm4982_vm6, %v4949_v29  ;;  %4420 = vst [vmem:[#allocation3 + $0xc8] sm:$0x1] %v4419_v57  ;;  %v4239_v16 = vsel %vm11108_vm8, %v4231_v42, %v4238_v11  ;;  %v4412_v4 = vsel %vm11069_vm2, %v4240_v10, %v4411_v62  ;;  %v4908_v43 = vrot.slane %v4906_v22, 1  ;;  %v6643_v6 = vrot.slane %v6641_v24, 1 }
 0x2ba   : > { %5279 = vst.msk [vmem:[#allocation4 + $0xa8] sm:$0xff] %vm5271_vm9, %v12428_v2  ;;  %4413 = vst [vmem:[#allocation3 + $0xbc] sm:$0x1] %v4412_v4  ;;  %v5217_v9 = vrot.slane %v10851_v63, 1  ;;  %v5783_v12 = vrot.slane %v5781_v28, 1  ;;  %v6648_v40 = vrot.slane %v6646_v1, 1 }
 0x2bb   : > { %4417 = vst.msk [vmem:[#allocation3 + $0xc4] sm:$0xf] %vm13105_vm7, %v4256_v47  ;;  %v5218_v7 = vrot.slane %v10852_v55, 1  ;;  %v6644_v20 = vor.u32 %v6643_v6, %v6639_v0  ;;  %v7036_v28 = vld [vmem:[#allocation4 + $0x90] sm:$0xff]  ;;  %v6689_v49 = vshll.u32 %v12412_v50, 16  ;;  %v5764_v30 = vshll.u32 %v12495_v53, 16 }
 0x2bc   : > { %5456 = vst.msk [vmem:[#allocation4 + $0xa8] sm:$0xff] %vm5448_vm5, %v12398_v5  ;;  %v4899_v5 = vshrl.u32 %v12455_v21, 16  ;;  %v5784_v51 = vsel %vm1254_vm12, %v5779_v25, %v5783_v12  ;;  %v6694_v34 = vshll.u32 %v12497_v14, 16  ;;  %vm9219_vm2 = vcmask 1041409  }
 0x2bd   : > { %v12479_v2 = vpop.permute.xlu0 %6282  ;;  %4410 = vst.msk [vmem:[#allocation3 + $0xb8] sm:$0xf] %vm13106_vm0, %v4239_v16  ;;  %v6649_v59 = vsel %vm1254_vm12, %v6644_v20, %v6648_v40  ;;  %7346 = vmatmul.mubr.bf16.gmra.mrb[20].mxu1 %v7036_v28  ;;  %v5219_v15 = vsel %vm1688_vm10, %v5217_v9, %v5218_v7  ;;  %v10891_v9 = vld [vmem:[#allocation3 + $0x8c] ss:$0 sps:$4 sm:$0x11]   ;;  %v5766_v40 = vrot.slane %v5764_v30, 1 }
 0x2be   : > { %v12484_v26 = vpop.permute.xlu1 %5418  ;;  %v4904_v46 = vor.u32 %v4903_v36, %v4899_v5  ;;  %5860 = vst.msk [vmem:[#allocation4 + $0x110] sm:$0xff] %vm4549_vm1, %v5784_v51  ;;  %4562 = vst.msk [vmem:[#allocation4 + $0x120] sm:$0xff] %vm4549_vm1, %v10892_v19  ;;  %6720 = vrot.lane.b32.xlu0 %v6649_v59, %s10984_s12  ;;  %v5762_v51 = vshrl.u32 %v12495_v53, 16  ;;  %vm9221_vm8 = vcmask 1042434  }
 0x2c0   : > { %v4909_v21 = vsel %vm1254_vm12, %v4904_v46, %v4908_v43  ;;  %v10873_v6 = vld [vmem:[#allocation3 + $0xc8] ss:$0 sps:$4 sm:$0x11]  }
 0x2c1   : > { %v6281_v13 = vpop.permute.xlu0 %6280  ;;  %4960 = vrot.lane.b32.xlu1 %v4909_v21, %s10980_s15  ;;  %v10862_v23 = vld [vmem:[#allocation3 + $0xbc] ss:$0 sps:$4 sm:$0x11]   ;;  %v6981_v19 = vrot.slane %v10873_v6, 1 }
 0x2c2   : > { %6321 = vst.msk [vmem:[#allocation4 + $0xb0] sm:$0xff] %vm5271_vm9, %v6281_v13  ;;  %v5417_v27 = vpop.permute.xlu1 %5416  ;;  %v10857_v44 = vld [vmem:[#allocation3 + $0xc0] sm:$0xff]   ;;  %v5221_v56 = vrot.slane %v10862_v23, 1  ;;  %v10865_v41 = vld [vmem:[#allocation3 + $0xbc] ss:$0 sps:$4 sm:$0x11]   ;;  %v5767_v23 = vor.u32 %v5766_v40, %v5762_v51 }
 0x2c3   : > { %5457 = vst.msk [vmem:[#allocation4 + $0xc0] sm:$0xff] %vm5448_vm5, %v5417_v27  ;;  %6294 = vrot.lane.b32.xlu0 %v10857_v44, %s10983_s8  ;;  %v6084_v11 = vrot.slane %v10865_v41, 1  ;;  %v10867_v10 = vld [vmem:[#allocation3 + $0xbc] ss:$0 sps:$4 sm:$0x11]   ;;  %v10875_v20 = vld [vmem:[#allocation3 + $0xc0] sm:$0xff]  }
 0x2c4   : > { %v10858_v32 = vld [vmem:[#allocation3 + $0xb4] sm:$0xff]   ;;  %v4930_v48 = vshll.u32 %v10867_v10, 16  ;;  %v10869_v35 = vld [vmem:[#allocation3 + $0xbc] ss:$0 sps:$4 sm:$0x11]   ;;  %v10874_v59 = vld [vmem:[#allocation3 + $0xc0] sm:$0xff]  }
 0x2c5   : > { %v6108_v62 = vpop.permute.xlu0 %6107  ;;  %v10861_v31 = vld [vmem:[#allocation3 + $0xb4] sm:$0xfe]   ;;  %5251 = vrot.lane.b32.xlu1 %v5219_v15, %s10983_s8  ;;  %v6670_v63 = vshll.u32 %v10869_v35, 16  ;;  %v10871_v24 = vld [vmem:[#allocation3 + $0xbc] ss:$0 sps:$4 sm:$0x11]  }
 0x2c6   : > { %6146 = vst.msk [vmem:[#allocation4 + $0xe0] sm:$0xff] %vm4982_vm6, %v6108_v62  ;;  %v5244_v33 = vpop.permute.xlu1 %5243  ;;  %v10866_v8 = vld [vmem:[#allocation3 + $0xb4] sm:$0xff]   ;;  %v5220_v39 = vrot.slane %v10861_v31, 1  ;;  %v4932_v22 = vrot.slane %v4930_v48, 1  ;;  %v10872_v36 = vld [vmem:[#allocation3 + $0xc0] sm:$0xfe]  }
 0x2c7   : > { %v10864_v58 = vld [vmem:[#allocation3 + $0xb4] sm:$0xfe]   ;;  %v4923_v29 = vshrl.u32 %v10866_v8, 16  ;;  %v4925_v60 = vshll.u32 %v10866_v8, 16  ;;  %v6672_v25 = vrot.slane %v6670_v63, 1  ;;  %v6978_v43 = vrot.slane %v10871_v24, 1 }
 0x2c8   : > { %v10860_v37 = vld [vmem:[#allocation3 + $0xb4] sm:$0xff]   ;;  %v6083_v42 = vrot.slane %v10864_v58, 1  ;;  %v5222_v57 = vsel %vm1688_vm10, %v5220_v39, %v5221_v56  ;;  %v6980_v12 = vrot.slane %v10872_v36, 1  ;;  %v10876_v27 = vld [vmem:[#allocation3 + $0xc8] ss:$0 sps:$4 sm:$0x11]  }
 0x2c9   : > { %v6106_v18 = vpop.permute.xlu0 %6105  ;;  %5428 = vrot.lane.b32.xlu1 %v10858_v32, %s10984_s12  ;;  %v4927_v45 = vrot.slane %v4925_v60, 1  ;;  %v10868_v47 = vld [vmem:[#allocation3 + $0xb4] sm:$0xff]   ;;  %6292 = vrot.lane.b32.xlu0 %v10860_v37, %s10983_s8  ;;  %v6677_v28 = vshll.u32 %v10875_v20, 16  ;;  %v10877_v44 = vld [vmem:[#allocation3 + $0xc0] sm:$0xfe]   ;;  %v6682_v30 = vshll.u32 %v10876_v27, 16 }
 0x2ca   : > { %6145 = vst.msk [vmem:[#allocation4 + $0xc8] sm:$0xff] %vm4982_vm6, %v6106_v18  ;;  %v5242_v61 = vpop.permute.xlu1 %5241  ;;  %v6663_v16 = vshrl.u32 %v10868_v47, 16  ;;  %v6665_v4 = vshll.u32 %v10868_v47, 16  ;;  %v10870_v3 = vld [vmem:[#allocation3 + $0xb4] sm:$0xfe]   ;;  %v6982_v21 = vsel %vm1688_vm10, %v6980_v12, %v6981_v19  ;;  %v12541_v15 = vrot.slane %v6694_v34, 1 }
 0x2cb   : > { %6322 = vst.msk [vmem:[#allocation4 + $0xc8] sm:$0xff] %vm5271_vm9, %v12479_v2  ;;  %v4928_v38 = vor.u32 %v4927_v45, %v4923_v29  ;;  %v6085_v2 = vsel %vm1688_vm10, %v6083_v42, %v6084_v11  ;;  %v6977_v5 = vrot.slane %v10870_v3, 1  ;;  %v10878_v32 = vld [vmem:[#allocation3 + $0xc8] ss:$0 sps:$4 sm:$0x11]   ;;  %v6675_v53 = vshrl.u32 %v10875_v20, 16 }
 0x2cc   : > { %v6667_v17 = vrot.slane %v6665_v4, 1  ;;  %7016 = vst.msk [vmem:[#allocation4 + $0x160] sm:$0xff] %vm4549_vm1, %v6982_v21  ;;  %v6679_v31 = vrot.slane %v6677_v28, 1  ;;  %v5769_v8 = vshll.u32 %v10891_v9, 16  ;;  %v10893_v58 = vld [vmem:[#allocation3 + $0x84] sm:$0xff]   ;;  %v6684_v37 = vrot.slane %v6682_v30, 1 }
 0x2cd   : > { %v6715_v54 = vpop.permute.xlu0 %6714  ;;  %5253 = vrot.lane.b32.xlu1 %v5222_v57, %s10983_s8  ;;  %6117 = vrot.lane.b32.xlu0 %v6085_v2, %s10980_s15  ;;  %v4933_v1 = vsel %vm1254_vm12, %v4928_v38, %v4932_v22  ;;  %v6979_v13 = vsel %vm1688_vm10, %v6977_v5, %v6978_v43  ;;  %v6086_v39 = vrot.slane %v10877_v44, 1  ;;  %4561 = vst.msk [vmem:[#allocation4 + $0x108] sm:$0xff] %vm4549_vm1, %v10893_v58  ;;  %v10894_v34 = vld [vmem:[#allocation3 + $0xa8] sm:$0xff]   ;;  %v6087_v56 = vrot.slane %v10878_v32, 1  ;;  %v7039_v29 = vld [vmem:[#allocation4 + $0xa8] sm:$0xff]  ;;  %v10900_v5 = vld [vmem:[#allocation3 + $0xb4] sm:$0xff]  }
 0x2ce   : > { %6754 = vst.msk [vmem:[#allocation4 + $0xc8] sm:$0xff] %vm5448_vm5, %v6715_v54  ;;  %v4955_v0 = vpop.permute.xlu1 %4954  ;;  %v6668_v55 = vor.u32 %v6667_v17, %v6663_v16  ;;  %v5771_v14 = vrot.slane %v5769_v8, 1  ;;  %v10895_v10 = vld [vmem:[#allocation3 + $0xb0] ss:$0 sps:$4 sm:$0x11]   ;;  %v5800_v45 = vshll.u32 %v10894_v34, 16 }
 0x2cf   : > { %4993 = vst.msk [vmem:[#allocation4 + $0xf0] sm:$0xff] %vm4982_vm6, %v4955_v0  ;;  %v5805_v57 = vshll.u32 %v10895_v10, 16  ;;  %v10896_v48 = vld [vmem:[#allocation3 + $0x9c] sm:$0xff]   ;;  %v6088_v35 = vsel %vm1688_vm10, %v6086_v39, %v6087_v56  ;;  %v10897_v38 = vld [vmem:[#allocation3 + $0xa4] ss:$0 sps:$4 sm:$0x11]  }
 0x2d0   : > { %5282 = vst.msk [vmem:[#allocation4 + $0xf0] sm:$0xff] %vm5271_vm9, %v5244_v33  ;;  %v6673_v7 = vsel %vm1254_vm12, %v6668_v55, %v6672_v25  ;;  %v6691_v33 = vrot.slane %v6689_v49, 1  ;;  %v6680_v49 = vor.u32 %v6679_v31, %v6675_v53  ;;  %v5772_v11 = vsel %vm1254_vm12, %v5767_v23, %v5771_v14  ;;  %v10898_v16 = vld [vmem:[#allocation3 + $0xa8] sm:$0xff]   ;;  %v10899_v17 = vld [vmem:[#allocation3 + $0x9c] sm:$0xff]   ;;  %v10902_v9 = vld [vmem:[#allocation3 + $0xb4] sm:$0xff]  }
 0x2d1   : > { %v6713_v46 = vpop.permute.xlu0 %6712  ;;  %4964 = vrot.lane.b32.xlu1 %v4933_v1, %s10980_s15  ;;  %6724 = vrot.lane.b32.xlu0 %v6673_v7, %s10984_s12  ;;  %7015 = vst.msk [vmem:[#allocation4 + $0x148] sm:$0xff] %vm4549_vm1, %v6979_v13  ;;  %5859 = vst.msk [vmem:[#allocation4 + $0xf8] sm:$0xff] %vm4549_vm1, %v5772_v11  ;;  %v5802_v47 = vrot.slane %v5800_v45, 1  ;;  %v10879_v4 = vld [vmem:[#allocation3 + $0xcc] sm:$0xff]   ;;  %v5807_v22 = vrot.slane %v5805_v57, 1  ;;  %v5786_v63 = vshrl.u32 %v10896_v48, 16 }
 0x2d2   : > { %6753 = vst.msk [vmem:[#allocation4 + $0xb0] sm:$0xff] %vm5448_vm5, %v6713_v46  ;;  %v4953_v62 = vpop.permute.xlu1 %4952  ;;  %v6685_v42 = vsel %vm1254_vm12, %v6680_v49, %v6684_v37  ;;  %v5788_v3 = vshll.u32 %v10896_v48, 16  ;;  %v5793_v2 = vshll.u32 %v10897_v38, 16  ;;  %v6692_v24 = vor.u32 %v6691_v33, %v6687_v52  ;;  %v7042_v36 = vld [vmem:[#allocation4 + $0xc0] sm:$0xff]  ;;  %v10903_v12 = vld [vmem:[#allocation3 + $0xc0] sm:$0xff]  }
 0x2d3   : > { %4992 = vst.msk [vmem:[#allocation4 + $0xd8] sm:$0xff] %vm4982_vm6, %v4953_v62  ;;  %v10901_v0 = vld [vmem:[#allocation3 + $0xbc] ss:$0 sps:$4 sm:$0x11]   ;;  %v5812_v6 = vshll.u32 %v10900_v5, 16  ;;  %v5810_v46 = vshrl.u32 %v10900_v5, 16 }
 0x2d4   : > { %5281 = vst.msk [vmem:[#allocation4 + $0xd8] sm:$0xff] %vm5271_vm9, %v5242_v61  ;;  %v5798_v61 = vshrl.u32 %v10894_v34, 16  ;;  %v5790_v25 = vrot.slane %v5788_v3, 1  ;;  %v5795_v43 = vrot.slane %v5793_v2, 1  ;;  %v5817_v50 = vshll.u32 %v10901_v0, 16 }
 0x2d5   : > { %5430 = vrot.lane.b32.xlu1 %v10874_v59, %s10984_s12  ;;  %5458 = vst.msk [vmem:[#allocation4 + $0xd8] sm:$0xff] %vm5448_vm5, %v12484_v26  ;;  %v7043_v60 = vld [vmem:[#allocation4 + $0xc8] sm:$0xff]  ;;  %6726 = vrot.lane.b32.xlu0 %v6685_v42, %s10984_s12  ;;  %v7062_v26 = vld [vmem:[#allocation4 + $0x160] sm:$0xff]  ;;  %v6697_v52 = vsel %vm1254_vm12, %v6692_v24, %v12541_v15  ;;  %v5814_v7 = vrot.slane %v5812_v6, 1  ;;  %v5824_v20 = vshll.u32 %v10903_v12, 16  ;;  %v5822_v59 = vshrl.u32 %v10903_v12, 16 }
 0x2d6   : > { %v5803_v54 = vor.u32 %v5802_v47, %v5798_v61  ;;  %4564 = vst.msk [vmem:[#allocation4 + $0x150] sm:$0xff] %vm4549_vm1, %v10898_v16  ;;  %4563 = vst.msk [vmem:[#allocation4 + $0x138] sm:$0xff] %vm4549_vm1, %v10899_v17  ;;  %v5791_v55 = vor.u32 %v5790_v25, %v5786_v63  ;;  %v10904_v13 = vld [vmem:[#allocation3 + $0xc8] ss:$0 sps:$4 sm:$0x11]   ;;  %v5819_v21 = vrot.slane %v5817_v50, 1 }
 0x2d7   : > { %4565 = vst.msk [vmem:[#allocation4 + $0x168] sm:$0xff] %vm4549_vm1, %v10902_v9  ;;  %v5815_v51 = vor.u32 %v5814_v7, %v5810_v46  ;;  %v5829_v28 = vshll.u32 %v10904_v13, 16  ;;  %v5826_v44 = vrot.slane %v5824_v20, 1  ;;  %v10905_v62 = vld [vmem:[#allocation3 + $0xcc] sm:$0xfe]  }
 0x2d8   : > { %v7059_v18 = vld [vmem:[#allocation4 + $0x148] sm:$0xff]  ;;  %v5808_v1 = vsel %vm1254_vm12, %v5803_v54, %v5807_v22  ;;  %v5796_v40 = vsel %vm1254_vm12, %v5791_v55, %v5795_v43  ;;  %v10906_v30 = vld [vmem:[#allocation3 + $0xd4] ss:$0 sps:$4 sm:$0x11]   ;;  %v6983_v31 = vrot.slane %v10905_v62, 1 }
 0x2d9   : > { %v7040_v41 = vld [vmem:[#allocation4 + $0xb0] sm:$0xff]  ;;  %10331 = vmatmul.mubr.msk.bf16.gmra.mrb[60].mxu0 %vm4549_vm1, %v7059_v18  ;;  %6119 = vrot.lane.b32.xlu0 %v6088_v35, %s10980_s15  ;;  %5862 = vst.msk [vmem:[#allocation4 + $0x140] sm:$0xff] %vm4549_vm1, %v5808_v1  ;;  %5861 = vst.msk [vmem:[#allocation4 + $0x128] sm:$0xff] %vm4549_vm1, %v5796_v40  ;;  %v5820_v32 = vsel %vm1254_vm12, %v5815_v51, %v5819_v21  ;;  %v5827_v15 = vor.u32 %v5826_v44, %v5822_v59  ;;  %v5831_v53 = vrot.slane %v5829_v28, 1  ;;  %s10916_s15 = scalar_lea.vmem %s10915_s17, 2048 }
 0x2da   : > { %7353 = vmatprep.mubr.bf16.mxu1 %v7040_v41  ;;  %10334 = vmatprep.mubr.msk.bf16.mxu0 %vm4549_vm1, %v7062_v26  ;;  %5863 = vst.msk [vmem:[#allocation4 + $0x158] sm:$0xff] %vm4549_vm1, %v5820_v32  ;;  %v6984_v23 = vrot.slane %v10906_v30, 1 }
 0x2db   : > { %7354 = vmatmul.mubr.bf16.gmra.mrb[24].mxu1 %v7039_v29  ;;  %v5832_v58 = vsel %vm1254_vm12, %v5827_v15, %v5831_v53  ;;  %vm9225_vm12 = vcmask 1044484  }
 0x2dc   : > { %7361 = vmatprep.mubr.bf16.mxu1 %v7043_v60  ;;  %v6985_v37 = vsel %vm1688_vm10, %v6983_v31, %v6984_v23  ;;  %5864 = vst.msk [vmem:[#allocation4 + $0x170] sm:$0xff] %vm4549_vm1, %v5832_v58  ;;  %v7045_v11 = vld [vmem:[#allocation4 + $0xd8] sm:$0xff]  ;;  %vm9223_vm10 = vcmask 1043459  }
 0x2dd   : > { %6296 = vrot.lane.b32.xlu0 %v10879_v4, %s10983_s8  ;;  %7017 = vst.msk [vmem:[#allocation4 + $0x178] sm:$0xff] %vm4549_vm1, %v6985_v37  ;;  %v12592_v4 = vld [vmem:[%s13030_s4] ss:$0 sm:$0xff] }
 0x2df   : > { %v6287_v19 = vpop.permute.xlu0 %6286 }
 0x2e0   : > { %v5423_v27 = vpop.permute.xlu1 %5422 }
 0x2e1   : > { %6728 = vrot.lane.b32.xlu0 %v6697_v52, %s10984_s12  ;;  %s215_s12 = sand.u32 1, %s10964_s19  }
 0x2e2   : > { %s9378_s23 = sshll.u32 %s215_s12, 6  ;;  %s12984_s22 = scalar_lea.sflag [#allocation6], %s215_s12 }
 0x2e3   : > { %7362 = vmatmul.mubr.bf16.gmra.mrb[28].mxu1 %v7042_v36  ;;  %v6285_v33 = vpop.permute.xlu0 %6284  ;;  %s12704_s25 = scalar_lea.vmem [#allocation5], %s9378_s23 }
 0x2e4   : > { %6323 = vst.msk [vmem:[#allocation4 + $0xe0] sm:$0xff] %vm5271_vm9, %v6285_v33  ;;  %v5421_v8 = vpop.permute.xlu1 %5420  ;;  %v7065_v34 = vld [vmem:[#allocation4 + $0x178] sm:$0xff]  ;;  %s9312_s7 = sshll.u32 %s12704_s25, 4  ;;  %s12977_s7 = int_to_ptr.vmem [resolvable:$true] %s9312_s7 }
 0x2e5   : > { %5459 = vst.msk [vmem:[#allocation4 + $0xf0] sm:$0xff] %vm5448_vm5, %v5421_v8  ;;  %10335 = vmatmul.mubr.msk.bf16.gmra.mrb[64].mxu0 %vm4549_vm1, %v7065_v34  ;;  %s10910_s14 = scalar_lea.vmem %s12977_s7, 1024  ;;  %p10917_p0 = scmp.lt.s32.totalorder %s12977_s7, %s10915_s17 }
 0x2e6   : > { %p10911_p11 = scmp.ne.s32.totalorder %s12977_s7, %s10910_s14  ;;  %p10918_p1 = scmp.lt.s32.totalorder %s10916_s15, %s10910_s14 }
 0x2e7   : > { %v6112_v39 = vpop.permute.xlu0 %6111 }
 0x2e8   : > { %6148 = vst.msk [vmem:[#allocation4 + $0x110] sm:$0xff] %vm4982_vm6, %v6112_v39  ;;  %v5248_v49 = vpop.permute.xlu1 %5247  ;;  %p10912_p12 = pnand %p10911_p11, %p11056_p5  ;;  %p10919_p2 = por %p10918_p1, %p10917_p0 }
 0x2ea   : > { %p10913_p13 = pneg %p10912_p12 }
 0x2eb   : > { %v6110_v14 = vpop.permute.xlu0 %6109 }
 0x2ec   : > { %6147 = vst.msk [vmem:[#allocation4 + $0xf8] sm:$0xff] %vm4982_vm6, %v6110_v14  ;;  %v5246_v56 = vpop.permute.xlu1 %5245  ;;  %v7048_v61 = vld [vmem:[#allocation4 + $0xf0] sm:$0xff]  ;;  %p10920_p3 = pnand %p10919_p2, %p10913_p13 }
 0x2ed   : > { %6324 = vst.msk [vmem:[#allocation4 + $0xf8] sm:$0xff] %vm5271_vm9, %v6287_v19  ;;  %v10985_v19 = vmov 1983009808  }
 0x2ee   : > { %v7653_v20 = vunpack.c.l.s4 %v10985_v19 }
 0x2ef   : > { %v6719_v41 = vpop.permute.xlu0 %6718 }
 0x2f0   : > { %6756 = vst.msk [vmem:[#allocation4 + $0xf8] sm:$0xff] %vm5448_vm5, %v6719_v41  ;;  %v4959_v29 = vpop.permute.xlu1 %4958  ;;  %v7654_v59 = vunpack.c.0.s8 %v7653_v20 }
 0x2f1   : > { %4995 = vst.msk [vmem:[#allocation4 + $0x120] sm:$0xff] %vm4982_vm6, %v4959_v29 }
 0x2f2   : > { %5284 = vst.msk [vmem:[#allocation4 + $0x120] sm:$0xff] %vm5271_vm9, %v5248_v49 }
 0x2f3   : > { %v6717_v18 = vpop.permute.xlu0 %6716 }
 0x2f4   : > { %6755 = vst.msk [vmem:[#allocation4 + $0xe0] sm:$0xff] %vm5448_vm5, %v6717_v18 }
 0x2f5   : > { %v4957_v42 = vpop.permute.xlu1 %4956 }
 0x2f6   : > { %4994 = vst.msk [vmem:[#allocation4 + $0x108] sm:$0xff] %vm4982_vm6, %v4957_v42 }
 0x2f7   : > { %5283 = vst.msk [vmem:[#allocation4 + $0x108] sm:$0xff] %vm5271_vm9, %v5246_v56  ;;  %v7049_v10 = vld [vmem:[#allocation4 + $0xf8] sm:$0xff] }
 0x2f8   : > { %5460 = vst.msk [vmem:[#allocation4 + $0x108] sm:$0xff] %vm5448_vm5, %v5423_v27  ;;  %v7655_v27 = vlaneseq }
 0x2fa   : > { %v7656_v28 = vshrl.u32 %v7655_v27, 7 }
 0x2fb   : > { %v7046_v60 = vld [vmem:[#allocation4 + $0xe0] sm:$0xff] }
 0x2fc   : > { %7369 = vmatprep.mubr.bf16.mxu1 %v7046_v60  ;;  %v12628_v32 = vsub.s32 %v7654_v59, %v7656_v28  ;;  %v12655_v19 = vsub.s32 0, %v7656_v28 }
 0x2fd   : > { %7370 = vmatmul.mubr.bf16.gmra.mrb[32].mxu1 %v7045_v11 }
 0x2fe   : > { %7377 = vmatprep.mubr.bf16.mxu1 %v7049_v10 }
 0x2ff   : > { %v7051_v8 = vld [vmem:[#allocation4 + $0x108] sm:$0xff] }
 0x305   : > { %7378 = vmatmul.mubr.bf16.gmra.mrb[36].mxu1 %v7048_v61 }
 0x30f   : > { %v10150_v45 = vpop.f32.mrb[32].mxu0 }
 0x310   : > { %v10151_v26 = vpop.f32.mrb[33].mxu0 }
 0x311   : > { %v10152_v57 = vadd.f32 %v10151_v26, %v10150_v45  ;;  %v10153_v48 = vpop.f32.mrb[34].mxu0 }
 0x312   : > { %v10154_v38 = vpop.f32.mrb[35].mxu0 }
 0x313   : > { %v6291_v47 = vpop.permute.xlu0 %6290  ;;  %v10155_v16 = vadd.f32 %v10154_v38, %v10153_v48  ;;  %v7300_v3 = vadd.f32 %v10152_v57, %v12592_v4 }
 0x314   : > { %v5427_v35 = vpop.permute.xlu1 %5426 }
 0x315   : > { %v7303_v25 = vadd.f32 %v10155_v16, %v12592_v4 }
 0x317   : > { %v6289_v54 = vpop.permute.xlu0 %6288 }
 0x318   : > { %6325 = vst.msk [vmem:[#allocation4 + $0x110] sm:$0xff] %vm5271_vm9, %v6289_v54  ;;  %v5425_v22 = vpop.permute.xlu1 %5424  ;;  %v12596_v63 = vpop.f32.mrb[36].mxu0 }
 0x319   : > { %5461 = vst.msk [vmem:[#allocation4 + $0x120] sm:$0xff] %vm5448_vm5, %v5425_v22  ;;  %v7460_v2 = vpop.f32.mrb[37].mxu0 }
 0x31a   : > { %v7461_v24 = vadd.f32 %v7460_v2, %v7300_v3  ;;  %v12599_v1 = vpop.f32.mrb[38].mxu0 }
 0x31b   : > { %v6116_v17 = vpop.permute.xlu0 %6115  ;;  %v7463_v5 = vpop.f32.mrb[39].mxu0 }
 0x31c   : > { %6150 = vst.msk [vmem:[#allocation4 + $0x140] sm:$0xff] %vm4982_vm6, %v6116_v17  ;;  %v7464_v36 = vadd.f32 %v7463_v5, %v7303_v25  ;;  %v5250_v0 = vpop.permute.xlu1 %5249  ;;  %v7587_v30 = vmax.f32 %v7461_v24, 0.0 }
 0x31e   : > { %v7651_v31 = vcombine.high %v7587_v30, %v7587_v30  ;;  %v7588_v23 = vmax.f32 %v7464_v36, 0.0  ;;  %v7658_v37 = vrot.slane %v7587_v30, %v12628_v32 }
 0x31f   : > { %v6114_v55 = vpop.permute.xlu0 %6113 }
 0x320   : > { %6149 = vst.msk [vmem:[#allocation4 + $0x128] sm:$0xff] %vm4982_vm6, %v6114_v55  ;;  %v12605_v43 = vpop.f32.mrb[40].mxu0  ;;  %v4963_v46 = vpop.permute.xlu1 %4962  ;;  %v7665_v34 = vrot.slane %v7651_v31, %v12628_v32  ;;  %v7668_v56 = vcombine.high %v7588_v23, %v7588_v23  ;;  %v7675_v41 = vrot.slane %v7588_v23, %v12628_v32  ;;  %v7666_v60 = vcombine.high %v7658_v37, %v7658_v37  ;;  %v7054_v16 = vld [vmem:[#allocation4 + $0x120] sm:$0xff] }
 0x321   : > { %6326 = vst.msk [vmem:[#allocation4 + $0x128] sm:$0xff] %vm5271_vm9, %v6291_v47  ;;  %v12607_v6 = vpop.f32.mrb[41].mxu0  ;;  %v9948_v3 = vrot.slane %v7658_v37, 9 }
 0x322   : > { %v12609_v9 = vpop.f32.mrb[42].mxu0  ;;  %4997 = vst.msk [vmem:[#allocation4 + $0x150] sm:$0xff] %vm4982_vm6, %v4963_v46  ;;  %v7667_v57 = vcombine.high %v7665_v34, %v7665_v34  ;;  %v7682_v48 = vrot.slane %v7668_v56, %v12628_v32  ;;  %v9949_v2 = vrot.slane %v7666_v60, 9  ;;  %v9950_v17 = vrot.slane %v7665_v34, 9 }
 0x323   : > { %v12611_v12 = vpop.f32.mrb[43].mxu0  ;;  %v9952_v55 = vrot.slane %v7675_v41, 9 }
 0x324   : > { %v9951_v36 = vrot.slane %v7667_v57, 9  ;;  %v12660_v59 = vmax.f32 %v7665_v34, %v9950_v17 }
 0x326   : > { %v8710_v28 = vmax.f32 %v7667_v57, %v9951_v36 }
 0x327   : > { %v6723_v50 = vpop.permute.xlu0 %6722 }
 0x328   : > { %v12614_v52 = vpop.f32.mrb[44].mxu0  ;;  %6758 = vst.msk [vmem:[#allocation4 + $0x128] sm:$0xff] %vm5448_vm5, %v6723_v50 }
 0x329   : > { %v12617_v40 = vpop.f32.mrb[45].mxu0 }
 0x32a   : > { %v12619_v7 = vpop.f32.mrb[46].mxu0 }
 0x32b   : > { %v12621_v13 = vpop.f32.mrb[47].mxu0 }
 0x32f   : > { %v7055_v58 = vld [vmem:[#allocation4 + $0x128] sm:$0xff] }
 0x330   : > { %v6721_v21 = vpop.permute.xlu0 %6720 }
 0x331   : > { %6757 = vst.msk [vmem:[#allocation4 + $0x110] sm:$0xff] %vm5448_vm5, %v6721_v21  ;;  %v12658_v21 = vmax.f32 %v7666_v60, %v9949_v2 }
 0x333   : > { %v4961_v51 = vpop.permute.xlu1 %4960 }
 0x334   : > { %4996 = vst.msk [vmem:[#allocation4 + $0x138] sm:$0xff] %vm4982_vm6, %v4961_v51  ;;  %v8707_v51 = vmax.f32 %v7658_v37, %v9948_v3 }
 0x335   : > { %5285 = vst.msk [vmem:[#allocation4 + $0x138] sm:$0xff] %vm5271_vm9, %v5250_v0  ;;  %v6295_v62 = vpop.permute.xlu0 %6294  ;;  %v12653_v0 = vcombine.high %v7682_v48, %v7682_v48 }
 0x336   : > { %5462 = vst.msk [vmem:[#allocation4 + $0x138] sm:$0xff] %vm5448_vm5, %v5427_v35  ;;  %v7683_v35 = vcombine.high %v7675_v41, %v7675_v41 }
 0x337   : > { %v5252_v44 = vpop.permute.xlu1 %5251 }
 0x338   : > { %5286 = vst.msk [vmem:[#allocation4 + $0x150] sm:$0xff] %vm5271_vm9, %v5252_v44  ;;  %v7052_v15 = vld [vmem:[#allocation4 + $0x110] sm:$0xff]  ;;  %v9953_v46 = vrot.slane %v7683_v35, 9 }
 0x339   : > { %7385 = vmatprep.mubr.bf16.mxu1 %v7052_v15 }
 0x33a   : > { %7386 = vmatmul.mubr.bf16.gmra.mrb[40].mxu1 %v7051_v8  ;;  %v12633_v49 = vpop.f32.mrb[48].mxu0  ;;  %v9955_v8 = vrot.slane %v12653_v0, 9 }
 0x33b   : > { %v5429_v33 = vpop.permute.xlu1 %5428  ;;  %v6293_v53 = vpop.permute.xlu0 %6292  ;;  %7393 = vmatprep.mubr.bf16.mxu1 %v7055_v58  ;;  %v12666_v58 = vmax.f32 %v7683_v35, %v9953_v46 }
 0x33c   : > { %5463 = vst.msk [vmem:[#allocation4 + $0x150] sm:$0xff] %vm5448_vm5, %v5429_v33  ;;  %v12637_v29 = vpop.f32.mrb[49].mxu0  ;;  %v10156_v42 = vpop.f32.mrb[0].mxu1 }
 0x33d   : > { %6327 = vst.msk [vmem:[#allocation4 + $0x140] sm:$0xff] %vm5271_vm9, %v6293_v53  ;;  %v12640_v18 = vpop.f32.mrb[50].mxu0  ;;  %v10157_v10 = vpop.f32.mrb[1].mxu1 }
 0x33e   : > { %v12643_v11 = vpop.f32.mrb[51].mxu0  ;;  %v10158_v45 = vadd.f32 %v10157_v10, %v10156_v42  ;;  %v10159_v26 = vpop.f32.mrb[2].mxu1 }
 0x33f   : > { %v5254_v39 = vpop.permute.xlu1 %5253  ;;  %v6118_v14 = vpop.permute.xlu0 %6117 }
 0x340   : > { %6151 = vst.msk [vmem:[#allocation4 + $0x158] sm:$0xff] %vm4982_vm6, %v6118_v14  ;;  %v10160_v38 = vpop.f32.mrb[3].mxu1  ;;  %v7308_v54 = vadd.f32 %v10158_v45, %v12592_v4 }
 0x341   : > { %6328 = vst.msk [vmem:[#allocation4 + $0x158] sm:$0xff] %vm5271_vm9, %v6295_v62  ;;  %v10161_v22 = vadd.f32 %v10160_v38, %v10159_v26 }
 0x342   : > { %7394 = vmatmul.mubr.bf16.gmra.mrb[44].mxu1 %v7054_v16  ;;  %v7469_v25 = vadd.f32 %v12596_v63, %v7308_v54  ;;  %v9954_v63 = vrot.slane %v7682_v48, 9 }
 0x343   : > { %v4965_v61 = vpop.permute.xlu1 %4964  ;;  %v6725_v47 = vpop.permute.xlu0 %6724  ;;  %v7311_v5 = vadd.f32 %v10161_v22, %v12592_v4 }
 0x344   : > { %4998 = vst.msk [vmem:[#allocation4 + $0x168] sm:$0xff] %vm4982_vm6, %v4965_v61  ;;  %v7589_v50 = vmax.f32 %v7469_v25, 0.0  ;;  %v10162_v27 = vpop.f32.mrb[4].mxu1  ;;  %v8713_v60 = vmax.f32 %v7682_v48, %v9954_v63 }
 0x345   : > { %5287 = vst.msk [vmem:[#allocation4 + $0x168] sm:$0xff] %vm5271_vm9, %v5254_v39  ;;  %v7472_v20 = vadd.f32 %v12599_v1, %v7311_v5  ;;  %v10163_v44 = vpop.f32.mrb[5].mxu1  ;;  %v12664_v1 = vmax.f32 %v7675_v41, %v9952_v55  ;;  %v7057_v39 = vld [vmem:[#allocation4 + $0x138] sm:$0xff] }
 0x346   : > { %6759 = vst.msk [vmem:[#allocation4 + $0x140] sm:$0xff] %vm5448_vm5, %v6725_v47  ;;  %v7685_v62 = vcombine.high %v7589_v50, %v7589_v50  ;;  %v7692_v30 = vrot.slane %v7589_v50, %v12628_v32  ;;  %v10164_v15 = vadd.f32 %v10163_v44, %v10162_v27  ;;  %v10165_v53 = vpop.f32.mrb[6].mxu1 }
 0x347   : > { %v5431_v24 = vpop.permute.xlu1 %5430  ;;  %v7590_v33 = vmax.f32 %v7472_v20, 0.0  ;;  %v6727_v31 = vpop.permute.xlu0 %6726 }
 0x348   : > { %5464 = vst.msk [vmem:[#allocation4 + $0x168] sm:$0xff] %vm5448_vm5, %v5431_v24  ;;  %v10166_v37 = vpop.f32.mrb[7].mxu1  ;;  %6760 = vst.msk [vmem:[#allocation4 + $0x158] sm:$0xff] %vm5448_vm5, %v6727_v31  ;;  %v7699_v14 = vrot.slane %v7685_v62, %v12628_v32  ;;  %v7700_v34 = vcombine.high %v7692_v30, %v7692_v30  ;;  %v9956_v56 = vrot.slane %v7692_v30, 9  ;;  %v7316_v41 = vadd.f32 %v10164_v15, %v12592_v4 }
 0x349   : > { %v7702_v42 = vcombine.high %v7590_v33, %v7590_v33  ;;  %v7709_v10 = vrot.slane %v7590_v33, %v12628_v32  ;;  %v10167_v61 = vadd.f32 %v10166_v37, %v10165_v53  ;;  %v8714_v53 = vmax.f32 %v12653_v0, %v9955_v8 }
 0x34a   : > { %v7701_v45 = vcombine.high %v7699_v14, %v7699_v14  ;;  %v9957_v26 = vrot.slane %v7700_v34, 9  ;;  %v9958_v47 = vrot.slane %v7699_v14, 9  ;;  %v8715_v57 = vmax.f32 %v7692_v30, %v9956_v56 }
 0x34b   : > { %v6120_v35 = vpop.permute.xlu0 %6119  ;;  %v7716_v38 = vrot.slane %v7702_v42, %v12628_v32  ;;  %v7717_v16 = vcombine.high %v7709_v10, %v7709_v10  ;;  %v9960_v54 = vrot.slane %v7709_v10, 9  ;;  %v7477_v22 = vadd.f32 %v12607_v6, %v7316_v41 }
 0x34c   : > { %6152 = vst.msk [vmem:[#allocation4 + $0x170] sm:$0xff] %vm4982_vm6, %v6120_v35  ;;  %v9959_v48 = vrot.slane %v7701_v45, 9  ;;  %v8716_v3 = vmax.f32 %v7700_v34, %v9957_v26  ;;  %v8717_v2 = vmax.f32 %v7699_v14, %v9958_v47  ;;  %v8835_v17 = vmax.f32 %v8707_v51, %v8715_v57  ;;  %v7060_v51 = vld [vmem:[#allocation4 + $0x150] sm:$0xff] }
 0x34d   : > { %v7058_v23 = vld [vmem:[#allocation4 + $0x140] sm:$0xff]  ;;  %v7718_v24 = vcombine.high %v7716_v38, %v7716_v38  ;;  %v9961_v25 = vrot.slane %v7717_v16, 9  ;;  %v9962_v5 = vrot.slane %v7716_v38, 9  ;;  %v8719_v36 = vmax.f32 %v7709_v10, %v9960_v54 }
 0x34e   : > { %7401 = vmatprep.mubr.bf16.mxu1 %v7058_v23  ;;  %v8718_v55 = vmax.f32 %v7701_v45, %v9959_v48  ;;  %v8836_v46 = vmax.f32 %v12658_v21, %v8716_v3  ;;  %v8837_v50 = vmax.f32 %v12660_v59, %v8717_v2  ;;  %v8966_v20 = vrot.slane %v8835_v17, %v12655_v19 }
 0x34f   : > { %7402 = vmatmul.mubr.bf16.gmra.mrb[48].mxu1 %v7057_v39  ;;  %v6297_v27 = vpop.permute.xlu0 %6296  ;;  %v7061_v6 = vld [vmem:[#allocation4 + $0x158] sm:$0xff]  ;;  %v9963_v63 = vrot.slane %v7718_v24, 9  ;;  %v8720_v44 = vmax.f32 %v7717_v16, %v9961_v25  ;;  %v8721_v62 = vmax.f32 %v7716_v38, %v9962_v5  ;;  %v8839_v30 = vmax.f32 %v12664_v1, %v8719_v36 }
 0x350   : > { %6329 = vst.msk [vmem:[#allocation4 + $0x170] sm:$0xff] %vm5271_vm9, %v6297_v27  ;;  %7409 = vmatprep.mubr.bf16.mxu1 %v7061_v6  ;;  %v8838_v33 = vmax.f32 %v8710_v28, %v8718_v55  ;;  %v8970_v15 = vrot.slane %v8836_v46, %v12655_v19  ;;  %v8974_v21 = vrot.slane %v8837_v50, %v12655_v19  ;;  %v7591_v59 = vmax.f32 %v7477_v22, 0.0 }
 0x351   : > { %v8722_v31 = vmax.f32 %v7718_v24, %v9963_v63  ;;  %v8840_v23 = vmax.f32 %v12666_v58, %v8720_v44  ;;  %v8841_v37 = vmax.f32 %v8713_v60, %v8721_v62  ;;  %v8982_v56 = vrot.slane %v8839_v30, %v12655_v19 }
 0x352   : > { %v8978_v1 = vrot.slane %v8838_v33, %v12655_v19  ;;  %v9220_v39 = vsel %vm9219_vm2, %v8970_v15, %v8966_v20  ;;  %vm9227_vm6 = vcmask 1045509   ;;  %vm9229_vm9 = vcmask 1046534  }
 0x353   : > { %v6729_v14 = vpop.permute.xlu0 %6728  ;;  %v9222_v28 = vsel %vm9221_vm8, %v8974_v21, %v9220_v39  ;;  %v8842_v34 = vmax.f32 %v8714_v53, %v8722_v31  ;;  %v8986_v0 = vrot.slane %v8840_v23, %v12655_v19  ;;  %v7719_v58 = vcombine.high %v7591_v59, %v7591_v59 }
 0x354   : > { %6761 = vst.msk [vmem:[#allocation4 + $0x170] sm:$0xff] %vm5448_vm5, %v6729_v14  ;;  %v9224_v8 = vsel %vm9223_vm10, %v8978_v1, %v9222_v28  ;;  %v8990_v42 = vrot.slane %v8841_v37, %v12655_v19  ;;  %v7319_v10 = vadd.f32 %v10167_v61, %v12592_v4  ;;  %v7726_v26 = vrot.slane %v7591_v59, %v12628_v32  ;;  %v10168_v16 = vpop.f32.mrb[8].mxu1 }
 0x355   : > { %v9226_v60 = vsel %vm9225_vm12, %v8982_v56, %v9224_v8  ;;  %v8994_v41 = vrot.slane %v8842_v34, %v12655_v19  ;;  %v7733_v38 = vrot.slane %v7719_v58, %v12628_v32  ;;  %v10169_v22 = vpop.f32.mrb[9].mxu1  ;;  %v12709_v25 = vpop.f32.mrb[52].mxu0 }
 0x356   : > { %v9228_v45 = vsel %vm9227_vm6, %v8986_v0, %v9226_v60  ;;  %v7480_v57 = vadd.f32 %v12611_v12, %v7319_v10  ;;  %v7734_v54 = vcombine.high %v7726_v26, %v7726_v26  ;;  %v10170_v17 = vadd.f32 %v10169_v22, %v10168_v16  ;;  %v10171_v24 = vpop.f32.mrb[10].mxu1  ;;  %v7063_v12 = vld [vmem:[#allocation4 + $0x168] sm:$0xff]  ;;  %v12711_v55 = vpop.f32.mrb[53].mxu0 }
 0x357   : > { %7410 = vmatmul.mubr.bf16.gmra.mrb[52].mxu1 %v7060_v51  ;;  %v9230_v47 = vsel %vm9229_vm9, %v8990_v42, %v9228_v45  ;;  %v7735_v5 = vcombine.high %v7733_v38, %v7733_v38  ;;  %v10172_v36 = vpop.f32.mrb[11].mxu1  ;;  %v12714_v50 = vpop.f32.mrb[54].mxu0  ;;  %v9964_v20 = vrot.slane %v7726_v26, 9  ;;  %v9966_v44 = vrot.slane %v7733_v38, 9 }
 0x358   : > { %v9232_v35 = vsel %vm9231_vm4, %v8994_v41, %v9230_v47  ;;  %v7592_v61 = vmax.f32 %v7480_v57, 0.0  ;;  %v7324_v46 = vadd.f32 %v10170_v17, %v12592_v4  ;;  %v9965_v27 = vrot.slane %v7734_v54, 9  ;;  %v12716_v63 = vpop.f32.mrb[55].mxu0 }
 0x359   : > { %9290 = vst.msk [vmem:[%s12704_s25] sm:$0xff] %vm4549_vm1, %v9232_v35  ;;  %v10173_v6 = vadd.f32 %v10172_v36, %v10171_v24  ;;  %v9967_v51 = vrot.slane %v7735_v5, 9  ;;  %v8723_v53 = vmax.f32 %v7726_v26, %v9964_v20  ;;  %v8725_v39 = vmax.f32 %v7733_v38, %v9966_v44 }
 0x35a   : > { %v7736_v3 = vcombine.high %v7592_v61, %v7592_v61  ;;  %v7743_v2 = vrot.slane %v7592_v61, %v12628_v32  ;;  %v7485_v33 = vadd.f32 %v12605_v43, %v7324_v46  ;;  %v8724_v31 = vmax.f32 %v7734_v54, %v9965_v27 }
 0x35b   : > { %v7064_v48 = vld [vmem:[#allocation4 + $0x170] sm:$0xff]  ;;  %v7327_v15 = vadd.f32 %v10173_v6, %v12592_v4  ;;  %v8726_v0 = vmax.f32 %v7735_v5, %v9967_v51 }
 0x35c   : > { %7417 = vmatprep.mubr.bf16.mxu1 %v7064_v48  ;;  %v7750_v62 = vrot.slane %v7736_v3, %v12628_v32  ;;  %v7751_v30 = vcombine.high %v7743_v2, %v7743_v2  ;;  %v9968_v21 = vrot.slane %v7743_v2, 9  ;;  %v10174_v59 = vpop.f32.mrb[12].mxu1  ;;  %v7593_v23 = vmax.f32 %v7485_v33, 0.0 }
 0x35d   : > { %v7488_v37 = vadd.f32 %v12609_v9, %v7327_v15  ;;  %v10175_v1 = vpop.f32.mrb[13].mxu1 }
 0x35e   : > { %v7752_v14 = vcombine.high %v7750_v62, %v7750_v62  ;;  %v9969_v28 = vrot.slane %v7751_v30, 9  ;;  %v10176_v34 = vadd.f32 %v10175_v1, %v10174_v59  ;;  %v10177_v56 = vpop.f32.mrb[14].mxu1  ;;  %v7753_v8 = vcombine.high %v7593_v23, %v7593_v23 }
 0x35f   : > { %7418 = vmatmul.mubr.bf16.gmra.mrb[56].mxu1 %v7063_v12  ;;  %v7760_v58 = vrot.slane %v7593_v23, %v12628_v32  ;;  %v7594_v43 = vmax.f32 %v7488_v37, 0.0  ;;  %v10178_v42 = vpop.f32.mrb[15].mxu1  ;;  %v9970_v60 = vrot.slane %v7750_v62, 9  ;;  %v8727_v10 = vmax.f32 %v7743_v2, %v9968_v21 }
 0x360   : > { %v7332_v41 = vadd.f32 %v10176_v34, %v12592_v4  ;;  %v10179_v45 = vadd.f32 %v10178_v42, %v10177_v56  ;;  %v7767_v26 = vrot.slane %v7753_v8, %v12628_v32  ;;  %v9971_v35 = vrot.slane %v7752_v14, 9 }
 0x361   : > { %v7768_v9 = vcombine.high %v7760_v58, %v7760_v58  ;;  %v9972_v47 = vrot.slane %v7760_v58, 9  ;;  %v7770_v57 = vcombine.high %v7594_v43, %v7594_v43  ;;  %v8728_v38 = vmax.f32 %v7751_v30, %v9969_v28 }
 0x362   : > { %v7777_v61 = vrot.slane %v7594_v43, %v12628_v32  ;;  %v7493_v16 = vadd.f32 %v12617_v40, %v7332_v41  ;;  %v7769_v54 = vcombine.high %v7767_v26, %v7767_v26  ;;  %v9974_v48 = vrot.slane %v7767_v26, 9 }
 0x363   : > { %v9973_v22 = vrot.slane %v7768_v9, 9  ;;  %v8731_v3 = vmax.f32 %v7760_v58, %v9972_v47  ;;  %v8729_v17 = vmax.f32 %v7750_v62, %v9970_v60  ;;  %v7784_v2 = vrot.slane %v7770_v57, %v12628_v32 }
 0x364   : > { %v7785_v24 = vcombine.high %v7777_v61, %v7777_v61  ;;  %v9976_v12 = vrot.slane %v7777_v61, 9  ;;  %v9975_v5 = vrot.slane %v7769_v54, 9  ;;  %v8733_v46 = vmax.f32 %v7767_v26, %v9974_v48 }
 0x365   : > { %v8732_v36 = vmax.f32 %v7768_v9, %v9973_v22  ;;  %v8843_v20 = vmax.f32 %v8723_v53, %v8731_v3  ;;  %v7786_v27 = vcombine.high %v7784_v2, %v7784_v2  ;;  %v9978_v44 = vrot.slane %v7784_v2, 9 }
 0x366   : > { %v9977_v6 = vrot.slane %v7785_v24, 9  ;;  %v8735_v30 = vmax.f32 %v7777_v61, %v9976_v12  ;;  %v8730_v51 = vmax.f32 %v7752_v14, %v9971_v35  ;;  %v8734_v33 = vmax.f32 %v7769_v54, %v9975_v5 }
 0x367   : > { %v8844_v40 = vmax.f32 %v8724_v31, %v8732_v36  ;;  %v8845_v15 = vmax.f32 %v8725_v39, %v8733_v46  ;;  %v9979_v21 = vrot.slane %v7786_v27, 9  ;;  %v8737_v23 = vmax.f32 %v7784_v2, %v9978_v44 }
 0x368   : > { %v8736_v59 = vmax.f32 %v7785_v24, %v9977_v6  ;;  %v8847_v62 = vmax.f32 %v8727_v10, %v8735_v30  ;;  %v8846_v37 = vmax.f32 %v8726_v0, %v8734_v33  ;;  %v8998_v1 = vrot.slane %v8843_v20, %v12655_v19 }
 0x369   : > { %v9002_v28 = vrot.slane %v8844_v40, %v12655_v19  ;;  %v9006_v34 = vrot.slane %v8845_v15, %v12655_v19  ;;  %v8738_v53 = vmax.f32 %v7786_v27, %v9979_v21  ;;  %v8849_v8 = vmax.f32 %v8729_v17, %v8737_v23 }
 0x36a   : > { %v8848_v56 = vmax.f32 %v8728_v38, %v8736_v59  ;;  %v7335_v14 = vadd.f32 %v10179_v45, %v12592_v4  ;;  %v9010_v31 = vrot.slane %v8846_v37, %v12655_v19  ;;  %v9014_v0 = vrot.slane %v8847_v62, %v12655_v19 }
 0x36b   : > { %v9233_v39 = vsel %vm9219_vm2, %v9002_v28, %v8998_v1  ;;  %v8850_v43 = vmax.f32 %v8730_v51, %v8738_v53  ;;  %v9022_v10 = vrot.slane %v8849_v8, %v12655_v19  ;;  %v7595_v35 = vmax.f32 %v7493_v16, 0.0 }
 0x36c   : > { %v9234_v58 = vsel %vm9221_vm8, %v9006_v34, %v9233_v39  ;;  %v9018_v42 = vrot.slane %v8848_v56, %v12655_v19  ;;  %v7496_v26 = vadd.f32 %v12621_v13, %v7335_v14 }
 0x36d   : > { %v9235_v60 = vsel %vm9223_vm10, %v9010_v31, %v9234_v58  ;;  %v9026_v45 = vrot.slane %v8850_v43, %v12655_v19  ;;  %v7787_v38 = vcombine.high %v7595_v35, %v7595_v35  ;;  %v7794_v48 = vrot.slane %v7595_v35, %v12628_v32 }
 0x36e   : > { %v9236_v41 = vsel %vm9225_vm12, %v9014_v0, %v9235_v60  ;;  %v7596_v61 = vmax.f32 %v7496_v26, 0.0 }
 0x36f   : > { %v9237_v9 = vsel %vm9227_vm6, %v9018_v42, %v9236_v41  ;;  %v7801_v17 = vrot.slane %v7787_v38, %v12628_v32  ;;  %v7802_v12 = vcombine.high %v7794_v48, %v7794_v48  ;;  %v9980_v51 = vrot.slane %v7794_v48, 9 }
 0x370   : > { %v9238_v47 = vsel %vm9229_vm9, %v9022_v10, %v9237_v9  ;;  %v7804_v2 = vcombine.high %v7596_v61, %v7596_v61  ;;  %v7811_v5 = vrot.slane %v7596_v61, %v12628_v32 }
 0x371   : > { %v9239_v57 = vsel %vm9231_vm4, %v9026_v45, %v9238_v47  ;;  %v7803_v20 = vcombine.high %v7801_v17, %v7801_v17  ;;  %v9981_v33 = vrot.slane %v7802_v12, 9  ;;  %v9982_v40 = vrot.slane %v7801_v17, 9 }
 0x372   : > { %9291 = vst.msk [vmem:[%s12704_s25 + $0x8] sm:$0xff] %vm4549_vm1, %v9239_v57  ;;  %v7818_v27 = vrot.slane %v7804_v2, %v12628_v32  ;;  %v7819_v15 = vcombine.high %v7811_v5, %v7811_v5  ;;  %v9984_v37 = vrot.slane %v7811_v5, 9  ;;  %v8739_v53 = vmax.f32 %v7794_v48, %v9980_v51 }
 0x373   : > { %v9983_v23 = vrot.slane %v7803_v20, 9  ;;  %v8740_v56 = vmax.f32 %v7802_v12, %v9981_v33  ;;  %v8741_v8 = vmax.f32 %v7801_v17, %v9982_v40 }
 0x374   : > { %v7820_v62 = vcombine.high %v7818_v27, %v7818_v27  ;;  %v9985_v14 = vrot.slane %v7819_v15, 9  ;;  %v9986_v60 = vrot.slane %v7818_v27, 9  ;;  %v8743_v41 = vmax.f32 %v7811_v5, %v9984_v37 }
 0x375   : > { %v8742_v42 = vmax.f32 %v7803_v20, %v9983_v23 }
 0x376   : > { %v9987_v10 = vrot.slane %v7820_v62, 9  ;;  %v8744_v57 = vmax.f32 %v7819_v15, %v9985_v14  ;;  %v8745_v15 = vmax.f32 %v7818_v27, %v9986_v60 }
 0x386   : > { %v12747_v54 = vpop.f32.mrb[56].mxu0 }
 0x387   : > { %v12749_v22 = vpop.f32.mrb[57].mxu0 }
 0x388   : > { %v12752_v13 = vpop.f32.mrb[58].mxu0  ;;  %v10180_v24 = vpop.f32.mrb[16].mxu1 }
 0x389   : > { %v12754_v3 = vpop.f32.mrb[59].mxu0  ;;  %v10181_v16 = vpop.f32.mrb[17].mxu1 }
 0x38a   : > { %v10182_v36 = vadd.f32 %v10181_v16, %v10180_v24  ;;  %v10183_v46 = vpop.f32.mrb[18].mxu1 }
 0x38b   : > { %v10184_v6 = vpop.f32.mrb[19].mxu1 }
 0x38c   : > { %v7340_v44 = vadd.f32 %v10182_v36, %v12592_v4  ;;  %v10185_v30 = vadd.f32 %v10184_v6, %v10183_v46 }
 0x38e   : > { %v7501_v21 = vadd.f32 %v12614_v52, %v7340_v44  ;;  %v7343_v59 = vadd.f32 %v10185_v30, %v12592_v4 }
 0x390   : > { %v7597_v1 = vmax.f32 %v7501_v21, 0.0  ;;  %v7504_v28 = vadd.f32 %v12619_v7, %v7343_v59  ;;  %v10186_v34 = vpop.f32.mrb[20].mxu1 }
 0x391   : > { %v10187_v31 = vpop.f32.mrb[21].mxu1 }
 0x392   : > { %v7821_v39 = vcombine.high %v7597_v1, %v7597_v1  ;;  %v7828_v58 = vrot.slane %v7597_v1, %v12628_v32  ;;  %v7598_v43 = vmax.f32 %v7504_v28, 0.0  ;;  %v10188_v0 = vadd.f32 %v10187_v31, %v10186_v34  ;;  %v10189_v52 = vpop.f32.mrb[22].mxu1 }
 0x393   : > { %v10190_v26 = vpop.f32.mrb[23].mxu1 }
 0x394   : > { %v7835_v45 = vrot.slane %v7821_v39, %v12628_v32  ;;  %v7836_v7 = vcombine.high %v7828_v58, %v7828_v58  ;;  %v9988_v9 = vrot.slane %v7828_v58, 9  ;;  %v7838_v47 = vcombine.high %v7598_v43, %v7598_v43 }
 0x395   : > { %v7845_v35 = vrot.slane %v7598_v43, %v12628_v32  ;;  %v7348_v38 = vadd.f32 %v10188_v0, %v12592_v4  ;;  %v10191_v61 = vadd.f32 %v10190_v26, %v10189_v52 }
 0x396   : > { %v7837_v48 = vcombine.high %v7835_v45, %v7835_v45  ;;  %v9989_v17 = vrot.slane %v7836_v7, 9  ;;  %v9990_v2 = vrot.slane %v7835_v45, 9  ;;  %v8747_v24 = vmax.f32 %v7828_v58, %v9988_v9 }
 0x397   : > { %v7852_v12 = vrot.slane %v7838_v47, %v12628_v32  ;;  %v7853_v16 = vcombine.high %v7845_v35, %v7845_v35  ;;  %v9992_v5 = vrot.slane %v7845_v35, 9  ;;  %v7509_v36 = vadd.f32 %v12637_v29, %v7348_v38 }
 0x398   : > { %v9991_v46 = vrot.slane %v7837_v48, 9  ;;  %v8748_v20 = vmax.f32 %v7836_v7, %v9989_v17  ;;  %v8749_v6 = vmax.f32 %v7835_v45, %v9990_v2  ;;  %v8851_v44 = vmax.f32 %v8739_v53, %v8747_v24 }
 0x399   : > { %v7854_v30 = vcombine.high %v7852_v12, %v7852_v12  ;;  %v9993_v51 = vrot.slane %v7853_v16, 9  ;;  %v9994_v33 = vrot.slane %v7852_v12, 9  ;;  %v8751_v40 = vmax.f32 %v7845_v35, %v9992_v5 }
 0x39a   : > { %v8750_v21 = vmax.f32 %v7837_v48, %v9991_v46  ;;  %v8852_v59 = vmax.f32 %v8740_v56, %v8748_v20  ;;  %v8853_v23 = vmax.f32 %v8741_v8, %v8749_v6  ;;  %v9030_v31 = vrot.slane %v8851_v44, %v12655_v19 }
 0x39b   : > { %v9995_v37 = vrot.slane %v7854_v30, 9  ;;  %v8752_v1 = vmax.f32 %v7853_v16, %v9993_v51  ;;  %v8753_v28 = vmax.f32 %v7852_v12, %v9994_v33  ;;  %v8855_v34 = vmax.f32 %v8743_v41, %v8751_v40 }
 0x39c   : > { %v8854_v14 = vmax.f32 %v8742_v42, %v8750_v21  ;;  %v9034_v29 = vrot.slane %v8852_v59, %v12655_v19  ;;  %v9038_v39 = vrot.slane %v8853_v23, %v12655_v19  ;;  %v8746_v53 = vmax.f32 %v7820_v62, %v9987_v10 }
 0x39d   : > { %v8754_v58 = vmax.f32 %v7854_v30, %v9995_v37  ;;  %v8856_v43 = vmax.f32 %v8744_v57, %v8752_v1  ;;  %v8857_v0 = vmax.f32 %v8745_v15, %v8753_v28  ;;  %v9046_v42 = vrot.slane %v8855_v34, %v12655_v19 }
 0x39e   : > { %v9042_v27 = vrot.slane %v8854_v14, %v12655_v19  ;;  %v9240_v56 = vsel %vm9219_vm2, %v9034_v29, %v9030_v31  ;;  %v7351_v10 = vadd.f32 %v10191_v61, %v12592_v4  ;;  %v7599_v9 = vmax.f32 %v7509_v36, 0.0 }
 0x39f   : > { %v9241_v8 = vsel %vm9221_vm8, %v9038_v39, %v9240_v56  ;;  %v8858_v52 = vmax.f32 %v8746_v53, %v8754_v58  ;;  %v9050_v60 = vrot.slane %v8856_v43, %v12655_v19  ;;  %v9054_v26 = vrot.slane %v8857_v0, %v12655_v19 }
 0x3a0   : > { %v9242_v41 = vsel %vm9223_vm10, %v9042_v27, %v9241_v8  ;;  %v7512_v57 = vadd.f32 %v12643_v11, %v7351_v10  ;;  %v7855_v48 = vcombine.high %v7599_v9, %v7599_v9  ;;  %v7862_v17 = vrot.slane %v7599_v9, %v12628_v32 }
 0x3a1   : > { %v9243_v62 = vsel %vm9225_vm12, %v9046_v42, %v9242_v41  ;;  %v9058_v45 = vrot.slane %v8858_v52, %v12655_v19 }
 0x3a2   : > { %v9244_v7 = vsel %vm9227_vm6, %v9050_v60, %v9243_v62  ;;  %v7600_v38 = vmax.f32 %v7512_v57, 0.0  ;;  %v7869_v11 = vrot.slane %v7855_v48, %v12628_v32  ;;  %v7870_v36 = vcombine.high %v7862_v17, %v7862_v17 }
 0x3a3   : > { %v9245_v47 = vsel %vm9229_vm9, %v9054_v26, %v9244_v7  ;;  %v9996_v40 = vrot.slane %v7862_v17, 9 }
 0x3a4   : > { %v9246_v35 = vsel %vm9231_vm4, %v9058_v45, %v9245_v47  ;;  %v7872_v61 = vcombine.high %v7600_v38, %v7600_v38  ;;  %v7879_v24 = vrot.slane %v7600_v38, %v12628_v32  ;;  %v7871_v21 = vcombine.high %v7869_v11, %v7869_v11 }
 0x3a5   : > { %9292 = vst.msk [vmem:[%s12704_s25 + $0x10] sm:$0xff] %vm4549_vm1, %v9246_v35  ;;  %v9997_v59 = vrot.slane %v7870_v36, 9  ;;  %v9998_v37 = vrot.slane %v7869_v11, 9  ;;  %v8755_v29 = vmax.f32 %v7862_v17, %v9996_v40 }
 0x3a6   : > { %v7886_v44 = vrot.slane %v7872_v61, %v12628_v32  ;;  %v7887_v30 = vcombine.high %v7879_v24, %v7879_v24  ;;  %v10000_v1 = vrot.slane %v7879_v24, 9  ;;  %v9999_v58 = vrot.slane %v7871_v21, 9 }
 0x3a7   : > { %v8756_v43 = vmax.f32 %v7870_v36, %v9997_v59  ;;  %v8757_v8 = vmax.f32 %v7869_v11, %v9998_v37 }
 0x3a8   : > { %v7888_v34 = vcombine.high %v7886_v44, %v7886_v44  ;;  %v10001_v14 = vrot.slane %v7887_v30, 9  ;;  %v10002_v0 = vrot.slane %v7886_v44, 9  ;;  %v8759_v52 = vmax.f32 %v7879_v24, %v10000_v1 }
 0x3aa   : > { %v10003_v26 = vrot.slane %v7888_v34, 9  ;;  %v8760_v62 = vmax.f32 %v7887_v30, %v10001_v14  ;;  %v8761_v57 = vmax.f32 %v7886_v44, %v10002_v0 }
 0x3ac   : > { %v12789_v2 = vpop.f32.mrb[60].mxu0  ;;  %v8762_v0 = vmax.f32 %v7888_v34, %v10003_v26 }
 0x3ad   : > { %v12792_v12 = vpop.f32.mrb[61].mxu0 }
 0x3ae   : > { %v10192_v16 = vpop.f32.mrb[24].mxu1  ;;  %v12794_v5 = vpop.f32.mrb[62].mxu0 }
 0x3af   : > { %v10193_v46 = vpop.f32.mrb[25].mxu1  ;;  %v12797_v20 = vpop.f32.mrb[63].mxu0 }
 0x3b0   : > { %v10195_v6 = vpop.f32.mrb[26].mxu1  ;;  %v10194_v51 = vadd.f32 %v10193_v46, %v10192_v16 }
 0x3b1   : > { %v10196_v33 = vpop.f32.mrb[27].mxu1 }
 0x3b2   : > { %v10197_v15 = vadd.f32 %v10196_v33, %v10195_v6  ;;  %v7356_v23 = vadd.f32 %v10194_v51, %v12592_v4 }
 0x3b4   : > { %v7359_v28 = vadd.f32 %v10197_v15, %v12592_v4  ;;  %v7517_v31 = vadd.f32 %v12633_v49, %v7356_v23 }
 0x3b6   : > { %v7520_v39 = vadd.f32 %v12640_v18, %v7359_v28  ;;  %v10198_v53 = vpop.f32.mrb[28].mxu1  ;;  %v7601_v27 = vmax.f32 %v7517_v31, 0.0  ;;  %v8758_v31 = vmax.f32 %v7871_v21, %v9999_v58 }
 0x3b7   : > { %v10199_v56 = vpop.f32.mrb[29].mxu1 }
 0x3b8   : > { %v7602_v42 = vmax.f32 %v7520_v39, 0.0  ;;  %v10200_v60 = vadd.f32 %v10199_v56, %v10198_v53  ;;  %v10201_v41 = vpop.f32.mrb[30].mxu1  ;;  %v7889_v10 = vcombine.high %v7601_v27, %v7601_v27  ;;  %v7896_v45 = vrot.slane %v7601_v27, %v12628_v32 }
 0x3b9   : > { %v10202_v49 = vpop.f32.mrb[31].mxu1 }
 0x3ba   : > { %v7906_v7 = vcombine.high %v7602_v42, %v7602_v42  ;;  %v7913_v18 = vrot.slane %v7602_v42, %v12628_v32  ;;  %v7364_v9 = vadd.f32 %v10200_v60, %v12592_v4  ;;  %v10203_v47 = vadd.f32 %v10202_v49, %v10201_v41 }
 0x3bb   : > { %v7903_v35 = vrot.slane %v7889_v10, %v12628_v32  ;;  %v7904_v38 = vcombine.high %v7896_v45, %v7896_v45  ;;  %v10004_v48 = vrot.slane %v7896_v45, 9 }
 0x3bc   : > { %v7920_v17 = vrot.slane %v7906_v7, %v12628_v32  ;;  %v7921_v61 = vcombine.high %v7913_v18, %v7913_v18  ;;  %v10008_v24 = vrot.slane %v7913_v18, 9  ;;  %v7525_v16 = vadd.f32 %v12711_v55, %v7364_v9 }
 0x3bd   : > { %v7905_v11 = vcombine.high %v7903_v35, %v7903_v35  ;;  %v10005_v36 = vrot.slane %v7904_v38, 9  ;;  %v10006_v46 = vrot.slane %v7903_v35, 9  ;;  %v8763_v6 = vmax.f32 %v7896_v45, %v10004_v48 }
 0x3be   : > { %v7922_v30 = vcombine.high %v7920_v17, %v7920_v17  ;;  %v10009_v51 = vrot.slane %v7921_v61, 9  ;;  %v10010_v33 = vrot.slane %v7920_v17, 9  ;;  %v8767_v40 = vmax.f32 %v7913_v18, %v10008_v24 }
 0x3bf   : > { %v10007_v15 = vrot.slane %v7905_v11, 9  ;;  %v8764_v44 = vmax.f32 %v7904_v38, %v10005_v36  ;;  %v8765_v59 = vmax.f32 %v7903_v35, %v10006_v46  ;;  %v8859_v23 = vmax.f32 %v8755_v29, %v8763_v6 }
 0x3c0   : > { %v10011_v37 = vrot.slane %v7922_v30, 9  ;;  %v8768_v1 = vmax.f32 %v7921_v61, %v10009_v51  ;;  %v8769_v28 = vmax.f32 %v7920_v17, %v10010_v33  ;;  %v8863_v14 = vmax.f32 %v8759_v52, %v8767_v40 }
 0x3c1   : > { %v8766_v39 = vmax.f32 %v7905_v11, %v10007_v15  ;;  %v8860_v53 = vmax.f32 %v8756_v43, %v8764_v44  ;;  %v8861_v55 = vmax.f32 %v8757_v8, %v8765_v59  ;;  %v9062_v41 = vrot.slane %v8859_v23, %v12655_v19 }
 0x3c2   : > { %v8770_v27 = vmax.f32 %v7922_v30, %v10011_v37  ;;  %v8864_v56 = vmax.f32 %v8760_v62, %v8768_v1  ;;  %v8865_v42 = vmax.f32 %v8761_v57, %v8769_v28  ;;  %v7367_v49 = vadd.f32 %v10203_v47, %v12592_v4  ;;  %v12821_v62 = vpop.f32.mrb[64].mxu0 }
 0x3c3   : > { %v8862_v60 = vmax.f32 %v8758_v31, %v8766_v39  ;;  %v9066_v10 = vrot.slane %v8860_v53, %v12655_v19  ;;  %v9070_v45 = vrot.slane %v8861_v55, %v12655_v19  ;;  %v9078_v58 = vrot.slane %v8863_v14, %v12655_v19  ;;  %v12825_v18 = vpop.f32.mrb[65].mxu0 }
 0x3c4   : > { %v8866_v29 = vmax.f32 %v8762_v0, %v8770_v27  ;;  %v7528_v43 = vadd.f32 %v12716_v63, %v7367_v49  ;;  %v9082_v8 = vrot.slane %v8864_v56, %v12655_v19  ;;  %v9086_v7 = vrot.slane %v8865_v42, %v12655_v19  ;;  %v12829_v57 = vpop.f32.mrb[66].mxu0 }
 0x3c5   : > { %v9074_v52 = vrot.slane %v8862_v60, %v12655_v19  ;;  %v9247_v21 = vsel %vm9219_vm2, %v9066_v10, %v9062_v41  ;;  %v12832_v35 = vpop.f32.mrb[67].mxu0  ;;  %v7603_v48 = vmax.f32 %v7525_v16, 0.0  ;;  %v12844_v16 = vld [vmem:[%s13030_s4] ss:$0 sm:$0xff] }
 0x3c6   : > { %v9248_v34 = vsel %vm9221_vm8, %v9070_v45, %v9247_v21  ;;  %v9090_v9 = vrot.slane %v8866_v29, %v12655_v19  ;;  %v7604_v61 = vmax.f32 %v7528_v43, 0.0 }
 0x3c7   : > { %v9249_v26 = vsel %vm9223_vm10, %v9074_v52, %v9248_v34  ;;  %v7923_v17 = vcombine.high %v7603_v48, %v7603_v48  ;;  %v7930_v24 = vrot.slane %v7603_v48, %v12628_v32 }
 0x3c8   : > { %v9250_v4 = vsel %vm9225_vm12, %v9078_v58, %v9249_v26  ;;  %v7940_v36 = vcombine.high %v7604_v61, %v7604_v61  ;;  %v7947_v30 = vrot.slane %v7604_v61, %v12628_v32 }
 0x3c9   : > { %v9251_v47 = vsel %vm9227_vm6, %v9082_v8, %v9250_v4  ;;  %v7937_v11 = vrot.slane %v7923_v17, %v12628_v32  ;;  %v7938_v6 = vcombine.high %v7930_v24, %v7930_v24  ;;  %v10012_v1 = vrot.slane %v7930_v24, 9 }
 0x3ca   : > { %v9252_v63 = vsel %vm9229_vm9, %v9086_v7, %v9251_v47  ;;  %v7954_v44 = vrot.slane %v7940_v36, %v12628_v32  ;;  %v7955_v31 = vcombine.high %v7947_v30, %v7947_v30  ;;  %v10016_v27 = vrot.slane %v7947_v30, 9 }
 0x3cb   : > { %v9253_v38 = vsel %vm9231_vm4, %v9090_v9, %v9252_v63  ;;  %v7939_v15 = vcombine.high %v7937_v11, %v7937_v11  ;;  %v10013_v28 = vrot.slane %v7938_v6, 9  ;;  %v10014_v14 = vrot.slane %v7937_v11, 9 }
 0x3cc   : > { %9293 = vst.msk [vmem:[%s12704_s25 + $0x18] sm:$0xff] %vm4549_vm1, %v9253_v38  ;;  %v7956_v0 = vcombine.high %v7954_v44, %v7954_v44  ;;  %v8771_v41 = vmax.f32 %v7930_v24, %v10012_v1  ;;  %v10017_v29 = vrot.slane %v7955_v31, 9  ;;  %v10018_v8 = vrot.slane %v7954_v44, 9 }
 0x3cd   : > { %v10015_v55 = vrot.slane %v7939_v15, 9  ;;  %v8772_v10 = vmax.f32 %v7938_v6, %v10013_v28  ;;  %v8773_v45 = vmax.f32 %v7937_v11, %v10014_v14  ;;  %v8775_v7 = vmax.f32 %v7947_v30, %v10016_v27 }
 0x3ce   : > { %v10019_v26 = vrot.slane %v7956_v0, 9  ;;  %v8776_v38 = vmax.f32 %v7955_v31, %v10017_v29  ;;  %v8777_v31 = vmax.f32 %v7954_v44, %v10018_v8 }
 0x3cf   : > { %v8774_v43 = vmax.f32 %v7939_v15, %v10015_v55 }
 0x3d0   : > { %v10204_v46 = vpop.f32.mrb[32].mxu1 }
 0x3d1   : > { %v10205_v51 = vpop.f32.mrb[33].mxu1 }
 0x3d2   : > { %v10206_v33 = vadd.f32 %v10205_v51, %v10204_v46  ;;  %v10207_v40 = vpop.f32.mrb[34].mxu1 }
 0x3d3   : > { %v10208_v59 = vpop.f32.mrb[35].mxu1 }
 0x3d4   : > { %v7372_v23 = vadd.f32 %v12844_v16, %v10206_v33  ;;  %v10209_v37 = vadd.f32 %v10208_v59, %v10207_v40 }
 0x3d6   : > { %v7533_v39 = vadd.f32 %v12709_v25, %v7372_v23  ;;  %v7375_v53 = vadd.f32 %v12844_v16, %v10209_v37 }
 0x3d8   : > { %v7605_v56 = vmax.f32 %v7533_v39, 0.0  ;;  %v7536_v42 = vadd.f32 %v12714_v50, %v7375_v53  ;;  %v10210_v60 = vpop.f32.mrb[36].mxu1 }
 0x3d9   : > { %v10211_v49 = vpop.f32.mrb[37].mxu1 }
 0x3da   : > { %v7957_v52 = vcombine.high %v7605_v56, %v7605_v56  ;;  %v7964_v21 = vrot.slane %v7605_v56, %v12628_v32  ;;  %v7606_v34 = vmax.f32 %v7536_v42, 0.0  ;;  %v10212_v58 = vadd.f32 %v10211_v49, %v10210_v60  ;;  %v10213_v25 = vpop.f32.mrb[38].mxu1 }
 0x3db   : > { %v10214_v4 = vpop.f32.mrb[39].mxu1 }
 0x3dc   : > { %v7971_v9 = vrot.slane %v7957_v52, %v12628_v32  ;;  %v7972_v50 = vcombine.high %v7964_v21, %v7964_v21  ;;  %v10020_v47 = vrot.slane %v7964_v21, 9  ;;  %v7974_v63 = vcombine.high %v7606_v34, %v7606_v34 }
 0x3dd   : > { %v7981_v48 = vrot.slane %v7606_v34, %v12628_v32  ;;  %v7380_v17 = vadd.f32 %v12844_v16, %v10212_v58  ;;  %v10215_v61 = vadd.f32 %v10214_v4, %v10213_v25 }
 0x3de   : > { %v7973_v24 = vcombine.high %v7971_v9, %v7971_v9  ;;  %v10021_v11 = vrot.slane %v7972_v50, 9  ;;  %v10022_v36 = vrot.slane %v7971_v9, 9  ;;  %v8779_v46 = vmax.f32 %v7964_v21, %v10020_v47 }
 0x3df   : > { %v7988_v6 = vrot.slane %v7974_v63, %v12628_v32  ;;  %v7989_v51 = vcombine.high %v7981_v48, %v7981_v48  ;;  %v10024_v30 = vrot.slane %v7981_v48, 9  ;;  %v7541_v33 = vadd.f32 %v12749_v22, %v7380_v17 }
 0x3e0   : > { %v10023_v40 = vrot.slane %v7973_v24, 9  ;;  %v8780_v15 = vmax.f32 %v7972_v50, %v10021_v11  ;;  %v8781_v59 = vmax.f32 %v7971_v9, %v10022_v36  ;;  %v8867_v23 = vmax.f32 %v8771_v41, %v8779_v46 }
 0x3e1   : > { %v7990_v37 = vcombine.high %v7988_v6, %v7988_v6  ;;  %v10025_v1 = vrot.slane %v7989_v51, 9  ;;  %v10026_v28 = vrot.slane %v7988_v6, 9  ;;  %v8783_v14 = vmax.f32 %v7981_v48, %v10024_v30 }
 0x3e2   : > { %v8782_v39 = vmax.f32 %v7973_v24, %v10023_v40  ;;  %v8868_v53 = vmax.f32 %v8772_v10, %v8780_v15  ;;  %v8869_v55 = vmax.f32 %v8773_v45, %v8781_v59  ;;  %v9094_v49 = vrot.slane %v8867_v23, %v12655_v19 }
 0x3e3   : > { %v10027_v27 = vrot.slane %v7990_v37, 9  ;;  %v8784_v56 = vmax.f32 %v7989_v51, %v10025_v1  ;;  %v8785_v42 = vmax.f32 %v7988_v6, %v10026_v28  ;;  %v8871_v60 = vmax.f32 %v8775_v7, %v8783_v14 }
 0x3e4   : > { %v8870_v29 = vmax.f32 %v8774_v43, %v8782_v39  ;;  %v9098_v22 = vrot.slane %v8868_v53, %v12655_v19  ;;  %v9102_v52 = vrot.slane %v8869_v55, %v12655_v19  ;;  %v8778_v41 = vmax.f32 %v7956_v0, %v10019_v26 }
 0x3e5   : > { %v8786_v21 = vmax.f32 %v7990_v37, %v10027_v27  ;;  %v8872_v34 = vmax.f32 %v8776_v38, %v8784_v56  ;;  %v8873_v58 = vmax.f32 %v8777_v31, %v8785_v42  ;;  %v9110_v43 = vrot.slane %v8871_v60, %v12655_v19 }
 0x3e6   : > { %v9106_v44 = vrot.slane %v8870_v29, %v12655_v19  ;;  %v9254_v10 = vsel %vm9219_vm2, %v9098_v22, %v9094_v49  ;;  %v7383_v26 = vadd.f32 %v12844_v16, %v10215_v61  ;;  %v7607_v48 = vmax.f32 %v7541_v33, 0.0 }
 0x3e7   : > { %v9255_v45 = vsel %vm9221_vm8, %v9102_v52, %v9254_v10  ;;  %v8874_v25 = vmax.f32 %v8778_v41, %v8786_v21  ;;  %v9114_v8 = vrot.slane %v8872_v34, %v12655_v19  ;;  %v9118_v4 = vrot.slane %v8873_v58, %v12655_v19 }
 0x3e8   : > { %v9256_v7 = vsel %vm9223_vm10, %v9106_v44, %v9255_v45  ;;  %v7544_v63 = vadd.f32 %v12754_v3, %v7383_v26  ;;  %v7991_v17 = vcombine.high %v7607_v48, %v7607_v48  ;;  %v7998_v11 = vrot.slane %v7607_v48, %v12628_v32 }
 0x3e9   : > { %v9257_v0 = vsel %vm9225_vm12, %v9110_v43, %v9256_v7  ;;  %v9122_v9 = vrot.slane %v8874_v25, %v12655_v19 }
 0x3ea   : > { %v9258_v50 = vsel %vm9227_vm6, %v9114_v8, %v9257_v0  ;;  %v7608_v24 = vmax.f32 %v7544_v63, 0.0  ;;  %v8005_v36 = vrot.slane %v7991_v17, %v12628_v32  ;;  %v8006_v51 = vcombine.high %v7998_v11, %v7998_v11 }
 0x3eb   : > { %v9259_v47 = vsel %vm9229_vm9, %v9118_v4, %v9258_v50  ;;  %v10028_v28 = vrot.slane %v7998_v11, 9 }
 0x3ec   : > { %v9260_v38 = vsel %vm9231_vm4, %v9122_v9, %v9259_v47  ;;  %v8008_v61 = vcombine.high %v7608_v24, %v7608_v24  ;;  %v8015_v46 = vrot.slane %v7608_v24, %v12628_v32  ;;  %v8007_v3 = vcombine.high %v8005_v36, %v8005_v36 }
 0x3ed   : > { %9294 = vst.msk [vmem:[%s12704_s25 + $0x20] sm:$0xff] %vm4549_vm1, %v9260_v38  ;;  %v10029_v14 = vrot.slane %v8006_v51, 9  ;;  %v10030_v31 = vrot.slane %v8005_v36, 9  ;;  %v8787_v22 = vmax.f32 %v7998_v11, %v10028_v28 }
 0x3ee   : > { %v8022_v59 = vrot.slane %v8008_v61, %v12628_v32  ;;  %v8023_v23 = vcombine.high %v8015_v46, %v8015_v46  ;;  %v10031_v55 = vrot.slane %v8007_v3, 9  ;;  %v10032_v56 = vrot.slane %v8015_v46, 9 }
 0x3ef   : > { %v8788_v52 = vmax.f32 %v8006_v51, %v10029_v14  ;;  %v8789_v41 = vmax.f32 %v8005_v36, %v10030_v31 }
 0x3f0   : > { %v8024_v27 = vcombine.high %v8022_v59, %v8022_v59  ;;  %v10033_v42 = vrot.slane %v8023_v23, 9  ;;  %v10034_v21 = vrot.slane %v8022_v59, 9  ;;  %v8790_v25 = vmax.f32 %v8007_v3, %v10031_v55 }
 0x3f1   : > { %v8791_v8 = vmax.f32 %v8015_v46, %v10032_v56 }
 0x3f2   : > { %v10035_v43 = vrot.slane %v8024_v27, 9  ;;  %v8792_v7 = vmax.f32 %v8023_v23, %v10033_v42  ;;  %v8793_v50 = vmax.f32 %v8022_v59, %v10034_v21 }
 0x40d   : > { %v10216_v6 = vpop.f32.mrb[40].mxu1 }
 0x40e   : > { %v10217_v30 = vpop.f32.mrb[41].mxu1 }
 0x40f   : > { %v10218_v40 = vadd.f32 %v10217_v30, %v10216_v6  ;;  %v10219_v15 = vpop.f32.mrb[42].mxu1 }
 0x410   : > { %v10220_v37 = vpop.f32.mrb[43].mxu1 }
 0x411   : > { %v7388_v33 = vadd.f32 %v12844_v16, %v10218_v40  ;;  %v10221_v1 = vadd.f32 %v10220_v37, %v10219_v15 }
 0x413   : > { %v7549_v39 = vadd.f32 %v12747_v54, %v7388_v33  ;;  %v7391_v53 = vadd.f32 %v12844_v16, %v10221_v1 }
 0x415   : > { %v7609_v60 = vmax.f32 %v7549_v39, 0.0  ;;  %v7552_v29 = vadd.f32 %v12752_v13, %v7391_v53  ;;  %v10222_v49 = vpop.f32.mrb[44].mxu1 }
 0x416   : > { %v10223_v34 = vpop.f32.mrb[45].mxu1 }
 0x417   : > { %v8025_v58 = vcombine.high %v7609_v60, %v7609_v60  ;;  %v8032_v44 = vrot.slane %v7609_v60, %v12628_v32  ;;  %v7610_v10 = vmax.f32 %v7552_v29, 0.0  ;;  %v10224_v54 = vadd.f32 %v10223_v34, %v10222_v49  ;;  %v10225_v45 = vpop.f32.mrb[46].mxu1 }
 0x418   : > { %v10226_v4 = vpop.f32.mrb[47].mxu1  ;;  %v8794_v34 = vmax.f32 %v8024_v27, %v10035_v43 }
 0x419   : > { %v8039_v0 = vrot.slane %v8025_v58, %v12628_v32  ;;  %v8040_v13 = vcombine.high %v8032_v44, %v8032_v44  ;;  %v10036_v26 = vrot.slane %v8032_v44, 9  ;;  %v8042_v9 = vcombine.high %v7610_v10, %v7610_v10 }
 0x41a   : > { %v8049_v47 = vrot.slane %v7610_v10, %v12628_v32  ;;  %v7396_v63 = vadd.f32 %v12844_v16, %v10224_v54  ;;  %v10227_v38 = vadd.f32 %v10226_v4, %v10225_v45 }
 0x41b   : > { %v8041_v48 = vcombine.high %v8039_v0, %v8039_v0  ;;  %v10037_v17 = vrot.slane %v8040_v13, 9  ;;  %v10038_v24 = vrot.slane %v8039_v0, 9  ;;  %v8795_v11 = vmax.f32 %v8032_v44, %v10036_v26 }
 0x41c   : > { %v8056_v36 = vrot.slane %v8042_v9, %v12628_v32  ;;  %v8057_v61 = vcombine.high %v8049_v47, %v8049_v47  ;;  %v10040_v46 = vrot.slane %v8049_v47, 9  ;;  %v7557_v6 = vadd.f32 %v12792_v12, %v7396_v63 }
 0x41d   : > { %v10039_v51 = vrot.slane %v8041_v48, 9  ;;  %v8796_v30 = vmax.f32 %v8040_v13, %v10037_v17  ;;  %v8797_v40 = vmax.f32 %v8039_v0, %v10038_v24  ;;  %v8875_v15 = vmax.f32 %v8787_v22, %v8795_v11 }
 0x41e   : > { %v8058_v59 = vcombine.high %v8056_v36, %v8056_v36  ;;  %v10041_v23 = vrot.slane %v8057_v61, 9  ;;  %v10042_v37 = vrot.slane %v8056_v36, 9  ;;  %v8799_v33 = vmax.f32 %v8049_v47, %v10040_v46 }
 0x41f   : > { %v8798_v28 = vmax.f32 %v8041_v48, %v10039_v51  ;;  %v8876_v14 = vmax.f32 %v8788_v52, %v8796_v30  ;;  %v8877_v31 = vmax.f32 %v8789_v41, %v8797_v40  ;;  %v9126_v39 = vrot.slane %v8875_v15, %v12655_v19 }
 0x420   : > { %v10043_v55 = vrot.slane %v8058_v59, 9  ;;  %v8800_v56 = vmax.f32 %v8057_v61, %v10041_v23  ;;  %v8801_v42 = vmax.f32 %v8056_v36, %v10042_v37  ;;  %v8879_v12 = vmax.f32 %v8791_v8, %v8799_v33 }
 0x421   : > { %v8878_v29 = vmax.f32 %v8790_v25, %v8798_v28  ;;  %v9130_v49 = vrot.slane %v8876_v14, %v12655_v19  ;;  %v9134_v22 = vrot.slane %v8877_v31, %v12655_v19  ;;  %v7611_v21 = vmax.f32 %v7557_v6, 0.0 }
 0x422   : > { %v10228_v3 = vpop.f32.mrb[48].mxu1  ;;  %v8802_v58 = vmax.f32 %v8058_v59, %v10043_v55  ;;  %v8880_v44 = vmax.f32 %v8792_v7, %v8800_v56  ;;  %v8881_v10 = vmax.f32 %v8793_v50, %v8801_v42  ;;  %v9142_v25 = vrot.slane %v8879_v12, %v12655_v19 }
 0x423   : > { %v10229_v1 = vpop.f32.mrb[49].mxu1  ;;  %v9138_v52 = vrot.slane %v8878_v29, %v12655_v19  ;;  %v9261_v41 = vsel %vm9219_vm2, %v9130_v49, %v9126_v39  ;;  %v8059_v54 = vcombine.high %v7611_v21, %v7611_v21  ;;  %v8066_v45 = vrot.slane %v7611_v21, %v12628_v32 }
 0x424   : > { %v10231_v53 = vpop.f32.mrb[50].mxu1  ;;  %v9262_v8 = vsel %vm9221_vm8, %v9134_v22, %v9261_v41  ;;  %v8882_v4 = vmax.f32 %v8794_v34, %v8802_v58  ;;  %v9146_v0 = vrot.slane %v8880_v44, %v12655_v19  ;;  %v9150_v7 = vrot.slane %v8881_v10, %v12655_v19 }
 0x425   : > { %v10232_v60 = vpop.f32.mrb[51].mxu1  ;;  %v9263_v13 = vsel %vm9223_vm10, %v9138_v52, %v9262_v8  ;;  %v8073_v27 = vrot.slane %v8059_v54, %v12628_v32  ;;  %v7399_v9 = vadd.f32 %v12844_v16, %v10227_v38  ;;  %v10230_v50 = vadd.f32 %v10229_v1, %v10228_v3 }
 0x426   : > { %v9264_v26 = vsel %vm9225_vm12, %v9142_v25, %v9263_v13  ;;  %v9154_v63 = vrot.slane %v8882_v4, %v12655_v19  ;;  %v8074_v17 = vcombine.high %v8066_v45, %v8066_v45  ;;  %v10233_v40 = vadd.f32 %v10232_v60, %v10231_v53 }
 0x427   : > { %v9265_v48 = vsel %vm9227_vm6, %v9146_v0, %v9264_v26  ;;  %v7560_v36 = vadd.f32 %v12797_v20, %v7399_v9  ;;  %v7404_v61 = vadd.f32 %v12844_v16, %v10230_v50  ;;  %v8075_v51 = vcombine.high %v8073_v27, %v8073_v27 }
 0x428   : > { %v9266_v11 = vsel %vm9229_vm9, %v9150_v7, %v9265_v48  ;;  %v10044_v3 = vrot.slane %v8066_v45, 9  ;;  %v10045_v59 = vrot.slane %v8074_v17, 9  ;;  %v7407_v1 = vadd.f32 %v12844_v16, %v10233_v40 }
 0x429   : > { %v9267_v6 = vsel %vm9231_vm4, %v9154_v63, %v9266_v11  ;;  %v7612_v38 = vmax.f32 %v7560_v36, 0.0  ;;  %v7565_v30 = vadd.f32 %v12789_v2, %v7404_v61  ;;  %v10046_v28 = vrot.slane %v8073_v27, 9 }
 0x42a   : > { %v10234_v43 = vpop.f32.mrb[52].mxu1  ;;  %9295 = vst.msk [vmem:[%s12704_s25 + $0x28] sm:$0xff] %vm4549_vm1, %v9267_v6  ;;  %v10047_v14 = vrot.slane %v8075_v51, 9  ;;  %v7568_v12 = vadd.f32 %v12794_v5, %v7407_v1  ;;  %v8803_v49 = vmax.f32 %v8066_v45, %v10044_v3  ;;  %v8804_v22 = vmax.f32 %v8074_v17, %v10045_v59 }
 0x42b   : > { %v10235_v47 = vpop.f32.mrb[53].mxu1  ;;  %v8076_v37 = vcombine.high %v7612_v38, %v7612_v38  ;;  %v8083_v33 = vrot.slane %v7612_v38, %v12628_v32  ;;  %v7613_v20 = vmax.f32 %v7565_v30, 0.0  ;;  %v8805_v54 = vmax.f32 %v8073_v27, %v10046_v28 }
 0x42c   : > { %v10237_v24 = vpop.f32.mrb[54].mxu1  ;;  %v10236_v15 = vadd.f32 %v10235_v47, %v10234_v43  ;;  %v7614_v52 = vmax.f32 %v7568_v12, 0.0  ;;  %v8806_v8 = vmax.f32 %v8075_v51, %v10047_v14 }
 0x42d   : > { %v10238_v46 = vpop.f32.mrb[55].mxu1  ;;  %v8090_v55 = vrot.slane %v8076_v37, %v12628_v32  ;;  %v8091_v2 = vcombine.high %v8083_v33, %v8083_v33  ;;  %v10048_v53 = vrot.slane %v8083_v33, 9  ;;  %v8093_v56 = vcombine.high %v7613_v20, %v7613_v20 }
 0x42e   : > { %v10239_v23 = vadd.f32 %v10238_v46, %v10237_v24  ;;  %v7412_v31 = vadd.f32 %v12844_v16, %v10236_v15  ;;  %v8100_v42 = vrot.slane %v7613_v20, %v12628_v32  ;;  %v8110_v26 = vcombine.high %v7614_v52, %v7614_v52 }
 0x42f   : > { %v8092_v21 = vcombine.high %v8090_v55, %v8090_v55  ;;  %v10049_v34 = vrot.slane %v8091_v2, 9  ;;  %v8107_v58 = vrot.slane %v8093_v56, %v12628_v32  ;;  %v10050_v4 = vrot.slane %v8090_v55, 9 }
 0x430   : > { %v7415_v39 = vadd.f32 %v12844_v16, %v10239_v23  ;;  %v7573_v60 = vadd.f32 %v12825_v18, %v7412_v31  ;;  %v8108_v44 = vcombine.high %v8100_v42, %v8100_v42  ;;  %v10052_v10 = vrot.slane %v8100_v42, 9 }
 0x431   : > { %v8807_v25 = vmax.f32 %v8083_v33, %v10048_v53  ;;  %v8109_v0 = vcombine.high %v8107_v58, %v8107_v58  ;;  %v10054_v13 = vrot.slane %v8107_v58, 9  ;;  %v10051_v45 = vrot.slane %v8092_v21, 9 }
 0x432   : > { %v12921_v29 = vadd.f32 %v12832_v35, %v7415_v39  ;;  %v10240_v41 = vpop.f32.mrb[56].mxu1  ;;  %v10053_v18 = vrot.slane %v8108_v44, 9  ;;  %v8811_v35 = vmax.f32 %v8100_v42, %v10052_v10  ;;  %v8808_v7 = vmax.f32 %v8091_v2, %v10049_v34 }
 0x433   : > { %v10241_v5 = vpop.f32.mrb[57].mxu1  ;;  %v8117_v9 = vrot.slane %v7614_v52, %v12628_v32  ;;  %v10055_v47 = vrot.slane %v8109_v0, 9  ;;  %v8813_v48 = vmax.f32 %v8107_v58, %v10054_v13  ;;  %v8809_v27 = vmax.f32 %v8090_v55, %v10050_v4 }
 0x434   : > { %v10243_v43 = vpop.f32.mrb[58].mxu1  ;;  %v8812_v63 = vmax.f32 %v8108_v44, %v10053_v18  ;;  %v8883_v17 = vmax.f32 %v8803_v49, %v8811_v35  ;;  %v8124_v24 = vrot.slane %v8110_v26, %v12628_v32  ;;  %v7615_v51 = vmax.f32 %v7573_v60, 0.0 }
 0x435   : > { %v10244_v50 = vpop.f32.mrb[59].mxu1  ;;  %v8125_v11 = vcombine.high %v8117_v9, %v8117_v9  ;;  %v10056_v36 = vrot.slane %v8117_v9, 9  ;;  %v8814_v61 = vmax.f32 %v8109_v0, %v10055_v47  ;;  %v8885_v6 = vmax.f32 %v8805_v54, %v8813_v48 }
 0x436   : > { %v8884_v46 = vmax.f32 %v8804_v22, %v8812_v63  ;;  %v8126_v38 = vcombine.high %v8124_v24, %v8124_v24  ;;  %v10058_v40 = vrot.slane %v8124_v24, 9  ;;  %v9158_v59 = vrot.slane %v8883_v17, %v12655_v19 }
 0x437   : > { %v10057_v30 = vrot.slane %v8125_v11, 9  ;;  %v8815_v15 = vmax.f32 %v8117_v9, %v10056_v36  ;;  %v8886_v3 = vmax.f32 %v8806_v8, %v8814_v61  ;;  %v9166_v37 = vrot.slane %v8885_v6, %v12655_v19 }
 0x438   : > { %v9162_v23 = vrot.slane %v8884_v46, %v12655_v19  ;;  %v10059_v33 = vrot.slane %v8126_v38, 9  ;;  %v8817_v1 = vmax.f32 %v8124_v24, %v10058_v40  ;;  %v8810_v14 = vmax.f32 %v8092_v21, %v10051_v45 }
 0x439   : > { %v8816_v20 = vmax.f32 %v8125_v11, %v10057_v30  ;;  %v8887_v28 = vmax.f32 %v8807_v25, %v8815_v15  ;;  %v9170_v31 = vrot.slane %v8886_v3, %v12655_v19  ;;  %v8127_v55 = vcombine.high %v7615_v51, %v7615_v51 }
 0x43a   : > { %v9268_v39 = vsel %vm9219_vm2, %v9162_v23, %v9158_v59  ;;  %v8818_v53 = vmax.f32 %v8126_v38, %v10059_v33  ;;  %v8889_v42 = vmax.f32 %v8809_v27, %v8817_v1  ;;  %v8134_v21 = vrot.slane %v7615_v51, %v12628_v32 }
 0x43b   : > { %v9269_v2 = vsel %vm9221_vm8, %v9166_v37, %v9268_v39  ;;  %v8888_v56 = vmax.f32 %v8808_v7, %v8816_v20  ;;  %v9174_v12 = vrot.slane %v8887_v28, %v12655_v19  ;;  %v8141_v52 = vrot.slane %v8127_v55, %v12628_v32 }
 0x43c   : > { %v9270_v60 = vsel %vm9223_vm10, %v9170_v31, %v9269_v2  ;;  %v8890_v49 = vmax.f32 %v8810_v14, %v8818_v53  ;;  %v9182_v34 = vrot.slane %v8889_v42, %v12655_v19  ;;  %v7616_v54 = vmax.f32 %v12921_v29, 0.0 }
 0x43d   : > { %v9178_v22 = vrot.slane %v8888_v56, %v12655_v19  ;;  %v9271_v58 = vsel %vm9225_vm12, %v9174_v12, %v9270_v60  ;;  %v10242_v4 = vadd.f32 %v10241_v5, %v10240_v41  ;;  %v10245_v25 = vadd.f32 %v10244_v50, %v10243_v43 }
 0x43e   : > { %v9186_v44 = vrot.slane %v8890_v49, %v12655_v19  ;;  %v8142_v18 = vcombine.high %v8134_v21, %v8134_v21  ;;  %v8144_v13 = vcombine.high %v7616_v54, %v7616_v54  ;;  %v8151_v35 = vrot.slane %v7616_v54, %v12628_v32 }
 0x43f   : > { %v9272_v10 = vsel %vm9227_vm6, %v9178_v22, %v9271_v58  ;;  %v7420_v45 = vadd.f32 %v12844_v16, %v10242_v4  ;;  %v7423_v7 = vadd.f32 %v12844_v16, %v10245_v25  ;;  %v8143_v26 = vcombine.high %v8141_v52, %v8141_v52 }
 0x440   : > { %v9273_v8 = vsel %vm9229_vm9, %v9182_v34, %v9272_v10  ;;  %v10060_v9 = vrot.slane %v8134_v21, 9  ;;  %v8158_v29 = vrot.slane %v8144_v13, %v12628_v32  ;;  %v8159_v47 = vcombine.high %v8151_v35, %v8151_v35 }
 0x441   : > { %v9274_v0 = vsel %vm9231_vm4, %v9186_v44, %v9273_v8  ;;  %v7581_v41 = vadd.f32 %v12821_v62, %v7420_v45  ;;  %v7584_v5 = vadd.f32 %v12829_v57, %v7423_v7  ;;  %v10061_v43 = vrot.slane %v8142_v18, 9 }
 0x442   : > { %9296 = vst.msk [vmem:[%s12704_s25 + $0x30] sm:$0xff] %vm4549_vm1, %v9274_v0  ;;  %v10062_v50 = vrot.slane %v8141_v52, 9  ;;  %v8160_v63 = vcombine.high %v8158_v29, %v8158_v29  ;;  %v10064_v48 = vrot.slane %v8151_v35, 9  ;;  %v10063_v24 = vrot.slane %v8143_v26, 9 }
 0x443   : > { %v7617_v17 = vmax.f32 %v7581_v41, 0.0  ;;  %v7618_v27 = vmax.f32 %v7584_v5, 0.0  ;;  %v8819_v11 = vmax.f32 %v8134_v21, %v10060_v9  ;;  %v10065_v36 = vrot.slane %v8159_v47, 9 }
 0x444   : > { %v10066_v61 = vrot.slane %v8158_v29, 9  ;;  %v8820_v38 = vmax.f32 %v8142_v18, %v10061_v43  ;;  %v8821_v62 = vmax.f32 %v8141_v52, %v10062_v50  ;;  %v10067_v30 = vrot.slane %v8160_v63, 9 }
 0x445   : > { %v8161_v16 = vcombine.high %v7617_v17, %v7617_v17  ;;  %v8168_v46 = vrot.slane %v7617_v17, %v12628_v32  ;;  %v8178_v6 = vcombine.high %v7618_v27, %v7618_v27  ;;  %v8185_v51 = vrot.slane %v7618_v27, %v12628_v32 }
 0x446   : > { %v8823_v57 = vmax.f32 %v8151_v35, %v10064_v48  ;;  %v8824_v23 = vmax.f32 %v8159_v47, %v10065_v36  ;;  %v8825_v37 = vmax.f32 %v8158_v29, %v10066_v61  ;;  %v8822_v34 = vmax.f32 %v8143_v26, %v10063_v24 }
 0x447   : > { %v8175_v40 = vrot.slane %v8161_v16, %v12628_v32  ;;  %v8176_v15 = vcombine.high %v8168_v46, %v8168_v46  ;;  %v10068_v3 = vrot.slane %v8168_v46, 9  ;;  %v8192_v59 = vrot.slane %v8178_v6, %v12628_v32 }
 0x448   : > { %v8193_v33 = vcombine.high %v8185_v51, %v8185_v51  ;;  %v10072_v20 = vrot.slane %v8185_v51, 9  ;;  %v8826_v52 = vmax.f32 %v8160_v63, %v10067_v30 }
 0x449   : > { %v8177_v1 = vcombine.high %v8175_v40, %v8175_v40  ;;  %v10069_v28 = vrot.slane %v8176_v15, 9  ;;  %v10070_v14 = vrot.slane %v8175_v40, 9  ;;  %v8827_v31 = vmax.f32 %v8168_v46, %v10068_v3 }
 0x44a   : > { %v8194_v39 = vcombine.high %v8192_v59, %v8192_v59  ;;  %v10073_v55 = vrot.slane %v8193_v33, 9  ;;  %v10074_v2 = vrot.slane %v8192_v59, 9  ;;  %v8831_v53 = vmax.f32 %v8185_v51, %v10072_v20 }
 0x44b   : > { %v10071_v56 = vrot.slane %v8177_v1, 9  ;;  %v8828_v42 = vmax.f32 %v8176_v15, %v10069_v28  ;;  %v8829_v12 = vmax.f32 %v8175_v40, %v10070_v14  ;;  %v8891_v60 = vmax.f32 %v8819_v11, %v8827_v31 }
 0x44c   : > { %v10075_v49 = vrot.slane %v8194_v39, 9  ;;  %v8832_v22 = vmax.f32 %v8193_v33, %v10073_v55  ;;  %v8833_v21 = vmax.f32 %v8192_v59, %v10074_v2  ;;  %v8895_v32 = vmax.f32 %v8823_v57, %v8831_v53 }
 0x44d   : > { %v8830_v58 = vmax.f32 %v8177_v1, %v10071_v56  ;;  %v8892_v44 = vmax.f32 %v8820_v38, %v8828_v42  ;;  %v8893_v10 = vmax.f32 %v8821_v62, %v8829_v12  ;;  %v9190_v0 = vrot.slane %v8891_v60, %v12655_v19 }
 0x44e   : > { %v8834_v54 = vmax.f32 %v8194_v39, %v10075_v49  ;;  %v8896_v8 = vmax.f32 %v8824_v23, %v8832_v22  ;;  %v8897_v4 = vmax.f32 %v8825_v37, %v8833_v21  ;;  %v9206_v9 = vrot.slane %v8895_v32, %v12655_v19 }
 0x44f   : > { %v8894_v25 = vmax.f32 %v8822_v34, %v8830_v58  ;;  %v9194_v18 = vrot.slane %v8892_v44, %v12655_v19  ;;  %v9198_v13 = vrot.slane %v8893_v10, %v12655_v19 }
 0x450   : > { %v8898_v35 = vmax.f32 %v8826_v52, %v8834_v54  ;;  %v9210_v29 = vrot.slane %v8896_v8, %v12655_v19  ;;  %v9214_v41 = vrot.slane %v8897_v4, %v12655_v19 }
 0x451   : > { %v9202_v45 = vrot.slane %v8894_v25, %v12655_v19  ;;  %v9275_v7 = vsel %vm9219_vm2, %v9194_v18, %v9190_v0 }
 0x452   : > { %v9276_v26 = vsel %vm9221_vm8, %v9198_v13, %v9275_v7  ;;  %v9218_v43 = vrot.slane %v8898_v35, %v12655_v19 }
 0x453   : > { %v9277_v47 = vsel %vm9223_vm10, %v9202_v45, %v9276_v26 }
 0x454   : > { %v9278_v5 = vsel %vm9225_vm12, %v9206_v9, %v9277_v47 }
 0x455   : > { %v9279_v50 = vsel %vm9227_vm6, %v9210_v29, %v9278_v5 }
 0x456   : > { %v9280_v63 = vsel %vm9229_vm9, %v9214_v41, %v9279_v50 }
 0x457   : > { %v9281_v48 = vsel %vm9231_vm4, %v9218_v43, %v9280_v63 }
 0x458   : > { %9297 = vst.msk [vmem:[%s12704_s25 + $0x38] sm:$0xff] %vm4549_vm1, %v9281_v48 }
 0x459   : > { %10923 = shalt.err (!%p10920_p3)
}
 0x45a   : > { %s10924_s8 = scalar_lea.hbm %s12974_s13, 1024  ;;  %s10928_s25 = scalar_lea.hbm %s13031_s5, 2048 }
 0x45b   : > { %p10925_p4 = scmp.ne.s32.totalorder %s12974_s13, %s10924_s8  ;;  %p10929_p9 = scmp.lt.u32.totalorder %s12974_s13, %s13031_s5 }
 0x45c   : > { %p10930_p10 = scmp.lt.u32.totalorder %s10928_s25, %s10924_s8  ;;  %p10932_p12 = scmp.lt.u32.totalorder %s10924_s8, %s12974_s13 }
 0x45d   : > { %p10926_p7 = pnand %p10925_p4, %p11056_p5 }
 0x45e   : > { %p10931_p11 = por %p10930_p10, %p10929_p9 }
 0x45f   : > { %p10927_p8 = pneg %p10926_p7 }
 0x460   : > { %p10933_p13 = por %p10932_p12, %p10931_p11 }
 0x462   : > { %p10934_p0 = pnand %p10933_p13, %p10927_p8 }
 0x464   : > { %10937 = shalt.err (!%p10934_p0)
}
 0x465   : > { %s10987_s6 = smov 128  }
 0x466   : > { %10355 = dma.vmem_to_hbm [thread:$0]  (%p11056_p5), %s12977_s7, 1024, %s12974_s13, %s12984_s22, %s10987_s6, %s10987_s6, %s10976_s11  }
 0x467 PF: > { %p10361_p1 = scmp.ge.s32.totalorder %s10972_s21, 2  ;;  %s9327_s9 = sand.u32 1, %s10960_s18  }
 0x468   : > { %s9328_s10 = scalar_lea.sflag [#allocation6], %s9327_s9 }
 0x469   : > { %p10358_p2 = pnand %p10361_p1, %p11060_p6 }
 0x46b   : > { %10955 = dma.done.wait (!%p10358_p2), %s9328_s10, 1024  }
 0x46c   : > { %10957 = vsyncadd (!%p10358_p2), %s9328_s10, 4294966272  ;;  %p15_p3 = scmp.ge.s32.totalorder %s11043_s24, 4   ;;  %s13107_s18 = smov %s10964_s19 }
 0x46d   : > { %s13108_s19 = smov %s10968_s20  ;;  %s13109_s20 = smov %s11054_s27 }
 0x46e   : > { %s13110_s21 = smov %s11043_s24  ;;  %17 = sbr.rel (!%p15_p3) target bundleno = 3 (0x3), region = 81 }
 0x475   :  { %9333 = vsyncpa [#allocation6], 1 }
 0x476   :  { %9335 = vsyncpa [#allocation6 + $0x1], 1 }

</bundles_post_ra>
